<compile_context>
chip_gen: v5e
topology: v5e:2x2
jax: 0.10.0
libtpu: 0.0.40
codegen_flags: <defaults>
</compile_context>

<pallas_src>
import math
from functools import lru_cache

import numpy as np

import jax
import jax.numpy as jnp
from jax import lax
from jax.experimental import pallas as pl
from jax.experimental.pallas import tpu as pltpu

F32 = jnp.float32
BF16 = jnp.bfloat16


def _vmem_limit_bytes():
    try:
        cap = int(getattr(pltpu.get_tpu_info(), "vmem_capacity_bytes", 128 * 1024 * 1024))
    except Exception:
        cap = 128 * 1024 * 1024
    # leave headroom: 96 MiB on 128 MiB parts (v5e/v6e), ~48 MiB on 64 MiB parts (v7x).
    return int(max(32 * 1024 * 1024, min(cap * 3 // 4, 96 * 1024 * 1024)))


_VMEM_LIMIT = _vmem_limit_bytes()


def _cparams(dims):
    return pltpu.CompilerParams(dimension_semantics=dims, vmem_limit_bytes=_VMEM_LIMIT)


def _spec_1buf(block_shape, index_map):
    """BlockSpec for a grid-invariant input: single-buffered to save VMEM (esp. v7x).
    Falls back to the default double-buffered spec if pipeline_mode is unavailable."""
    buffered = getattr(pl, "Buffered", None)
    if buffered is not None:
        try:
            return pl.BlockSpec(block_shape, index_map, pipeline_mode=buffered(1))
        except TypeError:
            pass
    return pl.BlockSpec(block_shape, index_map)


# ----------------------------------------------------------------------------- #
# Centered 2-D DFT matrices (fft2c / ifft2c as  Y = A @ X @ B^T)
# ----------------------------------------------------------------------------- #
@lru_cache(maxsize=None)
def _centered_dft_np(n, inverse):
    eye = np.eye(n)
    shifted = np.fft.ifftshift(eye, axes=0)
    if inverse:
        m = np.fft.ifft(shifted, axis=0) * np.sqrt(n)
    else:
        m = np.fft.fft(shifted, axis=0) / np.sqrt(n)
    m = np.fft.fftshift(m, axes=0)
    return (np.ascontiguousarray(np.real(m)).astype(np.float32),
            np.ascontiguousarray(np.imag(m)).astype(np.float32))


def _dft_mats(H, W, inverse):
    """Returns (A_r, A_i, A_r+A_i, B_r^T, B_i^T, (B_r+B_i)^T) — Karatsuba sums hoisted."""
    ar, ai = _centered_dft_np(H, inverse)
    br, bi = _centered_dft_np(W, inverse)
    brt = np.ascontiguousarray(br.T)
    bit = np.ascontiguousarray(bi.T)
    return (jnp.asarray(ar), jnp.asarray(ai), jnp.asarray(ar + ai),
            jnp.asarray(brt), jnp.asarray(bit), jnp.asarray(brt + bit))


def _cmatmul(ar, ai, br, bi, lsum=None, rsum=None):
    """Complex matmul (ar + i*ai) @ (br + i*bi) with 3 real MXU matmuls (Karatsuba).
    lsum / rsum are optional precomputed (ar+ai) / (br+bi) operands."""
    dot = lambda a, b: jnp.dot(a, b, preferred_element_type=jnp.float32)
    t1 = dot(ar, br)
    t2 = dot(ai, bi)
    ls = (ar + ai) if lsum is None else lsum
    rs = (br + bi) if rsum is None else rsum
    t3 = dot(ls, rs)
    return t1 - t2, t3 - t1 - t2


# ----------------------------------------------------------------------------- #
# Fused  ifft2c  +  x * conj(sens)  +  sum over coils          (sens_reduce)
#   row-tiled: grid (B, n_rows, C); rows give an extra "parallel" axis (megacore) and
#   bound per-step VMEM.
# ----------------------------------------------------------------------------- #
def _reduce_kernel(kr_ref, ki_ref, sr_ref, si_ref, ar_ref, ai_ref, as_ref,
                   br_ref, bi_ref, bs_ref, or_ref, oi_ref):
    @pl.when(pl.program_id(2) == 0)
    def _init():
        or_ref[...] = jnp.zeros(or_ref.shape, or_ref.dtype)
        oi_ref[...] = jnp.zeros(oi_ref.shape, oi_ref.dtype)

    tr, ti = _cmatmul(ar_ref[...], ai_ref[...], kr_ref[0, 0], ki_ref[0, 0],
                      lsum=as_ref[...])
    yr, yi = _cmatmul(tr, ti, br_ref[...], bi_ref[...], rsum=bs_ref[...])
    sr = sr_ref[0, 0]
    si = si_ref[0, 0]
    or_ref[0] += yr * sr + yi * si
    oi_ref[0] += yi * sr - yr * si


def _row_split(H):
    for n in (4, 2):
        if H % n == 0 and (H // n) % 8 == 0:
            return n
    return 1


def _reduce_pallas(kr, ki, sr, si):
    B, C, H, W = kr.shape
    ar, ai, asum, br, bi, bsum = _dft_mats(H, W, inverse=True)
    n_r = _row_split(H)
    RT = H // n_r
    coil = pl.BlockSpec((1, 1, H, W), lambda b, r, c: (b, c, 0, 0))
    sens = pl.BlockSpec((1, 1, RT, W), lambda b, r, c: (b, c, r, 0))
    out = pl.BlockSpec((1, RT, W), lambda b, r, c: (b, r, 0))
    arow = pl.BlockSpec((RT, H), lambda b, r, c: (r, 0))
    mw = _spec_1buf((W, W), lambda b, r, c: (0, 0))
    return pl.pallas_call(
        _reduce_kernel,
        out_shape=(jax.ShapeDtypeStruct((B, H, W), F32),) * 2,
        grid=(B, n_r, C),
        in_specs=[coil, coil, sens, sens, arow, arow, arow, mw, mw, mw],
        out_specs=(out, out),
        compiler_params=_cparams(("parallel", "parallel", "arbitrary")),
    )(kr, ki, sr, si, ar, ai, asum, br, bi, bsum)


# ----------------------------------------------------------------------------- #
# Fused  x * sens  +  fft2c  +  soft data consistency + cascade combine
#   out = cur - where(mask, cur - ref, 0) * w - fft2c(x * sens)
# ----------------------------------------------------------------------------- #
def _expand_dc_kernel(xr_ref, xi_ref, sr_ref, si_ref, cr_ref, ci_ref, rr_ref, ri_ref,
                      m_ref, ar_ref, ai_ref, as_ref, br_ref, bi_ref, bs_ref, w_ref,
                      or_ref, oi_ref):
    sr = sr_ref[0, 0]
    si = si_ref[0, 0]
    xr = xr_ref[0]
    xi = xi_ref[0]
    er = xr * sr - xi * si
    ei = xr * si + xi * sr
    tr, ti = _cmatmul(ar_ref[...], ai_ref[...], er, ei, lsum=as_ref[...])
    fr, fi = _cmatmul(tr, ti, br_ref[...], bi_ref[...], rsum=bs_ref[...])

    cr = cr_ref[0, 0]
    ci = ci_ref[0, 0]
    w = w_ref[0]
    # mask is strictly binary in fastMRI; >0.5 recovers the boolean.
    mb = jnp.broadcast_to(m_ref[0, 0] > 0.5, cr.shape)
    dr = jnp.where(mb, cr - rr_ref[0, 0], 0.0) * w
    di = jnp.where(mb, ci - ri_ref[0, 0], 0.0) * w
    or_ref[0, 0] = cr - dr - fr
    oi_ref[0, 0] = ci - di - fi


def _expand_dc_pallas(xr, xi, sr, si, cr, ci, rr, ri, mask_f, dcw):
    B, C, H, W = cr.shape
    ar, ai, asum, br, bi, bsum = _dft_mats(H, W, inverse=False)
    img = pl.BlockSpec((1, H, W), lambda b, c: (b, 0, 0))
    coil = pl.BlockSpec((1, 1, H, W), lambda b, c: (b, c, 0, 0))
    msk = pl.BlockSpec((1, 1, 1, W), lambda b, c: (b, 0, 0, 0))
    mh = _spec_1buf((H, H), lambda b, c: (0, 0))
    mw = _spec_1buf((W, W), lambda b, c: (0, 0))
    return pl.pallas_call(
        _expand_dc_kernel,
        out_shape=(jax.ShapeDtypeStruct((B, C, H, W), F32),) * 2,
        grid=(B, C),
        in_specs=[img, img, coil, coil, coil, coil, coil, coil, msk,
                  mh, mh, mh, mw, mw, mw,
                  pl.BlockSpec(memory_space=pltpu.MemorySpace.SMEM)],
        out_specs=(coil, coil),
        compiler_params=_cparams(("parallel", "parallel")),
    )(xr, xi, sr, si, cr, ci, rr, ri, mask_f, ar, ai, asum, br, bi, bsum, dcw)


# ----------------------------------------------------------------------------- #
# U-Net building blocks
# ----------------------------------------------------------------------------- #
def _max_flat(cin, m, taps):
    """VMEM budget (bytes per flat column) for the conv pass-1 tiles:
    double-buffered bf16 input, bf16 tap-concat scratch, double-buffered bf16 output
    plus the f32 accumulator."""
    per_col = 4 * cin + 2 * taps * cin + 8 * m
    budget = max(4 * 1024 * 1024, min(20 * 1024 * 1024, _VMEM_LIMIT // 3))
    return max(512, budget // max(per_col, 1))


def _row_tile_cands(H, wx, max_flat):
    cands = [th for th in range(1, H + 1)
             if H % th == 0 and (th == H or (th * wx) % 128 == 0)]
    fit = [th for th in cands if th * wx <= max_flat]
    return cands, fit


def _choose_th(H, wx, cin, m, taps):
    """Largest row tile TH dividing H with a lane-aligned flat width (or TH == H) that
    fits the VMEM budget."""
    cands, fit = _row_tile_cands(H, wx, _max_flat(cin, m, taps))
    return max(fit) if fit else min(cands)


def _plan_conv_tile(H, W, cin, m, taps):
    """Pick (Wx, TH) for the 3x3 conv: padded row width Wx >= W+2 and a row tile TH that
    divides H, keeps TH*Wx lane-aligned (or a single full-H tile), and fits VMEM.  If
    W+2 has no fitting aligned divisor (typical only at odd mid-level widths), widen Wx
    instead of blowing the VMEM budget with a full-H tile."""
    mf = _max_flat(cin, m, taps)
    min_wx = W + 2
    cands, fit = _row_tile_cands(H, min_wx, mf)
    if fit:
        return min_wx, max(fit)
    for wx in range(min_wx + 1, min_wx + 128):
        _, f2 = _row_tile_cands(H, wx, mf)
        if f2:
            return wx, max(f2)
    return min_wx, min(cands)     # last resort; may exceed the soft VMEM budget


def _extract_row_windows(xp, th, halo):
    """(B, C, R, Wx) -> (B, n_th, C, (th+halo)*Wx) overlapping row windows (halo extra rows)."""
    B, C, R, Wx = xp.shape
    n_th = (R - halo) // th
    if n_th == 1:
        win = xp[:, None]
    else:
        win = jnp.stack([xp[:, :, t * th: t * th + th + halo, :] for t in range(n_th)], axis=1)
    return win.reshape(B, n_th, C, (th + halo) * Wx)


def _make_mm_stats_kernel(offs, tq, cin, has_mask, x_is_windowed):
    """Pass 1: single (m, n_taps*cin) x (n_taps*cin, tq) bf16 matmul with f32 MXU
    accumulation; the tap-concatenated operand is built once per tile in a VMEM scratch.
    Per-row sum / sum-of-squares over valid columns accumulate across the tile grid."""
    n_taps = len(offs)

    def kernel(*refs):
        idx = 0
        x_ref = refs[idx]; idx += 1
        w_ref = refs[idx]; idx += 1
        mask_ref = None
        if has_mask:
            mask_ref = refs[idx]; idx += 1
        y_ref, s1_ref, s2_ref = refs[idx], refs[idx + 1], refs[idx + 2]
        idx += 3
        xcat_ref = refs[idx] if n_taps > 1 else None

        @pl.when(pl.program_id(1) == 0)
        def _init():
            s1_ref[...] = jnp.zeros(s1_ref.shape, s1_ref.dtype)
            s2_ref[...] = jnp.zeros(s2_ref.shape, s2_ref.dtype)

        x = x_ref[0, 0] if x_is_windowed else x_ref[0]          # (cin, tqh) bf16
        if n_taps == 1:
            rhs = x[:, offs[0]:offs[0] + tq]
        else:
            for k in range(n_taps):
                xcat_ref[k * cin:(k + 1) * cin, :] = x[:, offs[k]:offs[k] + tq]
            rhs = xcat_ref[...]
        acc = jnp.dot(w_ref[...], rhs, preferred_element_type=jnp.float32)
        av = acc * mask_ref[...] if has_mask else acc
        s1_ref[0] += jnp.sum(av, axis=1, keepdims=True)
        s2_ref[0] += jnp.sum(av * av, axis=1, keepdims=True)
        y_ref[0] = acc.astype(y_ref.dtype)

    return kernel


def _conv_matmul_stats(x_in, w2d, offs, tq, col_mask=None):
    """x_in: (B, n_th, cin, tqh) overlapping windows, or (B, cin, L) flat (no halo).
    w2d: (m, n_taps*cin).  Returns (y bf16 (B, m, L), s1 f32 (B, m, 1), s2 f32 (B, m, 1))."""
    m, kcat = w2d.shape
    n_taps = len(offs)
    has_mask = col_mask is not None

    if x_in.ndim == 3:
        B, cin, Ltot = x_in.shape
        n_th = Ltot // tq
        x_spec = pl.BlockSpec((1, cin, tq), lambda b, t: (b, 0, t))
        windowed = False
    else:
        B, n_th, cin, tqh = x_in.shape
        x_spec = pl.BlockSpec((1, 1, cin, tqh), lambda b, t: (b, t, 0, 0))
        windowed = True
    L = n_th * tq

    kernel = _make_mm_stats_kernel(tuple(offs), tq, cin, has_mask, windowed)
    in_specs = [x_spec, _spec_1buf((m, kcat), lambda b, t: (0, 0))]
    args = [x_in, w2d]
    if has_mask:
        in_specs.append(_spec_1buf((1, tq), lambda b, t: (0, 0)))
        args.append(col_mask)
    scratch = [] if n_taps == 1 else [pltpu.VMEM((kcat, tq), BF16)]

    return pl.pallas_call(
        kernel,
        out_shape=(jax.ShapeDtypeStruct((B, m, L), BF16),
                   jax.ShapeDtypeStruct((B, m, 1), F32),
                   jax.ShapeDtypeStruct((B, m, 1), F32)),
        grid=(B, n_th),
        in_specs=in_specs,
        out_specs=(pl.BlockSpec((1, m, tq), lambda b, t: (b, 0, t)),
                   pl.BlockSpec((1, m, 1), lambda b, t: (b, 0, 0)),
                   pl.BlockSpec((1, m, 1), lambda b, t: (b, 0, 0))),
        scratch_shapes=scratch,
        compiler_params=_cparams(("parallel", "arbitrary")),
    )(*args)


def _norm_act(y, mean, inv, tq, slope=0.2):
    """Pass 2: per-row (y - mean) * inv, then LeakyReLU(slope); tiled elementwise (f32
    compute, bf16 store)."""
    B, m, L = y.shape
    n_th = L // tq

    def kernel(y_ref, mu_ref, iv_ref, o_ref):
        z = (y_ref[0].astype(jnp.float32) - mu_ref[0]) * iv_ref[0]
        o_ref[0] = jnp.where(z >= 0.0, z, slope * z).astype(o_ref.dtype)

    return pl.pallas_call(
        kernel,
        out_shape=jax.ShapeDtypeStruct((B, m, L), BF16),
        grid=(B, n_th),
        in_specs=[pl.BlockSpec((1, m, tq), lambda b, t: (b, 0, t)),
                  pl.BlockSpec((1, m, 1), lambda b, t: (b, 0, 0)),
                  pl.BlockSpec((1, m, 1), lambda b, t: (b, 0, 0))],
        out_specs=pl.BlockSpec((1, m, tq), lambda b, t: (b, 0, t)),
        compiler_params=_cparams(("parallel", "parallel")),
    )(y, mean.astype(F32), inv.astype(F32))


def conv3x3_in_lrelu(x, w):
    """Conv2d(3x3, pad=1, bias=False) + InstanceNorm2d + LeakyReLU(0.2), two-pass IN."""
    B, Cin, H, W = x.shape
    Cout = w.shape[0]
    Wx, TH = _plan_conv_tile(H, W, cin=Cin, m=Cout, taps=9)
    TQ = TH * Wx
    # pad: 1 top / 2 bottom / 1 left / (Wx-1-W) right (extra bottom row keeps tap slices in-bounds)
    xp = jnp.pad(x.astype(BF16), ((0, 0), (0, 0), (1, 2), (1, Wx - 1 - W)))
    # TODO(synk): express the overlapping row windows with in-kernel DMA (memory_space=pl.ANY
    # + pl.ds) instead of materializing this stacked copy in HBM.
    x_win = _extract_row_windows(xp, TH, 3)                      # (B, n_th, Cin, (TH+3)*Wx)
    wt = jnp.transpose(w, (0, 2, 3, 1)).reshape(Cout, 9 * Cin).astype(BF16)
    offs = tuple(dy * Wx + dx for dy in range(3) for dx in range(3))
    col_mask = jnp.asarray((np.arange(TQ) % Wx < W).astype(np.float32)).reshape(1, TQ)
    y, s1, s2 = _conv_matmul_stats(x_win, wt, offs, TQ, col_mask)
    n = float(H * W)
    mean = s1 / n
    var = s2 / n - mean * mean
    inv = lax.rsqrt(jnp.maximum(var, 0.0) + 1e-5)
    y = _norm_act(y, mean, inv, TQ)
    return y.reshape(B, Cout, H, Wx)[:, :, :, :W]


def transpose_conv_block(p, x):
    """ConvTranspose2d(k=2, s=2, bias=False) + InstanceNorm2d + LeakyReLU(0.2).
    The 4 taps are fused into a single (4*Cout, Cin) matmul; IN stats combined over taps.
    The input is taken directly from the flat activation (no windowed HBM copy)."""
    B, Cin, H, W = x.shape
    w = p['w']                                                   # (Cin, Cout, 2, 2)
    Cout = w.shape[1]
    TH = _choose_th(H, W, cin=Cin, m=4 * Cout, taps=1)
    TQ = TH * W
    x_flat = x.astype(BF16).reshape(B, Cin, H * W)
    wt = jnp.transpose(w, (2, 3, 1, 0)).reshape(4 * Cout, Cin).astype(BF16)
    y, s1, s2 = _conv_matmul_stats(x_flat, wt, (0,), TQ, None)
    n = 4.0 * H * W                                              # IN over the full 2H x 2W map
    s1c = s1.reshape(B, 4, Cout).sum(axis=1)
    s2c = s2.reshape(B, 4, Cout).sum(axis=1)
    mean_c = s1c / n
    var_c = s2c / n - mean_c * mean_c
    inv_c = lax.rsqrt(jnp.maximum(var_c, 0.0) + 1e-5)
    mean = jnp.tile(mean_c, (1, 4)).reshape(B, 4 * Cout, 1)
    inv = jnp.tile(inv_c, (1, 4)).reshape(B, 4 * Cout, 1)
    y = _norm_act(y, mean, inv, TQ)                              # (B, 4*Cout, H*W)
    # TODO(synk): emit the interleaved (Cout, 2H, 2W) layout directly from the kernel with
    # bitcast-packed lane pairs + even/odd row stores instead of this XLA transpose.
    y = y.reshape(B, 2, 2, Cout, H, W).transpose(0, 3, 4, 1, 5, 2)
    return y.reshape(B, Cout, 2 * H, 2 * W)


def conv1x1_bias(x, w, b):
    """Conv2d(1x1) with bias, no norm / activation (bf16 operands, f32 output)."""
    B, Cin, H, W = x.shape
    w2 = w.reshape(w.shape[0], -1).astype(BF16)                  # (Cout, Cin)
    Cout = w2.shape[0]
    TH = _choose_th(H, W, cin=Cin, m=Cout, taps=1)
    TQ = TH * W
    n_th = H // TH
    x_flat = x.astype(BF16).reshape(B, Cin, H * W)
    bcol = b.reshape(Cout, 1).astype(F32)

    def kernel(x_ref, w_ref, b_ref, o_ref):
        o_ref[0] = jnp.dot(w_ref[...], x_ref[0],
                           preferred_element_type=jnp.float32) + b_ref[...]

    y = pl.pallas_call(
        kernel,
        out_shape=jax.ShapeDtypeStruct((B, Cout, H * W), F32),
        grid=(B, n_th),
        in_specs=[pl.BlockSpec((1, Cin, TQ), lambda bb, t: (bb, 0, t)),
                  _spec_1buf((Cout, w2.shape[1]), lambda bb, t: (0, 0)),
                  _spec_1buf((Cout, 1), lambda bb, t: (0, 0))],
        out_specs=pl.BlockSpec((1, Cout, TQ), lambda bb, t: (bb, 0, t)),
        compiler_params=_cparams(("parallel", "parallel")),
    )(x_flat, w2, bcol)
    return y.reshape(B, Cout, H, W)


def conv_block(p, x):
    x = conv3x3_in_lrelu(x, p['w1'])
    x = conv3x3_in_lrelu(x, p['w2'])
    return x


def avg_pool2(x):
    # TODO(synk): fuse the 2x2 average pool into the preceding norm/act kernel.
    B, C, H, W = x.shape
    return x.reshape(B, C, H // 2, 2, W // 2, 2).mean(axis=(3, 5))


def unet_forward(p, x):
    stack = []
    out = x
    for dp in p['down']:
        out = conv_block(dp, out)
        stack.append(out)
        out = avg_pool2(out)
    out = conv_block(p['bottom'], out)
    for tp, up in zip(p['up_t'], p['up_c']):
        skip = stack.pop()
        out = transpose_conv_block(tp, out)
        # TODO(synk): reflect-pad branch for odd spatial sizes in the up path not implemented
        # (never triggered: NormUnet pads H, W to a multiple of 16).
        out = jnp.concatenate([out, skip], axis=1)
        out = conv_block(up['conv'], out)
        if up['final'] is not None:
            out = conv1x1_bias(out, up['final']['w'], up['final']['b'])
    return out


def norm_unet(p, x):
    """fastMRI NormUnet on (B, 1, H, W, 2)."""
    B, C, H, W, _ = x.shape
    xc = jnp.transpose(x, (0, 4, 1, 2, 3)).reshape(B, 2 * C, H, W)    # [re..., im...]
    g = xc.reshape(B, 2, C * H * W)
    mean = jnp.mean(g, axis=2).reshape(B, 2, 1, 1)
    std = jnp.std(g, axis=2, ddof=1).reshape(B, 2, 1, 1)              # unbiased, like torch.std
    xn = (xc - mean) / std
    h_mult = ((H - 1) | 15) + 1
    w_mult = ((W - 1) | 15) + 1
    h_pad = ((h_mult - H) // 2, h_mult - H - (h_mult - H) // 2)
    w_pad = ((w_mult - W) // 2, w_mult - W - (w_mult - W) // 2)
    xp = jnp.pad(xn, ((0, 0), (0, 0), h_pad, w_pad))
    y = unet_forward(p['unet'], xp)
    y = y[:, :, h_pad[0]:h_pad[0] + H, w_pad[0]:w_pad[0] + W]
    y = y * std + mean
    return y.reshape(B, 2, C, H, W).transpose(0, 2, 3, 4, 1)


# ----------------------------------------------------------------------------- #
# VarNetBlock / VarNet2 forward
# ----------------------------------------------------------------------------- #
def varnet_block(p, cur_r, cur_i, ref_r, ref_i, mask_f, sr, si):
    x0r, x0i = _reduce_pallas(cur_r, cur_i, sr, si)               # fused ifft2c + coil reduce
    x0 = jnp.stack([x0r, x0i], axis=-1)[:, None]                  # (B, 1, H, W, 2)
    m = norm_unet(p['norm_unet'], x0)                             # (B, 1, H, W, 2)
    return _expand_dc_pallas(m[:, 0, :, :, 0], m[:, 0, :, :, 1], sr, si,
                             cur_r, cur_i, ref_r, ref_i, mask_f, p['dc_weight'])


def varnet2_forward(params, masked_kspace, mask, sens_maps):
    kr = masked_kspace[..., 0]
    ki = masked_kspace[..., 1]
    sr = sens_maps[..., 0]
    si = sens_maps[..., 1]
    mask_f = mask[..., 0].astype(F32)                             # (B, 1, 1, W)
    cur_r, cur_i = kr, ki
    for p in params['cascades']:
        cur_r, cur_i = varnet_block(p, cur_r, cur_i, kr, ki, mask_f, sr, si)
    imr, imi = _reduce_pallas(cur_r, cur_i, sr, si)
    im_comb = jnp.stack([imr, imi], axis=-1)[:, None]             # (B, 1, H, W, 2)
    kspace_pred = jnp.stack([cur_r, cur_i], axis=-1)              # (B, C, H, W, 2)
    return im_comb, kspace_pred


# ----------------------------------------------------------------------------- #
# Deterministic parameter init (mirrors PyTorch module shapes; synthetic weights)
# ----------------------------------------------------------------------------- #
def _init_conv_block(key, cin, cout):
    k1, k2 = jax.random.split(key)
    return {'w1': jax.random.normal(k1, (cout, cin, 3, 3), F32) / math.sqrt(cin * 9),
            'w2': jax.random.normal(k2, (cout, cout, 3, 3), F32) / math.sqrt(cout * 9)}


def _init_tconv_block(key, cin, cout):
    return {'w': jax.random.normal(key, (cin, cout, 2, 2), F32) / math.sqrt(cin * 4)}


def init_unet_params(key, in_chans, out_chans, chans, num_pools):
    ki = iter(jax.random.split(key, 3 * num_pools + 4))
    p = {'down': [], 'up_t': [], 'up_c': []}
    ch = chans
    p['down'].append(_init_conv_block(next(ki), in_chans, chans))
    for _ in range(num_pools - 1):
        p['down'].append(_init_conv_block(next(ki), ch, ch * 2))
        ch *= 2
    p['bottom'] = _init_conv_block(next(ki), ch, ch * 2)
    for _ in range(num_pools - 1):
        p['up_t'].append(_init_tconv_block(next(ki), ch * 2, ch))
        p['up_c'].append({'conv': _init_conv_block(next(ki), ch * 2, ch), 'final': None})
        ch //= 2
    p['up_t'].append(_init_tconv_block(next(ki), ch * 2, ch))
    kf = next(ki)
    p['up_c'].append({'conv': _init_conv_block(next(ki), ch * 2, ch),
                      'final': {'w': jax.random.normal(kf, (out_chans, ch), F32) / math.sqrt(ch),
                                'b': jnp.zeros((out_chans,), F32)}})
    return p


def init_varnet2_params(key, num_cascades=12, chans=18, pools=4):
    cascades = []
    for k in jax.random.split(key, num_cascades):
        cascades.append({'norm_unet': {'unet': init_unet_params(k, 2, 2, chans, pools)},
                         'dc_weight': jnp.ones((1,), F32)})       # torch.ones(1)
    return {'cascades': cascades}


# ----------------------------------------------------------------------------- #
if __name__ == "__main__":
    key = jax.random.PRNGKey(0)
    kk, km, ks, kp = jax.random.split(key, 4)

    B, C, H, W = 2, 4, 16, 16
    masked_kspace = jax.random.normal(kk, (B, C, H, W, 2), F32)
    cols = jax.random.bernoulli(km, 0.5, (W,))
    mask = jnp.broadcast_to(cols.reshape(1, 1, 1, W, 1), (B, 1, 1, W, 1))   # bool mask
    sens_maps = jax.random.normal(ks, (B, C, H, W, 2), F32) * 0.5

    # small-but-structurally-faithful config (defaults of the PyTorch module are 12/18/4)
    params = init_varnet2_params(kp, num_cascades=2, chans=8, pools=2)

    fwd = jax.jit(varnet2_forward)
    im_comb, kspace_pred = fwd(params, masked_kspace, mask, sens_maps)
    jax.block_until_ready((im_comb, kspace_pred))

    assert im_comb.shape == (B, 1, H, W, 2), im_comb.shape
    assert kspace_pred.shape == (B, C, H, W, 2), kspace_pred.shape
    assert bool(jnp.all(jnp.isfinite(im_comb))) and bool(jnp.all(jnp.isfinite(kspace_pred)))
    print("KERNEL_OK")
</pallas_src>

<mosaic_0001>
module attributes {stable_mosaic.version = 11 : i64} {
  func.func @_reduce_kernel(%arg0: i32, %arg1: i32, %arg2: i32, %arg3: memref<1x1x16x16xf32, #tpu.memory_space<vmem>>, %arg4: memref<1x1x16x16xf32, #tpu.memory_space<vmem>>, %arg5: memref<1x1x8x16xf32, #tpu.memory_space<vmem>>, %arg6: memref<1x1x8x16xf32, #tpu.memory_space<vmem>>, %arg7: memref<8x16xf32, #tpu.memory_space<vmem>>, %arg8: memref<8x16xf32, #tpu.memory_space<vmem>>, %arg9: memref<8x16xf32, #tpu.memory_space<vmem>>, %arg10: memref<16x16xf32, #tpu.memory_space<vmem>>, %arg11: memref<16x16xf32, #tpu.memory_space<vmem>>, %arg12: memref<16x16xf32, #tpu.memory_space<vmem>>, %arg13: memref<1x8x16xf32, #tpu.memory_space<vmem>>, %arg14: memref<1x8x16xf32, #tpu.memory_space<vmem>>) attributes {dimension_semantics = [#tpu.dimension_semantics<parallel>, #tpu.dimension_semantics<parallel>, #tpu.dimension_semantics<arbitrary>], iteration_bounds = array<i64: 2, 2, 4>, scalar_prefetch = 0 : i64, scratch_operands = 0 : i64, tpu.core_type = #tpu.core_type<tc>, window_params = [{transform_indices = @transform_0, window_bounds = array<i64: 1, 1, 16, 16>}, {transform_indices = @transform_1, window_bounds = array<i64: 1, 1, 16, 16>}, {transform_indices = @transform_2, window_bounds = array<i64: 1, 1, 8, 16>}, {transform_indices = @transform_3, window_bounds = array<i64: 1, 1, 8, 16>}, {transform_indices = @transform_4, window_bounds = array<i64: 8, 16>}, {transform_indices = @transform_5, window_bounds = array<i64: 8, 16>}, {transform_indices = @transform_6, window_bounds = array<i64: 8, 16>}, {pipeline_mode = #tpu.pipeline_mode<synchronous>, transform_indices = @transform_7, window_bounds = array<i64: 16, 16>}, {pipeline_mode = #tpu.pipeline_mode<synchronous>, transform_indices = @transform_8, window_bounds = array<i64: 16, 16>}, {pipeline_mode = #tpu.pipeline_mode<synchronous>, transform_indices = @transform_9, window_bounds = array<i64: 16, 16>}, {transform_indices = @transform_10, window_bounds = array<i64: 1, 8, 16>}, {transform_indices = @transform_11, window_bounds = array<i64: 1, 8, 16>}]} {
    %c0_i32 = arith.constant 0 : i32
    %0 = arith.cmpi eq, %arg2, %c0_i32 : i32
    %1 = arith.extui %0 : i1 to i32
    %c0_i32_0 = arith.constant 0 : i32
    %2 = arith.cmpi ne, %1, %c0_i32_0 : i32
    scf.if %2 {
      %cst_45 = arith.constant 0.000000e+00 : f32
      %49 = vector.broadcast %cst_45 : f32 to vector<1x8x16xf32>
      %c0_46 = arith.constant 0 : index
      %c0_47 = arith.constant 0 : index
      %c0_48 = arith.constant 0 : index
      %50 = vector.load %arg13[%c0_46, %c0_47, %c0_48] : memref<1x8x16xf32, #tpu.memory_space<vmem>>, vector<1x8x16xf32>
      tpu.vector_store %arg13[%c0_46, %c0_47, %c0_48], %49 {strides = array<i32>} : memref<1x8x16xf32, #tpu.memory_space<vmem>>, vector<1x8x16xf32>,
      %cst_49 = arith.constant 0.000000e+00 : f32
      %51 = vector.broadcast %cst_49 : f32 to vector<1x8x16xf32>
      %c0_50 = arith.constant 0 : index
      %c0_51 = arith.constant 0 : index
      %c0_52 = arith.constant 0 : index
      %52 = vector.load %arg14[%c0_50, %c0_51, %c0_52] : memref<1x8x16xf32, #tpu.memory_space<vmem>>, vector<1x8x16xf32>
      tpu.vector_store %arg14[%c0_50, %c0_51, %c0_52], %51 {strides = array<i32>} : memref<1x8x16xf32, #tpu.memory_space<vmem>>, vector<1x8x16xf32>,
    } else {
    }
    %c0 = arith.constant 0 : index
    %c0_1 = arith.constant 0 : index
    %3 = vector.load %arg7[%c0, %c0_1] : memref<8x16xf32, #tpu.memory_space<vmem>>, vector<8x16xf32>
    %c0_2 = arith.constant 0 : index
    %c0_3 = arith.constant 0 : index
    %4 = vector.load %arg8[%c0_2, %c0_3] : memref<8x16xf32, #tpu.memory_space<vmem>>, vector<8x16xf32>
    %c0_4 = arith.constant 0 : index
    %c0_5 = arith.constant 0 : index
    %c0_6 = arith.constant 0 : index
    %c0_7 = arith.constant 0 : index
    %5 = vector.load %arg3[%c0_4, %c0_5, %c0_6, %c0_7] : memref<1x1x16x16xf32, #tpu.memory_space<vmem>>, vector<1x1x16x16xf32>
    %6 = vector.shape_cast %5 : vector<1x1x16x16xf32> to vector<16x16xf32>
    %c0_8 = arith.constant 0 : index
    %c0_9 = arith.constant 0 : index
    %c0_10 = arith.constant 0 : index
    %c0_11 = arith.constant 0 : index
    %7 = vector.load %arg4[%c0_8, %c0_9, %c0_10, %c0_11] : memref<1x1x16x16xf32, #tpu.memory_space<vmem>>, vector<1x1x16x16xf32>
    %8 = vector.shape_cast %7 : vector<1x1x16x16xf32> to vector<16x16xf32>
    %c0_12 = arith.constant 0 : index
    %c0_13 = arith.constant 0 : index
    %9 = vector.load %arg9[%c0_12, %c0_13] : memref<8x16xf32, #tpu.memory_space<vmem>>, vector<8x16xf32>
    %cst = arith.constant dense<0.000000e+00> : vector<8x16xf32>
    %10 = tpu.matmul %3, %6, %cst {dimension_numbers = #tpu.dot_dimension_numbers<[1], [0], [0], [1], [0, 0, 1, 1], [], []>} : vector<8x16xf32>, vector<16x16xf32>, vector<8x16xf32> -> vector<8x16xf32>
    %cst_14 = arith.constant dense<0.000000e+00> : vector<8x16xf32>
    %11 = tpu.matmul %4, %8, %cst_14 {dimension_numbers = #tpu.dot_dimension_numbers<[1], [0], [0], [1], [0, 0, 1, 1], [], []>} : vector<8x16xf32>, vector<16x16xf32>, vector<8x16xf32> -> vector<8x16xf32>
    %12 = arith.addf %6, %8 : vector<16x16xf32>
    %cst_15 = arith.constant dense<0.000000e+00> : vector<8x16xf32>
    %13 = tpu.matmul %9, %12, %cst_15 {dimension_numbers = #tpu.dot_dimension_numbers<[1], [0], [0], [1], [0, 0, 1, 1], [], []>} : vector<8x16xf32>, vector<16x16xf32>, vector<8x16xf32> -> vector<8x16xf32>
    %14 = arith.subf %10, %11 : vector<8x16xf32>
    %15 = arith.subf %13, %10 : vector<8x16xf32>
    %16 = arith.subf %15, %11 : vector<8x16xf32>
    %c0_16 = arith.constant 0 : index
    %c0_17 = arith.constant 0 : index
    %17 = vector.load %arg10[%c0_16, %c0_17] : memref<16x16xf32, #tpu.memory_space<vmem>>, vector<16x16xf32>
    %c0_18 = arith.constant 0 : index
    %c0_19 = arith.constant 0 : index
    %18 = vector.load %arg11[%c0_18, %c0_19] : memref<16x16xf32, #tpu.memory_space<vmem>>, vector<16x16xf32>
    %c0_20 = arith.constant 0 : index
    %c0_21 = arith.constant 0 : index
    %19 = vector.load %arg12[%c0_20, %c0_21] : memref<16x16xf32, #tpu.memory_space<vmem>>, vector<16x16xf32>
    %cst_22 = arith.constant dense<0.000000e+00> : vector<8x16xf32>
    %20 = tpu.matmul %14, %17, %cst_22 {dimension_numbers = #tpu.dot_dimension_numbers<[1], [0], [0], [1], [0, 0, 1, 1], [], []>} : vector<8x16xf32>, vector<16x16xf32>, vector<8x16xf32> -> vector<8x16xf32>
    %cst_23 = arith.constant dense<0.000000e+00> : vector<8x16xf32>
    %21 = tpu.matmul %16, %18, %cst_23 {dimension_numbers = #tpu.dot_dimension_numbers<[1], [0], [0], [1], [0, 0, 1, 1], [], []>} : vector<8x16xf32>, vector<16x16xf32>, vector<8x16xf32> -> vector<8x16xf32>
    %22 = arith.addf %14, %16 : vector<8x16xf32>
    %cst_24 = arith.constant dense<0.000000e+00> : vector<8x16xf32>
    %23 = tpu.matmul %22, %19, %cst_24 {dimension_numbers = #tpu.dot_dimension_numbers<[1], [0], [0], [1], [0, 0, 1, 1], [], []>} : vector<8x16xf32>, vector<16x16xf32>, vector<8x16xf32> -> vector<8x16xf32>
    %24 = arith.subf %20, %21 : vector<8x16xf32>
    %25 = arith.subf %23, %20 : vector<8x16xf32>
    %26 = arith.subf %25, %21 : vector<8x16xf32>
    %c0_25 = arith.constant 0 : index
    %c0_26 = arith.constant 0 : index
    %c0_27 = arith.constant 0 : index
    %c0_28 = arith.constant 0 : index
    %27 = vector.load %arg5[%c0_25, %c0_26, %c0_27, %c0_28] : memref<1x1x8x16xf32, #tpu.memory_space<vmem>>, vector<1x1x8x16xf32>
    %28 = vector.shape_cast %27 : vector<1x1x8x16xf32> to vector<8x16xf32>
    %c0_29 = arith.constant 0 : index
    %c0_30 = arith.constant 0 : index
    %c0_31 = arith.constant 0 : index
    %c0_32 = arith.constant 0 : index
    %29 = vector.load %arg6[%c0_29, %c0_30, %c0_31, %c0_32] : memref<1x1x8x16xf32, #tpu.memory_space<vmem>>, vector<1x1x8x16xf32>
    %30 = vector.shape_cast %29 : vector<1x1x8x16xf32> to vector<8x16xf32>
    %c0_33 = arith.constant 0 : index
    %c0_34 = arith.constant 0 : index
    %c0_35 = arith.constant 0 : index
    %31 = vector.load %arg13[%c0_33, %c0_34, %c0_35] : memref<1x8x16xf32, #tpu.memory_space<vmem>>, vector<1x8x16xf32>
    %32 = vector.shape_cast %31 : vector<1x8x16xf32> to vector<8x16xf32>
    %33 = arith.mulf %24, %28 : vector<8x16xf32>
    %34 = arith.mulf %26, %30 : vector<8x16xf32>
    %35 = arith.addf %33, %34 : vector<8x16xf32>
    %36 = arith.addf %32, %35 : vector<8x16xf32>
    %c0_36 = arith.constant 0 : index
    %c0_37 = arith.constant 0 : index
    %c0_38 = arith.constant 0 : index
    %37 = vector.load %arg13[%c0_36, %c0_37, %c0_38] : memref<1x8x16xf32, #tpu.memory_space<vmem>>, vector<1x8x16xf32>
    %38 = vector.shape_cast %37 : vector<1x8x16xf32> to vector<8x16xf32>
    %39 = vector.shape_cast %36 : vector<8x16xf32> to vector<1x8x16xf32>
    tpu.vector_store %arg13[%c0_36, %c0_37, %c0_38], %39 {strides = array<i32>} : memref<1x8x16xf32, #tpu.memory_space<vmem>>, vector<1x8x16xf32>,
    %c0_39 = arith.constant 0 : index
    %c0_40 = arith.constant 0 : index
    %c0_41 = arith.constant 0 : index
    %40 = vector.load %arg14[%c0_39, %c0_40, %c0_41] : memref<1x8x16xf32, #tpu.memory_space<vmem>>, vector<1x8x16xf32>
    %41 = vector.shape_cast %40 : vector<1x8x16xf32> to vector<8x16xf32>
    %42 = arith.mulf %26, %28 : vector<8x16xf32>
    %43 = arith.mulf %24, %30 : vector<8x16xf32>
    %44 = arith.subf %42, %43 : vector<8x16xf32>
    %45 = arith.addf %41, %44 : vector<8x16xf32>
    %c0_42 = arith.constant 0 : index
    %c0_43 = arith.constant 0 : index
    %c0_44 = arith.constant 0 : index
    %46 = vector.load %arg14[%c0_42, %c0_43, %c0_44] : memref<1x8x16xf32, #tpu.memory_space<vmem>>, vector<1x8x16xf32>
    %47 = vector.shape_cast %46 : vector<1x8x16xf32> to vector<8x16xf32>
    %48 = vector.shape_cast %45 : vector<8x16xf32> to vector<1x8x16xf32>
    tpu.vector_store %arg14[%c0_42, %c0_43, %c0_44], %48 {strides = array<i32>} : memref<1x8x16xf32, #tpu.memory_space<vmem>>, vector<1x8x16xf32>,
    return
  }
  func.func @transform_0(%arg0: i32, %arg1: i32, %arg2: i32) -> (i32, i32, i32, i32) {
    %c0_i32 = arith.constant 0 : i32
    %c0_i32_0 = arith.constant 0 : i32
    %c0_i32_1 = arith.constant 0 : i32
    return %arg0, %arg2, %c0_i32, %c0_i32_0 : i32, i32, i32, i32
  }
  func.func @transform_1(%arg0: i32, %arg1: i32, %arg2: i32) -> (i32, i32, i32, i32) {
    %c0_i32 = arith.constant 0 : i32
    %c0_i32_0 = arith.constant 0 : i32
    %c0_i32_1 = arith.constant 0 : i32
    return %arg0, %arg2, %c0_i32, %c0_i32_0 : i32, i32, i32, i32
  }
  func.func @transform_2(%arg0: i32, %arg1: i32, %arg2: i32) -> (i32, i32, i32, i32) {
    %c0_i32 = arith.constant 0 : i32
    %c0_i32_0 = arith.constant 0 : i32
    return %arg0, %arg2, %arg1, %c0_i32 : i32, i32, i32, i32
  }
  func.func @transform_3(%arg0: i32, %arg1: i32, %arg2: i32) -> (i32, i32, i32, i32) {
    %c0_i32 = arith.constant 0 : i32
    %c0_i32_0 = arith.constant 0 : i32
    return %arg0, %arg2, %arg1, %c0_i32 : i32, i32, i32, i32
  }
  func.func @transform_4(%arg0: i32, %arg1: i32, %arg2: i32) -> (i32, i32) {
    %c0_i32 = arith.constant 0 : i32
    %c0_i32_0 = arith.constant 0 : i32
    return %arg1, %c0_i32 : i32, i32
  }
  func.func @transform_5(%arg0: i32, %arg1: i32, %arg2: i32) -> (i32, i32) {
    %c0_i32 = arith.constant 0 : i32
    %c0_i32_0 = arith.constant 0 : i32
    return %arg1, %c0_i32 : i32, i32
  }
  func.func @transform_6(%arg0: i32, %arg1: i32, %arg2: i32) -> (i32, i32) {
    %c0_i32 = arith.constant 0 : i32
    %c0_i32_0 = arith.constant 0 : i32
    return %arg1, %c0_i32 : i32, i32
  }
  func.func @transform_7(%arg0: i32, %arg1: i32, %arg2: i32) -> (i32, i32) {
    %c0_i32 = arith.constant 0 : i32
    %c0_i32_0 = arith.constant 0 : i32
    %c0_i32_1 = arith.constant 0 : i32
    return %c0_i32, %c0_i32_0 : i32, i32
  }
  func.func @transform_8(%arg0: i32, %arg1: i32, %arg2: i32) -> (i32, i32) {
    %c0_i32 = arith.constant 0 : i32
    %c0_i32_0 = arith.constant 0 : i32
    %c0_i32_1 = arith.constant 0 : i32
    return %c0_i32, %c0_i32_0 : i32, i32
  }
  func.func @transform_9(%arg0: i32, %arg1: i32, %arg2: i32) -> (i32, i32) {
    %c0_i32 = arith.constant 0 : i32
    %c0_i32_0 = arith.constant 0 : i32
    %c0_i32_1 = arith.constant 0 : i32
    return %c0_i32, %c0_i32_0 : i32, i32
  }
  func.func @transform_10(%arg0: i32, %arg1: i32, %arg2: i32) -> (i32, i32, i32) {
    %c0_i32 = arith.constant 0 : i32
    %c0_i32_0 = arith.constant 0 : i32
    return %arg0, %arg1, %c0_i32 : i32, i32, i32
  }
  func.func @transform_11(%arg0: i32, %arg1: i32, %arg2: i32) -> (i32, i32, i32) {
    %c0_i32 = arith.constant 0 : i32
    %c0_i32_0 = arith.constant 0 : i32
    return %arg0, %arg1, %c0_i32 : i32, i32, i32
  }
}

module attributes {stable_mosaic.version = 11 : i64} {
  func.func @kernel(%arg0: i32, %arg1: i32, %arg2: memref<1x1x2x342xbf16, #tpu.memory_space<vmem>>, %arg3: memref<8x18xbf16, #tpu.memory_space<vmem>>, %arg4: memref<1x288xf32, #tpu.memory_space<vmem>>, %arg5: memref<1x8x288xbf16, #tpu.memory_space<vmem>>, %arg6: memref<1x8x1xf32, #tpu.memory_space<vmem>>, %arg7: memref<1x8x1xf32, #tpu.memory_space<vmem>>, %arg8: memref<18x288xbf16, #tpu.memory_space<vmem>>) attributes {dimension_semantics = [#tpu.dimension_semantics<parallel>, #tpu.dimension_semantics<arbitrary>], iteration_bounds = array<i64: 2, 1>, scalar_prefetch = 0 : i64, scratch_operands = 1 : i64, tpu.core_type = #tpu.core_type<tc>, window_params = [{transform_indices = @transform_0, window_bounds = array<i64: 1, 1, 2, 342>}, {pipeline_mode = #tpu.pipeline_mode<synchronous>, transform_indices = @transform_1, window_bounds = array<i64: 8, 18>}, {pipeline_mode = #tpu.pipeline_mode<synchronous>, transform_indices = @transform_2, window_bounds = array<i64: 1, 288>}, {transform_indices = @transform_3, window_bounds = array<i64: 1, 8, 288>}, {transform_indices = @transform_4, window_bounds = array<i64: 1, 8, 1>}, {transform_indices = @transform_5, window_bounds = array<i64: 1, 8, 1>}]} {
    %c0_i32 = arith.constant 0 : i32
    %0 = arith.cmpi eq, %arg1, %c0_i32 : i32
    %1 = arith.extui %0 : i1 to i32
    %c0_i32_0 = arith.constant 0 : i32
    %2 = arith.cmpi ne, %1, %c0_i32_0 : i32
    scf.if %2 {
      %cst_37 = arith.constant 0.000000e+00 : f32
      %50 = vector.broadcast %cst_37 : f32 to vector<1x8x1xf32>
      %c0_38 = arith.constant 0 : index
      %c0_39 = arith.constant 0 : index
      %c0_40 = arith.constant 0 : index
      %51 = vector.load %arg6[%c0_38, %c0_39, %c0_40] : memref<1x8x1xf32, #tpu.memory_space<vmem>>, vector<1x8x1xf32>
      tpu.vector_store %arg6[%c0_38, %c0_39, %c0_40], %50 {strides = array<i32>} : memref<1x8x1xf32, #tpu.memory_space<vmem>>, vector<1x8x1xf32>,
      %cst_41 = arith.constant 0.000000e+00 : f32
      %52 = vector.broadcast %cst_41 : f32 to vector<1x8x1xf32>
      %c0_42 = arith.constant 0 : index
      %c0_43 = arith.constant 0 : index
      %c0_44 = arith.constant 0 : index
      %53 = vector.load %arg7[%c0_42, %c0_43, %c0_44] : memref<1x8x1xf32, #tpu.memory_space<vmem>>, vector<1x8x1xf32>
      tpu.vector_store %arg7[%c0_42, %c0_43, %c0_44], %52 {strides = array<i32>} : memref<1x8x1xf32, #tpu.memory_space<vmem>>, vector<1x8x1xf32>,
    } else {
    }
    %c0 = arith.constant 0 : index
    %c0_1 = arith.constant 0 : index
    %c0_2 = arith.constant 0 : index
    %c0_3 = arith.constant 0 : index
    %3 = vector.load %arg2[%c0, %c0_1, %c0_2, %c0_3] : memref<1x1x2x342xbf16, #tpu.memory_space<vmem>>, vector<1x1x2x342xbf16>
    %4 = vector.shape_cast %3 : vector<1x1x2x342xbf16> to vector<2x342xbf16>
    %5 = vector.extract_strided_slice %4 {offsets = [0, 0], sizes = [2, 288], strides = [1, 1]} : vector<2x342xbf16> to vector<2x288xbf16>
    %c0_4 = arith.constant 0 : index
    %c0_5 = arith.constant 0 : index
    %6 = vector.load %arg8[%c0_4, %c0_5] : memref<18x288xbf16, #tpu.memory_space<vmem>>, vector<2x288xbf16>
    tpu.vector_store %arg8[%c0_4, %c0_5], %5 {strides = array<i32>} : memref<18x288xbf16, #tpu.memory_space<vmem>>, vector<2x288xbf16>,
    %7 = vector.extract_strided_slice %4 {offsets = [0, 1], sizes = [2, 288], strides = [1, 1]} : vector<2x342xbf16> to vector<2x288xbf16>
    %c2 = arith.constant 2 : index
    %c0_6 = arith.constant 0 : index
    %8 = vector.load %arg8[%c2, %c0_6] : memref<18x288xbf16, #tpu.memory_space<vmem>>, vector<2x288xbf16>
    tpu.vector_store %arg8[%c2, %c0_6], %7 {strides = array<i32>} : memref<18x288xbf16, #tpu.memory_space<vmem>>, vector<2x288xbf16>,
    %9 = vector.extract_strided_slice %4 {offsets = [0, 2], sizes = [2, 288], strides = [1, 1]} : vector<2x342xbf16> to vector<2x288xbf16>
    %c4 = arith.constant 4 : index
    %c0_7 = arith.constant 0 : index
    %10 = vector.load %arg8[%c4, %c0_7] : memref<18x288xbf16, #tpu.memory_space<vmem>>, vector<2x288xbf16>
    tpu.vector_store %arg8[%c4, %c0_7], %9 {strides = array<i32>} : memref<18x288xbf16, #tpu.memory_space<vmem>>, vector<2x288xbf16>,
    %11 = vector.extract_strided_slice %4 {offsets = [0, 18], sizes = [2, 288], strides = [1, 1]} : vector<2x342xbf16> to vector<2x288xbf16>
    %c6 = arith.constant 6 : index
    %c0_8 = arith.constant 0 : index
    %12 = vector.load %arg8[%c6, %c0_8] : memref<18x288xbf16, #tpu.memory_space<vmem>>, vector<2x288xbf16>
    tpu.vector_store %arg8[%c6, %c0_8], %11 {strides = array<i32>} : memref<18x288xbf16, #tpu.memory_space<vmem>>, vector<2x288xbf16>,
    %13 = vector.extract_strided_slice %4 {offsets = [0, 19], sizes = [2, 288], strides = [1, 1]} : vector<2x342xbf16> to vector<2x288xbf16>
    %c8 = arith.constant 8 : index
    %c0_9 = arith.constant 0 : index
    %14 = vector.load %arg8[%c8, %c0_9] : memref<18x288xbf16, #tpu.memory_space<vmem>>, vector<2x288xbf16>
    tpu.vector_store %arg8[%c8, %c0_9], %13 {strides = array<i32>} : memref<18x288xbf16, #tpu.memory_space<vmem>>, vector<2x288xbf16>,
    %15 = vector.extract_strided_slice %4 {offsets = [0, 20], sizes = [2, 288], strides = [1, 1]} : vector<2x342xbf16> to vector<2x288xbf16>
    %c10 = arith.constant 10 : index
    %c0_10 = arith.constant 0 : index
    %16 = vector.load %arg8[%c10, %c0_10] : memref<18x288xbf16, #tpu.memory_space<vmem>>, vector<2x288xbf16>
    tpu.vector_store %arg8[%c10, %c0_10], %15 {strides = array<i32>} : memref<18x288xbf16, #tpu.memory_space<vmem>>, vector<2x288xbf16>,
    %17 = vector.extract_strided_slice %4 {offsets = [0, 36], sizes = [2, 288], strides = [1, 1]} : vector<2x342xbf16> to vector<2x288xbf16>
    %c12 = arith.constant 12 : index
    %c0_11 = arith.constant 0 : index
    %18 = vector.load %arg8[%c12, %c0_11] : memref<18x288xbf16, #tpu.memory_space<vmem>>, vector<2x288xbf16>
    tpu.vector_store %arg8[%c12, %c0_11], %17 {strides = array<i32>} : memref<18x288xbf16, #tpu.memory_space<vmem>>, vector<2x288xbf16>,
    %19 = vector.extract_strided_slice %4 {offsets = [0, 37], sizes = [2, 288], strides = [1, 1]} : vector<2x342xbf16> to vector<2x288xbf16>
    %c14 = arith.constant 14 : index
    %c0_12 = arith.constant 0 : index
    %20 = vector.load %arg8[%c14, %c0_12] : memref<18x288xbf16, #tpu.memory_space<vmem>>, vector<2x288xbf16>
    tpu.vector_store %arg8[%c14, %c0_12], %19 {strides = array<i32>} : memref<18x288xbf16, #tpu.memory_space<vmem>>, vector<2x288xbf16>,
    %21 = vector.extract_strided_slice %4 {offsets = [0, 38], sizes = [2, 288], strides = [1, 1]} : vector<2x342xbf16> to vector<2x288xbf16>
    %c16 = arith.constant 16 : index
    %c0_13 = arith.constant 0 : index
    %22 = vector.load %arg8[%c16, %c0_13] : memref<18x288xbf16, #tpu.memory_space<vmem>>, vector<2x288xbf16>
    tpu.vector_store %arg8[%c16, %c0_13], %21 {strides = array<i32>} : memref<18x288xbf16, #tpu.memory_space<vmem>>, vector<2x288xbf16>,
    %c0_14 = arith.constant 0 : index
    %c0_15 = arith.constant 0 : index
    %23 = vector.load %arg8[%c0_14, %c0_15] : memref<18x288xbf16, #tpu.memory_space<vmem>>, vector<18x288xbf16>
    %c0_16 = arith.constant 0 : index
    %c0_17 = arith.constant 0 : index
    %24 = vector.load %arg3[%c0_16, %c0_17] : memref<8x18xbf16, #tpu.memory_space<vmem>>, vector<8x18xbf16>
    %cst = arith.constant dense<0.000000e+00> : vector<8x288xf32>
    %25 = tpu.matmul %24, %23, %cst {dimension_numbers = #tpu.dot_dimension_numbers<[1], [0], [0], [1], [0, 0, 1, 1], [], []>} : vector<8x18xbf16>, vector<18x288xbf16>, vector<8x288xf32> -> vector<8x288xf32>
    %c0_18 = arith.constant 0 : index
    %c0_19 = arith.constant 0 : index
    %26 = vector.load %arg4[%c0_18, %c0_19] : memref<1x288xf32, #tpu.memory_space<vmem>>, vector<1x288xf32>
    %27 = vector.broadcast %26 : vector<1x288xf32> to vector<8x288xf32>
    %28 = arith.mulf %25, %27 : vector<8x288xf32>
    %c0_20 = arith.constant 0 : index
    %c0_21 = arith.constant 0 : index
    %c0_22 = arith.constant 0 : index
    %29 = vector.load %arg6[%c0_20, %c0_21, %c0_22] : memref<1x8x1xf32, #tpu.memory_space<vmem>>, vector<1x8x1xf32>
    %30 = vector.shape_cast %29 : vector<1x8x1xf32> to vector<8x1xf32>
    %cst_23 = arith.constant dense<0.000000e+00> : vector<8xf32>
    %31 = vector.multi_reduction <add>, %28, %cst_23 [1] : vector<8x288xf32> to vector<8xf32>
    %32 = vector.shape_cast %31 : vector<8xf32> to vector<8x1xf32>
    %33 = arith.addf %30, %32 : vector<8x1xf32>
    %c0_24 = arith.constant 0 : index
    %c0_25 = arith.constant 0 : index
    %c0_26 = arith.constant 0 : index
    %34 = vector.load %arg6[%c0_24, %c0_25, %c0_26] : memref<1x8x1xf32, #tpu.memory_space<vmem>>, vector<1x8x1xf32>
    %35 = vector.shape_cast %34 : vector<1x8x1xf32> to vector<8x1xf32>
    %36 = vector.shape_cast %33 : vector<8x1xf32> to vector<1x8x1xf32>
    tpu.vector_store %arg6[%c0_24, %c0_25, %c0_26], %36 {strides = array<i32>} : memref<1x8x1xf32, #tpu.memory_space<vmem>>, vector<1x8x1xf32>,
    %c0_27 = arith.constant 0 : index
    %c0_28 = arith.constant 0 : index
    %c0_29 = arith.constant 0 : index
    %37 = vector.load %arg7[%c0_27, %c0_28, %c0_29] : memref<1x8x1xf32, #tpu.memory_space<vmem>>, vector<1x8x1xf32>
    %38 = vector.shape_cast %37 : vector<1x8x1xf32> to vector<8x1xf32>
    %39 = arith.mulf %28, %28 : vector<8x288xf32>
    %cst_30 = arith.constant dense<0.000000e+00> : vector<8xf32>
    %40 = vector.multi_reduction <add>, %39, %cst_30 [1] : vector<8x288xf32> to vector<8xf32>
    %41 = vector.shape_cast %40 : vector<8xf32> to vector<8x1xf32>
    %42 = arith.addf %38, %41 : vector<8x1xf32>
    %c0_31 = arith.constant 0 : index
    %c0_32 = arith.constant 0 : index
    %c0_33 = arith.constant 0 : index
    %43 = vector.load %arg7[%c0_31, %c0_32, %c0_33] : memref<1x8x1xf32, #tpu.memory_space<vmem>>, vector<1x8x1xf32>
    %44 = vector.shape_cast %43 : vector<1x8x1xf32> to vector<8x1xf32>
    %45 = vector.shape_cast %42 : vector<8x1xf32> to vector<1x8x1xf32>
    tpu.vector_store %arg7[%c0_31, %c0_32, %c0_33], %45 {strides = array<i32>} : memref<1x8x1xf32, #tpu.memory_space<vmem>>, vector<1x8x1xf32>,
    %46 = arith.truncf %25 : vector<8x288xf32> to vector<8x288xbf16>
    %c0_34 = arith.constant 0 : index
    %c0_35 = arith.constant 0 : index
    %c0_36 = arith.constant 0 : index
    %47 = vector.load %arg5[%c0_34, %c0_35, %c0_36] : memref<1x8x288xbf16, #tpu.memory_space<vmem>>, vector<1x8x288xbf16>
    %48 = vector.shape_cast %47 : vector<1x8x288xbf16> to vector<8x288xbf16>
    %49 = vector.shape_cast %46 : vector<8x288xbf16> to vector<1x8x288xbf16>
    tpu.vector_store %arg5[%c0_34, %c0_35, %c0_36], %49 {strides = array<i32>} : memref<1x8x288xbf16, #tpu.memory_space<vmem>>, vector<1x8x288xbf16>,
    return
  }
  func.func @transform_0(%arg0: i32, %arg1: i32) -> (i32, i32, i32, i32) {
    %c0_i32 = arith.constant 0 : i32
    %c0_i32_0 = arith.constant 0 : i32
    %c0_i32_1 = arith.constant 0 : i32
    return %arg0, %arg1, %c0_i32, %c0_i32_0 : i32, i32, i32, i32
  }
  func.func @transform_1(%arg0: i32, %arg1: i32) -> (i32, i32) {
    %c0_i32 = arith.constant 0 : i32
    %c0_i32_0 = arith.constant 0 : i32
    %c0_i32_1 = arith.constant 0 : i32
    return %c0_i32, %c0_i32_0 : i32, i32
  }
  func.func @transform_2(%arg0: i32, %arg1: i32) -> (i32, i32) {
    %c0_i32 = arith.constant 0 : i32
    %c0_i32_0 = arith.constant 0 : i32
    %c0_i32_1 = arith.constant 0 : i32
    return %c0_i32, %c0_i32_0 : i32, i32
  }
  func.func @transform_3(%arg0: i32, %arg1: i32) -> (i32, i32, i32) {
    %c0_i32 = arith.constant 0 : i32
    %c0_i32_0 = arith.constant 0 : i32
    return %arg0, %c0_i32, %arg1 : i32, i32, i32
  }
  func.func @transform_4(%arg0: i32, %arg1: i32) -> (i32, i32, i32) {
    %c0_i32 = arith.constant 0 : i32
    %c0_i32_0 = arith.constant 0 : i32
    %c0_i32_1 = arith.constant 0 : i32
    return %arg0, %c0_i32, %c0_i32_0 : i32, i32, i32
  }
  func.func @transform_5(%arg0: i32, %arg1: i32) -> (i32, i32, i32) {
    %c0_i32 = arith.constant 0 : i32
    %c0_i32_0 = arith.constant 0 : i32
    %c0_i32_1 = arith.constant 0 : i32
    return %arg0, %c0_i32, %c0_i32_0 : i32, i32, i32
  }
}

module attributes {stable_mosaic.version = 11 : i64} {
  func.func @kernel(%arg0: i32, %arg1: i32, %arg2: memref<1x8x288xbf16, #tpu.memory_space<vmem>>, %arg3: memref<1x8x1xf32, #tpu.memory_space<vmem>>, %arg4: memref<1x8x1xf32, #tpu.memory_space<vmem>>, %arg5: memref<1x8x288xbf16, #tpu.memory_space<vmem>>) attributes {dimension_semantics = [#tpu.dimension_semantics<parallel>, #tpu.dimension_semantics<parallel>], iteration_bounds = array<i64: 2, 1>, scalar_prefetch = 0 : i64, scratch_operands = 0 : i64, tpu.core_type = #tpu.core_type<tc>, window_params = [{transform_indices = @transform_0, window_bounds = array<i64: 1, 8, 288>}, {transform_indices = @transform_1, window_bounds = array<i64: 1, 8, 1>}, {transform_indices = @transform_2, window_bounds = array<i64: 1, 8, 1>}, {transform_indices = @transform_3, window_bounds = array<i64: 1, 8, 288>}]} {
    %c0 = arith.constant 0 : index
    %c0_0 = arith.constant 0 : index
    %c0_1 = arith.constant 0 : index
    %0 = vector.load %arg2[%c0, %c0_0, %c0_1] : memref<1x8x288xbf16, #tpu.memory_space<vmem>>, vector<1x8x288xbf16>
    %1 = vector.shape_cast %0 : vector<1x8x288xbf16> to vector<8x288xbf16>
    %2 = arith.extf %1 : vector<8x288xbf16> to vector<8x288xf32>
    %c0_2 = arith.constant 0 : index
    %c0_3 = arith.constant 0 : index
    %c0_4 = arith.constant 0 : index
    %3 = vector.load %arg3[%c0_2, %c0_3, %c0_4] : memref<1x8x1xf32, #tpu.memory_space<vmem>>, vector<1x8x1xf32>
    %4 = vector.shape_cast %3 : vector<1x8x1xf32> to vector<8x1xf32>
    %5 = vector.broadcast %4 : vector<8x1xf32> to vector<8x288xf32>
    %6 = arith.subf %2, %5 : vector<8x288xf32>
    %c0_5 = arith.constant 0 : index
    %c0_6 = arith.constant 0 : index
    %c0_7 = arith.constant 0 : index
    %7 = vector.load %arg4[%c0_5, %c0_6, %c0_7] : memref<1x8x1xf32, #tpu.memory_space<vmem>>, vector<1x8x1xf32>
    %8 = vector.shape_cast %7 : vector<1x8x1xf32> to vector<8x1xf32>
    %9 = vector.broadcast %8 : vector<8x1xf32> to vector<8x288xf32>
    %10 = arith.mulf %6, %9 : vector<8x288xf32>
    %cst = arith.constant 0.000000e+00 : f32
    %11 = vector.broadcast %cst : f32 to vector<8x288xf32>
    %12 = arith.cmpf oge, %10, %11 : vector<8x288xf32>
    %cst_8 = arith.constant 2.000000e-01 : f32
    %13 = vector.broadcast %cst_8 : f32 to vector<8x288xf32>
    %14 = arith.mulf %13, %10 : vector<8x288xf32>
    %15 = arith.select %12, %10, %14 : vector<8x288xi1>, vector<8x288xf32>
    %16 = arith.truncf %15 : vector<8x288xf32> to vector<8x288xbf16>
    %c0_9 = arith.constant 0 : index
    %c0_10 = arith.constant 0 : index
    %c0_11 = arith.constant 0 : index
    %17 = vector.load %arg5[%c0_9, %c0_10, %c0_11] : memref<1x8x288xbf16, #tpu.memory_space<vmem>>, vector<1x8x288xbf16>
    %18 = vector.shape_cast %17 : vector<1x8x288xbf16> to vector<8x288xbf16>
    %19 = vector.shape_cast %16 : vector<8x288xbf16> to vector<1x8x288xbf16>
    tpu.vector_store %arg5[%c0_9, %c0_10, %c0_11], %19 {strides = array<i32>} : memref<1x8x288xbf16, #tpu.memory_space<vmem>>, vector<1x8x288xbf16>,
    return
  }
  func.func @transform_0(%arg0: i32, %arg1: i32) -> (i32, i32, i32) {
    %c0_i32 = arith.constant 0 : i32
    %c0_i32_0 = arith.constant 0 : i32
    return %arg0, %c0_i32, %arg1 : i32, i32, i32
  }
  func.func @transform_1(%arg0: i32, %arg1: i32) -> (i32, i32, i32) {
    %c0_i32 = arith.constant 0 : i32
    %c0_i32_0 = arith.constant 0 : i32
    %c0_i32_1 = arith.constant 0 : i32
    return %arg0, %c0_i32, %c0_i32_0 : i32, i32, i32
  }
  func.func @transform_2(%arg0: i32, %arg1: i32) -> (i32, i32, i32) {
    %c0_i32 = arith.constant 0 : i32
    %c0_i32_0 = arith.constant 0 : i32
    %c0_i32_1 = arith.constant 0 : i32
    return %arg0, %c0_i32, %c0_i32_0 : i32, i32, i32
  }
  func.func @transform_3(%arg0: i32, %arg1: i32) -> (i32, i32, i32) {
    %c0_i32 = arith.constant 0 : i32
    %c0_i32_0 = arith.constant 0 : i32
    return %arg0, %c0_i32, %arg1 : i32, i32, i32
  }
}

module attributes {stable_mosaic.version = 11 : i64} {
  func.func @kernel(%arg0: i32, %arg1: i32, %arg2: memref<1x1x8x342xbf16, #tpu.memory_space<vmem>>, %arg3: memref<8x72xbf16, #tpu.memory_space<vmem>>, %arg4: memref<1x288xf32, #tpu.memory_space<vmem>>, %arg5: memref<1x8x288xbf16, #tpu.memory_space<vmem>>, %arg6: memref<1x8x1xf32, #tpu.memory_space<vmem>>, %arg7: memref<1x8x1xf32, #tpu.memory_space<vmem>>, %arg8: memref<72x288xbf16, #tpu.memory_space<vmem>>) attributes {dimension_semantics = [#tpu.dimension_semantics<parallel>, #tpu.dimension_semantics<arbitrary>], iteration_bounds = array<i64: 2, 1>, scalar_prefetch = 0 : i64, scratch_operands = 1 : i64, tpu.core_type = #tpu.core_type<tc>, window_params = [{transform_indices = @transform_0, window_bounds = array<i64: 1, 1, 8, 342>}, {pipeline_mode = #tpu.pipeline_mode<synchronous>, transform_indices = @transform_1, window_bounds = array<i64: 8, 72>}, {pipeline_mode = #tpu.pipeline_mode<synchronous>, transform_indices = @transform_2, window_bounds = array<i64: 1, 288>}, {transform_indices = @transform_3, window_bounds = array<i64: 1, 8, 288>}, {transform_indices = @transform_4, window_bounds = array<i64: 1, 8, 1>}, {transform_indices = @transform_5, window_bounds = array<i64: 1, 8, 1>}]} {
    %c0_i32 = arith.constant 0 : i32
    %0 = arith.cmpi eq, %arg1, %c0_i32 : i32
    %1 = arith.extui %0 : i1 to i32
    %c0_i32_0 = arith.constant 0 : i32
    %2 = arith.cmpi ne, %1, %c0_i32_0 : i32
    scf.if %2 {
      %cst_37 = arith.constant 0.000000e+00 : f32
      %50 = vector.broadcast %cst_37 : f32 to vector<1x8x1xf32>
      %c0_38 = arith.constant 0 : index
      %c0_39 = arith.constant 0 : index
      %c0_40 = arith.constant 0 : index
      %51 = vector.load %arg6[%c0_38, %c0_39, %c0_40] : memref<1x8x1xf32, #tpu.memory_space<vmem>>, vector<1x8x1xf32>
      tpu.vector_store %arg6[%c0_38, %c0_39, %c0_40], %50 {strides = array<i32>} : memref<1x8x1xf32, #tpu.memory_space<vmem>>, vector<1x8x1xf32>,
      %cst_41 = arith.constant 0.000000e+00 : f32
      %52 = vector.broadcast %cst_41 : f32 to vector<1x8x1xf32>
      %c0_42 = arith.constant 0 : index
      %c0_43 = arith.constant 0 : index
      %c0_44 = arith.constant 0 : index
      %53 = vector.load %arg7[%c0_42, %c0_43, %c0_44] : memref<1x8x1xf32, #tpu.memory_space<vmem>>, vector<1x8x1xf32>
      tpu.vector_store %arg7[%c0_42, %c0_43, %c0_44], %52 {strides = array<i32>} : memref<1x8x1xf32, #tpu.memory_space<vmem>>, vector<1x8x1xf32>,
    } else {
    }
    %c0 = arith.constant 0 : index
    %c0_1 = arith.constant 0 : index
    %c0_2 = arith.constant 0 : index
    %c0_3 = arith.constant 0 : index
    %3 = vector.load %arg2[%c0, %c0_1, %c0_2, %c0_3] : memref<1x1x8x342xbf16, #tpu.memory_space<vmem>>, vector<1x1x8x342xbf16>
    %4 = vector.shape_cast %3 : vector<1x1x8x342xbf16> to vector<8x342xbf16>
    %5 = vector.extract_strided_slice %4 {offsets = [0, 0], sizes = [8, 288], strides = [1, 1]} : vector<8x342xbf16> to vector<8x288xbf16>
    %c0_4 = arith.constant 0 : index
    %c0_5 = arith.constant 0 : index
    %6 = vector.load %arg8[%c0_4, %c0_5] : memref<72x288xbf16, #tpu.memory_space<vmem>>, vector<8x288xbf16>
    tpu.vector_store %arg8[%c0_4, %c0_5], %5 {strides = array<i32>} : memref<72x288xbf16, #tpu.memory_space<vmem>>, vector<8x288xbf16>,
    %7 = vector.extract_strided_slice %4 {offsets = [0, 1], sizes = [8, 288], strides = [1, 1]} : vector<8x342xbf16> to vector<8x288xbf16>
    %c8 = arith.constant 8 : index
    %c0_6 = arith.constant 0 : index
    %8 = vector.load %arg8[%c8, %c0_6] : memref<72x288xbf16, #tpu.memory_space<vmem>>, vector<8x288xbf16>
    tpu.vector_store %arg8[%c8, %c0_6], %7 {strides = array<i32>} : memref<72x288xbf16, #tpu.memory_space<vmem>>, vector<8x288xbf16>,
    %9 = vector.extract_strided_slice %4 {offsets = [0, 2], sizes = [8, 288], strides = [1, 1]} : vector<8x342xbf16> to vector<8x288xbf16>
    %c16 = arith.constant 16 : index
    %c0_7 = arith.constant 0 : index
    %10 = vector.load %arg8[%c16, %c0_7] : memref<72x288xbf16, #tpu.memory_space<vmem>>, vector<8x288xbf16>
    tpu.vector_store %arg8[%c16, %c0_7], %9 {strides = array<i32>} : memref<72x288xbf16, #tpu.memory_space<vmem>>, vector<8x288xbf16>,
    %11 = vector.extract_strided_slice %4 {offsets = [0, 18], sizes = [8, 288], strides = [1, 1]} : vector<8x342xbf16> to vector<8x288xbf16>
    %c24 = arith.constant 24 : index
    %c0_8 = arith.constant 0 : index
    %12 = vector.load %arg8[%c24, %c0_8] : memref<72x288xbf16, #tpu.memory_space<vmem>>, vector<8x288xbf16>
    tpu.vector_store %arg8[%c24, %c0_8], %11 {strides = array<i32>} : memref<72x288xbf16, #tpu.memory_space<vmem>>, vector<8x288xbf16>,
    %13 = vector.extract_strided_slice %4 {offsets = [0, 19], sizes = [8, 288], strides = [1, 1]} : vector<8x342xbf16> to vector<8x288xbf16>
    %c32 = arith.constant 32 : index
    %c0_9 = arith.constant 0 : index
    %14 = vector.load %arg8[%c32, %c0_9] : memref<72x288xbf16, #tpu.memory_space<vmem>>, vector<8x288xbf16>
    tpu.vector_store %arg8[%c32, %c0_9], %13 {strides = array<i32>} : memref<72x288xbf16, #tpu.memory_space<vmem>>, vector<8x288xbf16>,
    %15 = vector.extract_strided_slice %4 {offsets = [0, 20], sizes = [8, 288], strides = [1, 1]} : vector<8x342xbf16> to vector<8x288xbf16>
    %c40 = arith.constant 40 : index
    %c0_10 = arith.constant 0 : index
    %16 = vector.load %arg8[%c40, %c0_10] : memref<72x288xbf16, #tpu.memory_space<vmem>>, vector<8x288xbf16>
    tpu.vector_store %arg8[%c40, %c0_10], %15 {strides = array<i32>} : memref<72x288xbf16, #tpu.memory_space<vmem>>, vector<8x288xbf16>,
    %17 = vector.extract_strided_slice %4 {offsets = [0, 36], sizes = [8, 288], strides = [1, 1]} : vector<8x342xbf16> to vector<8x288xbf16>
    %c48 = arith.constant 48 : index
    %c0_11 = arith.constant 0 : index
    %18 = vector.load %arg8[%c48, %c0_11] : memref<72x288xbf16, #tpu.memory_space<vmem>>, vector<8x288xbf16>
    tpu.vector_store %arg8[%c48, %c0_11], %17 {strides = array<i32>} : memref<72x288xbf16, #tpu.memory_space<vmem>>, vector<8x288xbf16>,
    %19 = vector.extract_strided_slice %4 {offsets = [0, 37], sizes = [8, 288], strides = [1, 1]} : vector<8x342xbf16> to vector<8x288xbf16>
    %c56 = arith.constant 56 : index
    %c0_12 = arith.constant 0 : index
    %20 = vector.load %arg8[%c56, %c0_12] : memref<72x288xbf16, #tpu.memory_space<vmem>>, vector<8x288xbf16>
    tpu.vector_store %arg8[%c56, %c0_12], %19 {strides = array<i32>} : memref<72x288xbf16, #tpu.memory_space<vmem>>, vector<8x288xbf16>,
    %21 = vector.extract_strided_slice %4 {offsets = [0, 38], sizes = [8, 288], strides = [1, 1]} : vector<8x342xbf16> to vector<8x288xbf16>
    %c64 = arith.constant 64 : index
    %c0_13 = arith.constant 0 : index
    %22 = vector.load %arg8[%c64, %c0_13] : memref<72x288xbf16, #tpu.memory_space<vmem>>, vector<8x288xbf16>
    tpu.vector_store %arg8[%c64, %c0_13], %21 {strides = array<i32>} : memref<72x288xbf16, #tpu.memory_space<vmem>>, vector<8x288xbf16>,
    %c0_14 = arith.constant 0 : index
    %c0_15 = arith.constant 0 : index
    %23 = vector.load %arg8[%c0_14, %c0_15] : memref<72x288xbf16, #tpu.memory_space<vmem>>, vector<72x288xbf16>
    %c0_16 = arith.constant 0 : index
    %c0_17 = arith.constant 0 : index
    %24 = vector.load %arg3[%c0_16, %c0_17] : memref<8x72xbf16, #tpu.memory_space<vmem>>, vector<8x72xbf16>
    %cst = arith.constant dense<0.000000e+00> : vector<8x288xf32>
    %25 = tpu.matmul %24, %23, %cst {dimension_numbers = #tpu.dot_dimension_numbers<[1], [0], [0], [1], [0, 0, 1, 1], [], []>} : vector<8x72xbf16>, vector<72x288xbf16>, vector<8x288xf32> -> vector<8x288xf32>
    %c0_18 = arith.constant 0 : index
    %c0_19 = arith.constant 0 : index
    %26 = vector.load %arg4[%c0_18, %c0_19] : memref<1x288xf32, #tpu.memory_space<vmem>>, vector<1x288xf32>
    %27 = vector.broadcast %26 : vector<1x288xf32> to vector<8x288xf32>
    %28 = arith.mulf %25, %27 : vector<8x288xf32>
    %c0_20 = arith.constant 0 : index
    %c0_21 = arith.constant 0 : index
    %c0_22 = arith.constant 0 : index
    %29 = vector.load %arg6[%c0_20, %c0_21, %c0_22] : memref<1x8x1xf32, #tpu.memory_space<vmem>>, vector<1x8x1xf32>
    %30 = vector.shape_cast %29 : vector<1x8x1xf32> to vector<8x1xf32>
    %cst_23 = arith.constant dense<0.000000e+00> : vector<8xf32>
    %31 = vector.multi_reduction <add>, %28, %cst_23 [1] : vector<8x288xf32> to vector<8xf32>
    %32 = vector.shape_cast %31 : vector<8xf32> to vector<8x1xf32>
    %33 = arith.addf %30, %32 : vector<8x1xf32>
    %c0_24 = arith.constant 0 : index
    %c0_25 = arith.constant 0 : index
    %c0_26 = arith.constant 0 : index
    %34 = vector.load %arg6[%c0_24, %c0_25, %c0_26] : memref<1x8x1xf32, #tpu.memory_space<vmem>>, vector<1x8x1xf32>
    %35 = vector.shape_cast %34 : vector<1x8x1xf32> to vector<8x1xf32>
    %36 = vector.shape_cast %33 : vector<8x1xf32> to vector<1x8x1xf32>
    tpu.vector_store %arg6[%c0_24, %c0_25, %c0_26], %36 {strides = array<i32>} : memref<1x8x1xf32, #tpu.memory_space<vmem>>, vector<1x8x1xf32>,
    %c0_27 = arith.constant 0 : index
    %c0_28 = arith.constant 0 : index
    %c0_29 = arith.constant 0 : index
    %37 = vector.load %arg7[%c0_27, %c0_28, %c0_29] : memref<1x8x1xf32, #tpu.memory_space<vmem>>, vector<1x8x1xf32>
    %38 = vector.shape_cast %37 : vector<1x8x1xf32> to vector<8x1xf32>
    %39 = arith.mulf %28, %28 : vector<8x288xf32>
    %cst_30 = arith.constant dense<0.000000e+00> : vector<8xf32>
    %40 = vector.multi_reduction <add>, %39, %cst_30 [1] : vector<8x288xf32> to vector<8xf32>
    %41 = vector.shape_cast %40 : vector<8xf32> to vector<8x1xf32>
    %42 = arith.addf %38, %41 : vector<8x1xf32>
    %c0_31 = arith.constant 0 : index
    %c0_32 = arith.constant 0 : index
    %c0_33 = arith.constant 0 : index
    %43 = vector.load %arg7[%c0_31, %c0_32, %c0_33] : memref<1x8x1xf32, #tpu.memory_space<vmem>>, vector<1x8x1xf32>
    %44 = vector.shape_cast %43 : vector<1x8x1xf32> to vector<8x1xf32>
    %45 = vector.shape_cast %42 : vector<8x1xf32> to vector<1x8x1xf32>
    tpu.vector_store %arg7[%c0_31, %c0_32, %c0_33], %45 {strides = array<i32>} : memref<1x8x1xf32, #tpu.memory_space<vmem>>, vector<1x8x1xf32>,
    %46 = arith.truncf %25 : vector<8x288xf32> to vector<8x288xbf16>
    %c0_34 = arith.constant 0 : index
    %c0_35 = arith.constant 0 : index
    %c0_36 = arith.constant 0 : index
    %47 = vector.load %arg5[%c0_34, %c0_35, %c0_36] : memref<1x8x288xbf16, #tpu.memory_space<vmem>>, vector<1x8x288xbf16>
    %48 = vector.shape_cast %47 : vector<1x8x288xbf16> to vector<8x288xbf16>
    %49 = vector.shape_cast %46 : vector<8x288xbf16> to vector<1x8x288xbf16>
    tpu.vector_store %arg5[%c0_34, %c0_35, %c0_36], %49 {strides = array<i32>} : memref<1x8x288xbf16, #tpu.memory_space<vmem>>, vector<1x8x288xbf16>,
    return
  }
  func.func @transform_0(%arg0: i32, %arg1: i32) -> (i32, i32, i32, i32) {
    %c0_i32 = arith.constant 0 : i32
    %c0_i32_0 = arith.constant 0 : i32
    %c0_i32_1 = arith.constant 0 : i32
    return %arg0, %arg1, %c0_i32, %c0_i32_0 : i32, i32, i32, i32
  }
  func.func @transform_1(%arg0: i32, %arg1: i32) -> (i32, i32) {
    %c0_i32 = arith.constant 0 : i32
    %c0_i32_0 = arith.constant 0 : i32
    %c0_i32_1 = arith.constant 0 : i32
    return %c0_i32, %c0_i32_0 : i32, i32
  }
  func.func @transform_2(%arg0: i32, %arg1: i32) -> (i32, i32) {
    %c0_i32 = arith.constant 0 : i32
    %c0_i32_0 = arith.constant 0 : i32
    %c0_i32_1 = arith.constant 0 : i32
    return %c0_i32, %c0_i32_0 : i32, i32
  }
  func.func @transform_3(%arg0: i32, %arg1: i32) -> (i32, i32, i32) {
    %c0_i32 = arith.constant 0 : i32
    %c0_i32_0 = arith.constant 0 : i32
    return %arg0, %c0_i32, %arg1 : i32, i32, i32
  }
  func.func @transform_4(%arg0: i32, %arg1: i32) -> (i32, i32, i32) {
    %c0_i32 = arith.constant 0 : i32
    %c0_i32_0 = arith.constant 0 : i32
    %c0_i32_1 = arith.constant 0 : i32
    return %arg0, %c0_i32, %c0_i32_0 : i32, i32, i32
  }
  func.func @transform_5(%arg0: i32, %arg1: i32) -> (i32, i32, i32) {
    %c0_i32 = arith.constant 0 : i32
    %c0_i32_0 = arith.constant 0 : i32
    %c0_i32_1 = arith.constant 0 : i32
    return %arg0, %c0_i32, %c0_i32_0 : i32, i32, i32
  }
}

module attributes {stable_mosaic.version = 11 : i64} {
  func.func @kernel(%arg0: i32, %arg1: i32, %arg2: memref<1x1x8x110xbf16, #tpu.memory_space<vmem>>, %arg3: memref<16x72xbf16, #tpu.memory_space<vmem>>, %arg4: memref<1x80xf32, #tpu.memory_space<vmem>>, %arg5: memref<1x16x80xbf16, #tpu.memory_space<vmem>>, %arg6: memref<1x16x1xf32, #tpu.memory_space<vmem>>, %arg7: memref<1x16x1xf32, #tpu.memory_space<vmem>>, %arg8: memref<72x80xbf16, #tpu.memory_space<vmem>>) attributes {dimension_semantics = [#tpu.dimension_semantics<parallel>, #tpu.dimension_semantics<arbitrary>], iteration_bounds = array<i64: 2, 1>, scalar_prefetch = 0 : i64, scratch_operands = 1 : i64, tpu.core_type = #tpu.core_type<tc>, window_params = [{transform_indices = @transform_0, window_bounds = array<i64: 1, 1, 8, 110>}, {pipeline_mode = #tpu.pipeline_mode<synchronous>, transform_indices = @transform_1, window_bounds = array<i64: 16, 72>}, {pipeline_mode = #tpu.pipeline_mode<synchronous>, transform_indices = @transform_2, window_bounds = array<i64: 1, 80>}, {transform_indices = @transform_3, window_bounds = array<i64: 1, 16, 80>}, {transform_indices = @transform_4, window_bounds = array<i64: 1, 16, 1>}, {transform_indices = @transform_5, window_bounds = array<i64: 1, 16, 1>}]} {
    %c0_i32 = arith.constant 0 : i32
    %0 = arith.cmpi eq, %arg1, %c0_i32 : i32
    %1 = arith.extui %0 : i1 to i32
    %c0_i32_0 = arith.constant 0 : i32
    %2 = arith.cmpi ne, %1, %c0_i32_0 : i32
    scf.if %2 {
      %cst_37 = arith.constant 0.000000e+00 : f32
      %50 = vector.broadcast %cst_37 : f32 to vector<1x16x1xf32>
      %c0_38 = arith.constant 0 : index
      %c0_39 = arith.constant 0 : index
      %c0_40 = arith.constant 0 : index
      %51 = vector.load %arg6[%c0_38, %c0_39, %c0_40] : memref<1x16x1xf32, #tpu.memory_space<vmem>>, vector<1x16x1xf32>
      tpu.vector_store %arg6[%c0_38, %c0_39, %c0_40], %50 {strides = array<i32>} : memref<1x16x1xf32, #tpu.memory_space<vmem>>, vector<1x16x1xf32>,
      %cst_41 = arith.constant 0.000000e+00 : f32
      %52 = vector.broadcast %cst_41 : f32 to vector<1x16x1xf32>
      %c0_42 = arith.constant 0 : index
      %c0_43 = arith.constant 0 : index
      %c0_44 = arith.constant 0 : index
      %53 = vector.load %arg7[%c0_42, %c0_43, %c0_44] : memref<1x16x1xf32, #tpu.memory_space<vmem>>, vector<1x16x1xf32>
      tpu.vector_store %arg7[%c0_42, %c0_43, %c0_44], %52 {strides = array<i32>} : memref<1x16x1xf32, #tpu.memory_space<vmem>>, vector<1x16x1xf32>,
    } else {
    }
    %c0 = arith.constant 0 : index
    %c0_1 = arith.constant 0 : index
    %c0_2 = arith.constant 0 : index
    %c0_3 = arith.constant 0 : index
    %3 = vector.load %arg2[%c0, %c0_1, %c0_2, %c0_3] : memref<1x1x8x110xbf16, #tpu.memory_space<vmem>>, vector<1x1x8x110xbf16>
    %4 = vector.shape_cast %3 : vector<1x1x8x110xbf16> to vector<8x110xbf16>
    %5 = vector.extract_strided_slice %4 {offsets = [0, 0], sizes = [8, 80], strides = [1, 1]} : vector<8x110xbf16> to vector<8x80xbf16>
    %c0_4 = arith.constant 0 : index
    %c0_5 = arith.constant 0 : index
    %6 = vector.load %arg8[%c0_4, %c0_5] : memref<72x80xbf16, #tpu.memory_space<vmem>>, vector<8x80xbf16>
    tpu.vector_store %arg8[%c0_4, %c0_5], %5 {strides = array<i32>} : memref<72x80xbf16, #tpu.memory_space<vmem>>, vector<8x80xbf16>,
    %7 = vector.extract_strided_slice %4 {offsets = [0, 1], sizes = [8, 80], strides = [1, 1]} : vector<8x110xbf16> to vector<8x80xbf16>
    %c8 = arith.constant 8 : index
    %c0_6 = arith.constant 0 : index
    %8 = vector.load %arg8[%c8, %c0_6] : memref<72x80xbf16, #tpu.memory_space<vmem>>, vector<8x80xbf16>
    tpu.vector_store %arg8[%c8, %c0_6], %7 {strides = array<i32>} : memref<72x80xbf16, #tpu.memory_space<vmem>>, vector<8x80xbf16>,
    %9 = vector.extract_strided_slice %4 {offsets = [0, 2], sizes = [8, 80], strides = [1, 1]} : vector<8x110xbf16> to vector<8x80xbf16>
    %c16 = arith.constant 16 : index
    %c0_7 = arith.constant 0 : index
    %10 = vector.load %arg8[%c16, %c0_7] : memref<72x80xbf16, #tpu.memory_space<vmem>>, vector<8x80xbf16>
    tpu.vector_store %arg8[%c16, %c0_7], %9 {strides = array<i32>} : memref<72x80xbf16, #tpu.memory_space<vmem>>, vector<8x80xbf16>,
    %11 = vector.extract_strided_slice %4 {offsets = [0, 10], sizes = [8, 80], strides = [1, 1]} : vector<8x110xbf16> to vector<8x80xbf16>
    %c24 = arith.constant 24 : index
    %c0_8 = arith.constant 0 : index
    %12 = vector.load %arg8[%c24, %c0_8] : memref<72x80xbf16, #tpu.memory_space<vmem>>, vector<8x80xbf16>
    tpu.vector_store %arg8[%c24, %c0_8], %11 {strides = array<i32>} : memref<72x80xbf16, #tpu.memory_space<vmem>>, vector<8x80xbf16>,
    %13 = vector.extract_strided_slice %4 {offsets = [0, 11], sizes = [8, 80], strides = [1, 1]} : vector<8x110xbf16> to vector<8x80xbf16>
    %c32 = arith.constant 32 : index
    %c0_9 = arith.constant 0 : index
    %14 = vector.load %arg8[%c32, %c0_9] : memref<72x80xbf16, #tpu.memory_space<vmem>>, vector<8x80xbf16>
    tpu.vector_store %arg8[%c32, %c0_9], %13 {strides = array<i32>} : memref<72x80xbf16, #tpu.memory_space<vmem>>, vector<8x80xbf16>,
    %15 = vector.extract_strided_slice %4 {offsets = [0, 12], sizes = [8, 80], strides = [1, 1]} : vector<8x110xbf16> to vector<8x80xbf16>
    %c40 = arith.constant 40 : index
    %c0_10 = arith.constant 0 : index
    %16 = vector.load %arg8[%c40, %c0_10] : memref<72x80xbf16, #tpu.memory_space<vmem>>, vector<8x80xbf16>
    tpu.vector_store %arg8[%c40, %c0_10], %15 {strides = array<i32>} : memref<72x80xbf16, #tpu.memory_space<vmem>>, vector<8x80xbf16>,
    %17 = vector.extract_strided_slice %4 {offsets = [0, 20], sizes = [8, 80], strides = [1, 1]} : vector<8x110xbf16> to vector<8x80xbf16>
    %c48 = arith.constant 48 : index
    %c0_11 = arith.constant 0 : index
    %18 = vector.load %arg8[%c48, %c0_11] : memref<72x80xbf16, #tpu.memory_space<vmem>>, vector<8x80xbf16>
    tpu.vector_store %arg8[%c48, %c0_11], %17 {strides = array<i32>} : memref<72x80xbf16, #tpu.memory_space<vmem>>, vector<8x80xbf16>,
    %19 = vector.extract_strided_slice %4 {offsets = [0, 21], sizes = [8, 80], strides = [1, 1]} : vector<8x110xbf16> to vector<8x80xbf16>
    %c56 = arith.constant 56 : index
    %c0_12 = arith.constant 0 : index
    %20 = vector.load %arg8[%c56, %c0_12] : memref<72x80xbf16, #tpu.memory_space<vmem>>, vector<8x80xbf16>
    tpu.vector_store %arg8[%c56, %c0_12], %19 {strides = array<i32>} : memref<72x80xbf16, #tpu.memory_space<vmem>>, vector<8x80xbf16>,
    %21 = vector.extract_strided_slice %4 {offsets = [0, 22], sizes = [8, 80], strides = [1, 1]} : vector<8x110xbf16> to vector<8x80xbf16>
    %c64 = arith.constant 64 : index
    %c0_13 = arith.constant 0 : index
    %22 = vector.load %arg8[%c64, %c0_13] : memref<72x80xbf16, #tpu.memory_space<vmem>>, vector<8x80xbf16>
    tpu.vector_store %arg8[%c64, %c0_13], %21 {strides = array<i32>} : memref<72x80xbf16, #tpu.memory_space<vmem>>, vector<8x80xbf16>,
    %c0_14 = arith.constant 0 : index
    %c0_15 = arith.constant 0 : index
    %23 = vector.load %arg8[%c0_14, %c0_15] : memref<72x80xbf16, #tpu.memory_space<vmem>>, vector<72x80xbf16>
    %c0_16 = arith.constant 0 : index
    %c0_17 = arith.constant 0 : index
    %24 = vector.load %arg3[%c0_16, %c0_17] : memref<16x72xbf16, #tpu.memory_space<vmem>>, vector<16x72xbf16>
    %cst = arith.constant dense<0.000000e+00> : vector<16x80xf32>
    %25 = tpu.matmul %24, %23, %cst {dimension_numbers = #tpu.dot_dimension_numbers<[1], [0], [0], [1], [0, 0, 1, 1], [], []>} : vector<16x72xbf16>, vector<72x80xbf16>, vector<16x80xf32> -> vector<16x80xf32>
    %c0_18 = arith.constant 0 : index
    %c0_19 = arith.constant 0 : index
    %26 = vector.load %arg4[%c0_18, %c0_19] : memref<1x80xf32, #tpu.memory_space<vmem>>, vector<1x80xf32>
    %27 = vector.broadcast %26 : vector<1x80xf32> to vector<16x80xf32>
    %28 = arith.mulf %25, %27 : vector<16x80xf32>
    %c0_20 = arith.constant 0 : index
    %c0_21 = arith.constant 0 : index
    %c0_22 = arith.constant 0 : index
    %29 = vector.load %arg6[%c0_20, %c0_21, %c0_22] : memref<1x16x1xf32, #tpu.memory_space<vmem>>, vector<1x16x1xf32>
    %30 = vector.shape_cast %29 : vector<1x16x1xf32> to vector<16x1xf32>
    %cst_23 = arith.constant dense<0.000000e+00> : vector<16xf32>
    %31 = vector.multi_reduction <add>, %28, %cst_23 [1] : vector<16x80xf32> to vector<16xf32>
    %32 = vector.shape_cast %31 : vector<16xf32> to vector<16x1xf32>
    %33 = arith.addf %30, %32 : vector<16x1xf32>
    %c0_24 = arith.constant 0 : index
    %c0_25 = arith.constant 0 : index
    %c0_26 = arith.constant 0 : index
    %34 = vector.load %arg6[%c0_24, %c0_25, %c0_26] : memref<1x16x1xf32, #tpu.memory_space<vmem>>, vector<1x16x1xf32>
    %35 = vector.shape_cast %34 : vector<1x16x1xf32> to vector<16x1xf32>
    %36 = vector.shape_cast %33 : vector<16x1xf32> to vector<1x16x1xf32>
    tpu.vector_store %arg6[%c0_24, %c0_25, %c0_26], %36 {strides = array<i32>} : memref<1x16x1xf32, #tpu.memory_space<vmem>>, vector<1x16x1xf32>,
    %c0_27 = arith.constant 0 : index
    %c0_28 = arith.constant 0 : index
    %c0_29 = arith.constant 0 : index
    %37 = vector.load %arg7[%c0_27, %c0_28, %c0_29] : memref<1x16x1xf32, #tpu.memory_space<vmem>>, vector<1x16x1xf32>
    %38 = vector.shape_cast %37 : vector<1x16x1xf32> to vector<16x1xf32>
    %39 = arith.mulf %28, %28 : vector<16x80xf32>
    %cst_30 = arith.constant dense<0.000000e+00> : vector<16xf32>
    %40 = vector.multi_reduction <add>, %39, %cst_30 [1] : vector<16x80xf32> to vector<16xf32>
    %41 = vector.shape_cast %40 : vector<16xf32> to vector<16x1xf32>
    %42 = arith.addf %38, %41 : vector<16x1xf32>
    %c0_31 = arith.constant 0 : index
    %c0_32 = arith.constant 0 : index
    %c0_33 = arith.constant 0 : index
    %43 = vector.load %arg7[%c0_31, %c0_32, %c0_33] : memref<1x16x1xf32, #tpu.memory_space<vmem>>, vector<1x16x1xf32>
    %44 = vector.shape_cast %43 : vector<1x16x1xf32> to vector<16x1xf32>
    %45 = vector.shape_cast %42 : vector<16x1xf32> to vector<1x16x1xf32>
    tpu.vector_store %arg7[%c0_31, %c0_32, %c0_33], %45 {strides = array<i32>} : memref<1x16x1xf32, #tpu.memory_space<vmem>>, vector<1x16x1xf32>,
    %46 = arith.truncf %25 : vector<16x80xf32> to vector<16x80xbf16>
    %c0_34 = arith.constant 0 : index
    %c0_35 = arith.constant 0 : index
    %c0_36 = arith.constant 0 : index
    %47 = vector.load %arg5[%c0_34, %c0_35, %c0_36] : memref<1x16x80xbf16, #tpu.memory_space<vmem>>, vector<1x16x80xbf16>
    %48 = vector.shape_cast %47 : vector<1x16x80xbf16> to vector<16x80xbf16>
    %49 = vector.shape_cast %46 : vector<16x80xbf16> to vector<1x16x80xbf16>
    tpu.vector_store %arg5[%c0_34, %c0_35, %c0_36], %49 {strides = array<i32>} : memref<1x16x80xbf16, #tpu.memory_space<vmem>>, vector<1x16x80xbf16>,
    return
  }
  func.func @transform_0(%arg0: i32, %arg1: i32) -> (i32, i32, i32, i32) {
    %c0_i32 = arith.constant 0 : i32
    %c0_i32_0 = arith.constant 0 : i32
    %c0_i32_1 = arith.constant 0 : i32
    return %arg0, %arg1, %c0_i32, %c0_i32_0 : i32, i32, i32, i32
  }
  func.func @transform_1(%arg0: i32, %arg1: i32) -> (i32, i32) {
    %c0_i32 = arith.constant 0 : i32
    %c0_i32_0 = arith.constant 0 : i32
    %c0_i32_1 = arith.constant 0 : i32
    return %c0_i32, %c0_i32_0 : i32, i32
  }
  func.func @transform_2(%arg0: i32, %arg1: i32) -> (i32, i32) {
    %c0_i32 = arith.constant 0 : i32
    %c0_i32_0 = arith.constant 0 : i32
    %c0_i32_1 = arith.constant 0 : i32
    return %c0_i32, %c0_i32_0 : i32, i32
  }
  func.func @transform_3(%arg0: i32, %arg1: i32) -> (i32, i32, i32) {
    %c0_i32 = arith.constant 0 : i32
    %c0_i32_0 = arith.constant 0 : i32
    return %arg0, %c0_i32, %arg1 : i32, i32, i32
  }
  func.func @transform_4(%arg0: i32, %arg1: i32) -> (i32, i32, i32) {
    %c0_i32 = arith.constant 0 : i32
    %c0_i32_0 = arith.constant 0 : i32
    %c0_i32_1 = arith.constant 0 : i32
    return %arg0, %c0_i32, %c0_i32_0 : i32, i32, i32
  }
  func.func @transform_5(%arg0: i32, %arg1: i32) -> (i32, i32, i32) {
    %c0_i32 = arith.constant 0 : i32
    %c0_i32_0 = arith.constant 0 : i32
    %c0_i32_1 = arith.constant 0 : i32
    return %arg0, %c0_i32, %c0_i32_0 : i32, i32, i32
  }
}

module attributes {stable_mosaic.version = 11 : i64} {
  func.func @kernel(%arg0: i32, %arg1: i32, %arg2: memref<1x16x80xbf16, #tpu.memory_space<vmem>>, %arg3: memref<1x16x1xf32, #tpu.memory_space<vmem>>, %arg4: memref<1x16x1xf32, #tpu.memory_space<vmem>>, %arg5: memref<1x16x80xbf16, #tpu.memory_space<vmem>>) attributes {dimension_semantics = [#tpu.dimension_semantics<parallel>, #tpu.dimension_semantics<parallel>], iteration_bounds = array<i64: 2, 1>, scalar_prefetch = 0 : i64, scratch_operands = 0 : i64, tpu.core_type = #tpu.core_type<tc>, window_params = [{transform_indices = @transform_0, window_bounds = array<i64: 1, 16, 80>}, {transform_indices = @transform_1, window_bounds = array<i64: 1, 16, 1>}, {transform_indices = @transform_2, window_bounds = array<i64: 1, 16, 1>}, {transform_indices = @transform_3, window_bounds = array<i64: 1, 16, 80>}]} {
    %c0 = arith.constant 0 : index
    %c0_0 = arith.constant 0 : index
    %c0_1 = arith.constant 0 : index
    %0 = vector.load %arg2[%c0, %c0_0, %c0_1] : memref<1x16x80xbf16, #tpu.memory_space<vmem>>, vector<1x16x80xbf16>
    %1 = vector.shape_cast %0 : vector<1x16x80xbf16> to vector<16x80xbf16>
    %2 = arith.extf %1 : vector<16x80xbf16> to vector<16x80xf32>
    %c0_2 = arith.constant 0 : index
    %c0_3 = arith.constant 0 : index
    %c0_4 = arith.constant 0 : index
    %3 = vector.load %arg3[%c0_2, %c0_3, %c0_4] : memref<1x16x1xf32, #tpu.memory_space<vmem>>, vector<1x16x1xf32>
    %4 = vector.shape_cast %3 : vector<1x16x1xf32> to vector<16x1xf32>
    %5 = vector.broadcast %4 : vector<16x1xf32> to vector<16x80xf32>
    %6 = arith.subf %2, %5 : vector<16x80xf32>
    %c0_5 = arith.constant 0 : index
    %c0_6 = arith.constant 0 : index
    %c0_7 = arith.constant 0 : index
    %7 = vector.load %arg4[%c0_5, %c0_6, %c0_7] : memref<1x16x1xf32, #tpu.memory_space<vmem>>, vector<1x16x1xf32>
    %8 = vector.shape_cast %7 : vector<1x16x1xf32> to vector<16x1xf32>
    %9 = vector.broadcast %8 : vector<16x1xf32> to vector<16x80xf32>
    %10 = arith.mulf %6, %9 : vector<16x80xf32>
    %cst = arith.constant 0.000000e+00 : f32
    %11 = vector.broadcast %cst : f32 to vector<16x80xf32>
    %12 = arith.cmpf oge, %10, %11 : vector<16x80xf32>
    %cst_8 = arith.constant 2.000000e-01 : f32
    %13 = vector.broadcast %cst_8 : f32 to vector<16x80xf32>
    %14 = arith.mulf %13, %10 : vector<16x80xf32>
    %15 = arith.select %12, %10, %14 : vector<16x80xi1>, vector<16x80xf32>
    %16 = arith.truncf %15 : vector<16x80xf32> to vector<16x80xbf16>
    %c0_9 = arith.constant 0 : index
    %c0_10 = arith.constant 0 : index
    %c0_11 = arith.constant 0 : index
    %17 = vector.load %arg5[%c0_9, %c0_10, %c0_11] : memref<1x16x80xbf16, #tpu.memory_space<vmem>>, vector<1x16x80xbf16>
    %18 = vector.shape_cast %17 : vector<1x16x80xbf16> to vector<16x80xbf16>
    %19 = vector.shape_cast %16 : vector<16x80xbf16> to vector<1x16x80xbf16>
    tpu.vector_store %arg5[%c0_9, %c0_10, %c0_11], %19 {strides = array<i32>} : memref<1x16x80xbf16, #tpu.memory_space<vmem>>, vector<1x16x80xbf16>,
    return
  }
  func.func @transform_0(%arg0: i32, %arg1: i32) -> (i32, i32, i32) {
    %c0_i32 = arith.constant 0 : i32
    %c0_i32_0 = arith.constant 0 : i32
    return %arg0, %c0_i32, %arg1 : i32, i32, i32
  }
  func.func @transform_1(%arg0: i32, %arg1: i32) -> (i32, i32, i32) {
    %c0_i32 = arith.constant 0 : i32
    %c0_i32_0 = arith.constant 0 : i32
    %c0_i32_1 = arith.constant 0 : i32
    return %arg0, %c0_i32, %c0_i32_0 : i32, i32, i32
  }
  func.func @transform_2(%arg0: i32, %arg1: i32) -> (i32, i32, i32) {
    %c0_i32 = arith.constant 0 : i32
    %c0_i32_0 = arith.constant 0 : i32
    %c0_i32_1 = arith.constant 0 : i32
    return %arg0, %c0_i32, %c0_i32_0 : i32, i32, i32
  }
  func.func @transform_3(%arg0: i32, %arg1: i32) -> (i32, i32, i32) {
    %c0_i32 = arith.constant 0 : i32
    %c0_i32_0 = arith.constant 0 : i32
    return %arg0, %c0_i32, %arg1 : i32, i32, i32
  }
}

module attributes {stable_mosaic.version = 11 : i64} {
  func.func @kernel(%arg0: i32, %arg1: i32, %arg2: memref<1x1x16x110xbf16, #tpu.memory_space<vmem>>, %arg3: memref<16x144xbf16, #tpu.memory_space<vmem>>, %arg4: memref<1x80xf32, #tpu.memory_space<vmem>>, %arg5: memref<1x16x80xbf16, #tpu.memory_space<vmem>>, %arg6: memref<1x16x1xf32, #tpu.memory_space<vmem>>, %arg7: memref<1x16x1xf32, #tpu.memory_space<vmem>>, %arg8: memref<144x80xbf16, #tpu.memory_space<vmem>>) attributes {dimension_semantics = [#tpu.dimension_semantics<parallel>, #tpu.dimension_semantics<arbitrary>], iteration_bounds = array<i64: 2, 1>, scalar_prefetch = 0 : i64, scratch_operands = 1 : i64, tpu.core_type = #tpu.core_type<tc>, window_params = [{transform_indices = @transform_0, window_bounds = array<i64: 1, 1, 16, 110>}, {pipeline_mode = #tpu.pipeline_mode<synchronous>, transform_indices = @transform_1, window_bounds = array<i64: 16, 144>}, {pipeline_mode = #tpu.pipeline_mode<synchronous>, transform_indices = @transform_2, window_bounds = array<i64: 1, 80>}, {transform_indices = @transform_3, window_bounds = array<i64: 1, 16, 80>}, {transform_indices = @transform_4, window_bounds = array<i64: 1, 16, 1>}, {transform_indices = @transform_5, window_bounds = array<i64: 1, 16, 1>}]} {
    %c0_i32 = arith.constant 0 : i32
    %0 = arith.cmpi eq, %arg1, %c0_i32 : i32
    %1 = arith.extui %0 : i1 to i32
    %c0_i32_0 = arith.constant 0 : i32
    %2 = arith.cmpi ne, %1, %c0_i32_0 : i32
    scf.if %2 {
      %cst_37 = arith.constant 0.000000e+00 : f32
      %50 = vector.broadcast %cst_37 : f32 to vector<1x16x1xf32>
      %c0_38 = arith.constant 0 : index
      %c0_39 = arith.constant 0 : index
      %c0_40 = arith.constant 0 : index
      %51 = vector.load %arg6[%c0_38, %c0_39, %c0_40] : memref<1x16x1xf32, #tpu.memory_space<vmem>>, vector<1x16x1xf32>
      tpu.vector_store %arg6[%c0_38, %c0_39, %c0_40], %50 {strides = array<i32>} : memref<1x16x1xf32, #tpu.memory_space<vmem>>, vector<1x16x1xf32>,
      %cst_41 = arith.constant 0.000000e+00 : f32
      %52 = vector.broadcast %cst_41 : f32 to vector<1x16x1xf32>
      %c0_42 = arith.constant 0 : index
      %c0_43 = arith.constant 0 : index
      %c0_44 = arith.constant 0 : index
      %53 = vector.load %arg7[%c0_42, %c0_43, %c0_44] : memref<1x16x1xf32, #tpu.memory_space<vmem>>, vector<1x16x1xf32>
      tpu.vector_store %arg7[%c0_42, %c0_43, %c0_44], %52 {strides = array<i32>} : memref<1x16x1xf32, #tpu.memory_space<vmem>>, vector<1x16x1xf32>,
    } else {
    }
    %c0 = arith.constant 0 : index
    %c0_1 = arith.constant 0 : index
    %c0_2 = arith.constant 0 : index
    %c0_3 = arith.constant 0 : index
    %3 = vector.load %arg2[%c0, %c0_1, %c0_2, %c0_3] : memref<1x1x16x110xbf16, #tpu.memory_space<vmem>>, vector<1x1x16x110xbf16>
    %4 = vector.shape_cast %3 : vector<1x1x16x110xbf16> to vector<16x110xbf16>
    %5 = vector.extract_strided_slice %4 {offsets = [0, 0], sizes = [16, 80], strides = [1, 1]} : vector<16x110xbf16> to vector<16x80xbf16>
    %c0_4 = arith.constant 0 : index
    %c0_5 = arith.constant 0 : index
    %6 = vector.load %arg8[%c0_4, %c0_5] : memref<144x80xbf16, #tpu.memory_space<vmem>>, vector<16x80xbf16>
    tpu.vector_store %arg8[%c0_4, %c0_5], %5 {strides = array<i32>} : memref<144x80xbf16, #tpu.memory_space<vmem>>, vector<16x80xbf16>,
    %7 = vector.extract_strided_slice %4 {offsets = [0, 1], sizes = [16, 80], strides = [1, 1]} : vector<16x110xbf16> to vector<16x80xbf16>
    %c16 = arith.constant 16 : index
    %c0_6 = arith.constant 0 : index
    %8 = vector.load %arg8[%c16, %c0_6] : memref<144x80xbf16, #tpu.memory_space<vmem>>, vector<16x80xbf16>
    tpu.vector_store %arg8[%c16, %c0_6], %7 {strides = array<i32>} : memref<144x80xbf16, #tpu.memory_space<vmem>>, vector<16x80xbf16>,
    %9 = vector.extract_strided_slice %4 {offsets = [0, 2], sizes = [16, 80], strides = [1, 1]} : vector<16x110xbf16> to vector<16x80xbf16>
    %c32 = arith.constant 32 : index
    %c0_7 = arith.constant 0 : index
    %10 = vector.load %arg8[%c32, %c0_7] : memref<144x80xbf16, #tpu.memory_space<vmem>>, vector<16x80xbf16>
    tpu.vector_store %arg8[%c32, %c0_7], %9 {strides = array<i32>} : memref<144x80xbf16, #tpu.memory_space<vmem>>, vector<16x80xbf16>,
    %11 = vector.extract_strided_slice %4 {offsets = [0, 10], sizes = [16, 80], strides = [1, 1]} : vector<16x110xbf16> to vector<16x80xbf16>
    %c48 = arith.constant 48 : index
    %c0_8 = arith.constant 0 : index
    %12 = vector.load %arg8[%c48, %c0_8] : memref<144x80xbf16, #tpu.memory_space<vmem>>, vector<16x80xbf16>
    tpu.vector_store %arg8[%c48, %c0_8], %11 {strides = array<i32>} : memref<144x80xbf16, #tpu.memory_space<vmem>>, vector<16x80xbf16>,
    %13 = vector.extract_strided_slice %4 {offsets = [0, 11], sizes = [16, 80], strides = [1, 1]} : vector<16x110xbf16> to vector<16x80xbf16>
    %c64 = arith.constant 64 : index
    %c0_9 = arith.constant 0 : index
    %14 = vector.load %arg8[%c64, %c0_9] : memref<144x80xbf16, #tpu.memory_space<vmem>>, vector<16x80xbf16>
    tpu.vector_store %arg8[%c64, %c0_9], %13 {strides = array<i32>} : memref<144x80xbf16, #tpu.memory_space<vmem>>, vector<16x80xbf16>,
    %15 = vector.extract_strided_slice %4 {offsets = [0, 12], sizes = [16, 80], strides = [1, 1]} : vector<16x110xbf16> to vector<16x80xbf16>
    %c80 = arith.constant 80 : index
    %c0_10 = arith.constant 0 : index
    %16 = vector.load %arg8[%c80, %c0_10] : memref<144x80xbf16, #tpu.memory_space<vmem>>, vector<16x80xbf16>
    tpu.vector_store %arg8[%c80, %c0_10], %15 {strides = array<i32>} : memref<144x80xbf16, #tpu.memory_space<vmem>>, vector<16x80xbf16>,
    %17 = vector.extract_strided_slice %4 {offsets = [0, 20], sizes = [16, 80], strides = [1, 1]} : vector<16x110xbf16> to vector<16x80xbf16>
    %c96 = arith.constant 96 : index
    %c0_11 = arith.constant 0 : index
    %18 = vector.load %arg8[%c96, %c0_11] : memref<144x80xbf16, #tpu.memory_space<vmem>>, vector<16x80xbf16>
    tpu.vector_store %arg8[%c96, %c0_11], %17 {strides = array<i32>} : memref<144x80xbf16, #tpu.memory_space<vmem>>, vector<16x80xbf16>,
    %19 = vector.extract_strided_slice %4 {offsets = [0, 21], sizes = [16, 80], strides = [1, 1]} : vector<16x110xbf16> to vector<16x80xbf16>
    %c112 = arith.constant 112 : index
    %c0_12 = arith.constant 0 : index
    %20 = vector.load %arg8[%c112, %c0_12] : memref<144x80xbf16, #tpu.memory_space<vmem>>, vector<16x80xbf16>
    tpu.vector_store %arg8[%c112, %c0_12], %19 {strides = array<i32>} : memref<144x80xbf16, #tpu.memory_space<vmem>>, vector<16x80xbf16>,
    %21 = vector.extract_strided_slice %4 {offsets = [0, 22], sizes = [16, 80], strides = [1, 1]} : vector<16x110xbf16> to vector<16x80xbf16>
    %c128 = arith.constant 128 : index
    %c0_13 = arith.constant 0 : index
    %22 = vector.load %arg8[%c128, %c0_13] : memref<144x80xbf16, #tpu.memory_space<vmem>>, vector<16x80xbf16>
    tpu.vector_store %arg8[%c128, %c0_13], %21 {strides = array<i32>} : memref<144x80xbf16, #tpu.memory_space<vmem>>, vector<16x80xbf16>,
    %c0_14 = arith.constant 0 : index
    %c0_15 = arith.constant 0 : index
    %23 = vector.load %arg8[%c0_14, %c0_15] : memref<144x80xbf16, #tpu.memory_space<vmem>>, vector<144x80xbf16>
    %c0_16 = arith.constant 0 : index
    %c0_17 = arith.constant 0 : index
    %24 = vector.load %arg3[%c0_16, %c0_17] : memref<16x144xbf16, #tpu.memory_space<vmem>>, vector<16x144xbf16>
    %cst = arith.constant dense<0.000000e+00> : vector<16x80xf32>
    %25 = tpu.matmul %24, %23, %cst {dimension_numbers = #tpu.dot_dimension_numbers<[1], [0], [0], [1], [0, 0, 1, 1], [], []>} : vector<16x144xbf16>, vector<144x80xbf16>, vector<16x80xf32> -> vector<16x80xf32>
    %c0_18 = arith.constant 0 : index
    %c0_19 = arith.constant 0 : index
    %26 = vector.load %arg4[%c0_18, %c0_19] : memref<1x80xf32, #tpu.memory_space<vmem>>, vector<1x80xf32>
    %27 = vector.broadcast %26 : vector<1x80xf32> to vector<16x80xf32>
    %28 = arith.mulf %25, %27 : vector<16x80xf32>
    %c0_20 = arith.constant 0 : index
    %c0_21 = arith.constant 0 : index
    %c0_22 = arith.constant 0 : index
    %29 = vector.load %arg6[%c0_20, %c0_21, %c0_22] : memref<1x16x1xf32, #tpu.memory_space<vmem>>, vector<1x16x1xf32>
    %30 = vector.shape_cast %29 : vector<1x16x1xf32> to vector<16x1xf32>
    %cst_23 = arith.constant dense<0.000000e+00> : vector<16xf32>
    %31 = vector.multi_reduction <add>, %28, %cst_23 [1] : vector<16x80xf32> to vector<16xf32>
    %32 = vector.shape_cast %31 : vector<16xf32> to vector<16x1xf32>
    %33 = arith.addf %30, %32 : vector<16x1xf32>
    %c0_24 = arith.constant 0 : index
    %c0_25 = arith.constant 0 : index
    %c0_26 = arith.constant 0 : index
    %34 = vector.load %arg6[%c0_24, %c0_25, %c0_26] : memref<1x16x1xf32, #tpu.memory_space<vmem>>, vector<1x16x1xf32>
    %35 = vector.shape_cast %34 : vector<1x16x1xf32> to vector<16x1xf32>
    %36 = vector.shape_cast %33 : vector<16x1xf32> to vector<1x16x1xf32>
    tpu.vector_store %arg6[%c0_24, %c0_25, %c0_26], %36 {strides = array<i32>} : memref<1x16x1xf32, #tpu.memory_space<vmem>>, vector<1x16x1xf32>,
    %c0_27 = arith.constant 0 : index
    %c0_28 = arith.constant 0 : index
    %c0_29 = arith.constant 0 : index
    %37 = vector.load %arg7[%c0_27, %c0_28, %c0_29] : memref<1x16x1xf32, #tpu.memory_space<vmem>>, vector<1x16x1xf32>
    %38 = vector.shape_cast %37 : vector<1x16x1xf32> to vector<16x1xf32>
    %39 = arith.mulf %28, %28 : vector<16x80xf32>
    %cst_30 = arith.constant dense<0.000000e+00> : vector<16xf32>
    %40 = vector.multi_reduction <add>, %39, %cst_30 [1] : vector<16x80xf32> to vector<16xf32>
    %41 = vector.shape_cast %40 : vector<16xf32> to vector<16x1xf32>
    %42 = arith.addf %38, %41 : vector<16x1xf32>
    %c0_31 = arith.constant 0 : index
    %c0_32 = arith.constant 0 : index
    %c0_33 = arith.constant 0 : index
    %43 = vector.load %arg7[%c0_31, %c0_32, %c0_33] : memref<1x16x1xf32, #tpu.memory_space<vmem>>, vector<1x16x1xf32>
    %44 = vector.shape_cast %43 : vector<1x16x1xf32> to vector<16x1xf32>
    %45 = vector.shape_cast %42 : vector<16x1xf32> to vector<1x16x1xf32>
    tpu.vector_store %arg7[%c0_31, %c0_32, %c0_33], %45 {strides = array<i32>} : memref<1x16x1xf32, #tpu.memory_space<vmem>>, vector<1x16x1xf32>,
    %46 = arith.truncf %25 : vector<16x80xf32> to vector<16x80xbf16>
    %c0_34 = arith.constant 0 : index
    %c0_35 = arith.constant 0 : index
    %c0_36 = arith.constant 0 : index
    %47 = vector.load %arg5[%c0_34, %c0_35, %c0_36] : memref<1x16x80xbf16, #tpu.memory_space<vmem>>, vector<1x16x80xbf16>
    %48 = vector.shape_cast %47 : vector<1x16x80xbf16> to vector<16x80xbf16>
    %49 = vector.shape_cast %46 : vector<16x80xbf16> to vector<1x16x80xbf16>
    tpu.vector_store %arg5[%c0_34, %c0_35, %c0_36], %49 {strides = array<i32>} : memref<1x16x80xbf16, #tpu.memory_space<vmem>>, vector<1x16x80xbf16>,
    return
  }
  func.func @transform_0(%arg0: i32, %arg1: i32) -> (i32, i32, i32, i32) {
    %c0_i32 = arith.constant 0 : i32
    %c0_i32_0 = arith.constant 0 : i32
    %c0_i32_1 = arith.constant 0 : i32
    return %arg0, %arg1, %c0_i32, %c0_i32_0 : i32, i32, i32, i32
  }
  func.func @transform_1(%arg0: i32, %arg1: i32) -> (i32, i32) {
    %c0_i32 = arith.constant 0 : i32
    %c0_i32_0 = arith.constant 0 : i32
    %c0_i32_1 = arith.constant 0 : i32
    return %c0_i32, %c0_i32_0 : i32, i32
  }
  func.func @transform_2(%arg0: i32, %arg1: i32) -> (i32, i32) {
    %c0_i32 = arith.constant 0 : i32
    %c0_i32_0 = arith.constant 0 : i32
    %c0_i32_1 = arith.constant 0 : i32
    return %c0_i32, %c0_i32_0 : i32, i32
  }
  func.func @transform_3(%arg0: i32, %arg1: i32) -> (i32, i32, i32) {
    %c0_i32 = arith.constant 0 : i32
    %c0_i32_0 = arith.constant 0 : i32
    return %arg0, %c0_i32, %arg1 : i32, i32, i32
  }
  func.func @transform_4(%arg0: i32, %arg1: i32) -> (i32, i32, i32) {
    %c0_i32 = arith.constant 0 : i32
    %c0_i32_0 = arith.constant 0 : i32
    %c0_i32_1 = arith.constant 0 : i32
    return %arg0, %c0_i32, %c0_i32_0 : i32, i32, i32
  }
  func.func @transform_5(%arg0: i32, %arg1: i32) -> (i32, i32, i32) {
    %c0_i32 = arith.constant 0 : i32
    %c0_i32_0 = arith.constant 0 : i32
    %c0_i32_1 = arith.constant 0 : i32
    return %arg0, %c0_i32, %c0_i32_0 : i32, i32, i32
  }
}

module attributes {stable_mosaic.version = 11 : i64} {
  func.func @kernel(%arg0: i32, %arg1: i32, %arg2: memref<1x32x24xbf16, #tpu.memory_space<vmem>>, %arg3: memref<1x32x1xf32, #tpu.memory_space<vmem>>, %arg4: memref<1x32x1xf32, #tpu.memory_space<vmem>>, %arg5: memref<1x32x24xbf16, #tpu.memory_space<vmem>>) attributes {dimension_semantics = [#tpu.dimension_semantics<parallel>, #tpu.dimension_semantics<parallel>], iteration_bounds = array<i64: 2, 1>, scalar_prefetch = 0 : i64, scratch_operands = 0 : i64, tpu.core_type = #tpu.core_type<tc>, window_params = [{transform_indices = @transform_0, window_bounds = array<i64: 1, 32, 24>}, {transform_indices = @transform_1, window_bounds = array<i64: 1, 32, 1>}, {transform_indices = @transform_2, window_bounds = array<i64: 1, 32, 1>}, {transform_indices = @transform_3, window_bounds = array<i64: 1, 32, 24>}]} {
    %c0 = arith.constant 0 : index
    %c0_0 = arith.constant 0 : index
    %c0_1 = arith.constant 0 : index
    %0 = vector.load %arg2[%c0, %c0_0, %c0_1] : memref<1x32x24xbf16, #tpu.memory_space<vmem>>, vector<1x32x24xbf16>
    %1 = vector.shape_cast %0 : vector<1x32x24xbf16> to vector<32x24xbf16>
    %2 = arith.extf %1 : vector<32x24xbf16> to vector<32x24xf32>
    %c0_2 = arith.constant 0 : index
    %c0_3 = arith.constant 0 : index
    %c0_4 = arith.constant 0 : index
    %3 = vector.load %arg3[%c0_2, %c0_3, %c0_4] : memref<1x32x1xf32, #tpu.memory_space<vmem>>, vector<1x32x1xf32>
    %4 = vector.shape_cast %3 : vector<1x32x1xf32> to vector<32x1xf32>
    %5 = vector.broadcast %4 : vector<32x1xf32> to vector<32x24xf32>
    %6 = arith.subf %2, %5 : vector<32x24xf32>
    %c0_5 = arith.constant 0 : index
    %c0_6 = arith.constant 0 : index
    %c0_7 = arith.constant 0 : index
    %7 = vector.load %arg4[%c0_5, %c0_6, %c0_7] : memref<1x32x1xf32, #tpu.memory_space<vmem>>, vector<1x32x1xf32>
    %8 = vector.shape_cast %7 : vector<1x32x1xf32> to vector<32x1xf32>
    %9 = vector.broadcast %8 : vector<32x1xf32> to vector<32x24xf32>
    %10 = arith.mulf %6, %9 : vector<32x24xf32>
    %cst = arith.constant 0.000000e+00 : f32
    %11 = vector.broadcast %cst : f32 to vector<32x24xf32>
    %12 = arith.cmpf oge, %10, %11 : vector<32x24xf32>
    %cst_8 = arith.constant 2.000000e-01 : f32
    %13 = vector.broadcast %cst_8 : f32 to vector<32x24xf32>
    %14 = arith.mulf %13, %10 : vector<32x24xf32>
    %15 = arith.select %12, %10, %14 : vector<32x24xi1>, vector<32x24xf32>
    %16 = arith.truncf %15 : vector<32x24xf32> to vector<32x24xbf16>
    %c0_9 = arith.constant 0 : index
    %c0_10 = arith.constant 0 : index
    %c0_11 = arith.constant 0 : index
    %17 = vector.load %arg5[%c0_9, %c0_10, %c0_11] : memref<1x32x24xbf16, #tpu.memory_space<vmem>>, vector<1x32x24xbf16>
    %18 = vector.shape_cast %17 : vector<1x32x24xbf16> to vector<32x24xbf16>
    %19 = vector.shape_cast %16 : vector<32x24xbf16> to vector<1x32x24xbf16>
    tpu.vector_store %arg5[%c0_9, %c0_10, %c0_11], %19 {strides = array<i32>} : memref<1x32x24xbf16, #tpu.memory_space<vmem>>, vector<1x32x24xbf16>,
    return
  }
  func.func @transform_0(%arg0: i32, %arg1: i32) -> (i32, i32, i32) {
    %c0_i32 = arith.constant 0 : i32
    %c0_i32_0 = arith.constant 0 : i32
    return %arg0, %c0_i32, %arg1 : i32, i32, i32
  }
  func.func @transform_1(%arg0: i32, %arg1: i32) -> (i32, i32, i32) {
    %c0_i32 = arith.constant 0 : i32
    %c0_i32_0 = arith.constant 0 : i32
    %c0_i32_1 = arith.constant 0 : i32
    return %arg0, %c0_i32, %c0_i32_0 : i32, i32, i32
  }
  func.func @transform_2(%arg0: i32, %arg1: i32) -> (i32, i32, i32) {
    %c0_i32 = arith.constant 0 : i32
    %c0_i32_0 = arith.constant 0 : i32
    %c0_i32_1 = arith.constant 0 : i32
    return %arg0, %c0_i32, %c0_i32_0 : i32, i32, i32
  }
  func.func @transform_3(%arg0: i32, %arg1: i32) -> (i32, i32, i32) {
    %c0_i32 = arith.constant 0 : i32
    %c0_i32_0 = arith.constant 0 : i32
    return %arg0, %c0_i32, %arg1 : i32, i32, i32
  }
}

module attributes {stable_mosaic.version = 11 : i64} {
  func.func @kernel(%arg0: i32, %arg1: i32, %arg2: memref<1x1x16x42xbf16, #tpu.memory_space<vmem>>, %arg3: memref<32x144xbf16, #tpu.memory_space<vmem>>, %arg4: memref<1x24xf32, #tpu.memory_space<vmem>>, %arg5: memref<1x32x24xbf16, #tpu.memory_space<vmem>>, %arg6: memref<1x32x1xf32, #tpu.memory_space<vmem>>, %arg7: memref<1x32x1xf32, #tpu.memory_space<vmem>>, %arg8: memref<144x24xbf16, #tpu.memory_space<vmem>>) attributes {dimension_semantics = [#tpu.dimension_semantics<parallel>, #tpu.dimension_semantics<arbitrary>], iteration_bounds = array<i64: 2, 1>, scalar_prefetch = 0 : i64, scratch_operands = 1 : i64, tpu.core_type = #tpu.core_type<tc>, window_params = [{transform_indices = @transform_0, window_bounds = array<i64: 1, 1, 16, 42>}, {pipeline_mode = #tpu.pipeline_mode<synchronous>, transform_indices = @transform_1, window_bounds = array<i64: 32, 144>}, {pipeline_mode = #tpu.pipeline_mode<synchronous>, transform_indices = @transform_2, window_bounds = array<i64: 1, 24>}, {transform_indices = @transform_3, window_bounds = array<i64: 1, 32, 24>}, {transform_indices = @transform_4, window_bounds = array<i64: 1, 32, 1>}, {transform_indices = @transform_5, window_bounds = array<i64: 1, 32, 1>}]} {
    %c0_i32 = arith.constant 0 : i32
    %0 = arith.cmpi eq, %arg1, %c0_i32 : i32
    %1 = arith.extui %0 : i1 to i32
    %c0_i32_0 = arith.constant 0 : i32
    %2 = arith.cmpi ne, %1, %c0_i32_0 : i32
    scf.if %2 {
      %cst_37 = arith.constant 0.000000e+00 : f32
      %50 = vector.broadcast %cst_37 : f32 to vector<1x32x1xf32>
      %c0_38 = arith.constant 0 : index
      %c0_39 = arith.constant 0 : index
      %c0_40 = arith.constant 0 : index
      %51 = vector.load %arg6[%c0_38, %c0_39, %c0_40] : memref<1x32x1xf32, #tpu.memory_space<vmem>>, vector<1x32x1xf32>
      tpu.vector_store %arg6[%c0_38, %c0_39, %c0_40], %50 {strides = array<i32>} : memref<1x32x1xf32, #tpu.memory_space<vmem>>, vector<1x32x1xf32>,
      %cst_41 = arith.constant 0.000000e+00 : f32
      %52 = vector.broadcast %cst_41 : f32 to vector<1x32x1xf32>
      %c0_42 = arith.constant 0 : index
      %c0_43 = arith.constant 0 : index
      %c0_44 = arith.constant 0 : index
      %53 = vector.load %arg7[%c0_42, %c0_43, %c0_44] : memref<1x32x1xf32, #tpu.memory_space<vmem>>, vector<1x32x1xf32>
      tpu.vector_store %arg7[%c0_42, %c0_43, %c0_44], %52 {strides = array<i32>} : memref<1x32x1xf32, #tpu.memory_space<vmem>>, vector<1x32x1xf32>,
    } else {
    }
    %c0 = arith.constant 0 : index
    %c0_1 = arith.constant 0 : index
    %c0_2 = arith.constant 0 : index
    %c0_3 = arith.constant 0 : index
    %3 = vector.load %arg2[%c0, %c0_1, %c0_2, %c0_3] : memref<1x1x16x42xbf16, #tpu.memory_space<vmem>>, vector<1x1x16x42xbf16>
    %4 = vector.shape_cast %3 : vector<1x1x16x42xbf16> to vector<16x42xbf16>
    %5 = vector.extract_strided_slice %4 {offsets = [0, 0], sizes = [16, 24], strides = [1, 1]} : vector<16x42xbf16> to vector<16x24xbf16>
    %c0_4 = arith.constant 0 : index
    %c0_5 = arith.constant 0 : index
    %6 = vector.load %arg8[%c0_4, %c0_5] : memref<144x24xbf16, #tpu.memory_space<vmem>>, vector<16x24xbf16>
    tpu.vector_store %arg8[%c0_4, %c0_5], %5 {strides = array<i32>} : memref<144x24xbf16, #tpu.memory_space<vmem>>, vector<16x24xbf16>,
    %7 = vector.extract_strided_slice %4 {offsets = [0, 1], sizes = [16, 24], strides = [1, 1]} : vector<16x42xbf16> to vector<16x24xbf16>
    %c16 = arith.constant 16 : index
    %c0_6 = arith.constant 0 : index
    %8 = vector.load %arg8[%c16, %c0_6] : memref<144x24xbf16, #tpu.memory_space<vmem>>, vector<16x24xbf16>
    tpu.vector_store %arg8[%c16, %c0_6], %7 {strides = array<i32>} : memref<144x24xbf16, #tpu.memory_space<vmem>>, vector<16x24xbf16>,
    %9 = vector.extract_strided_slice %4 {offsets = [0, 2], sizes = [16, 24], strides = [1, 1]} : vector<16x42xbf16> to vector<16x24xbf16>
    %c32 = arith.constant 32 : index
    %c0_7 = arith.constant 0 : index
    %10 = vector.load %arg8[%c32, %c0_7] : memref<144x24xbf16, #tpu.memory_space<vmem>>, vector<16x24xbf16>
    tpu.vector_store %arg8[%c32, %c0_7], %9 {strides = array<i32>} : memref<144x24xbf16, #tpu.memory_space<vmem>>, vector<16x24xbf16>,
    %11 = vector.extract_strided_slice %4 {offsets = [0, 6], sizes = [16, 24], strides = [1, 1]} : vector<16x42xbf16> to vector<16x24xbf16>
    %c48 = arith.constant 48 : index
    %c0_8 = arith.constant 0 : index
    %12 = vector.load %arg8[%c48, %c0_8] : memref<144x24xbf16, #tpu.memory_space<vmem>>, vector<16x24xbf16>
    tpu.vector_store %arg8[%c48, %c0_8], %11 {strides = array<i32>} : memref<144x24xbf16, #tpu.memory_space<vmem>>, vector<16x24xbf16>,
    %13 = vector.extract_strided_slice %4 {offsets = [0, 7], sizes = [16, 24], strides = [1, 1]} : vector<16x42xbf16> to vector<16x24xbf16>
    %c64 = arith.constant 64 : index
    %c0_9 = arith.constant 0 : index
    %14 = vector.load %arg8[%c64, %c0_9] : memref<144x24xbf16, #tpu.memory_space<vmem>>, vector<16x24xbf16>
    tpu.vector_store %arg8[%c64, %c0_9], %13 {strides = array<i32>} : memref<144x24xbf16, #tpu.memory_space<vmem>>, vector<16x24xbf16>,
    %15 = vector.extract_strided_slice %4 {offsets = [0, 8], sizes = [16, 24], strides = [1, 1]} : vector<16x42xbf16> to vector<16x24xbf16>
    %c80 = arith.constant 80 : index
    %c0_10 = arith.constant 0 : index
    %16 = vector.load %arg8[%c80, %c0_10] : memref<144x24xbf16, #tpu.memory_space<vmem>>, vector<16x24xbf16>
    tpu.vector_store %arg8[%c80, %c0_10], %15 {strides = array<i32>} : memref<144x24xbf16, #tpu.memory_space<vmem>>, vector<16x24xbf16>,
    %17 = vector.extract_strided_slice %4 {offsets = [0, 12], sizes = [16, 24], strides = [1, 1]} : vector<16x42xbf16> to vector<16x24xbf16>
    %c96 = arith.constant 96 : index
    %c0_11 = arith.constant 0 : index
    %18 = vector.load %arg8[%c96, %c0_11] : memref<144x24xbf16, #tpu.memory_space<vmem>>, vector<16x24xbf16>
    tpu.vector_store %arg8[%c96, %c0_11], %17 {strides = array<i32>} : memref<144x24xbf16, #tpu.memory_space<vmem>>, vector<16x24xbf16>,
    %19 = vector.extract_strided_slice %4 {offsets = [0, 13], sizes = [16, 24], strides = [1, 1]} : vector<16x42xbf16> to vector<16x24xbf16>
    %c112 = arith.constant 112 : index
    %c0_12 = arith.constant 0 : index
    %20 = vector.load %arg8[%c112, %c0_12] : memref<144x24xbf16, #tpu.memory_space<vmem>>, vector<16x24xbf16>
    tpu.vector_store %arg8[%c112, %c0_12], %19 {strides = array<i32>} : memref<144x24xbf16, #tpu.memory_space<vmem>>, vector<16x24xbf16>,
    %21 = vector.extract_strided_slice %4 {offsets = [0, 14], sizes = [16, 24], strides = [1, 1]} : vector<16x42xbf16> to vector<16x24xbf16>
    %c128 = arith.constant 128 : index
    %c0_13 = arith.constant 0 : index
    %22 = vector.load %arg8[%c128, %c0_13] : memref<144x24xbf16, #tpu.memory_space<vmem>>, vector<16x24xbf16>
    tpu.vector_store %arg8[%c128, %c0_13], %21 {strides = array<i32>} : memref<144x24xbf16, #tpu.memory_space<vmem>>, vector<16x24xbf16>,
    %c0_14 = arith.constant 0 : index
    %c0_15 = arith.constant 0 : index
    %23 = vector.load %arg8[%c0_14, %c0_15] : memref<144x24xbf16, #tpu.memory_space<vmem>>, vector<144x24xbf16>
    %c0_16 = arith.constant 0 : index
    %c0_17 = arith.constant 0 : index
    %24 = vector.load %arg3[%c0_16, %c0_17] : memref<32x144xbf16, #tpu.memory_space<vmem>>, vector<32x144xbf16>
    %cst = arith.constant dense<0.000000e+00> : vector<32x24xf32>
    %25 = tpu.matmul %24, %23, %cst {dimension_numbers = #tpu.dot_dimension_numbers<[1], [0], [0], [1], [0, 0, 1, 1], [], []>} : vector<32x144xbf16>, vector<144x24xbf16>, vector<32x24xf32> -> vector<32x24xf32>
    %c0_18 = arith.constant 0 : index
    %c0_19 = arith.constant 0 : index
    %26 = vector.load %arg4[%c0_18, %c0_19] : memref<1x24xf32, #tpu.memory_space<vmem>>, vector<1x24xf32>
    %27 = vector.broadcast %26 : vector<1x24xf32> to vector<32x24xf32>
    %28 = arith.mulf %25, %27 : vector<32x24xf32>
    %c0_20 = arith.constant 0 : index
    %c0_21 = arith.constant 0 : index
    %c0_22 = arith.constant 0 : index
    %29 = vector.load %arg6[%c0_20, %c0_21, %c0_22] : memref<1x32x1xf32, #tpu.memory_space<vmem>>, vector<1x32x1xf32>
    %30 = vector.shape_cast %29 : vector<1x32x1xf32> to vector<32x1xf32>
    %cst_23 = arith.constant dense<0.000000e+00> : vector<32xf32>
    %31 = vector.multi_reduction <add>, %28, %cst_23 [1] : vector<32x24xf32> to vector<32xf32>
    %32 = vector.shape_cast %31 : vector<32xf32> to vector<32x1xf32>
    %33 = arith.addf %30, %32 : vector<32x1xf32>
    %c0_24 = arith.constant 0 : index
    %c0_25 = arith.constant 0 : index
    %c0_26 = arith.constant 0 : index
    %34 = vector.load %arg6[%c0_24, %c0_25, %c0_26] : memref<1x32x1xf32, #tpu.memory_space<vmem>>, vector<1x32x1xf32>
    %35 = vector.shape_cast %34 : vector<1x32x1xf32> to vector<32x1xf32>
    %36 = vector.shape_cast %33 : vector<32x1xf32> to vector<1x32x1xf32>
    tpu.vector_store %arg6[%c0_24, %c0_25, %c0_26], %36 {strides = array<i32>} : memref<1x32x1xf32, #tpu.memory_space<vmem>>, vector<1x32x1xf32>,
    %c0_27 = arith.constant 0 : index
    %c0_28 = arith.constant 0 : index
    %c0_29 = arith.constant 0 : index
    %37 = vector.load %arg7[%c0_27, %c0_28, %c0_29] : memref<1x32x1xf32, #tpu.memory_space<vmem>>, vector<1x32x1xf32>
    %38 = vector.shape_cast %37 : vector<1x32x1xf32> to vector<32x1xf32>
    %39 = arith.mulf %28, %28 : vector<32x24xf32>
    %cst_30 = arith.constant dense<0.000000e+00> : vector<32xf32>
    %40 = vector.multi_reduction <add>, %39, %cst_30 [1] : vector<32x24xf32> to vector<32xf32>
    %41 = vector.shape_cast %40 : vector<32xf32> to vector<32x1xf32>
    %42 = arith.addf %38, %41 : vector<32x1xf32>
    %c0_31 = arith.constant 0 : index
    %c0_32 = arith.constant 0 : index
    %c0_33 = arith.constant 0 : index
    %43 = vector.load %arg7[%c0_31, %c0_32, %c0_33] : memref<1x32x1xf32, #tpu.memory_space<vmem>>, vector<1x32x1xf32>
    %44 = vector.shape_cast %43 : vector<1x32x1xf32> to vector<32x1xf32>
    %45 = vector.shape_cast %42 : vector<32x1xf32> to vector<1x32x1xf32>
    tpu.vector_store %arg7[%c0_31, %c0_32, %c0_33], %45 {strides = array<i32>} : memref<1x32x1xf32, #tpu.memory_space<vmem>>, vector<1x32x1xf32>,
    %46 = arith.truncf %25 : vector<32x24xf32> to vector<32x24xbf16>
    %c0_34 = arith.constant 0 : index
    %c0_35 = arith.constant 0 : index
    %c0_36 = arith.constant 0 : index
    %47 = vector.load %arg5[%c0_34, %c0_35, %c0_36] : memref<1x32x24xbf16, #tpu.memory_space<vmem>>, vector<1x32x24xbf16>
    %48 = vector.shape_cast %47 : vector<1x32x24xbf16> to vector<32x24xbf16>
    %49 = vector.shape_cast %46 : vector<32x24xbf16> to vector<1x32x24xbf16>
    tpu.vector_store %arg5[%c0_34, %c0_35, %c0_36], %49 {strides = array<i32>} : memref<1x32x24xbf16, #tpu.memory_space<vmem>>, vector<1x32x24xbf16>,
    return
  }
  func.func @transform_0(%arg0: i32, %arg1: i32) -> (i32, i32, i32, i32) {
    %c0_i32 = arith.constant 0 : i32
    %c0_i32_0 = arith.constant 0 : i32
    %c0_i32_1 = arith.constant 0 : i32
    return %arg0, %arg1, %c0_i32, %c0_i32_0 : i32, i32, i32, i32
  }
  func.func @transform_1(%arg0: i32, %arg1: i32) -> (i32, i32) {
    %c0_i32 = arith.constant 0 : i32
    %c0_i32_0 = arith.constant 0 : i32
    %c0_i32_1 = arith.constant 0 : i32
    return %c0_i32, %c0_i32_0 : i32, i32
  }
  func.func @transform_2(%arg0: i32, %arg1: i32) -> (i32, i32) {
    %c0_i32 = arith.constant 0 : i32
    %c0_i32_0 = arith.constant 0 : i32
    %c0_i32_1 = arith.constant 0 : i32
    return %c0_i32, %c0_i32_0 : i32, i32
  }
  func.func @transform_3(%arg0: i32, %arg1: i32) -> (i32, i32, i32) {
    %c0_i32 = arith.constant 0 : i32
    %c0_i32_0 = arith.constant 0 : i32
    return %arg0, %c0_i32, %arg1 : i32, i32, i32
  }
  func.func @transform_4(%arg0: i32, %arg1: i32) -> (i32, i32, i32) {
    %c0_i32 = arith.constant 0 : i32
    %c0_i32_0 = arith.constant 0 : i32
    %c0_i32_1 = arith.constant 0 : i32
    return %arg0, %c0_i32, %c0_i32_0 : i32, i32, i32
  }
  func.func @transform_5(%arg0: i32, %arg1: i32) -> (i32, i32, i32) {
    %c0_i32 = arith.constant 0 : i32
    %c0_i32_0 = arith.constant 0 : i32
    %c0_i32_1 = arith.constant 0 : i32
    return %arg0, %c0_i32, %c0_i32_0 : i32, i32, i32
  }
}

module attributes {stable_mosaic.version = 11 : i64} {
  func.func @kernel(%arg0: i32, %arg1: i32, %arg2: memref<1x1x32x42xbf16, #tpu.memory_space<vmem>>, %arg3: memref<32x288xbf16, #tpu.memory_space<vmem>>, %arg4: memref<1x24xf32, #tpu.memory_space<vmem>>, %arg5: memref<1x32x24xbf16, #tpu.memory_space<vmem>>, %arg6: memref<1x32x1xf32, #tpu.memory_space<vmem>>, %arg7: memref<1x32x1xf32, #tpu.memory_space<vmem>>, %arg8: memref<288x24xbf16, #tpu.memory_space<vmem>>) attributes {dimension_semantics = [#tpu.dimension_semantics<parallel>, #tpu.dimension_semantics<arbitrary>], iteration_bounds = array<i64: 2, 1>, scalar_prefetch = 0 : i64, scratch_operands = 1 : i64, tpu.core_type = #tpu.core_type<tc>, window_params = [{transform_indices = @transform_0, window_bounds = array<i64: 1, 1, 32, 42>}, {pipeline_mode = #tpu.pipeline_mode<synchronous>, transform_indices = @transform_1, window_bounds = array<i64: 32, 288>}, {pipeline_mode = #tpu.pipeline_mode<synchronous>, transform_indices = @transform_2, window_bounds = array<i64: 1, 24>}, {transform_indices = @transform_3, window_bounds = array<i64: 1, 32, 24>}, {transform_indices = @transform_4, window_bounds = array<i64: 1, 32, 1>}, {transform_indices = @transform_5, window_bounds = array<i64: 1, 32, 1>}]} {
    %c0_i32 = arith.constant 0 : i32
    %0 = arith.cmpi eq, %arg1, %c0_i32 : i32
    %1 = arith.extui %0 : i1 to i32
    %c0_i32_0 = arith.constant 0 : i32
    %2 = arith.cmpi ne, %1, %c0_i32_0 : i32
    scf.if %2 {
      %cst_37 = arith.constant 0.000000e+00 : f32
      %50 = vector.broadcast %cst_37 : f32 to vector<1x32x1xf32>
      %c0_38 = arith.constant 0 : index
      %c0_39 = arith.constant 0 : index
      %c0_40 = arith.constant 0 : index
      %51 = vector.load %arg6[%c0_38, %c0_39, %c0_40] : memref<1x32x1xf32, #tpu.memory_space<vmem>>, vector<1x32x1xf32>
      tpu.vector_store %arg6[%c0_38, %c0_39, %c0_40], %50 {strides = array<i32>} : memref<1x32x1xf32, #tpu.memory_space<vmem>>, vector<1x32x1xf32>,
      %cst_41 = arith.constant 0.000000e+00 : f32
      %52 = vector.broadcast %cst_41 : f32 to vector<1x32x1xf32>
      %c0_42 = arith.constant 0 : index
      %c0_43 = arith.constant 0 : index
      %c0_44 = arith.constant 0 : index
      %53 = vector.load %arg7[%c0_42, %c0_43, %c0_44] : memref<1x32x1xf32, #tpu.memory_space<vmem>>, vector<1x32x1xf32>
      tpu.vector_store %arg7[%c0_42, %c0_43, %c0_44], %52 {strides = array<i32>} : memref<1x32x1xf32, #tpu.memory_space<vmem>>, vector<1x32x1xf32>,
    } else {
    }
    %c0 = arith.constant 0 : index
    %c0_1 = arith.constant 0 : index
    %c0_2 = arith.constant 0 : index
    %c0_3 = arith.constant 0 : index
    %3 = vector.load %arg2[%c0, %c0_1, %c0_2, %c0_3] : memref<1x1x32x42xbf16, #tpu.memory_space<vmem>>, vector<1x1x32x42xbf16>
    %4 = vector.shape_cast %3 : vector<1x1x32x42xbf16> to vector<32x42xbf16>
    %5 = vector.extract_strided_slice %4 {offsets = [0, 0], sizes = [32, 24], strides = [1, 1]} : vector<32x42xbf16> to vector<32x24xbf16>
    %c0_4 = arith.constant 0 : index
    %c0_5 = arith.constant 0 : index
    %6 = vector.load %arg8[%c0_4, %c0_5] : memref<288x24xbf16, #tpu.memory_space<vmem>>, vector<32x24xbf16>
    tpu.vector_store %arg8[%c0_4, %c0_5], %5 {strides = array<i32>} : memref<288x24xbf16, #tpu.memory_space<vmem>>, vector<32x24xbf16>,
    %7 = vector.extract_strided_slice %4 {offsets = [0, 1], sizes = [32, 24], strides = [1, 1]} : vector<32x42xbf16> to vector<32x24xbf16>
    %c32 = arith.constant 32 : index
    %c0_6 = arith.constant 0 : index
    %8 = vector.load %arg8[%c32, %c0_6] : memref<288x24xbf16, #tpu.memory_space<vmem>>, vector<32x24xbf16>
    tpu.vector_store %arg8[%c32, %c0_6], %7 {strides = array<i32>} : memref<288x24xbf16, #tpu.memory_space<vmem>>, vector<32x24xbf16>,
    %9 = vector.extract_strided_slice %4 {offsets = [0, 2], sizes = [32, 24], strides = [1, 1]} : vector<32x42xbf16> to vector<32x24xbf16>
    %c64 = arith.constant 64 : index
    %c0_7 = arith.constant 0 : index
    %10 = vector.load %arg8[%c64, %c0_7] : memref<288x24xbf16, #tpu.memory_space<vmem>>, vector<32x24xbf16>
    tpu.vector_store %arg8[%c64, %c0_7], %9 {strides = array<i32>} : memref<288x24xbf16, #tpu.memory_space<vmem>>, vector<32x24xbf16>,
    %11 = vector.extract_strided_slice %4 {offsets = [0, 6], sizes = [32, 24], strides = [1, 1]} : vector<32x42xbf16> to vector<32x24xbf16>
    %c96 = arith.constant 96 : index
    %c0_8 = arith.constant 0 : index
    %12 = vector.load %arg8[%c96, %c0_8] : memref<288x24xbf16, #tpu.memory_space<vmem>>, vector<32x24xbf16>
    tpu.vector_store %arg8[%c96, %c0_8], %11 {strides = array<i32>} : memref<288x24xbf16, #tpu.memory_space<vmem>>, vector<32x24xbf16>,
    %13 = vector.extract_strided_slice %4 {offsets = [0, 7], sizes = [32, 24], strides = [1, 1]} : vector<32x42xbf16> to vector<32x24xbf16>
    %c128 = arith.constant 128 : index
    %c0_9 = arith.constant 0 : index
    %14 = vector.load %arg8[%c128, %c0_9] : memref<288x24xbf16, #tpu.memory_space<vmem>>, vector<32x24xbf16>
    tpu.vector_store %arg8[%c128, %c0_9], %13 {strides = array<i32>} : memref<288x24xbf16, #tpu.memory_space<vmem>>, vector<32x24xbf16>,
    %15 = vector.extract_strided_slice %4 {offsets = [0, 8], sizes = [32, 24], strides = [1, 1]} : vector<32x42xbf16> to vector<32x24xbf16>
    %c160 = arith.constant 160 : index
    %c0_10 = arith.constant 0 : index
    %16 = vector.load %arg8[%c160, %c0_10] : memref<288x24xbf16, #tpu.memory_space<vmem>>, vector<32x24xbf16>
    tpu.vector_store %arg8[%c160, %c0_10], %15 {strides = array<i32>} : memref<288x24xbf16, #tpu.memory_space<vmem>>, vector<32x24xbf16>,
    %17 = vector.extract_strided_slice %4 {offsets = [0, 12], sizes = [32, 24], strides = [1, 1]} : vector<32x42xbf16> to vector<32x24xbf16>
    %c192 = arith.constant 192 : index
    %c0_11 = arith.constant 0 : index
    %18 = vector.load %arg8[%c192, %c0_11] : memref<288x24xbf16, #tpu.memory_space<vmem>>, vector<32x24xbf16>
    tpu.vector_store %arg8[%c192, %c0_11], %17 {strides = array<i32>} : memref<288x24xbf16, #tpu.memory_space<vmem>>, vector<32x24xbf16>,
    %19 = vector.extract_strided_slice %4 {offsets = [0, 13], sizes = [32, 24], strides = [1, 1]} : vector<32x42xbf16> to vector<32x24xbf16>
    %c224 = arith.constant 224 : index
    %c0_12 = arith.constant 0 : index
    %20 = vector.load %arg8[%c224, %c0_12] : memref<288x24xbf16, #tpu.memory_space<vmem>>, vector<32x24xbf16>
    tpu.vector_store %arg8[%c224, %c0_12], %19 {strides = array<i32>} : memref<288x24xbf16, #tpu.memory_space<vmem>>, vector<32x24xbf16>,
    %21 = vector.extract_strided_slice %4 {offsets = [0, 14], sizes = [32, 24], strides = [1, 1]} : vector<32x42xbf16> to vector<32x24xbf16>
    %c256 = arith.constant 256 : index
    %c0_13 = arith.constant 0 : index
    %22 = vector.load %arg8[%c256, %c0_13] : memref<288x24xbf16, #tpu.memory_space<vmem>>, vector<32x24xbf16>
    tpu.vector_store %arg8[%c256, %c0_13], %21 {strides = array<i32>} : memref<288x24xbf16, #tpu.memory_space<vmem>>, vector<32x24xbf16>,
    %c0_14 = arith.constant 0 : index
    %c0_15 = arith.constant 0 : index
    %23 = vector.load %arg8[%c0_14, %c0_15] : memref<288x24xbf16, #tpu.memory_space<vmem>>, vector<288x24xbf16>
    %c0_16 = arith.constant 0 : index
    %c0_17 = arith.constant 0 : index
    %24 = vector.load %arg3[%c0_16, %c0_17] : memref<32x288xbf16, #tpu.memory_space<vmem>>, vector<32x288xbf16>
    %cst = arith.constant dense<0.000000e+00> : vector<32x24xf32>
    %25 = tpu.matmul %24, %23, %cst {dimension_numbers = #tpu.dot_dimension_numbers<[1], [0], [0], [1], [0, 0, 1, 1], [], []>} : vector<32x288xbf16>, vector<288x24xbf16>, vector<32x24xf32> -> vector<32x24xf32>
    %c0_18 = arith.constant 0 : index
    %c0_19 = arith.constant 0 : index
    %26 = vector.load %arg4[%c0_18, %c0_19] : memref<1x24xf32, #tpu.memory_space<vmem>>, vector<1x24xf32>
    %27 = vector.broadcast %26 : vector<1x24xf32> to vector<32x24xf32>
    %28 = arith.mulf %25, %27 : vector<32x24xf32>
    %c0_20 = arith.constant 0 : index
    %c0_21 = arith.constant 0 : index
    %c0_22 = arith.constant 0 : index
    %29 = vector.load %arg6[%c0_20, %c0_21, %c0_22] : memref<1x32x1xf32, #tpu.memory_space<vmem>>, vector<1x32x1xf32>
    %30 = vector.shape_cast %29 : vector<1x32x1xf32> to vector<32x1xf32>
    %cst_23 = arith.constant dense<0.000000e+00> : vector<32xf32>
    %31 = vector.multi_reduction <add>, %28, %cst_23 [1] : vector<32x24xf32> to vector<32xf32>
    %32 = vector.shape_cast %31 : vector<32xf32> to vector<32x1xf32>
    %33 = arith.addf %30, %32 : vector<32x1xf32>
    %c0_24 = arith.constant 0 : index
    %c0_25 = arith.constant 0 : index
    %c0_26 = arith.constant 0 : index
    %34 = vector.load %arg6[%c0_24, %c0_25, %c0_26] : memref<1x32x1xf32, #tpu.memory_space<vmem>>, vector<1x32x1xf32>
    %35 = vector.shape_cast %34 : vector<1x32x1xf32> to vector<32x1xf32>
    %36 = vector.shape_cast %33 : vector<32x1xf32> to vector<1x32x1xf32>
    tpu.vector_store %arg6[%c0_24, %c0_25, %c0_26], %36 {strides = array<i32>} : memref<1x32x1xf32, #tpu.memory_space<vmem>>, vector<1x32x1xf32>,
    %c0_27 = arith.constant 0 : index
    %c0_28 = arith.constant 0 : index
    %c0_29 = arith.constant 0 : index
    %37 = vector.load %arg7[%c0_27, %c0_28, %c0_29] : memref<1x32x1xf32, #tpu.memory_space<vmem>>, vector<1x32x1xf32>
    %38 = vector.shape_cast %37 : vector<1x32x1xf32> to vector<32x1xf32>
    %39 = arith.mulf %28, %28 : vector<32x24xf32>
    %cst_30 = arith.constant dense<0.000000e+00> : vector<32xf32>
    %40 = vector.multi_reduction <add>, %39, %cst_30 [1] : vector<32x24xf32> to vector<32xf32>
    %41 = vector.shape_cast %40 : vector<32xf32> to vector<32x1xf32>
    %42 = arith.addf %38, %41 : vector<32x1xf32>
    %c0_31 = arith.constant 0 : index
    %c0_32 = arith.constant 0 : index
    %c0_33 = arith.constant 0 : index
    %43 = vector.load %arg7[%c0_31, %c0_32, %c0_33] : memref<1x32x1xf32, #tpu.memory_space<vmem>>, vector<1x32x1xf32>
    %44 = vector.shape_cast %43 : vector<1x32x1xf32> to vector<32x1xf32>
    %45 = vector.shape_cast %42 : vector<32x1xf32> to vector<1x32x1xf32>
    tpu.vector_store %arg7[%c0_31, %c0_32, %c0_33], %45 {strides = array<i32>} : memref<1x32x1xf32, #tpu.memory_space<vmem>>, vector<1x32x1xf32>,
    %46 = arith.truncf %25 : vector<32x24xf32> to vector<32x24xbf16>
    %c0_34 = arith.constant 0 : index
    %c0_35 = arith.constant 0 : index
    %c0_36 = arith.constant 0 : index
    %47 = vector.load %arg5[%c0_34, %c0_35, %c0_36] : memref<1x32x24xbf16, #tpu.memory_space<vmem>>, vector<1x32x24xbf16>
    %48 = vector.shape_cast %47 : vector<1x32x24xbf16> to vector<32x24xbf16>
    %49 = vector.shape_cast %46 : vector<32x24xbf16> to vector<1x32x24xbf16>
    tpu.vector_store %arg5[%c0_34, %c0_35, %c0_36], %49 {strides = array<i32>} : memref<1x32x24xbf16, #tpu.memory_space<vmem>>, vector<1x32x24xbf16>,
    return
  }
  func.func @transform_0(%arg0: i32, %arg1: i32) -> (i32, i32, i32, i32) {
    %c0_i32 = arith.constant 0 : i32
    %c0_i32_0 = arith.constant 0 : i32
    %c0_i32_1 = arith.constant 0 : i32
    return %arg0, %arg1, %c0_i32, %c0_i32_0 : i32, i32, i32, i32
  }
  func.func @transform_1(%arg0: i32, %arg1: i32) -> (i32, i32) {
    %c0_i32 = arith.constant 0 : i32
    %c0_i32_0 = arith.constant 0 : i32
    %c0_i32_1 = arith.constant 0 : i32
    return %c0_i32, %c0_i32_0 : i32, i32
  }
  func.func @transform_2(%arg0: i32, %arg1: i32) -> (i32, i32) {
    %c0_i32 = arith.constant 0 : i32
    %c0_i32_0 = arith.constant 0 : i32
    %c0_i32_1 = arith.constant 0 : i32
    return %c0_i32, %c0_i32_0 : i32, i32
  }
  func.func @transform_3(%arg0: i32, %arg1: i32) -> (i32, i32, i32) {
    %c0_i32 = arith.constant 0 : i32
    %c0_i32_0 = arith.constant 0 : i32
    return %arg0, %c0_i32, %arg1 : i32, i32, i32
  }
  func.func @transform_4(%arg0: i32, %arg1: i32) -> (i32, i32, i32) {
    %c0_i32 = arith.constant 0 : i32
    %c0_i32_0 = arith.constant 0 : i32
    %c0_i32_1 = arith.constant 0 : i32
    return %arg0, %c0_i32, %c0_i32_0 : i32, i32, i32
  }
  func.func @transform_5(%arg0: i32, %arg1: i32) -> (i32, i32, i32) {
    %c0_i32 = arith.constant 0 : i32
    %c0_i32_0 = arith.constant 0 : i32
    %c0_i32_1 = arith.constant 0 : i32
    return %arg0, %c0_i32, %c0_i32_0 : i32, i32, i32
  }
}

module attributes {stable_mosaic.version = 11 : i64} {
  func.func @kernel(%arg0: i32, %arg1: i32, %arg2: memref<1x32x16xbf16, #tpu.memory_space<vmem>>, %arg3: memref<64x32xbf16, #tpu.memory_space<vmem>>, %arg4: memref<1x64x16xbf16, #tpu.memory_space<vmem>>, %arg5: memref<1x64x1xf32, #tpu.memory_space<vmem>>, %arg6: memref<1x64x1xf32, #tpu.memory_space<vmem>>) attributes {dimension_semantics = [#tpu.dimension_semantics<parallel>, #tpu.dimension_semantics<arbitrary>], iteration_bounds = array<i64: 2, 1>, scalar_prefetch = 0 : i64, scratch_operands = 0 : i64, tpu.core_type = #tpu.core_type<tc>, window_params = [{transform_indices = @transform_0, window_bounds = array<i64: 1, 32, 16>}, {pipeline_mode = #tpu.pipeline_mode<synchronous>, transform_indices = @transform_1, window_bounds = array<i64: 64, 32>}, {transform_indices = @transform_2, window_bounds = array<i64: 1, 64, 16>}, {transform_indices = @transform_3, window_bounds = array<i64: 1, 64, 1>}, {transform_indices = @transform_4, window_bounds = array<i64: 1, 64, 1>}]} {
    %c0_i32 = arith.constant 0 : i32
    %0 = arith.cmpi eq, %arg1, %c0_i32 : i32
    %1 = arith.extui %0 : i1 to i32
    %c0_i32_0 = arith.constant 0 : i32
    %2 = arith.cmpi ne, %1, %c0_i32_0 : i32
    scf.if %2 {
      %cst_22 = arith.constant 0.000000e+00 : f32
      %28 = vector.broadcast %cst_22 : f32 to vector<1x64x1xf32>
      %c0_23 = arith.constant 0 : index
      %c0_24 = arith.constant 0 : index
      %c0_25 = arith.constant 0 : index
      %29 = vector.load %arg5[%c0_23, %c0_24, %c0_25] : memref<1x64x1xf32, #tpu.memory_space<vmem>>, vector<1x64x1xf32>
      tpu.vector_store %arg5[%c0_23, %c0_24, %c0_25], %28 {strides = array<i32>} : memref<1x64x1xf32, #tpu.memory_space<vmem>>, vector<1x64x1xf32>,
      %cst_26 = arith.constant 0.000000e+00 : f32
      %30 = vector.broadcast %cst_26 : f32 to vector<1x64x1xf32>
      %c0_27 = arith.constant 0 : index
      %c0_28 = arith.constant 0 : index
      %c0_29 = arith.constant 0 : index
      %31 = vector.load %arg6[%c0_27, %c0_28, %c0_29] : memref<1x64x1xf32, #tpu.memory_space<vmem>>, vector<1x64x1xf32>
      tpu.vector_store %arg6[%c0_27, %c0_28, %c0_29], %30 {strides = array<i32>} : memref<1x64x1xf32, #tpu.memory_space<vmem>>, vector<1x64x1xf32>,
    } else {
    }
    %c0 = arith.constant 0 : index
    %c0_1 = arith.constant 0 : index
    %c0_2 = arith.constant 0 : index
    %3 = vector.load %arg2[%c0, %c0_1, %c0_2] : memref<1x32x16xbf16, #tpu.memory_space<vmem>>, vector<1x32x16xbf16>
    %4 = vector.shape_cast %3 : vector<1x32x16xbf16> to vector<32x16xbf16>
    %c0_3 = arith.constant 0 : index
    %c0_4 = arith.constant 0 : index
    %5 = vector.load %arg3[%c0_3, %c0_4] : memref<64x32xbf16, #tpu.memory_space<vmem>>, vector<64x32xbf16>
    %cst = arith.constant dense<0.000000e+00> : vector<64x16xf32>
    %6 = tpu.matmul %5, %4, %cst {dimension_numbers = #tpu.dot_dimension_numbers<[1], [0], [0], [1], [0, 0, 1, 1], [], []>} : vector<64x32xbf16>, vector<32x16xbf16>, vector<64x16xf32> -> vector<64x16xf32>
    %c0_5 = arith.constant 0 : index
    %c0_6 = arith.constant 0 : index
    %c0_7 = arith.constant 0 : index
    %7 = vector.load %arg5[%c0_5, %c0_6, %c0_7] : memref<1x64x1xf32, #tpu.memory_space<vmem>>, vector<1x64x1xf32>
    %8 = vector.shape_cast %7 : vector<1x64x1xf32> to vector<64x1xf32>
    %cst_8 = arith.constant dense<0.000000e+00> : vector<64xf32>
    %9 = vector.multi_reduction <add>, %6, %cst_8 [1] : vector<64x16xf32> to vector<64xf32>
    %10 = vector.shape_cast %9 : vector<64xf32> to vector<64x1xf32>
    %11 = arith.addf %8, %10 : vector<64x1xf32>
    %c0_9 = arith.constant 0 : index
    %c0_10 = arith.constant 0 : index
    %c0_11 = arith.constant 0 : index
    %12 = vector.load %arg5[%c0_9, %c0_10, %c0_11] : memref<1x64x1xf32, #tpu.memory_space<vmem>>, vector<1x64x1xf32>
    %13 = vector.shape_cast %12 : vector<1x64x1xf32> to vector<64x1xf32>
    %14 = vector.shape_cast %11 : vector<64x1xf32> to vector<1x64x1xf32>
    tpu.vector_store %arg5[%c0_9, %c0_10, %c0_11], %14 {strides = array<i32>} : memref<1x64x1xf32, #tpu.memory_space<vmem>>, vector<1x64x1xf32>,
    %c0_12 = arith.constant 0 : index
    %c0_13 = arith.constant 0 : index
    %c0_14 = arith.constant 0 : index
    %15 = vector.load %arg6[%c0_12, %c0_13, %c0_14] : memref<1x64x1xf32, #tpu.memory_space<vmem>>, vector<1x64x1xf32>
    %16 = vector.shape_cast %15 : vector<1x64x1xf32> to vector<64x1xf32>
    %17 = arith.mulf %6, %6 : vector<64x16xf32>
    %cst_15 = arith.constant dense<0.000000e+00> : vector<64xf32>
    %18 = vector.multi_reduction <add>, %17, %cst_15 [1] : vector<64x16xf32> to vector<64xf32>
    %19 = vector.shape_cast %18 : vector<64xf32> to vector<64x1xf32>
    %20 = arith.addf %16, %19 : vector<64x1xf32>
    %c0_16 = arith.constant 0 : index
    %c0_17 = arith.constant 0 : index
    %c0_18 = arith.constant 0 : index
    %21 = vector.load %arg6[%c0_16, %c0_17, %c0_18] : memref<1x64x1xf32, #tpu.memory_space<vmem>>, vector<1x64x1xf32>
    %22 = vector.shape_cast %21 : vector<1x64x1xf32> to vector<64x1xf32>
    %23 = vector.shape_cast %20 : vector<64x1xf32> to vector<1x64x1xf32>
    tpu.vector_store %arg6[%c0_16, %c0_17, %c0_18], %23 {strides = array<i32>} : memref<1x64x1xf32, #tpu.memory_space<vmem>>, vector<1x64x1xf32>,
    %24 = arith.truncf %6 : vector<64x16xf32> to vector<64x16xbf16>
    %c0_19 = arith.constant 0 : index
    %c0_20 = arith.constant 0 : index
    %c0_21 = arith.constant 0 : index
    %25 = vector.load %arg4[%c0_19, %c0_20, %c0_21] : memref<1x64x16xbf16, #tpu.memory_space<vmem>>, vector<1x64x16xbf16>
    %26 = vector.shape_cast %25 : vector<1x64x16xbf16> to vector<64x16xbf16>
    %27 = vector.shape_cast %24 : vector<64x16xbf16> to vector<1x64x16xbf16>
    tpu.vector_store %arg4[%c0_19, %c0_20, %c0_21], %27 {strides = array<i32>} : memref<1x64x16xbf16, #tpu.memory_space<vmem>>, vector<1x64x16xbf16>,
    return
  }
  func.func @transform_0(%arg0: i32, %arg1: i32) -> (i32, i32, i32) {
    %c0_i32 = arith.constant 0 : i32
    %c0_i32_0 = arith.constant 0 : i32
    return %arg0, %c0_i32, %arg1 : i32, i32, i32
  }
  func.func @transform_1(%arg0: i32, %arg1: i32) -> (i32, i32) {
    %c0_i32 = arith.constant 0 : i32
    %c0_i32_0 = arith.constant 0 : i32
    %c0_i32_1 = arith.constant 0 : i32
    return %c0_i32, %c0_i32_0 : i32, i32
  }
  func.func @transform_2(%arg0: i32, %arg1: i32) -> (i32, i32, i32) {
    %c0_i32 = arith.constant 0 : i32
    %c0_i32_0 = arith.constant 0 : i32
    return %arg0, %c0_i32, %arg1 : i32, i32, i32
  }
  func.func @transform_3(%arg0: i32, %arg1: i32) -> (i32, i32, i32) {
    %c0_i32 = arith.constant 0 : i32
    %c0_i32_0 = arith.constant 0 : i32
    %c0_i32_1 = arith.constant 0 : i32
    return %arg0, %c0_i32, %c0_i32_0 : i32, i32, i32
  }
  func.func @transform_4(%arg0: i32, %arg1: i32) -> (i32, i32, i32) {
    %c0_i32 = arith.constant 0 : i32
    %c0_i32_0 = arith.constant 0 : i32
    %c0_i32_1 = arith.constant 0 : i32
    return %arg0, %c0_i32, %c0_i32_0 : i32, i32, i32
  }
}

module attributes {stable_mosaic.version = 11 : i64} {
  func.func @kernel(%arg0: i32, %arg1: i32, %arg2: memref<1x64x16xbf16, #tpu.memory_space<vmem>>, %arg3: memref<1x64x1xf32, #tpu.memory_space<vmem>>, %arg4: memref<1x64x1xf32, #tpu.memory_space<vmem>>, %arg5: memref<1x64x16xbf16, #tpu.memory_space<vmem>>) attributes {dimension_semantics = [#tpu.dimension_semantics<parallel>, #tpu.dimension_semantics<parallel>], iteration_bounds = array<i64: 2, 1>, scalar_prefetch = 0 : i64, scratch_operands = 0 : i64, tpu.core_type = #tpu.core_type<tc>, window_params = [{transform_indices = @transform_0, window_bounds = array<i64: 1, 64, 16>}, {transform_indices = @transform_1, window_bounds = array<i64: 1, 64, 1>}, {transform_indices = @transform_2, window_bounds = array<i64: 1, 64, 1>}, {transform_indices = @transform_3, window_bounds = array<i64: 1, 64, 16>}]} {
    %c0 = arith.constant 0 : index
    %c0_0 = arith.constant 0 : index
    %c0_1 = arith.constant 0 : index
    %0 = vector.load %arg2[%c0, %c0_0, %c0_1] : memref<1x64x16xbf16, #tpu.memory_space<vmem>>, vector<1x64x16xbf16>
    %1 = vector.shape_cast %0 : vector<1x64x16xbf16> to vector<64x16xbf16>
    %2 = arith.extf %1 : vector<64x16xbf16> to vector<64x16xf32>
    %c0_2 = arith.constant 0 : index
    %c0_3 = arith.constant 0 : index
    %c0_4 = arith.constant 0 : index
    %3 = vector.load %arg3[%c0_2, %c0_3, %c0_4] : memref<1x64x1xf32, #tpu.memory_space<vmem>>, vector<1x64x1xf32>
    %4 = vector.shape_cast %3 : vector<1x64x1xf32> to vector<64x1xf32>
    %5 = vector.broadcast %4 : vector<64x1xf32> to vector<64x16xf32>
    %6 = arith.subf %2, %5 : vector<64x16xf32>
    %c0_5 = arith.constant 0 : index
    %c0_6 = arith.constant 0 : index
    %c0_7 = arith.constant 0 : index
    %7 = vector.load %arg4[%c0_5, %c0_6, %c0_7] : memref<1x64x1xf32, #tpu.memory_space<vmem>>, vector<1x64x1xf32>
    %8 = vector.shape_cast %7 : vector<1x64x1xf32> to vector<64x1xf32>
    %9 = vector.broadcast %8 : vector<64x1xf32> to vector<64x16xf32>
    %10 = arith.mulf %6, %9 : vector<64x16xf32>
    %cst = arith.constant 0.000000e+00 : f32
    %11 = vector.broadcast %cst : f32 to vector<64x16xf32>
    %12 = arith.cmpf oge, %10, %11 : vector<64x16xf32>
    %cst_8 = arith.constant 2.000000e-01 : f32
    %13 = vector.broadcast %cst_8 : f32 to vector<64x16xf32>
    %14 = arith.mulf %13, %10 : vector<64x16xf32>
    %15 = arith.select %12, %10, %14 : vector<64x16xi1>, vector<64x16xf32>
    %16 = arith.truncf %15 : vector<64x16xf32> to vector<64x16xbf16>
    %c0_9 = arith.constant 0 : index
    %c0_10 = arith.constant 0 : index
    %c0_11 = arith.constant 0 : index
    %17 = vector.load %arg5[%c0_9, %c0_10, %c0_11] : memref<1x64x16xbf16, #tpu.memory_space<vmem>>, vector<1x64x16xbf16>
    %18 = vector.shape_cast %17 : vector<1x64x16xbf16> to vector<64x16xbf16>
    %19 = vector.shape_cast %16 : vector<64x16xbf16> to vector<1x64x16xbf16>
    tpu.vector_store %arg5[%c0_9, %c0_10, %c0_11], %19 {strides = array<i32>} : memref<1x64x16xbf16, #tpu.memory_space<vmem>>, vector<1x64x16xbf16>,
    return
  }
  func.func @transform_0(%arg0: i32, %arg1: i32) -> (i32, i32, i32) {
    %c0_i32 = arith.constant 0 : i32
    %c0_i32_0 = arith.constant 0 : i32
    return %arg0, %c0_i32, %arg1 : i32, i32, i32
  }
  func.func @transform_1(%arg0: i32, %arg1: i32) -> (i32, i32, i32) {
    %c0_i32 = arith.constant 0 : i32
    %c0_i32_0 = arith.constant 0 : i32
    %c0_i32_1 = arith.constant 0 : i32
    return %arg0, %c0_i32, %c0_i32_0 : i32, i32, i32
  }
  func.func @transform_2(%arg0: i32, %arg1: i32) -> (i32, i32, i32) {
    %c0_i32 = arith.constant 0 : i32
    %c0_i32_0 = arith.constant 0 : i32
    %c0_i32_1 = arith.constant 0 : i32
    return %arg0, %c0_i32, %c0_i32_0 : i32, i32, i32
  }
  func.func @transform_3(%arg0: i32, %arg1: i32) -> (i32, i32, i32) {
    %c0_i32 = arith.constant 0 : i32
    %c0_i32_0 = arith.constant 0 : i32
    return %arg0, %c0_i32, %arg1 : i32, i32, i32
  }
}

module attributes {stable_mosaic.version = 11 : i64} {
  func.func @kernel(%arg0: i32, %arg1: i32, %arg2: memref<1x1x32x110xbf16, #tpu.memory_space<vmem>>, %arg3: memref<16x288xbf16, #tpu.memory_space<vmem>>, %arg4: memref<1x80xf32, #tpu.memory_space<vmem>>, %arg5: memref<1x16x80xbf16, #tpu.memory_space<vmem>>, %arg6: memref<1x16x1xf32, #tpu.memory_space<vmem>>, %arg7: memref<1x16x1xf32, #tpu.memory_space<vmem>>, %arg8: memref<288x80xbf16, #tpu.memory_space<vmem>>) attributes {dimension_semantics = [#tpu.dimension_semantics<parallel>, #tpu.dimension_semantics<arbitrary>], iteration_bounds = array<i64: 2, 1>, scalar_prefetch = 0 : i64, scratch_operands = 1 : i64, tpu.core_type = #tpu.core_type<tc>, window_params = [{transform_indices = @transform_0, window_bounds = array<i64: 1, 1, 32, 110>}, {pipeline_mode = #tpu.pipeline_mode<synchronous>, transform_indices = @transform_1, window_bounds = array<i64: 16, 288>}, {pipeline_mode = #tpu.pipeline_mode<synchronous>, transform_indices = @transform_2, window_bounds = array<i64: 1, 80>}, {transform_indices = @transform_3, window_bounds = array<i64: 1, 16, 80>}, {transform_indices = @transform_4, window_bounds = array<i64: 1, 16, 1>}, {transform_indices = @transform_5, window_bounds = array<i64: 1, 16, 1>}]} {
    %c0_i32 = arith.constant 0 : i32
    %0 = arith.cmpi eq, %arg1, %c0_i32 : i32
    %1 = arith.extui %0 : i1 to i32
    %c0_i32_0 = arith.constant 0 : i32
    %2 = arith.cmpi ne, %1, %c0_i32_0 : i32
    scf.if %2 {
      %cst_37 = arith.constant 0.000000e+00 : f32
      %50 = vector.broadcast %cst_37 : f32 to vector<1x16x1xf32>
      %c0_38 = arith.constant 0 : index
      %c0_39 = arith.constant 0 : index
      %c0_40 = arith.constant 0 : index
      %51 = vector.load %arg6[%c0_38, %c0_39, %c0_40] : memref<1x16x1xf32, #tpu.memory_space<vmem>>, vector<1x16x1xf32>
      tpu.vector_store %arg6[%c0_38, %c0_39, %c0_40], %50 {strides = array<i32>} : memref<1x16x1xf32, #tpu.memory_space<vmem>>, vector<1x16x1xf32>,
      %cst_41 = arith.constant 0.000000e+00 : f32
      %52 = vector.broadcast %cst_41 : f32 to vector<1x16x1xf32>
      %c0_42 = arith.constant 0 : index
      %c0_43 = arith.constant 0 : index
      %c0_44 = arith.constant 0 : index
      %53 = vector.load %arg7[%c0_42, %c0_43, %c0_44] : memref<1x16x1xf32, #tpu.memory_space<vmem>>, vector<1x16x1xf32>
      tpu.vector_store %arg7[%c0_42, %c0_43, %c0_44], %52 {strides = array<i32>} : memref<1x16x1xf32, #tpu.memory_space<vmem>>, vector<1x16x1xf32>,
    } else {
    }
    %c0 = arith.constant 0 : index
    %c0_1 = arith.constant 0 : index
    %c0_2 = arith.constant 0 : index
    %c0_3 = arith.constant 0 : index
    %3 = vector.load %arg2[%c0, %c0_1, %c0_2, %c0_3] : memref<1x1x32x110xbf16, #tpu.memory_space<vmem>>, vector<1x1x32x110xbf16>
    %4 = vector.shape_cast %3 : vector<1x1x32x110xbf16> to vector<32x110xbf16>
    %5 = vector.extract_strided_slice %4 {offsets = [0, 0], sizes = [32, 80], strides = [1, 1]} : vector<32x110xbf16> to vector<32x80xbf16>
    %c0_4 = arith.constant 0 : index
    %c0_5 = arith.constant 0 : index
    %6 = vector.load %arg8[%c0_4, %c0_5] : memref<288x80xbf16, #tpu.memory_space<vmem>>, vector<32x80xbf16>
    tpu.vector_store %arg8[%c0_4, %c0_5], %5 {strides = array<i32>} : memref<288x80xbf16, #tpu.memory_space<vmem>>, vector<32x80xbf16>,
    %7 = vector.extract_strided_slice %4 {offsets = [0, 1], sizes = [32, 80], strides = [1, 1]} : vector<32x110xbf16> to vector<32x80xbf16>
    %c32 = arith.constant 32 : index
    %c0_6 = arith.constant 0 : index
    %8 = vector.load %arg8[%c32, %c0_6] : memref<288x80xbf16, #tpu.memory_space<vmem>>, vector<32x80xbf16>
    tpu.vector_store %arg8[%c32, %c0_6], %7 {strides = array<i32>} : memref<288x80xbf16, #tpu.memory_space<vmem>>, vector<32x80xbf16>,
    %9 = vector.extract_strided_slice %4 {offsets = [0, 2], sizes = [32, 80], strides = [1, 1]} : vector<32x110xbf16> to vector<32x80xbf16>
    %c64 = arith.constant 64 : index
    %c0_7 = arith.constant 0 : index
    %10 = vector.load %arg8[%c64, %c0_7] : memref<288x80xbf16, #tpu.memory_space<vmem>>, vector<32x80xbf16>
    tpu.vector_store %arg8[%c64, %c0_7], %9 {strides = array<i32>} : memref<288x80xbf16, #tpu.memory_space<vmem>>, vector<32x80xbf16>,
    %11 = vector.extract_strided_slice %4 {offsets = [0, 10], sizes = [32, 80], strides = [1, 1]} : vector<32x110xbf16> to vector<32x80xbf16>
    %c96 = arith.constant 96 : index
    %c0_8 = arith.constant 0 : index
    %12 = vector.load %arg8[%c96, %c0_8] : memref<288x80xbf16, #tpu.memory_space<vmem>>, vector<32x80xbf16>
    tpu.vector_store %arg8[%c96, %c0_8], %11 {strides = array<i32>} : memref<288x80xbf16, #tpu.memory_space<vmem>>, vector<32x80xbf16>,
    %13 = vector.extract_strided_slice %4 {offsets = [0, 11], sizes = [32, 80], strides = [1, 1]} : vector<32x110xbf16> to vector<32x80xbf16>
    %c128 = arith.constant 128 : index
    %c0_9 = arith.constant 0 : index
    %14 = vector.load %arg8[%c128, %c0_9] : memref<288x80xbf16, #tpu.memory_space<vmem>>, vector<32x80xbf16>
    tpu.vector_store %arg8[%c128, %c0_9], %13 {strides = array<i32>} : memref<288x80xbf16, #tpu.memory_space<vmem>>, vector<32x80xbf16>,
    %15 = vector.extract_strided_slice %4 {offsets = [0, 12], sizes = [32, 80], strides = [1, 1]} : vector<32x110xbf16> to vector<32x80xbf16>
    %c160 = arith.constant 160 : index
    %c0_10 = arith.constant 0 : index
    %16 = vector.load %arg8[%c160, %c0_10] : memref<288x80xbf16, #tpu.memory_space<vmem>>, vector<32x80xbf16>
    tpu.vector_store %arg8[%c160, %c0_10], %15 {strides = array<i32>} : memref<288x80xbf16, #tpu.memory_space<vmem>>, vector<32x80xbf16>,
    %17 = vector.extract_strided_slice %4 {offsets = [0, 20], sizes = [32, 80], strides = [1, 1]} : vector<32x110xbf16> to vector<32x80xbf16>
    %c192 = arith.constant 192 : index
    %c0_11 = arith.constant 0 : index
    %18 = vector.load %arg8[%c192, %c0_11] : memref<288x80xbf16, #tpu.memory_space<vmem>>, vector<32x80xbf16>
    tpu.vector_store %arg8[%c192, %c0_11], %17 {strides = array<i32>} : memref<288x80xbf16, #tpu.memory_space<vmem>>, vector<32x80xbf16>,
    %19 = vector.extract_strided_slice %4 {offsets = [0, 21], sizes = [32, 80], strides = [1, 1]} : vector<32x110xbf16> to vector<32x80xbf16>
    %c224 = arith.constant 224 : index
    %c0_12 = arith.constant 0 : index
    %20 = vector.load %arg8[%c224, %c0_12] : memref<288x80xbf16, #tpu.memory_space<vmem>>, vector<32x80xbf16>
    tpu.vector_store %arg8[%c224, %c0_12], %19 {strides = array<i32>} : memref<288x80xbf16, #tpu.memory_space<vmem>>, vector<32x80xbf16>,
    %21 = vector.extract_strided_slice %4 {offsets = [0, 22], sizes = [32, 80], strides = [1, 1]} : vector<32x110xbf16> to vector<32x80xbf16>
    %c256 = arith.constant 256 : index
    %c0_13 = arith.constant 0 : index
    %22 = vector.load %arg8[%c256, %c0_13] : memref<288x80xbf16, #tpu.memory_space<vmem>>, vector<32x80xbf16>
    tpu.vector_store %arg8[%c256, %c0_13], %21 {strides = array<i32>} : memref<288x80xbf16, #tpu.memory_space<vmem>>, vector<32x80xbf16>,
    %c0_14 = arith.constant 0 : index
    %c0_15 = arith.constant 0 : index
    %23 = vector.load %arg8[%c0_14, %c0_15] : memref<288x80xbf16, #tpu.memory_space<vmem>>, vector<288x80xbf16>
    %c0_16 = arith.constant 0 : index
    %c0_17 = arith.constant 0 : index
    %24 = vector.load %arg3[%c0_16, %c0_17] : memref<16x288xbf16, #tpu.memory_space<vmem>>, vector<16x288xbf16>
    %cst = arith.constant dense<0.000000e+00> : vector<16x80xf32>
    %25 = tpu.matmul %24, %23, %cst {dimension_numbers = #tpu.dot_dimension_numbers<[1], [0], [0], [1], [0, 0, 1, 1], [], []>} : vector<16x288xbf16>, vector<288x80xbf16>, vector<16x80xf32> -> vector<16x80xf32>
    %c0_18 = arith.constant 0 : index
    %c0_19 = arith.constant 0 : index
    %26 = vector.load %arg4[%c0_18, %c0_19] : memref<1x80xf32, #tpu.memory_space<vmem>>, vector<1x80xf32>
    %27 = vector.broadcast %26 : vector<1x80xf32> to vector<16x80xf32>
    %28 = arith.mulf %25, %27 : vector<16x80xf32>
    %c0_20 = arith.constant 0 : index
    %c0_21 = arith.constant 0 : index
    %c0_22 = arith.constant 0 : index
    %29 = vector.load %arg6[%c0_20, %c0_21, %c0_22] : memref<1x16x1xf32, #tpu.memory_space<vmem>>, vector<1x16x1xf32>
    %30 = vector.shape_cast %29 : vector<1x16x1xf32> to vector<16x1xf32>
    %cst_23 = arith.constant dense<0.000000e+00> : vector<16xf32>
    %31 = vector.multi_reduction <add>, %28, %cst_23 [1] : vector<16x80xf32> to vector<16xf32>
    %32 = vector.shape_cast %31 : vector<16xf32> to vector<16x1xf32>
    %33 = arith.addf %30, %32 : vector<16x1xf32>
    %c0_24 = arith.constant 0 : index
    %c0_25 = arith.constant 0 : index
    %c0_26 = arith.constant 0 : index
    %34 = vector.load %arg6[%c0_24, %c0_25, %c0_26] : memref<1x16x1xf32, #tpu.memory_space<vmem>>, vector<1x16x1xf32>
    %35 = vector.shape_cast %34 : vector<1x16x1xf32> to vector<16x1xf32>
    %36 = vector.shape_cast %33 : vector<16x1xf32> to vector<1x16x1xf32>
    tpu.vector_store %arg6[%c0_24, %c0_25, %c0_26], %36 {strides = array<i32>} : memref<1x16x1xf32, #tpu.memory_space<vmem>>, vector<1x16x1xf32>,
    %c0_27 = arith.constant 0 : index
    %c0_28 = arith.constant 0 : index
    %c0_29 = arith.constant 0 : index
    %37 = vector.load %arg7[%c0_27, %c0_28, %c0_29] : memref<1x16x1xf32, #tpu.memory_space<vmem>>, vector<1x16x1xf32>
    %38 = vector.shape_cast %37 : vector<1x16x1xf32> to vector<16x1xf32>
    %39 = arith.mulf %28, %28 : vector<16x80xf32>
    %cst_30 = arith.constant dense<0.000000e+00> : vector<16xf32>
    %40 = vector.multi_reduction <add>, %39, %cst_30 [1] : vector<16x80xf32> to vector<16xf32>
    %41 = vector.shape_cast %40 : vector<16xf32> to vector<16x1xf32>
    %42 = arith.addf %38, %41 : vector<16x1xf32>
    %c0_31 = arith.constant 0 : index
    %c0_32 = arith.constant 0 : index
    %c0_33 = arith.constant 0 : index
    %43 = vector.load %arg7[%c0_31, %c0_32, %c0_33] : memref<1x16x1xf32, #tpu.memory_space<vmem>>, vector<1x16x1xf32>
    %44 = vector.shape_cast %43 : vector<1x16x1xf32> to vector<16x1xf32>
    %45 = vector.shape_cast %42 : vector<16x1xf32> to vector<1x16x1xf32>
    tpu.vector_store %arg7[%c0_31, %c0_32, %c0_33], %45 {strides = array<i32>} : memref<1x16x1xf32, #tpu.memory_space<vmem>>, vector<1x16x1xf32>,
    %46 = arith.truncf %25 : vector<16x80xf32> to vector<16x80xbf16>
    %c0_34 = arith.constant 0 : index
    %c0_35 = arith.constant 0 : index
    %c0_36 = arith.constant 0 : index
    %47 = vector.load %arg5[%c0_34, %c0_35, %c0_36] : memref<1x16x80xbf16, #tpu.memory_space<vmem>>, vector<1x16x80xbf16>
    %48 = vector.shape_cast %47 : vector<1x16x80xbf16> to vector<16x80xbf16>
    %49 = vector.shape_cast %46 : vector<16x80xbf16> to vector<1x16x80xbf16>
    tpu.vector_store %arg5[%c0_34, %c0_35, %c0_36], %49 {strides = array<i32>} : memref<1x16x80xbf16, #tpu.memory_space<vmem>>, vector<1x16x80xbf16>,
    return
  }
  func.func @transform_0(%arg0: i32, %arg1: i32) -> (i32, i32, i32, i32) {
    %c0_i32 = arith.constant 0 : i32
    %c0_i32_0 = arith.constant 0 : i32
    %c0_i32_1 = arith.constant 0 : i32
    return %arg0, %arg1, %c0_i32, %c0_i32_0 : i32, i32, i32, i32
  }
  func.func @transform_1(%arg0: i32, %arg1: i32) -> (i32, i32) {
    %c0_i32 = arith.constant 0 : i32
    %c0_i32_0 = arith.constant 0 : i32
    %c0_i32_1 = arith.constant 0 : i32
    return %c0_i32, %c0_i32_0 : i32, i32
  }
  func.func @transform_2(%arg0: i32, %arg1: i32) -> (i32, i32) {
    %c0_i32 = arith.constant 0 : i32
    %c0_i32_0 = arith.constant 0 : i32
    %c0_i32_1 = arith.constant 0 : i32
    return %c0_i32, %c0_i32_0 : i32, i32
  }
  func.func @transform_3(%arg0: i32, %arg1: i32) -> (i32, i32, i32) {
    %c0_i32 = arith.constant 0 : i32
    %c0_i32_0 = arith.constant 0 : i32
    return %arg0, %c0_i32, %arg1 : i32, i32, i32
  }
  func.func @transform_4(%arg0: i32, %arg1: i32) -> (i32, i32, i32) {
    %c0_i32 = arith.constant 0 : i32
    %c0_i32_0 = arith.constant 0 : i32
    %c0_i32_1 = arith.constant 0 : i32
    return %arg0, %c0_i32, %c0_i32_0 : i32, i32, i32
  }
  func.func @transform_5(%arg0: i32, %arg1: i32) -> (i32, i32, i32) {
    %c0_i32 = arith.constant 0 : i32
    %c0_i32_0 = arith.constant 0 : i32
    %c0_i32_1 = arith.constant 0 : i32
    return %arg0, %c0_i32, %c0_i32_0 : i32, i32, i32
  }
}

module attributes {stable_mosaic.version = 11 : i64} {
  func.func @kernel(%arg0: i32, %arg1: i32, %arg2: memref<1x16x64xbf16, #tpu.memory_space<vmem>>, %arg3: memref<32x16xbf16, #tpu.memory_space<vmem>>, %arg4: memref<1x32x64xbf16, #tpu.memory_space<vmem>>, %arg5: memref<1x32x1xf32, #tpu.memory_space<vmem>>, %arg6: memref<1x32x1xf32, #tpu.memory_space<vmem>>) attributes {dimension_semantics = [#tpu.dimension_semantics<parallel>, #tpu.dimension_semantics<arbitrary>], iteration_bounds = array<i64: 2, 1>, scalar_prefetch = 0 : i64, scratch_operands = 0 : i64, tpu.core_type = #tpu.core_type<tc>, window_params = [{transform_indices = @transform_0, window_bounds = array<i64: 1, 16, 64>}, {pipeline_mode = #tpu.pipeline_mode<synchronous>, transform_indices = @transform_1, window_bounds = array<i64: 32, 16>}, {transform_indices = @transform_2, window_bounds = array<i64: 1, 32, 64>}, {transform_indices = @transform_3, window_bounds = array<i64: 1, 32, 1>}, {transform_indices = @transform_4, window_bounds = array<i64: 1, 32, 1>}]} {
    %c0_i32 = arith.constant 0 : i32
    %0 = arith.cmpi eq, %arg1, %c0_i32 : i32
    %1 = arith.extui %0 : i1 to i32
    %c0_i32_0 = arith.constant 0 : i32
    %2 = arith.cmpi ne, %1, %c0_i32_0 : i32
    scf.if %2 {
      %cst_22 = arith.constant 0.000000e+00 : f32
      %28 = vector.broadcast %cst_22 : f32 to vector<1x32x1xf32>
      %c0_23 = arith.constant 0 : index
      %c0_24 = arith.constant 0 : index
      %c0_25 = arith.constant 0 : index
      %29 = vector.load %arg5[%c0_23, %c0_24, %c0_25] : memref<1x32x1xf32, #tpu.memory_space<vmem>>, vector<1x32x1xf32>
      tpu.vector_store %arg5[%c0_23, %c0_24, %c0_25], %28 {strides = array<i32>} : memref<1x32x1xf32, #tpu.memory_space<vmem>>, vector<1x32x1xf32>,
      %cst_26 = arith.constant 0.000000e+00 : f32
      %30 = vector.broadcast %cst_26 : f32 to vector<1x32x1xf32>
      %c0_27 = arith.constant 0 : index
      %c0_28 = arith.constant 0 : index
      %c0_29 = arith.constant 0 : index
      %31 = vector.load %arg6[%c0_27, %c0_28, %c0_29] : memref<1x32x1xf32, #tpu.memory_space<vmem>>, vector<1x32x1xf32>
      tpu.vector_store %arg6[%c0_27, %c0_28, %c0_29], %30 {strides = array<i32>} : memref<1x32x1xf32, #tpu.memory_space<vmem>>, vector<1x32x1xf32>,
    } else {
    }
    %c0 = arith.constant 0 : index
    %c0_1 = arith.constant 0 : index
    %c0_2 = arith.constant 0 : index
    %3 = vector.load %arg2[%c0, %c0_1, %c0_2] : memref<1x16x64xbf16, #tpu.memory_space<vmem>>, vector<1x16x64xbf16>
    %4 = vector.shape_cast %3 : vector<1x16x64xbf16> to vector<16x64xbf16>
    %c0_3 = arith.constant 0 : index
    %c0_4 = arith.constant 0 : index
    %5 = vector.load %arg3[%c0_3, %c0_4] : memref<32x16xbf16, #tpu.memory_space<vmem>>, vector<32x16xbf16>
    %cst = arith.constant dense<0.000000e+00> : vector<32x64xf32>
    %6 = tpu.matmul %5, %4, %cst {dimension_numbers = #tpu.dot_dimension_numbers<[1], [0], [0], [1], [0, 0, 1, 1], [], []>} : vector<32x16xbf16>, vector<16x64xbf16>, vector<32x64xf32> -> vector<32x64xf32>
    %c0_5 = arith.constant 0 : index
    %c0_6 = arith.constant 0 : index
    %c0_7 = arith.constant 0 : index
    %7 = vector.load %arg5[%c0_5, %c0_6, %c0_7] : memref<1x32x1xf32, #tpu.memory_space<vmem>>, vector<1x32x1xf32>
    %8 = vector.shape_cast %7 : vector<1x32x1xf32> to vector<32x1xf32>
    %cst_8 = arith.constant dense<0.000000e+00> : vector<32xf32>
    %9 = vector.multi_reduction <add>, %6, %cst_8 [1] : vector<32x64xf32> to vector<32xf32>
    %10 = vector.shape_cast %9 : vector<32xf32> to vector<32x1xf32>
    %11 = arith.addf %8, %10 : vector<32x1xf32>
    %c0_9 = arith.constant 0 : index
    %c0_10 = arith.constant 0 : index
    %c0_11 = arith.constant 0 : index
    %12 = vector.load %arg5[%c0_9, %c0_10, %c0_11] : memref<1x32x1xf32, #tpu.memory_space<vmem>>, vector<1x32x1xf32>
    %13 = vector.shape_cast %12 : vector<1x32x1xf32> to vector<32x1xf32>
    %14 = vector.shape_cast %11 : vector<32x1xf32> to vector<1x32x1xf32>
    tpu.vector_store %arg5[%c0_9, %c0_10, %c0_11], %14 {strides = array<i32>} : memref<1x32x1xf32, #tpu.memory_space<vmem>>, vector<1x32x1xf32>,
    %c0_12 = arith.constant 0 : index
    %c0_13 = arith.constant 0 : index
    %c0_14 = arith.constant 0 : index
    %15 = vector.load %arg6[%c0_12, %c0_13, %c0_14] : memref<1x32x1xf32, #tpu.memory_space<vmem>>, vector<1x32x1xf32>
    %16 = vector.shape_cast %15 : vector<1x32x1xf32> to vector<32x1xf32>
    %17 = arith.mulf %6, %6 : vector<32x64xf32>
    %cst_15 = arith.constant dense<0.000000e+00> : vector<32xf32>
    %18 = vector.multi_reduction <add>, %17, %cst_15 [1] : vector<32x64xf32> to vector<32xf32>
    %19 = vector.shape_cast %18 : vector<32xf32> to vector<32x1xf32>
    %20 = arith.addf %16, %19 : vector<32x1xf32>
    %c0_16 = arith.constant 0 : index
    %c0_17 = arith.constant 0 : index
    %c0_18 = arith.constant 0 : index
    %21 = vector.load %arg6[%c0_16, %c0_17, %c0_18] : memref<1x32x1xf32, #tpu.memory_space<vmem>>, vector<1x32x1xf32>
    %22 = vector.shape_cast %21 : vector<1x32x1xf32> to vector<32x1xf32>
    %23 = vector.shape_cast %20 : vector<32x1xf32> to vector<1x32x1xf32>
    tpu.vector_store %arg6[%c0_16, %c0_17, %c0_18], %23 {strides = array<i32>} : memref<1x32x1xf32, #tpu.memory_space<vmem>>, vector<1x32x1xf32>,
    %24 = arith.truncf %6 : vector<32x64xf32> to vector<32x64xbf16>
    %c0_19 = arith.constant 0 : index
    %c0_20 = arith.constant 0 : index
    %c0_21 = arith.constant 0 : index
    %25 = vector.load %arg4[%c0_19, %c0_20, %c0_21] : memref<1x32x64xbf16, #tpu.memory_space<vmem>>, vector<1x32x64xbf16>
    %26 = vector.shape_cast %25 : vector<1x32x64xbf16> to vector<32x64xbf16>
    %27 = vector.shape_cast %24 : vector<32x64xbf16> to vector<1x32x64xbf16>
    tpu.vector_store %arg4[%c0_19, %c0_20, %c0_21], %27 {strides = array<i32>} : memref<1x32x64xbf16, #tpu.memory_space<vmem>>, vector<1x32x64xbf16>,
    return
  }
  func.func @transform_0(%arg0: i32, %arg1: i32) -> (i32, i32, i32) {
    %c0_i32 = arith.constant 0 : i32
    %c0_i32_0 = arith.constant 0 : i32
    return %arg0, %c0_i32, %arg1 : i32, i32, i32
  }
  func.func @transform_1(%arg0: i32, %arg1: i32) -> (i32, i32) {
    %c0_i32 = arith.constant 0 : i32
    %c0_i32_0 = arith.constant 0 : i32
    %c0_i32_1 = arith.constant 0 : i32
    return %c0_i32, %c0_i32_0 : i32, i32
  }
  func.func @transform_2(%arg0: i32, %arg1: i32) -> (i32, i32, i32) {
    %c0_i32 = arith.constant 0 : i32
    %c0_i32_0 = arith.constant 0 : i32
    return %arg0, %c0_i32, %arg1 : i32, i32, i32
  }
  func.func @transform_3(%arg0: i32, %arg1: i32) -> (i32, i32, i32) {
    %c0_i32 = arith.constant 0 : i32
    %c0_i32_0 = arith.constant 0 : i32
    %c0_i32_1 = arith.constant 0 : i32
    return %arg0, %c0_i32, %c0_i32_0 : i32, i32, i32
  }
  func.func @transform_4(%arg0: i32, %arg1: i32) -> (i32, i32, i32) {
    %c0_i32 = arith.constant 0 : i32
    %c0_i32_0 = arith.constant 0 : i32
    %c0_i32_1 = arith.constant 0 : i32
    return %arg0, %c0_i32, %c0_i32_0 : i32, i32, i32
  }
}

module attributes {stable_mosaic.version = 11 : i64} {
  func.func @kernel(%arg0: i32, %arg1: i32, %arg2: memref<1x32x64xbf16, #tpu.memory_space<vmem>>, %arg3: memref<1x32x1xf32, #tpu.memory_space<vmem>>, %arg4: memref<1x32x1xf32, #tpu.memory_space<vmem>>, %arg5: memref<1x32x64xbf16, #tpu.memory_space<vmem>>) attributes {dimension_semantics = [#tpu.dimension_semantics<parallel>, #tpu.dimension_semantics<parallel>], iteration_bounds = array<i64: 2, 1>, scalar_prefetch = 0 : i64, scratch_operands = 0 : i64, tpu.core_type = #tpu.core_type<tc>, window_params = [{transform_indices = @transform_0, window_bounds = array<i64: 1, 32, 64>}, {transform_indices = @transform_1, window_bounds = array<i64: 1, 32, 1>}, {transform_indices = @transform_2, window_bounds = array<i64: 1, 32, 1>}, {transform_indices = @transform_3, window_bounds = array<i64: 1, 32, 64>}]} {
    %c0 = arith.constant 0 : index
    %c0_0 = arith.constant 0 : index
    %c0_1 = arith.constant 0 : index
    %0 = vector.load %arg2[%c0, %c0_0, %c0_1] : memref<1x32x64xbf16, #tpu.memory_space<vmem>>, vector<1x32x64xbf16>
    %1 = vector.shape_cast %0 : vector<1x32x64xbf16> to vector<32x64xbf16>
    %2 = arith.extf %1 : vector<32x64xbf16> to vector<32x64xf32>
    %c0_2 = arith.constant 0 : index
    %c0_3 = arith.constant 0 : index
    %c0_4 = arith.constant 0 : index
    %3 = vector.load %arg3[%c0_2, %c0_3, %c0_4] : memref<1x32x1xf32, #tpu.memory_space<vmem>>, vector<1x32x1xf32>
    %4 = vector.shape_cast %3 : vector<1x32x1xf32> to vector<32x1xf32>
    %5 = vector.broadcast %4 : vector<32x1xf32> to vector<32x64xf32>
    %6 = arith.subf %2, %5 : vector<32x64xf32>
    %c0_5 = arith.constant 0 : index
    %c0_6 = arith.constant 0 : index
    %c0_7 = arith.constant 0 : index
    %7 = vector.load %arg4[%c0_5, %c0_6, %c0_7] : memref<1x32x1xf32, #tpu.memory_space<vmem>>, vector<1x32x1xf32>
    %8 = vector.shape_cast %7 : vector<1x32x1xf32> to vector<32x1xf32>
    %9 = vector.broadcast %8 : vector<32x1xf32> to vector<32x64xf32>
    %10 = arith.mulf %6, %9 : vector<32x64xf32>
    %cst = arith.constant 0.000000e+00 : f32
    %11 = vector.broadcast %cst : f32 to vector<32x64xf32>
    %12 = arith.cmpf oge, %10, %11 : vector<32x64xf32>
    %cst_8 = arith.constant 2.000000e-01 : f32
    %13 = vector.broadcast %cst_8 : f32 to vector<32x64xf32>
    %14 = arith.mulf %13, %10 : vector<32x64xf32>
    %15 = arith.select %12, %10, %14 : vector<32x64xi1>, vector<32x64xf32>
    %16 = arith.truncf %15 : vector<32x64xf32> to vector<32x64xbf16>
    %c0_9 = arith.constant 0 : index
    %c0_10 = arith.constant 0 : index
    %c0_11 = arith.constant 0 : index
    %17 = vector.load %arg5[%c0_9, %c0_10, %c0_11] : memref<1x32x64xbf16, #tpu.memory_space<vmem>>, vector<1x32x64xbf16>
    %18 = vector.shape_cast %17 : vector<1x32x64xbf16> to vector<32x64xbf16>
    %19 = vector.shape_cast %16 : vector<32x64xbf16> to vector<1x32x64xbf16>
    tpu.vector_store %arg5[%c0_9, %c0_10, %c0_11], %19 {strides = array<i32>} : memref<1x32x64xbf16, #tpu.memory_space<vmem>>, vector<1x32x64xbf16>,
    return
  }
  func.func @transform_0(%arg0: i32, %arg1: i32) -> (i32, i32, i32) {
    %c0_i32 = arith.constant 0 : i32
    %c0_i32_0 = arith.constant 0 : i32
    return %arg0, %c0_i32, %arg1 : i32, i32, i32
  }
  func.func @transform_1(%arg0: i32, %arg1: i32) -> (i32, i32, i32) {
    %c0_i32 = arith.constant 0 : i32
    %c0_i32_0 = arith.constant 0 : i32
    %c0_i32_1 = arith.constant 0 : i32
    return %arg0, %c0_i32, %c0_i32_0 : i32, i32, i32
  }
  func.func @transform_2(%arg0: i32, %arg1: i32) -> (i32, i32, i32) {
    %c0_i32 = arith.constant 0 : i32
    %c0_i32_0 = arith.constant 0 : i32
    %c0_i32_1 = arith.constant 0 : i32
    return %arg0, %c0_i32, %c0_i32_0 : i32, i32, i32
  }
  func.func @transform_3(%arg0: i32, %arg1: i32) -> (i32, i32, i32) {
    %c0_i32 = arith.constant 0 : i32
    %c0_i32_0 = arith.constant 0 : i32
    return %arg0, %c0_i32, %arg1 : i32, i32, i32
  }
}

module attributes {stable_mosaic.version = 11 : i64} {
  func.func @kernel(%arg0: i32, %arg1: i32, %arg2: memref<1x1x16x342xbf16, #tpu.memory_space<vmem>>, %arg3: memref<8x144xbf16, #tpu.memory_space<vmem>>, %arg4: memref<1x288xf32, #tpu.memory_space<vmem>>, %arg5: memref<1x8x288xbf16, #tpu.memory_space<vmem>>, %arg6: memref<1x8x1xf32, #tpu.memory_space<vmem>>, %arg7: memref<1x8x1xf32, #tpu.memory_space<vmem>>, %arg8: memref<144x288xbf16, #tpu.memory_space<vmem>>) attributes {dimension_semantics = [#tpu.dimension_semantics<parallel>, #tpu.dimension_semantics<arbitrary>], iteration_bounds = array<i64: 2, 1>, scalar_prefetch = 0 : i64, scratch_operands = 1 : i64, tpu.core_type = #tpu.core_type<tc>, window_params = [{transform_indices = @transform_0, window_bounds = array<i64: 1, 1, 16, 342>}, {pipeline_mode = #tpu.pipeline_mode<synchronous>, transform_indices = @transform_1, window_bounds = array<i64: 8, 144>}, {pipeline_mode = #tpu.pipeline_mode<synchronous>, transform_indices = @transform_2, window_bounds = array<i64: 1, 288>}, {transform_indices = @transform_3, window_bounds = array<i64: 1, 8, 288>}, {transform_indices = @transform_4, window_bounds = array<i64: 1, 8, 1>}, {transform_indices = @transform_5, window_bounds = array<i64: 1, 8, 1>}]} {
    %c0_i32 = arith.constant 0 : i32
    %0 = arith.cmpi eq, %arg1, %c0_i32 : i32
    %1 = arith.extui %0 : i1 to i32
    %c0_i32_0 = arith.constant 0 : i32
    %2 = arith.cmpi ne, %1, %c0_i32_0 : i32
    scf.if %2 {
      %cst_37 = arith.constant 0.000000e+00 : f32
      %50 = vector.broadcast %cst_37 : f32 to vector<1x8x1xf32>
      %c0_38 = arith.constant 0 : index
      %c0_39 = arith.constant 0 : index
      %c0_40 = arith.constant 0 : index
      %51 = vector.load %arg6[%c0_38, %c0_39, %c0_40] : memref<1x8x1xf32, #tpu.memory_space<vmem>>, vector<1x8x1xf32>
      tpu.vector_store %arg6[%c0_38, %c0_39, %c0_40], %50 {strides = array<i32>} : memref<1x8x1xf32, #tpu.memory_space<vmem>>, vector<1x8x1xf32>,
      %cst_41 = arith.constant 0.000000e+00 : f32
      %52 = vector.broadcast %cst_41 : f32 to vector<1x8x1xf32>
      %c0_42 = arith.constant 0 : index
      %c0_43 = arith.constant 0 : index
      %c0_44 = arith.constant 0 : index
      %53 = vector.load %arg7[%c0_42, %c0_43, %c0_44] : memref<1x8x1xf32, #tpu.memory_space<vmem>>, vector<1x8x1xf32>
      tpu.vector_store %arg7[%c0_42, %c0_43, %c0_44], %52 {strides = array<i32>} : memref<1x8x1xf32, #tpu.memory_space<vmem>>, vector<1x8x1xf32>,
    } else {
    }
    %c0 = arith.constant 0 : index
    %c0_1 = arith.constant 0 : index
    %c0_2 = arith.constant 0 : index
    %c0_3 = arith.constant 0 : index
    %3 = vector.load %arg2[%c0, %c0_1, %c0_2, %c0_3] : memref<1x1x16x342xbf16, #tpu.memory_space<vmem>>, vector<1x1x16x342xbf16>
    %4 = vector.shape_cast %3 : vector<1x1x16x342xbf16> to vector<16x342xbf16>
    %5 = vector.extract_strided_slice %4 {offsets = [0, 0], sizes = [16, 288], strides = [1, 1]} : vector<16x342xbf16> to vector<16x288xbf16>
    %c0_4 = arith.constant 0 : index
    %c0_5 = arith.constant 0 : index
    %6 = vector.load %arg8[%c0_4, %c0_5] : memref<144x288xbf16, #tpu.memory_space<vmem>>, vector<16x288xbf16>
    tpu.vector_store %arg8[%c0_4, %c0_5], %5 {strides = array<i32>} : memref<144x288xbf16, #tpu.memory_space<vmem>>, vector<16x288xbf16>,
    %7 = vector.extract_strided_slice %4 {offsets = [0, 1], sizes = [16, 288], strides = [1, 1]} : vector<16x342xbf16> to vector<16x288xbf16>
    %c16 = arith.constant 16 : index
    %c0_6 = arith.constant 0 : index
    %8 = vector.load %arg8[%c16, %c0_6] : memref<144x288xbf16, #tpu.memory_space<vmem>>, vector<16x288xbf16>
    tpu.vector_store %arg8[%c16, %c0_6], %7 {strides = array<i32>} : memref<144x288xbf16, #tpu.memory_space<vmem>>, vector<16x288xbf16>,
    %9 = vector.extract_strided_slice %4 {offsets = [0, 2], sizes = [16, 288], strides = [1, 1]} : vector<16x342xbf16> to vector<16x288xbf16>
    %c32 = arith.constant 32 : index
    %c0_7 = arith.constant 0 : index
    %10 = vector.load %arg8[%c32, %c0_7] : memref<144x288xbf16, #tpu.memory_space<vmem>>, vector<16x288xbf16>
    tpu.vector_store %arg8[%c32, %c0_7], %9 {strides = array<i32>} : memref<144x288xbf16, #tpu.memory_space<vmem>>, vector<16x288xbf16>,
    %11 = vector.extract_strided_slice %4 {offsets = [0, 18], sizes = [16, 288], strides = [1, 1]} : vector<16x342xbf16> to vector<16x288xbf16>
    %c48 = arith.constant 48 : index
    %c0_8 = arith.constant 0 : index
    %12 = vector.load %arg8[%c48, %c0_8] : memref<144x288xbf16, #tpu.memory_space<vmem>>, vector<16x288xbf16>
    tpu.vector_store %arg8[%c48, %c0_8], %11 {strides = array<i32>} : memref<144x288xbf16, #tpu.memory_space<vmem>>, vector<16x288xbf16>,
    %13 = vector.extract_strided_slice %4 {offsets = [0, 19], sizes = [16, 288], strides = [1, 1]} : vector<16x342xbf16> to vector<16x288xbf16>
    %c64 = arith.constant 64 : index
    %c0_9 = arith.constant 0 : index
    %14 = vector.load %arg8[%c64, %c0_9] : memref<144x288xbf16, #tpu.memory_space<vmem>>, vector<16x288xbf16>
    tpu.vector_store %arg8[%c64, %c0_9], %13 {strides = array<i32>} : memref<144x288xbf16, #tpu.memory_space<vmem>>, vector<16x288xbf16>,
    %15 = vector.extract_strided_slice %4 {offsets = [0, 20], sizes = [16, 288], strides = [1, 1]} : vector<16x342xbf16> to vector<16x288xbf16>
    %c80 = arith.constant 80 : index
    %c0_10 = arith.constant 0 : index
    %16 = vector.load %arg8[%c80, %c0_10] : memref<144x288xbf16, #tpu.memory_space<vmem>>, vector<16x288xbf16>
    tpu.vector_store %arg8[%c80, %c0_10], %15 {strides = array<i32>} : memref<144x288xbf16, #tpu.memory_space<vmem>>, vector<16x288xbf16>,
    %17 = vector.extract_strided_slice %4 {offsets = [0, 36], sizes = [16, 288], strides = [1, 1]} : vector<16x342xbf16> to vector<16x288xbf16>
    %c96 = arith.constant 96 : index
    %c0_11 = arith.constant 0 : index
    %18 = vector.load %arg8[%c96, %c0_11] : memref<144x288xbf16, #tpu.memory_space<vmem>>, vector<16x288xbf16>
    tpu.vector_store %arg8[%c96, %c0_11], %17 {strides = array<i32>} : memref<144x288xbf16, #tpu.memory_space<vmem>>, vector<16x288xbf16>,
    %19 = vector.extract_strided_slice %4 {offsets = [0, 37], sizes = [16, 288], strides = [1, 1]} : vector<16x342xbf16> to vector<16x288xbf16>
    %c112 = arith.constant 112 : index
    %c0_12 = arith.constant 0 : index
    %20 = vector.load %arg8[%c112, %c0_12] : memref<144x288xbf16, #tpu.memory_space<vmem>>, vector<16x288xbf16>
    tpu.vector_store %arg8[%c112, %c0_12], %19 {strides = array<i32>} : memref<144x288xbf16, #tpu.memory_space<vmem>>, vector<16x288xbf16>,
    %21 = vector.extract_strided_slice %4 {offsets = [0, 38], sizes = [16, 288], strides = [1, 1]} : vector<16x342xbf16> to vector<16x288xbf16>
    %c128 = arith.constant 128 : index
    %c0_13 = arith.constant 0 : index
    %22 = vector.load %arg8[%c128, %c0_13] : memref<144x288xbf16, #tpu.memory_space<vmem>>, vector<16x288xbf16>
    tpu.vector_store %arg8[%c128, %c0_13], %21 {strides = array<i32>} : memref<144x288xbf16, #tpu.memory_space<vmem>>, vector<16x288xbf16>,
    %c0_14 = arith.constant 0 : index
    %c0_15 = arith.constant 0 : index
    %23 = vector.load %arg8[%c0_14, %c0_15] : memref<144x288xbf16, #tpu.memory_space<vmem>>, vector<144x288xbf16>
    %c0_16 = arith.constant 0 : index
    %c0_17 = arith.constant 0 : index
    %24 = vector.load %arg3[%c0_16, %c0_17] : memref<8x144xbf16, #tpu.memory_space<vmem>>, vector<8x144xbf16>
    %cst = arith.constant dense<0.000000e+00> : vector<8x288xf32>
    %25 = tpu.matmul %24, %23, %cst {dimension_numbers = #tpu.dot_dimension_numbers<[1], [0], [0], [1], [0, 0, 1, 1], [], []>} : vector<8x144xbf16>, vector<144x288xbf16>, vector<8x288xf32> -> vector<8x288xf32>
    %c0_18 = arith.constant 0 : index
    %c0_19 = arith.constant 0 : index
    %26 = vector.load %arg4[%c0_18, %c0_19] : memref<1x288xf32, #tpu.memory_space<vmem>>, vector<1x288xf32>
    %27 = vector.broadcast %26 : vector<1x288xf32> to vector<8x288xf32>
    %28 = arith.mulf %25, %27 : vector<8x288xf32>
    %c0_20 = arith.constant 0 : index
    %c0_21 = arith.constant 0 : index
    %c0_22 = arith.constant 0 : index
    %29 = vector.load %arg6[%c0_20, %c0_21, %c0_22] : memref<1x8x1xf32, #tpu.memory_space<vmem>>, vector<1x8x1xf32>
    %30 = vector.shape_cast %29 : vector<1x8x1xf32> to vector<8x1xf32>
    %cst_23 = arith.constant dense<0.000000e+00> : vector<8xf32>
    %31 = vector.multi_reduction <add>, %28, %cst_23 [1] : vector<8x288xf32> to vector<8xf32>
    %32 = vector.shape_cast %31 : vector<8xf32> to vector<8x1xf32>
    %33 = arith.addf %30, %32 : vector<8x1xf32>
    %c0_24 = arith.constant 0 : index
    %c0_25 = arith.constant 0 : index
    %c0_26 = arith.constant 0 : index
    %34 = vector.load %arg6[%c0_24, %c0_25, %c0_26] : memref<1x8x1xf32, #tpu.memory_space<vmem>>, vector<1x8x1xf32>
    %35 = vector.shape_cast %34 : vector<1x8x1xf32> to vector<8x1xf32>
    %36 = vector.shape_cast %33 : vector<8x1xf32> to vector<1x8x1xf32>
    tpu.vector_store %arg6[%c0_24, %c0_25, %c0_26], %36 {strides = array<i32>} : memref<1x8x1xf32, #tpu.memory_space<vmem>>, vector<1x8x1xf32>,
    %c0_27 = arith.constant 0 : index
    %c0_28 = arith.constant 0 : index
    %c0_29 = arith.constant 0 : index
    %37 = vector.load %arg7[%c0_27, %c0_28, %c0_29] : memref<1x8x1xf32, #tpu.memory_space<vmem>>, vector<1x8x1xf32>
    %38 = vector.shape_cast %37 : vector<1x8x1xf32> to vector<8x1xf32>
    %39 = arith.mulf %28, %28 : vector<8x288xf32>
    %cst_30 = arith.constant dense<0.000000e+00> : vector<8xf32>
    %40 = vector.multi_reduction <add>, %39, %cst_30 [1] : vector<8x288xf32> to vector<8xf32>
    %41 = vector.shape_cast %40 : vector<8xf32> to vector<8x1xf32>
    %42 = arith.addf %38, %41 : vector<8x1xf32>
    %c0_31 = arith.constant 0 : index
    %c0_32 = arith.constant 0 : index
    %c0_33 = arith.constant 0 : index
    %43 = vector.load %arg7[%c0_31, %c0_32, %c0_33] : memref<1x8x1xf32, #tpu.memory_space<vmem>>, vector<1x8x1xf32>
    %44 = vector.shape_cast %43 : vector<1x8x1xf32> to vector<8x1xf32>
    %45 = vector.shape_cast %42 : vector<8x1xf32> to vector<1x8x1xf32>
    tpu.vector_store %arg7[%c0_31, %c0_32, %c0_33], %45 {strides = array<i32>} : memref<1x8x1xf32, #tpu.memory_space<vmem>>, vector<1x8x1xf32>,
    %46 = arith.truncf %25 : vector<8x288xf32> to vector<8x288xbf16>
    %c0_34 = arith.constant 0 : index
    %c0_35 = arith.constant 0 : index
    %c0_36 = arith.constant 0 : index
    %47 = vector.load %arg5[%c0_34, %c0_35, %c0_36] : memref<1x8x288xbf16, #tpu.memory_space<vmem>>, vector<1x8x288xbf16>
    %48 = vector.shape_cast %47 : vector<1x8x288xbf16> to vector<8x288xbf16>
    %49 = vector.shape_cast %46 : vector<8x288xbf16> to vector<1x8x288xbf16>
    tpu.vector_store %arg5[%c0_34, %c0_35, %c0_36], %49 {strides = array<i32>} : memref<1x8x288xbf16, #tpu.memory_space<vmem>>, vector<1x8x288xbf16>,
    return
  }
  func.func @transform_0(%arg0: i32, %arg1: i32) -> (i32, i32, i32, i32) {
    %c0_i32 = arith.constant 0 : i32
    %c0_i32_0 = arith.constant 0 : i32
    %c0_i32_1 = arith.constant 0 : i32
    return %arg0, %arg1, %c0_i32, %c0_i32_0 : i32, i32, i32, i32
  }
  func.func @transform_1(%arg0: i32, %arg1: i32) -> (i32, i32) {
    %c0_i32 = arith.constant 0 : i32
    %c0_i32_0 = arith.constant 0 : i32
    %c0_i32_1 = arith.constant 0 : i32
    return %c0_i32, %c0_i32_0 : i32, i32
  }
  func.func @transform_2(%arg0: i32, %arg1: i32) -> (i32, i32) {
    %c0_i32 = arith.constant 0 : i32
    %c0_i32_0 = arith.constant 0 : i32
    %c0_i32_1 = arith.constant 0 : i32
    return %c0_i32, %c0_i32_0 : i32, i32
  }
  func.func @transform_3(%arg0: i32, %arg1: i32) -> (i32, i32, i32) {
    %c0_i32 = arith.constant 0 : i32
    %c0_i32_0 = arith.constant 0 : i32
    return %arg0, %c0_i32, %arg1 : i32, i32, i32
  }
  func.func @transform_4(%arg0: i32, %arg1: i32) -> (i32, i32, i32) {
    %c0_i32 = arith.constant 0 : i32
    %c0_i32_0 = arith.constant 0 : i32
    %c0_i32_1 = arith.constant 0 : i32
    return %arg0, %c0_i32, %c0_i32_0 : i32, i32, i32
  }
  func.func @transform_5(%arg0: i32, %arg1: i32) -> (i32, i32, i32) {
    %c0_i32 = arith.constant 0 : i32
    %c0_i32_0 = arith.constant 0 : i32
    %c0_i32_1 = arith.constant 0 : i32
    return %arg0, %c0_i32, %c0_i32_0 : i32, i32, i32
  }
}

module attributes {stable_mosaic.version = 11 : i64} {
  func.func @kernel(%arg0: i32, %arg1: i32, %arg2: memref<1x8x256xbf16, #tpu.memory_space<vmem>>, %arg3: memref<2x8xbf16, #tpu.memory_space<vmem>>, %arg4: memref<2x1xf32, #tpu.memory_space<vmem>>, %arg5: memref<1x2x256xf32, #tpu.memory_space<vmem>>) attributes {dimension_semantics = [#tpu.dimension_semantics<parallel>, #tpu.dimension_semantics<parallel>], iteration_bounds = array<i64: 2, 1>, scalar_prefetch = 0 : i64, scratch_operands = 0 : i64, tpu.core_type = #tpu.core_type<tc>, window_params = [{transform_indices = @transform_0, window_bounds = array<i64: 1, 8, 256>}, {pipeline_mode = #tpu.pipeline_mode<synchronous>, transform_indices = @transform_1, window_bounds = array<i64: 2, 8>}, {pipeline_mode = #tpu.pipeline_mode<synchronous>, transform_indices = @transform_2, window_bounds = array<i64: 2, 1>}, {transform_indices = @transform_3, window_bounds = array<i64: 1, 2, 256>}]} {
    %c0 = arith.constant 0 : index
    %c0_0 = arith.constant 0 : index
    %0 = vector.load %arg3[%c0, %c0_0] : memref<2x8xbf16, #tpu.memory_space<vmem>>, vector<2x8xbf16>
    %c0_1 = arith.constant 0 : index
    %c0_2 = arith.constant 0 : index
    %c0_3 = arith.constant 0 : index
    %1 = vector.load %arg2[%c0_1, %c0_2, %c0_3] : memref<1x8x256xbf16, #tpu.memory_space<vmem>>, vector<1x8x256xbf16>
    %2 = vector.shape_cast %1 : vector<1x8x256xbf16> to vector<8x256xbf16>
    %cst = arith.constant dense<0.000000e+00> : vector<2x256xf32>
    %3 = tpu.matmul %0, %2, %cst {dimension_numbers = #tpu.dot_dimension_numbers<[1], [0], [0], [1], [0, 0, 1, 1], [], []>} : vector<2x8xbf16>, vector<8x256xbf16>, vector<2x256xf32> -> vector<2x256xf32>
    %c0_4 = arith.constant 0 : index
    %c0_5 = arith.constant 0 : index
    %4 = vector.load %arg4[%c0_4, %c0_5] : memref<2x1xf32, #tpu.memory_space<vmem>>, vector<2x1xf32>
    %5 = vector.broadcast %4 : vector<2x1xf32> to vector<2x256xf32>
    %6 = arith.addf %3, %5 : vector<2x256xf32>
    %c0_6 = arith.constant 0 : index
    %c0_7 = arith.constant 0 : index
    %c0_8 = arith.constant 0 : index
    %7 = vector.load %arg5[%c0_6, %c0_7, %c0_8] : memref<1x2x256xf32, #tpu.memory_space<vmem>>, vector<1x2x256xf32>
    %8 = vector.shape_cast %7 : vector<1x2x256xf32> to vector<2x256xf32>
    %9 = vector.shape_cast %6 : vector<2x256xf32> to vector<1x2x256xf32>
    tpu.vector_store %arg5[%c0_6, %c0_7, %c0_8], %9 {strides = array<i32>} : memref<1x2x256xf32, #tpu.memory_space<vmem>>, vector<1x2x256xf32>,
    return
  }
  func.func @transform_0(%arg0: i32, %arg1: i32) -> (i32, i32, i32) {
    %c0_i32 = arith.constant 0 : i32
    %c0_i32_0 = arith.constant 0 : i32
    return %arg0, %c0_i32, %arg1 : i32, i32, i32
  }
  func.func @transform_1(%arg0: i32, %arg1: i32) -> (i32, i32) {
    %c0_i32 = arith.constant 0 : i32
    %c0_i32_0 = arith.constant 0 : i32
    %c0_i32_1 = arith.constant 0 : i32
    return %c0_i32, %c0_i32_0 : i32, i32
  }
  func.func @transform_2(%arg0: i32, %arg1: i32) -> (i32, i32) {
    %c0_i32 = arith.constant 0 : i32
    %c0_i32_0 = arith.constant 0 : i32
    %c0_i32_1 = arith.constant 0 : i32
    return %c0_i32, %c0_i32_0 : i32, i32
  }
  func.func @transform_3(%arg0: i32, %arg1: i32) -> (i32, i32, i32) {
    %c0_i32 = arith.constant 0 : i32
    %c0_i32_0 = arith.constant 0 : i32
    return %arg0, %c0_i32, %arg1 : i32, i32, i32
  }
}

module attributes {stable_mosaic.version = 11 : i64} {
  func.func @_expand_dc_kernel(%arg0: i32, %arg1: i32, %arg2: memref<1x16x16xf32, #tpu.memory_space<vmem>>, %arg3: memref<1x16x16xf32, #tpu.memory_space<vmem>>, %arg4: memref<1x1x16x16xf32, #tpu.memory_space<vmem>>, %arg5: memref<1x1x16x16xf32, #tpu.memory_space<vmem>>, %arg6: memref<1x1x16x16xf32, #tpu.memory_space<vmem>>, %arg7: memref<1x1x16x16xf32, #tpu.memory_space<vmem>>, %arg8: memref<1x1x16x16xf32, #tpu.memory_space<vmem>>, %arg9: memref<1x1x16x16xf32, #tpu.memory_space<vmem>>, %arg10: memref<1x1x1x16xf32, #tpu.memory_space<vmem>>, %arg11: memref<16x16xf32, #tpu.memory_space<vmem>>, %arg12: memref<16x16xf32, #tpu.memory_space<vmem>>, %arg13: memref<16x16xf32, #tpu.memory_space<vmem>>, %arg14: memref<16x16xf32, #tpu.memory_space<vmem>>, %arg15: memref<16x16xf32, #tpu.memory_space<vmem>>, %arg16: memref<16x16xf32, #tpu.memory_space<vmem>>, %arg17: memref<1xf32, #tpu.memory_space<smem>>, %arg18: memref<1x1x16x16xf32, #tpu.memory_space<vmem>>, %arg19: memref<1x1x16x16xf32, #tpu.memory_space<vmem>>) attributes {dimension_semantics = [#tpu.dimension_semantics<parallel>, #tpu.dimension_semantics<parallel>], iteration_bounds = array<i64: 2, 4>, scalar_prefetch = 0 : i64, scratch_operands = 0 : i64, tpu.core_type = #tpu.core_type<tc>, window_params = [{transform_indices = @transform_0, window_bounds = array<i64: 1, 16, 16>}, {transform_indices = @transform_1, window_bounds = array<i64: 1, 16, 16>}, {transform_indices = @transform_2, window_bounds = array<i64: 1, 1, 16, 16>}, {transform_indices = @transform_3, window_bounds = array<i64: 1, 1, 16, 16>}, {transform_indices = @transform_4, window_bounds = array<i64: 1, 1, 16, 16>}, {transform_indices = @transform_5, window_bounds = array<i64: 1, 1, 16, 16>}, {transform_indices = @transform_6, window_bounds = array<i64: 1, 1, 16, 16>}, {transform_indices = @transform_7, window_bounds = array<i64: 1, 1, 16, 16>}, {transform_indices = @transform_8, window_bounds = array<i64: 1, 1, 1, 16>}, {pipeline_mode = #tpu.pipeline_mode<synchronous>, transform_indices = @transform_9, window_bounds = array<i64: 16, 16>}, {pipeline_mode = #tpu.pipeline_mode<synchronous>, transform_indices = @transform_10, window_bounds = array<i64: 16, 16>}, {pipeline_mode = #tpu.pipeline_mode<synchronous>, transform_indices = @transform_11, window_bounds = array<i64: 16, 16>}, {pipeline_mode = #tpu.pipeline_mode<synchronous>, transform_indices = @transform_12, window_bounds = array<i64: 16, 16>}, {pipeline_mode = #tpu.pipeline_mode<synchronous>, transform_indices = @transform_13, window_bounds = array<i64: 16, 16>}, {pipeline_mode = #tpu.pipeline_mode<synchronous>, transform_indices = @transform_14, window_bounds = array<i64: 16, 16>}, {transform_indices = @transform_15, window_bounds = array<i64: 1>}, {transform_indices = @transform_16, window_bounds = array<i64: 1, 1, 16, 16>}, {transform_indices = @transform_17, window_bounds = array<i64: 1, 1, 16, 16>}]} {
    %c0 = arith.constant 0 : index
    %c0_0 = arith.constant 0 : index
    %c0_1 = arith.constant 0 : index
    %c0_2 = arith.constant 0 : index
    %0 = vector.load %arg4[%c0, %c0_0, %c0_1, %c0_2] : memref<1x1x16x16xf32, #tpu.memory_space<vmem>>, vector<1x1x16x16xf32>
    %1 = vector.shape_cast %0 : vector<1x1x16x16xf32> to vector<16x16xf32>
    %c0_3 = arith.constant 0 : index
    %c0_4 = arith.constant 0 : index
    %c0_5 = arith.constant 0 : index
    %c0_6 = arith.constant 0 : index
    %2 = vector.load %arg5[%c0_3, %c0_4, %c0_5, %c0_6] : memref<1x1x16x16xf32, #tpu.memory_space<vmem>>, vector<1x1x16x16xf32>
    %3 = vector.shape_cast %2 : vector<1x1x16x16xf32> to vector<16x16xf32>
    %c0_7 = arith.constant 0 : index
    %c0_8 = arith.constant 0 : index
    %c0_9 = arith.constant 0 : index
    %4 = vector.load %arg2[%c0_7, %c0_8, %c0_9] : memref<1x16x16xf32, #tpu.memory_space<vmem>>, vector<1x16x16xf32>
    %5 = vector.shape_cast %4 : vector<1x16x16xf32> to vector<16x16xf32>
    %c0_10 = arith.constant 0 : index
    %c0_11 = arith.constant 0 : index
    %c0_12 = arith.constant 0 : index
    %6 = vector.load %arg3[%c0_10, %c0_11, %c0_12] : memref<1x16x16xf32, #tpu.memory_space<vmem>>, vector<1x16x16xf32>
    %7 = vector.shape_cast %6 : vector<1x16x16xf32> to vector<16x16xf32>
    %8 = arith.mulf %5, %1 : vector<16x16xf32>
    %9 = arith.mulf %7, %3 : vector<16x16xf32>
    %10 = arith.subf %8, %9 : vector<16x16xf32>
    %11 = arith.mulf %5, %3 : vector<16x16xf32>
    %12 = arith.mulf %7, %1 : vector<16x16xf32>
    %13 = arith.addf %11, %12 : vector<16x16xf32>
    %c0_13 = arith.constant 0 : index
    %c0_14 = arith.constant 0 : index
    %14 = vector.load %arg11[%c0_13, %c0_14] : memref<16x16xf32, #tpu.memory_space<vmem>>, vector<16x16xf32>
    %c0_15 = arith.constant 0 : index
    %c0_16 = arith.constant 0 : index
    %15 = vector.load %arg12[%c0_15, %c0_16] : memref<16x16xf32, #tpu.memory_space<vmem>>, vector<16x16xf32>
    %c0_17 = arith.constant 0 : index
    %c0_18 = arith.constant 0 : index
    %16 = vector.load %arg13[%c0_17, %c0_18] : memref<16x16xf32, #tpu.memory_space<vmem>>, vector<16x16xf32>
    %cst = arith.constant dense<0.000000e+00> : vector<16x16xf32>
    %17 = tpu.matmul %14, %10, %cst {dimension_numbers = #tpu.dot_dimension_numbers<[1], [0], [0], [1], [0, 0, 1, 1], [], []>} : vector<16x16xf32>, vector<16x16xf32>, vector<16x16xf32> -> vector<16x16xf32>
    %cst_19 = arith.constant dense<0.000000e+00> : vector<16x16xf32>
    %18 = tpu.matmul %15, %13, %cst_19 {dimension_numbers = #tpu.dot_dimension_numbers<[1], [0], [0], [1], [0, 0, 1, 1], [], []>} : vector<16x16xf32>, vector<16x16xf32>, vector<16x16xf32> -> vector<16x16xf32>
    %19 = arith.addf %10, %13 : vector<16x16xf32>
    %cst_20 = arith.constant dense<0.000000e+00> : vector<16x16xf32>
    %20 = tpu.matmul %16, %19, %cst_20 {dimension_numbers = #tpu.dot_dimension_numbers<[1], [0], [0], [1], [0, 0, 1, 1], [], []>} : vector<16x16xf32>, vector<16x16xf32>, vector<16x16xf32> -> vector<16x16xf32>
    %21 = arith.subf %17, %18 : vector<16x16xf32>
    %22 = arith.subf %20, %17 : vector<16x16xf32>
    %23 = arith.subf %22, %18 : vector<16x16xf32>
    %c0_21 = arith.constant 0 : index
    %c0_22 = arith.constant 0 : index
    %24 = vector.load %arg14[%c0_21, %c0_22] : memref<16x16xf32, #tpu.memory_space<vmem>>, vector<16x16xf32>
    %c0_23 = arith.constant 0 : index
    %c0_24 = arith.constant 0 : index
    %25 = vector.load %arg15[%c0_23, %c0_24] : memref<16x16xf32, #tpu.memory_space<vmem>>, vector<16x16xf32>
    %c0_25 = arith.constant 0 : index
    %c0_26 = arith.constant 0 : index
    %26 = vector.load %arg16[%c0_25, %c0_26] : memref<16x16xf32, #tpu.memory_space<vmem>>, vector<16x16xf32>
    %cst_27 = arith.constant dense<0.000000e+00> : vector<16x16xf32>
    %27 = tpu.matmul %21, %24, %cst_27 {dimension_numbers = #tpu.dot_dimension_numbers<[1], [0], [0], [1], [0, 0, 1, 1], [], []>} : vector<16x16xf32>, vector<16x16xf32>, vector<16x16xf32> -> vector<16x16xf32>
    %cst_28 = arith.constant dense<0.000000e+00> : vector<16x16xf32>
    %28 = tpu.matmul %23, %25, %cst_28 {dimension_numbers = #tpu.dot_dimension_numbers<[1], [0], [0], [1], [0, 0, 1, 1], [], []>} : vector<16x16xf32>, vector<16x16xf32>, vector<16x16xf32> -> vector<16x16xf32>
    %29 = arith.addf %21, %23 : vector<16x16xf32>
    %cst_29 = arith.constant dense<0.000000e+00> : vector<16x16xf32>
    %30 = tpu.matmul %29, %26, %cst_29 {dimension_numbers = #tpu.dot_dimension_numbers<[1], [0], [0], [1], [0, 0, 1, 1], [], []>} : vector<16x16xf32>, vector<16x16xf32>, vector<16x16xf32> -> vector<16x16xf32>
    %31 = arith.subf %27, %28 : vector<16x16xf32>
    %32 = arith.subf %30, %27 : vector<16x16xf32>
    %33 = arith.subf %32, %28 : vector<16x16xf32>
    %c0_30 = arith.constant 0 : index
    %c0_31 = arith.constant 0 : index
    %c0_32 = arith.constant 0 : index
    %c0_33 = arith.constant 0 : index
    %34 = vector.load %arg6[%c0_30, %c0_31, %c0_32, %c0_33] : memref<1x1x16x16xf32, #tpu.memory_space<vmem>>, vector<1x1x16x16xf32>
    %35 = vector.shape_cast %34 : vector<1x1x16x16xf32> to vector<16x16xf32>
    %c0_34 = arith.constant 0 : index
    %c0_35 = arith.constant 0 : index
    %c0_36 = arith.constant 0 : index
    %c0_37 = arith.constant 0 : index
    %36 = vector.load %arg7[%c0_34, %c0_35, %c0_36, %c0_37] : memref<1x1x16x16xf32, #tpu.memory_space<vmem>>, vector<1x1x16x16xf32>
    %37 = vector.shape_cast %36 : vector<1x1x16x16xf32> to vector<16x16xf32>
    %c0_38 = arith.constant 0 : index
    %38 = memref.load %arg17[%c0_38] : memref<1xf32, #tpu.memory_space<smem>>
    %c0_39 = arith.constant 0 : index
    %c0_40 = arith.constant 0 : index
    %c0_41 = arith.constant 0 : index
    %c0_42 = arith.constant 0 : index
    %39 = vector.load %arg10[%c0_39, %c0_40, %c0_41, %c0_42] : memref<1x1x1x16xf32, #tpu.memory_space<vmem>>, vector<1x1x1x16xf32>
    %40 = vector.shape_cast %39 : vector<1x1x1x16xf32> to vector<1x16xf32>
    %cst_43 = arith.constant 5.000000e-01 : f32
    %41 = vector.broadcast %cst_43 : f32 to vector<1x16xf32>
    %42 = arith.cmpf ogt, %40, %41 : vector<1x16xf32>
    %43 = vector.shape_cast %42 : vector<1x16xi1> to vector<1x16xi1>
    %44 = vector.broadcast %43 : vector<1x16xi1> to vector<16x16xi1>
    %c0_44 = arith.constant 0 : index
    %c0_45 = arith.constant 0 : index
    %c0_46 = arith.constant 0 : index
    %c0_47 = arith.constant 0 : index
    %45 = vector.load %arg8[%c0_44, %c0_45, %c0_46, %c0_47] : memref<1x1x16x16xf32, #tpu.memory_space<vmem>>, vector<1x1x16x16xf32>
    %46 = vector.shape_cast %45 : vector<1x1x16x16xf32> to vector<16x16xf32>
    %47 = arith.subf %35, %46 : vector<16x16xf32>
    %cst_48 = arith.constant 0.000000e+00 : f32
    %48 = vector.broadcast %cst_48 : f32 to vector<16x16xf32>
    %49 = arith.select %44, %47, %48 : vector<16x16xi1>, vector<16x16xf32>
    %50 = vector.broadcast %38 : f32 to vector<16x16xf32>
    %51 = arith.mulf %49, %50 : vector<16x16xf32>
    %c0_49 = arith.constant 0 : index
    %c0_50 = arith.constant 0 : index
    %c0_51 = arith.constant 0 : index
    %c0_52 = arith.constant 0 : index
    %52 = vector.load %arg9[%c0_49, %c0_50, %c0_51, %c0_52] : memref<1x1x16x16xf32, #tpu.memory_space<vmem>>, vector<1x1x16x16xf32>
    %53 = vector.shape_cast %52 : vector<1x1x16x16xf32> to vector<16x16xf32>
    %54 = arith.subf %37, %53 : vector<16x16xf32>
    %cst_53 = arith.constant 0.000000e+00 : f32
    %55 = vector.broadcast %cst_53 : f32 to vector<16x16xf32>
    %56 = arith.select %44, %54, %55 : vector<16x16xi1>, vector<16x16xf32>
    %57 = vector.broadcast %38 : f32 to vector<16x16xf32>
    %58 = arith.mulf %56, %57 : vector<16x16xf32>
    %59 = arith.subf %35, %51 : vector<16x16xf32>
    %60 = arith.subf %59, %31 : vector<16x16xf32>
    %c0_54 = arith.constant 0 : index
    %c0_55 = arith.constant 0 : index
    %c0_56 = arith.constant 0 : index
    %c0_57 = arith.constant 0 : index
    %61 = vector.load %arg18[%c0_54, %c0_55, %c0_56, %c0_57] : memref<1x1x16x16xf32, #tpu.memory_space<vmem>>, vector<1x1x16x16xf32>
    %62 = vector.shape_cast %61 : vector<1x1x16x16xf32> to vector<16x16xf32>
    %63 = vector.shape_cast %60 : vector<16x16xf32> to vector<1x1x16x16xf32>
    tpu.vector_store %arg18[%c0_54, %c0_55, %c0_56, %c0_57], %63 {strides = array<i32>} : memref<1x1x16x16xf32, #tpu.memory_space<vmem>>, vector<1x1x16x16xf32>,
    %64 = arith.subf %37, %58 : vector<16x16xf32>
    %65 = arith.subf %64, %33 : vector<16x16xf32>
    %c0_58 = arith.constant 0 : index
    %c0_59 = arith.constant 0 : index
    %c0_60 = arith.constant 0 : index
    %c0_61 = arith.constant 0 : index
    %66 = vector.load %arg19[%c0_58, %c0_59, %c0_60, %c0_61] : memref<1x1x16x16xf32, #tpu.memory_space<vmem>>, vector<1x1x16x16xf32>
    %67 = vector.shape_cast %66 : vector<1x1x16x16xf32> to vector<16x16xf32>
    %68 = vector.shape_cast %65 : vector<16x16xf32> to vector<1x1x16x16xf32>
    tpu.vector_store %arg19[%c0_58, %c0_59, %c0_60, %c0_61], %68 {strides = array<i32>} : memref<1x1x16x16xf32, #tpu.memory_space<vmem>>, vector<1x1x16x16xf32>,
    return
  }
  func.func @transform_0(%arg0: i32, %arg1: i32) -> (i32, i32, i32) {
    %c0_i32 = arith.constant 0 : i32
    %c0_i32_0 = arith.constant 0 : i32
    %c0_i32_1 = arith.constant 0 : i32
    return %arg0, %c0_i32, %c0_i32_0 : i32, i32, i32
  }
  func.func @transform_1(%arg0: i32, %arg1: i32) -> (i32, i32, i32) {
    %c0_i32 = arith.constant 0 : i32
    %c0_i32_0 = arith.constant 0 : i32
    %c0_i32_1 = arith.constant 0 : i32
    return %arg0, %c0_i32, %c0_i32_0 : i32, i32, i32
  }
  func.func @transform_2(%arg0: i32, %arg1: i32) -> (i32, i32, i32, i32) {
    %c0_i32 = arith.constant 0 : i32
    %c0_i32_0 = arith.constant 0 : i32
    %c0_i32_1 = arith.constant 0 : i32
    return %arg0, %arg1, %c0_i32, %c0_i32_0 : i32, i32, i32, i32
  }
  func.func @transform_3(%arg0: i32, %arg1: i32) -> (i32, i32, i32, i32) {
    %c0_i32 = arith.constant 0 : i32
    %c0_i32_0 = arith.constant 0 : i32
    %c0_i32_1 = arith.constant 0 : i32
    return %arg0, %arg1, %c0_i32, %c0_i32_0 : i32, i32, i32, i32
  }
  func.func @transform_4(%arg0: i32, %arg1: i32) -> (i32, i32, i32, i32) {
    %c0_i32 = arith.constant 0 : i32
    %c0_i32_0 = arith.constant 0 : i32
    %c0_i32_1 = arith.constant 0 : i32
    return %arg0, %arg1, %c0_i32, %c0_i32_0 : i32, i32, i32, i32
  }
  func.func @transform_5(%arg0: i32, %arg1: i32) -> (i32, i32, i32, i32) {
    %c0_i32 = arith.constant 0 : i32
    %c0_i32_0 = arith.constant 0 : i32
    %c0_i32_1 = arith.constant 0 : i32
    return %arg0, %arg1, %c0_i32, %c0_i32_0 : i32, i32, i32, i32
  }
  func.func @transform_6(%arg0: i32, %arg1: i32) -> (i32, i32, i32, i32) {
    %c0_i32 = arith.constant 0 : i32
    %c0_i32_0 = arith.constant 0 : i32
    %c0_i32_1 = arith.constant 0 : i32
    return %arg0, %arg1, %c0_i32, %c0_i32_0 : i32, i32, i32, i32
  }
  func.func @transform_7(%arg0: i32, %arg1: i32) -> (i32, i32, i32, i32) {
    %c0_i32 = arith.constant 0 : i32
    %c0_i32_0 = arith.constant 0 : i32
    %c0_i32_1 = arith.constant 0 : i32
    return %arg0, %arg1, %c0_i32, %c0_i32_0 : i32, i32, i32, i32
  }
  func.func @transform_8(%arg0: i32, %arg1: i32) -> (i32, i32, i32, i32) {
    %c0_i32 = arith.constant 0 : i32
    %c0_i32_0 = arith.constant 0 : i32
    %c0_i32_1 = arith.constant 0 : i32
    %c0_i32_2 = arith.constant 0 : i32
    return %arg0, %c0_i32, %c0_i32_0, %c0_i32_1 : i32, i32, i32, i32
  }
  func.func @transform_9(%arg0: i32, %arg1: i32) -> (i32, i32) {
    %c0_i32 = arith.constant 0 : i32
    %c0_i32_0 = arith.constant 0 : i32
    %c0_i32_1 = arith.constant 0 : i32
    return %c0_i32, %c0_i32_0 : i32, i32
  }
  func.func @transform_10(%arg0: i32, %arg1: i32) -> (i32, i32) {
    %c0_i32 = arith.constant 0 : i32
    %c0_i32_0 = arith.constant 0 : i32
    %c0_i32_1 = arith.constant 0 : i32
    return %c0_i32, %c0_i32_0 : i32, i32
  }
  func.func @transform_11(%arg0: i32, %arg1: i32) -> (i32, i32) {
    %c0_i32 = arith.constant 0 : i32
    %c0_i32_0 = arith.constant 0 : i32
    %c0_i32_1 = arith.constant 0 : i32
    return %c0_i32, %c0_i32_0 : i32, i32
  }
  func.func @transform_12(%arg0: i32, %arg1: i32) -> (i32, i32) {
    %c0_i32 = arith.constant 0 : i32
    %c0_i32_0 = arith.constant 0 : i32
    %c0_i32_1 = arith.constant 0 : i32
    return %c0_i32, %c0_i32_0 : i32, i32
  }
  func.func @transform_13(%arg0: i32, %arg1: i32) -> (i32, i32) {
    %c0_i32 = arith.constant 0 : i32
    %c0_i32_0 = arith.constant 0 : i32
    %c0_i32_1 = arith.constant 0 : i32
    return %c0_i32, %c0_i32_0 : i32, i32
  }
  func.func @transform_14(%arg0: i32, %arg1: i32) -> (i32, i32) {
    %c0_i32 = arith.constant 0 : i32
    %c0_i32_0 = arith.constant 0 : i32
    %c0_i32_1 = arith.constant 0 : i32
    return %c0_i32, %c0_i32_0 : i32, i32
  }
  func.func @transform_15(%arg0: i32, %arg1: i32) -> i32 {
    %c0_i32 = arith.constant 0 : i32
    %c0_i32_0 = arith.constant 0 : i32
    return %c0_i32 : i32
  }
  func.func @transform_16(%arg0: i32, %arg1: i32) -> (i32, i32, i32, i32) {
    %c0_i32 = arith.constant 0 : i32
    %c0_i32_0 = arith.constant 0 : i32
    %c0_i32_1 = arith.constant 0 : i32
    return %arg0, %arg1, %c0_i32, %c0_i32_0 : i32, i32, i32, i32
  }
  func.func @transform_17(%arg0: i32, %arg1: i32) -> (i32, i32, i32, i32) {
    %c0_i32 = arith.constant 0 : i32
    %c0_i32_0 = arith.constant 0 : i32
    %c0_i32_1 = arith.constant 0 : i32
    return %arg0, %arg1, %c0_i32, %c0_i32_0 : i32, i32, i32, i32
  }
}

</mosaic_0001>

<bundles_post_ra>
// kernel: varnet2_forward.55
= control target key start
LH: loop header
LB: loop body
LE: loop exit
PB: predicated region body
PF: predicated region fallthrough
CT: control target
= control target key end

     0   :  { %s1260_s17 = smov 0   ;;  %s1262_s18 = smov 0   ;;  %s1406_s0 = inlined_call_operand.vmem [shape: f32[2,4,16,16], index: 0, kind: input, shape index: {}]   ;;  %s1407_s1 = inlined_call_operand.vmem [shape: f32[2,4,16,16], index: 1, kind: input, shape index: {}]   ;;  %s1408_s2 = inlined_call_operand.vmem [shape: f32[2,4,16,16], index: 2, kind: input, shape index: {}]   ;;  %s1409_s3 = inlined_call_operand.vmem [shape: f32[2,4,16,16], index: 3, kind: input, shape index: {}]   ;;  %s1410_s4 = inlined_call_operand.vmem [shape: f32[16,16], index: 4, kind: input, shape index: {}, may-alias: {4,7}]   ;;  %s1411_s5 = inlined_call_operand.vmem [shape: f32[16,16], index: 5, kind: input, shape index: {}, may-alias: {5,8}]   ;;  %s1412_s6 = inlined_call_operand.vmem [shape: f32[16,16], index: 6, kind: input, shape index: {}, may-alias: {6,9}]   ;;  %s1413_s7 = inlined_call_operand.vmem [shape: f32[16,16], index: 7, kind: input, shape index: {}, may-alias: {4,7}]   ;;  %s1414_s8 = inlined_call_operand.vmem [shape: f32[16,16], index: 8, kind: input, shape index: {}, may-alias: {5,8}]   ;;  %s1415_s9 = inlined_call_operand.vmem [shape: f32[16,16], index: 9, kind: input, shape index: {}, may-alias: {6,9}]   ;;  %s1416_s10 = inlined_call_operand.vmem [shape: f32[2,16,16], index: 10, kind: output, shape index: {0}]   ;;  %s1417_s11 = inlined_call_operand.vmem [shape: f32[2,16,16], index: 11, kind: output, shape index: {1}]  }
   0x1   :  { %1424 = sst [smem:[#allocation9_spill]] %s1406_s0  ;;  %s1264_s19 = smov 0  }
   0x2   :  { %1425 = sst [smem:[#allocation10_spill]] %s1407_s1  ;;  %s1266_s20 = smov 0  }
   0x3   :  { %1426 = sst [smem:[#allocation11_spill]] %s1410_s4  ;;  %s1268_s21 = smov 0  }
   0x4   :  { %1427 = sst [smem:[#allocation12_spill]] %s1414_s8  ;;  %s1270_s22 = smov 0  }
   0x5   :  { %1428 = sst [smem:[#allocation13_spill]] %s1415_s9  ;;  %s1272_s23 = smov 0  }
   0x6 LB: > { %1429 = sst [smem:[#allocation2_spill]] %s1185_s20  ;;  %s34_s24 = sadd.s32 1, %s1185_s20  ;;  %s1197_s23 = sphi %s1272_s23, %s22_s23   ;;  %s1193_s22 = sphi %s1270_s22, %s1448_s22   ;;  %s1189_s21 = sphi %s1268_s21, %s1447_s21   ;;  %s1185_s20 = sphi %s1266_s20, %s1446_s20   ;;  %s1181_s19 = sphi %s1264_s19, %s1445_s19   ;;  %s1177_s18 = sphi %s1262_s18, %s1444_s18   ;;  %s1173_s17 = sphi %s1260_s17, %s1443_s17  }
   0x7   : > { %1430 = sst [smem:[#allocation3_spill]] %s1189_s21  ;;  %p35_p0 = scmp.ge.s32.totalorder %s34_s24, 4 }
   0x8   : > { %1431 = sst [smem:[#allocation4_spill]] %s1193_s22  ;;  %s37_s25 = sadd.s32 1, %s1189_s21 }
   0x9   : > { %1432 = sst [smem:[#allocation5_spill]] %s1197_s23  ;;  %p1057_p1 = scmp.ge.s32.totalorder %s1197_s23, 1 }
   0xa   : > { %p454_p2 = scmp.lt.s32.totalorder %s1197_s23, 17  ;;  %s1450_s24 = smov (%p35_p0, %s34_s24), 0 }
   0xb   : > { %1433 = sst [smem:[#allocation6_spill]] %s1450_s24  ;;  %s1452_s25 = smov (!%p35_p0, %s37_s25), %s1189_s21 }
   0xc   : > { %p455_p3 = pnand %p1057_p1, %p454_p2  ;;  %p39_p4 = scmp.ge.s32.totalorder %s1452_s25, 2 }
   0xd   : > { %s41_s26 = sadd.s32 1, %s1193_s22  ;;  %p554_p6 = scmp.lt.s32.totalorder (!%p455_p3), %s1181_s19, 1 }
   0xe   : > { %s1454_s25 = smov (%p39_p4, %s1452_s25), 0  ;;  %s1456_s26 = smov (!%p39_p4, %s41_s26), %s1193_s22 }
   0xf   : > { %1434 = sst [smem:[#allocation7_spill]] %s1454_s25  ;;  %p43_p5 = scmp.ge.s32.totalorder %s1456_s26, 2 }
  0x10   : > { %458 = sbr.rel (%p455_p3) target bundleno = 322 (0x142), region = 60  ;;  %p556_p7 = scmp.lt.s32.totalorder (!%p455_p3), %s1173_s17, 3 }
  0x11   : > { %s1458_s26 = smov (%p43_p5, %s1456_s26), 0  ;;  %p576_p8 = scmp.lt.s32.totalorder (!%p455_p3), %s1177_s18, 1 }
  0x12   : > { %1435 = sst [smem:[#allocation8_spill]] %s1458_s26  ;;  %p1077_p9 = scmp.ne.s32.totalorder (!%p455_p3), %s1173_s17, 0 }
  0x13   : > { %s1436_s0 = sld [smem:[#allocation9_spill]] (!%p455_p3) }
  0x14   : > { %s1437_s1 = sld [smem:[#allocation10_spill]] (!%p455_p3) }
  0x15   : > { %s1460_s19 = smov (!%p554_p6, %s1181_s19), 1  ;;  %s1462_s18 = smov (!%p576_p8, %s1177_s18), 1 }
  0x16   : > { %s557_s27 = scalar_select %p556_p7, %s1173_s17, 3 }
  0x17   : > { %s1059_s28 = sshll.u32 %s1460_s19, 3  ;;  %s1073_s24 = sshll.u32 %s1460_s19, 1 }
  0x18   : > { %s1058_s29 = sshll.u32 %s557_s27, 1  ;;  %s1316_s21 = sshll.u32 %s1462_s18, 3 }
  0x19   : > { %s560_s30 = sadd.s32 %s1059_s28, %s1058_s29  ;;  %s579_s22 = sadd.s32 %s1058_s29, %s1462_s18 }
  0x1a   : > { %s1060_s12 = sshll.u32 %s560_s30, 3  ;;  %s581_s27 = sadd.s32 %s1059_s28, %s579_s22 }
  0x1b   : > { %s562_s15 = scalar_lea.vmem %s1436_s0, %s1060_s12  ;;  %s571_s25 = scalar_lea.vmem %s1437_s1, %s1060_s12 }
  0x1c   : > { %s1438_s4 = sld [smem:[#allocation11_spill]]  ;;  %s1066_s8 = sshll.u32 %s581_s27, 3 }
  0x1d   : > { %s603_s0 = scalar_lea.vmem %s1411_s5, %s1316_s21  ;;  %s1329_s19 = scalar_lea.vmem %s1408_s2, %s1066_s8 }
  0x1e   : > { %s1334_s1 = scalar_lea.vmem %s1409_s3, %s1066_s8  ;;  %s607_s20 = scalar_lea.vmem %s1412_s6, %s1316_s21 }
  0x1f   : > { %s613_s23 = sadd.s32 %s1073_s24, %s1462_s18  ;;  %627 = sbr.rel (%p1077_p9) target bundleno = 39 (0x27), region = 64 }
  0x20   : > { %s1074_s27 = sshll.u32 %s613_s23, 3 }
  0x21   : > { %s1343_s13 = scalar_lea.vmem %s1416_s10, %s1074_s27  ;;  %s1348_s12 = scalar_lea.vmem %s1417_s11, %s1074_s27 }
  0x22   : > { %s599_s30 = scalar_lea.vmem %s1438_s4, %s1316_s21 }
  0x24   : > { %vm628_vm0 = vcmask 130048   ;;  %v1199_v0 = vmov 0.0  }
  0x25   : > { %629 = vst.msk [vmem:[%s1343_s13] sm:$0xff] %vm628_vm0, %v1199_v0 }
  0x26   : > { %630 = vst.msk [vmem:[%s1348_s12] sm:$0xff] %vm628_vm0, %v1199_v0 }
  0x27 PF: > { %v634_v1 = vld [vmem:[%s562_s15 + $0x8] sm:$0xff]  ;;  %v633_v3 = vld [vmem:[%s562_s15] sm:$0xff]  ;;  %vm638_vm1 = vcmask 130048   ;;  %s1439_s21 = sld [smem:[#allocation13_spill]] }
  0x28   : > { %v636_v2 = vld [vmem:[%s571_s25 + $0x8] sm:$0xff]  ;;  %656 = vmatpush.msra.mxu0 %v634_v1  ;;  %v635_v5 = vld [vmem:[%s571_s25] sm:$0xff] }
  0x29   : > { %v686_v4 = vadd.f32 %v636_v2, %v634_v1  ;;  %679 = vmatpush.msra.mxu1 %v636_v2  ;;  %v631_v6 = vld [vmem:[%s599_s30] sm:$0xff]  ;;  %v685_v7 = vadd.f32 %v635_v5, %v633_v3  ;;  %v714_v10 = vld [vmem:[%s1413_s7 + $0x8] sm:$0xff]  ;;  %s1441_s30 = sld [smem:[#allocation12_spill]] }
  0x2a   : > { %v632_v8 = vld [vmem:[%s603_s0] sm:$0xff]  ;;  %657 = vmatpush.msra.mxu0 %v633_v3  ;;  %736 = vmatpush.msra.mxu3 %v714_v10 }
  0x2b   : > { %704 = vmatpush.msra.mxu2 %v686_v4  ;;  %v637_v9 = vld [vmem:[%s607_s20] sm:$0xff]  ;;  %680 = vmatpush.msra.mxu1 %v635_v5 }
  0x2c   : > { %1078 = vmatmul.msk.f32.vlgmr.msra.gmra.mxu0 %vm638_vm1, %v631_v6  ;;  %1079 = vmatmul.msk.f32.vlgmr.msra.gmra.mxu1 %vm638_vm1, %v632_v8  ;;  %v713_v11 = vld [vmem:[%s1413_s7] sm:$0xff] }
  0x2d   : > { %705 = vmatpush.msra.mxu2 %v685_v7  ;;  %s1440_s24 = smov %s1439_s21  ;;  %v718_v12 = vld [vmem:[%s1439_s21 + $0x8] sm:$0xff]  ;;  %737 = vmatpush.msra.mxu3 %v713_v11  ;;  %v792_v28 = vld [vmem:[%s1329_s19] sm:$0xff] }
  0x2e   : > { %1080 = vmatmul.msk.f32.vlgmr.msra.gmra.mxu2 %vm638_vm1, %v637_v9  ;;  %783 = vmatpush.msrb.mxu1 %v718_v12  ;;  %v717_v15 = vld [vmem:[%s1440_s24] sm:$0xff] }
  0x2f   : > { %v716_v13 = vld [vmem:[%s1441_s30 + $0x8] sm:$0xff]  ;;  %v715_v14 = vld [vmem:[%s1441_s30] sm:$0xff] }
  0x30   : > { %759 = vmatpush.msrb.mxu0 %v716_v13  ;;  %784 = vmatpush.msrb.mxu1 %v717_v15  ;;  %v793_v29 = vld [vmem:[%s1334_s1] sm:$0xff] }
  0x31   : > { %v794_v35 = vld [vmem:[%s1343_s13] sm:$0xff] }
  0x32   : > { %760 = vmatpush.msrb.mxu0 %v715_v14  ;;  %v800_v36 = vld [vmem:[%s1348_s12] sm:$0xff] }
  0xa9   : > { %v659_v16 = vpop.f32.mrf.mxu0  ;;  %v682_v17 = vpop.f32.mrf.mxu1 }
  0xaa   : > { %v710_v18 = vsub.f32 %v659_v16, %v682_v17 }
  0xac   : > { %1081 = vmatmul.msk.f32.vlgmr.msra.gmra.mxu3 %vm638_vm1, %v710_v18 }
  0xb1   : > { %v707_v19 = vpop.f32.mrf.mxu2 }
  0xb2   : > { %v711_v20 = vsub.f32 %v707_v19, %v659_v16 }
  0xb4   : > { %v712_v21 = vsub.f32 %v711_v20, %v682_v17 }
  0xb6   : > { %v765_v22 = vadd.f32 %v712_v21, %v710_v18  ;;  %1082 = vmatmul.msk.f32.vlgmr.msrb.gmra.mxu0 %vm638_vm1, %v712_v21 }
  0xb8   : > { %1083 = vmatmul.msk.f32.vlgmr.msrb.gmra.mxu1 %vm638_vm1, %v765_v22 }
 0x12f   : > { %v739_v23 = vpop.f32.mrf.mxu3 }
 0x133   : > { %v762_v24 = vpop.f32.mrf.mxu0 }
 0x134   : > { %v789_v26 = vsub.f32 %v739_v23, %v762_v24 }
 0x135   : > { %v786_v25 = vpop.f32.mrf.mxu1 }
 0x136   : > { %v790_v27 = vsub.f32 %v786_v25, %v739_v23  ;;  %v795_v31 = vmul.f32 %v792_v28, %v789_v26  ;;  %v802_v32 = vmul.f32 %v793_v29, %v789_v26 }
 0x138   : > { %v791_v30 = vsub.f32 %v790_v27, %v762_v24 }
 0x13a   : > { %v796_v33 = vmul.f32 %v793_v29, %v791_v30  ;;  %v801_v34 = vmul.f32 %v792_v28, %v791_v30 }
 0x13c   : > { %v797_v37 = vadd.f32 %v796_v33, %v795_v31  ;;  %v803_v38 = vsub.f32 %v801_v34, %v802_v32 }
 0x13e   : > { %v798_v39 = vadd.f32 %v797_v37, %v794_v35  ;;  %v804_v40 = vadd.f32 %v803_v38, %v800_v36 }
 0x140   : > { %799 = vst.msk [vmem:[%s1343_s13] sm:$0xff] %vm638_vm1, %v798_v39 }
 0x141   : > { %805 = vst.msk [vmem:[%s1348_s12] sm:$0xff] %vm638_vm1, %v804_v40 }
 0x142 PF: > { %s1442_s20 = sld [smem:[#allocation5_spill]] }
 0x143   : > { %s1443_s17 = sld [smem:[#allocation2_spill]] }
 0x144   : > { %s1444_s18 = sld [smem:[#allocation3_spill]] }
 0x145   : > { %s1445_s19 = sld [smem:[#allocation4_spill]] }
 0x146   : > { %s1447_s21 = sld [smem:[#allocation7_spill]] }
 0x147   : > { %s1448_s22 = sld [smem:[#allocation8_spill]] }
 0x148   : > { %s22_s23 = sadd.s32 1, %s1442_s20   ;;  %s1446_s20 = sld [smem:[#allocation6_spill]] }
 0x149   : > { %p19_p10 = scmp.ge.s32.totalorder %s22_s23, 18  }
 0x14b   :  { %21 = sbr.rel (!%p19_p10) target bundleno = 6 (0x6), region = 124 }

// kernel: varnet2_forward.57
= control target key start
LH: loop header
LB: loop body
LE: loop exit
PB: predicated region body
PF: predicated region fallthrough
CT: control target
= control target key end

     0   :  { %s475_s12 = smov 0   ;;  %s477_s13 = smov 0   ;;  %s518_s0 = inlined_call_operand.vmem [shape: bf16[2,8,288], index: 0, kind: input, shape index: {}]   ;;  %s519_s1 = inlined_call_operand.vmem [shape: f32[2,8,1], index: 1, kind: input, shape index: {}]   ;;  %s520_s2 = inlined_call_operand.vmem [shape: f32[2,8,1], index: 2, kind: input, shape index: {}]   ;;  %s521_s3 = inlined_call_operand.vmem [shape: bf16[2,8,288], index: 3, kind: output, shape index: {}]  }
   0x1   :  { %s479_s14 = smov 0  }
   0x2 LB: > { %s25_s15 = sadd.s32 1, %s448_s13  ;;  %p396_p0 = scmp.ge.s32.totalorder %s452_s14, 1  ;;  %s452_s14 = sphi %s479_s14, %s13_s14   ;;  %s448_s13 = sphi %s477_s13, %s523_s13   ;;  %s444_s12 = sphi %s475_s12, %s522_s12  }
   0x3   : > { %p27_p1 = scmp.ge.s32.totalorder %s25_s15, 2  ;;  %p176_p2 = scmp.lt.s32.totalorder %s452_s14, 3 }
   0x5   : > { %s525_s15 = smov (%p27_p1, %s25_s15), 0  ;;  %p177_p3 = pnand %p396_p0, %p176_p2 }
   0x6   : > { %p217_p4 = scmp.lt.s32.totalorder (!%p177_p3), %s444_s12, 1 }
   0x7   : > { %180 = sbr.rel (%p177_p3) target bundleno = 149 (0x95), region = 32 }
   0xc   : > { %v454_v0 = vmov 0   ;;  %s527_s12 = smov (!%p217_p4, %s444_s12), 1  ;;  %vm279_vm3 = vcmask 257024  }
   0xd   : > { %429 = vset.pattern.permute.xlu0 %v454_v0  ;;  %s398_s16 = sshll.u32 %s527_s12, 3  ;;  %s403_s23 = smul.u32 12, %s527_s12 }
   0xe   : > { %s229_s19 = scalar_lea.vmem %s519_s1, %s398_s16  ;;  %s233_s22 = scalar_lea.vmem %s520_s2, %s398_s16 }
   0xf   : > { %v249_v1 = vld [vmem:[%s229_s19] sm:$0xff]  ;;  %s224_s26 = scalar_lea.vmem %s518_s0, %s403_s23  ;;  %s242_s29 = scalar_lea.vmem %s521_s3, %s403_s23 }
  0x10   : > { %252 = vperm.xlu0 %429, %v249_v1   ;;  %v258_v2 = vld [vmem:[%s233_s22] sm:$0xff]  ;;  %v245_v5 = vld [vmem:[%s224_s26 + $0x8] sm:$0xf] }
  0x11   : > { %v244_v4 = vld [vmem:[%s224_s26] sm:$0xff]  ;;  %v248_v8 = vunpack.c.l.bf16 %v245_v5 }
  0x12   : > { %v246_v6 = vunpack.c.l.bf16 %v244_v4  ;;  %v247_v7 = vunpack.c.h.bf16 %v244_v4 }
  0x18   : > { %261 = vperm.xlu0 %429, %v258_v2  }
  0x82   : > { %v253_v3 = vpop.permute.xlu0 %252 }
  0x83   : > { %v255_v9 = vsub.f32 %v246_v6, %v253_v3  ;;  %v256_v10 = vsub.f32 %v247_v7, %v253_v3  ;;  %v257_v11 = vsub.f32 %v248_v8, %v253_v3 }
  0x8a   : > { %v262_v12 = vpop.permute.xlu0 %261 }
  0x8b   : > { %v264_v13 = vmul.f32 %v262_v12, %v255_v9  ;;  %v265_v14 = vmul.f32 %v262_v12, %v256_v10  ;;  %v266_v15 = vmul.f32 %v262_v12, %v257_v11 }
  0x8d   : > { %vm267_vm0 = vcmp.ge.f32.partialorder %v264_v13, 0.0  ;;  %vm268_vm1 = vcmp.ge.f32.partialorder %v265_v14, 0.0  ;;  %vm269_vm2 = vcmp.ge.f32.partialorder %v266_v15, 0.0  ;;  %v270_v16 = vmul.f32 0.2, %v264_v13 }
  0x8e   : > { %v271_v17 = vmul.f32 0.2, %v265_v14  ;;  %v272_v18 = vmul.f32 0.2, %v266_v15 }
  0x8f   : > { %v273_v19 = vsel %vm267_vm0, %v264_v13, %v270_v16 }
  0x90   : > { %v274_v20 = vsel %vm268_vm1, %v265_v14, %v271_v17  ;;  %v275_v21 = vsel %vm269_vm2, %v266_v15, %v272_v18 }
  0x91   : > { %v276_v22 = vpack.c.bf16 %v274_v20, %v273_v19  ;;  %v277_v23 = vpack.c.bf16 %v275_v21, %v275_v21 }
  0x93   : > { %278 = vst [vmem:[%s242_s29] sm:$0xff] %v276_v22 }
  0x94   : > { %280 = vst.msk [vmem:[%s242_s29 + $0x8] sm:$0xf] %vm279_vm3, %v277_v23 }
  0x95 PF: > { %s13_s14 = sadd.s32 1, %s452_s14   ;;  %s522_s12 = smov %s448_s13 }
  0x96   : > { %p10_p5 = scmp.ge.s32.totalorder %s13_s14, 4   ;;  %s523_s13 = smov %s525_s15 }
  0x98   :  { %12 = sbr.rel (!%p10_p5) target bundleno = 2 (0x2), region = 68 }

// kernel: varnet2_forward.56
= control target key start
LH: loop header
LB: loop body
LE: loop exit
PB: predicated region body
PF: predicated region fallthrough
CT: control target
= control target key end

     0   :  { %s848_s18 = smov 0   ;;  %s850_s19 = smov 0   ;;  %s935_s0 = inlined_call_operand.vmem [shape: bf16[2,1,2,342], index: 0, kind: input, shape index: {}]   ;;  %s936_s1 = inlined_call_operand.vmem [shape: bf16[8,18], index: 1, kind: input, shape index: {}]   ;;  %s937_s2 = inlined_call_operand.vmem [shape: f32[1,288], index: 2, kind: input, shape index: {}]   ;;  %s938_s3 = inlined_call_operand.vmem [shape: bf16[2,8,288], index: 3, kind: output, shape index: {0}]   ;;  %s939_s4 = inlined_call_operand.vmem [shape: f32[2,8,1], index: 4, kind: output, shape index: {1}]   ;;  %s940_s5 = inlined_call_operand.vmem [shape: f32[2,8,1], index: 5, kind: output, shape index: {2}]  }
   0x1   :  { %s852_s20 = smov 0  }
   0x2 LB: > { %s28_s21 = sadd.s32 1, %s803_s19  ;;  %p726_p0 = scmp.ge.s32.totalorder %s807_s20, 1  ;;  %s807_s20 = sphi %s852_s20, %s16_s20   ;;  %s803_s19 = sphi %s850_s19, %s942_s19   ;;  %s799_s18 = sphi %s848_s18, %s941_s18  }
   0x3   : > { %p30_p1 = scmp.ge.s32.totalorder %s28_s21, 2  ;;  %p211_p2 = scmp.lt.s32.totalorder %s807_s20, 3 }
   0x5   : > { %s944_s21 = smov (%p30_p1, %s28_s21), 0  ;;  %p212_p3 = pnand %p726_p0, %p211_p2 }
   0x6   : > { %p254_p4 = scmp.lt.s32.totalorder (!%p212_p3), %s799_s18, 1  ;;  %s809_s26 = smov (!%p212_p3), 127  }
   0x7   : > { %215 = sbr.rel (%p212_p3) target bundleno = 490 (0x1ea), region = 32  ;;  %s810_s27 = smov (!%p212_p3), 126  }
   0x8   : > { %s811_s28 = smov (!%p212_p3), 110   ;;  %s812_s29 = smov (!%p212_p3), 109  }
   0x9   : > { %s813_s30 = smov (!%p212_p3), 108   ;;  %s814_s6 = smov (!%p212_p3), 92  }
   0xa   : > { %s815_s7 = smov (!%p212_p3), 91   ;;  %s816_s8 = smov (!%p212_p3), 90  }
   0xc   : > { %s946_s18 = smov (!%p254_p4, %s799_s18), 1  ;;  %vm296_vm0 = vcmask 253952   ;;  %vm357_vm1 = vcmask 257027   ;;  %vm317_vm2 = vcmask 254977   ;;  %vm310_vm3 = vcmask 1043456  }
   0xd   : > { %s750_s22 = smul.u32 3, %s946_s18  ;;  %vm312_vm4 = vcmask 1039360   ;;  %vm352_vm5 = vcmask 900096   ;;  %vm337_vm6 = vcmask 256002   ;;  %vm332_vm7 = vcmask 1031168   ;;  %s728_s11 = sshll.u32 %s946_s18, 3 }
   0xe   : > { %vm371_vm8 = vcmask 891904   ;;  %vm409_vm9 = vcmask 752640   ;;  %vm390_vm10 = vcmask 883712   ;;  %vm446_vm11 = vcmask 736256   ;;  %s902_s14 = scalar_lea.vmem %s939_s4, %s728_s11  ;;  %s909_s17 = scalar_lea.vmem %s940_s5, %s728_s11 }
   0xf   : > { %s261_s25 = scalar_lea.vmem %s935_s0, %s750_s22  ;;  %vm487_vm12 = vcmask 1040384   ;;  %vm428_vm13 = vcmask 744448   ;;  %vm483_vm14 = vcmask 146432   ;;  %vm285_vm15 = vcmask 7168   ;;  %s751_s24 = smul.u32 12, %s946_s18 }
  0x10   : > { %v288_v0 = vld [vmem:[%s261_s25] sm:$0x7] }
  0x11   : > { %290 = vst [vmem:[#allocation1] ss:$4 sm:$0xff] %v288_v0 }
  0x18   : > { %v291_v1 = vld [vmem:[#allocation1] sm:$0xff]  ;;  %v292_v2 = vld [vmem:[#allocation1 + $0x8] sm:$0xff] }
  0x19   : > { %299 = vst [vmem:[#allocation1 + $0x1] ss:$4 sm:$0xff] %v288_v0 }
  0x1a   : > { %295 = vst [vmem:[#allocation2] sm:$0x11] %v291_v1 }
  0x1b   : > { %297 = vst.msk [vmem:[#allocation2 + $0x8] sm:$0x1] %vm296_vm0, %v292_v2 }
  0x20   : > { %v302_v3 = vld [vmem:[#allocation1 + $0x8] sm:$0xff]  ;;  %v300_v4 = vld [vmem:[#allocation1] sm:$0xff] }
  0x21   : > { %306 = vrot.lane.b32.xlu1 %v302_v3, %s809_s26  ;;  %320 = vst [vmem:[#allocation1 + $0x2] ss:$4 sm:$0xff] %v288_v0  ;;  %304 = vrot.lane.b32.xlu0 %v300_v4, %s809_s26 }
  0x28   : > { %v323_v5 = vld [vmem:[#allocation1 + $0x8] sm:$0xff]  ;;  %v321_v6 = vld [vmem:[#allocation1] sm:$0xff] }
  0x29   : > { %327 = vrot.lane.b32.xlu1 %v323_v5, %s810_s27  ;;  %340 = vst [vmem:[#allocation1 + $0x3] ss:$4 sm:$0xff] %v288_v0 }
  0x30   : > { %v341_v7 = vld [vmem:[#allocation1] sm:$0xff]  ;;  %v343_v8 = vld [vmem:[#allocation1 + $0x8] sm:$0xff] }
  0x31   : > { %325 = vrot.lane.b32.xlu1 %v321_v6, %s810_s27  ;;  %359 = vst [vmem:[#allocation1] ss:$4 sm:$0xff] %v288_v0  ;;  %347 = vrot.lane.b32.xlu2 %v343_v8, %s811_s28  ;;  %v458_v8 = vld [vmem:[%s936_s1] sm:$0xf]  ;;  %s270_s27 = scalar_lea.vmem %s938_s3, %s751_s24 }
  0x38   : > { %v362_v9 = vld [vmem:[#allocation1 + $0x8] sm:$0xff]  ;;  %v360_v10 = vld [vmem:[#allocation1] sm:$0xff] }
  0x39   : > { %364 = vrot.lane.b32.xlu0 %v360_v10, %s812_s29  ;;  %378 = vst [vmem:[#allocation1 + $0x1] ss:$4 sm:$0xff] %v288_v0  ;;  %345 = vrot.lane.b32.xlu2 %v341_v7, %s811_s28 }
  0x40   : > { %v381_v11 = vld [vmem:[#allocation1 + $0x8] sm:$0xff]  ;;  %v379_v12 = vld [vmem:[#allocation1] sm:$0xff] }
  0x41   : > { %385 = vrot.lane.b32.xlu0 %v381_v11, %s813_s30  ;;  %397 = vst [vmem:[#allocation1 + $0x2] ss:$4 sm:$0xff] %v288_v0  ;;  %366 = vrot.lane.b32.xlu2 %v362_v9, %s812_s29 }
  0x48   : > { %v400_v13 = vld [vmem:[#allocation1 + $0x8] sm:$0xff]  ;;  %v398_v14 = vld [vmem:[#allocation1] sm:$0xff] }
  0x49   : > { %404 = vrot.lane.b32.xlu1 %v400_v13, %s814_s6  ;;  %416 = vst [vmem:[#allocation1 + $0x3] ss:$4 sm:$0xff] %v288_v0 }
  0x50   : > { %v417_v15 = vld [vmem:[#allocation1] sm:$0xff]  ;;  %v419_v16 = vld [vmem:[#allocation1 + $0x8] sm:$0xff] }
  0x51   : > { %383 = vrot.lane.b32.xlu1 %v379_v12, %s813_s30  ;;  %434 = vst [vmem:[#allocation1] ss:$4 sm:$0xff] %v288_v0  ;;  %423 = vrot.lane.b32.xlu2 %v419_v16, %s815_s7 }
  0x58   : > { %v437_v17 = vld [vmem:[#allocation1 + $0x8] sm:$0xff]  ;;  %v435_v18 = vld [vmem:[#allocation1] sm:$0xff] }
  0x59   : > { %441 = vrot.lane.b32.xlu0 %v437_v17, %s816_s8  ;;  %402 = vrot.lane.b32.xlu2 %v398_v14, %s814_s6 }
  0x61   : > { %439 = vrot.lane.b32.xlu0 %v435_v18, %s816_s8 }
  0x69   : > { %421 = vrot.lane.b32.xlu0 %v417_v15, %s815_s7 }
  0x8b   : > { %v348_v19 = vpop.permute.xlu2 %347 }
  0x8c   : > { %358 = vst.msk [vmem:[#allocation2 + $0x8] sm:$0x8] %vm357_vm1, %v348_v19  ;;  %v350_v21 = vrot.slane %v348_v19, 4 }
  0x93   : > { %v307_v20 = vpop.permute.xlu1 %306  ;;  %v305_v22 = vpop.permute.xlu0 %304 }
  0x94   : > { %v309_v23 = vrot.slane %v307_v20, 4  ;;  %318 = vst.msk [vmem:[#allocation2 + $0x8] sm:$0x2] %vm317_vm2, %v307_v20  ;;  %v308_v24 = vrot.slane %v305_v22, 4  ;;  %v346_v25 = vpop.permute.xlu2 %345 }
  0x95   : > { %v349_v26 = vrot.slane %v346_v25, 4 }
  0x96   : > { %v311_v27 = vsel %vm310_vm3, %v308_v24, %v309_v23  ;;  %v817_v24 = vmov 0.0  }
  0x97   : > { %v313_v28 = vsel %vm312_vm4, %v305_v22, %v311_v27  ;;  %v351_v29 = vsel %vm310_vm3, %v349_v26, %v350_v21  ;;  %286 = vst.msk [vmem:[%s902_s14] sm:$0xff] %vm285_vm15, %v817_v24 }
  0x98   : > { %316 = vst [vmem:[#allocation2] sm:$0x22] %v313_v28  ;;  %v353_v30 = vsel %vm352_vm5, %v346_v25, %v351_v29  ;;  %v536_v25 = vld [vmem:[%s937_s2] sm:$0x7] }
  0x99   : > { %356 = vst [vmem:[#allocation2] sm:$0x88] %v353_v30  ;;  %v540_v26 = vperm.slane %v536_v25, 2  ;;  %v538_v30 = vperm.slane %v536_v25, 0 }
  0x9a   : > { %287 = vst.msk [vmem:[%s909_s17] sm:$0xff] %vm285_vm15, %v817_v24 }
  0x9b   : > { %v328_v31 = vpop.permute.xlu1 %327 }
  0x9c   : > { %338 = vst.msk [vmem:[#allocation2 + $0x8] sm:$0x4] %vm337_vm6, %v328_v31  ;;  %v367_v32 = vpop.permute.xlu2 %366  ;;  %v330_v33 = vrot.slane %v328_v31, 4  ;;  %v539_v31 = vperm.slane %v536_v25, 1 }
  0x9d   : > { %376 = vst.msk [vmem:[#allocation2 + $0x14] sm:$0x1] %vm296_vm0, %v367_v32  ;;  %v369_v38 = vrot.slane %v367_v32, 4 }
  0xa3   : > { %v326_v34 = vpop.permute.xlu1 %325  ;;  %v740_v1 = vld [vmem:[#allocation2 + $0x8] sm:$0xf] }
  0xa4   : > { %v329_v35 = vrot.slane %v326_v34, 4 }
  0xa6   : > { %v331_v36 = vsel %vm310_vm3, %v329_v35, %v330_v33 }
  0xa7   : > { %v333_v37 = vsel %vm332_vm7, %v326_v34, %v331_v36 }
  0xa8   : > { %336 = vst [vmem:[#allocation2] sm:$0x44] %v333_v37 }
  0xab   : > { %v365_v39 = vpop.permute.xlu0 %364  ;;  %v424_v40 = vpop.permute.xlu2 %423 }
  0xac   : > { %v368_v41 = vrot.slane %v365_v39, 4  ;;  %433 = vst.msk [vmem:[#allocation2 + $0x14] sm:$0x8] %vm357_vm1, %v424_v40  ;;  %v426_v6 = vrot.slane %v424_v40, 4  ;;  %vm549_vm1 = vcmask 261120  }
  0xae   : > { %v370_v42 = vsel %vm310_vm3, %v368_v41, %v369_v38 }
  0xaf   : > { %v372_v43 = vsel %vm371_vm8, %v365_v39, %v370_v42  ;;  %v732_v18 = vld [vmem:[#allocation2] sm:$0xf]  ;;  %v747_v20 = vld [vmem:[#allocation2 + $0x4] sm:$0xf] }
  0xb0   : > { %375 = vst [vmem:[#allocation2 + $0xc] sm:$0x11] %v372_v43 }
  0xb3   : > { %v386_v44 = vpop.permute.xlu0 %385  ;;  %v403_v45 = vpop.permute.xlu2 %402 }
  0xb4   : > { %395 = vst.msk [vmem:[#allocation2 + $0x14] sm:$0x2] %vm317_vm2, %v386_v44  ;;  %v406_v46 = vrot.slane %v403_v45, 4  ;;  %v388_v51 = vrot.slane %v386_v44, 4 }
  0xbb   : > { %v405_v47 = vpop.permute.xlu1 %404 }
  0xbc   : > { %v407_v48 = vrot.slane %v405_v47, 4  ;;  %414 = vst.msk [vmem:[#allocation2 + $0x14] sm:$0x4] %vm337_vm6, %v405_v47 }
  0xbe   : > { %v408_v49 = vsel %vm310_vm3, %v406_v46, %v407_v48 }
  0xbf   : > { %v410_v50 = vsel %vm409_vm9, %v403_v45, %v408_v49  ;;  %v547_v49 = vld [vmem:[%s902_s14] sm:$0xff] }
  0xc0   : > { %413 = vst [vmem:[#allocation2 + $0xc] sm:$0x44] %v410_v50 }
  0xc3   : > { %v384_v52 = vpop.permute.xlu1 %383  ;;  %v749_v3 = vld [vmem:[#allocation2 + $0x10] sm:$0xf0] }
  0xc4   : > { %v387_v53 = vrot.slane %v384_v52, 4  ;;  %v741_v5 = vor.u32 %v749_v3, %v740_v1 }
  0xc6   : > { %v389_v54 = vsel %vm310_vm3, %v387_v53, %v388_v51  ;;  %v557_v51 = vld [vmem:[%s909_s17] sm:$0xff] }
  0xc7   : > { %v391_v55 = vsel %vm390_vm10, %v384_v52, %v389_v54 }
  0xc8   : > { %394 = vst [vmem:[#allocation2 + $0xc] sm:$0x22] %v391_v55 }
  0xcb   : > { %v442_v56 = vpop.permute.xlu0 %441 }
  0xcc   : > { %451 = vst.msk [vmem:[#allocation2 + $0x20] sm:$0x1] %vm296_vm0, %v442_v56  ;;  %v444_v59 = vrot.slane %v442_v56, 4  ;;  %vm571_vm0 = vcmask 257024  }
  0xd3   : > { %v440_v57 = vpop.permute.xlu0 %439  ;;  %v457_v58 = vld [vmem:[#allocation2 + $0x20] sm:$0x1] }
  0xd4   : > { %v443_v60 = vrot.slane %v440_v57, 4  ;;  %v473_v61 = vunpack.c.l.b16 %v457_v58 }
  0xd6   : > { %v445_v62 = vsel %vm310_vm3, %v443_v60, %v444_v59  ;;  %v479_v63 = vpack.c.b16 %v473_v61, %v473_v61 }
  0xd7   : > { %v447_v0 = vsel %vm446_vm11, %v440_v57, %v445_v62 }
  0xd8   : > { %450 = vst [vmem:[#allocation2 + $0x18] sm:$0x11] %v447_v0  ;;  %v495_v2 = vsel %vm487_vm12, %v479_v63, 0 }
  0xd9   : > { %529 = vmatpush.bf16.msra.mxu2 %v495_v2 }
  0xdb   : > { %v422_v4 = vpop.permute.xlu0 %421 }
  0xdc   : > { %v425_v7 = vrot.slane %v422_v4, 4 }
  0xdd   : > { %530 = vmatpush.bf16.msra.mxu2 %v741_v5 }
  0xde   : > { %v427_v9 = vsel %vm310_vm3, %v425_v7, %v426_v6 }
  0xdf   : > { %v429_v10 = vsel %vm428_vm13, %v422_v4, %v427_v9  ;;  %v456_v11 = vld [vmem:[#allocation2 + $0x18] sm:$0x11] }
  0xe0   : > { %432 = vst [vmem:[#allocation2 + $0xc] sm:$0x88] %v429_v10  ;;  %744 = vmatmul.msk.bf16.vlgmr.msra.gmra.mxu2 %vm483_vm14, %v458_v8  ;;  %v471_v12 = vunpack.c.l.b16 %v456_v11  ;;  %v472_v13 = vunpack.c.h.b16 %v456_v11 }
  0xe2   : > { %v477_v14 = vpack.c.b16 %v471_v12, %v471_v12  ;;  %v478_v15 = vpack.c.b16 %v472_v13, %v472_v13 }
  0xe4   : > { %v489_v16 = vsel %vm487_vm12, %v477_v14, 0  ;;  %v492_v17 = vsel %vm487_vm12, %v478_v15, 0 }
  0xe5   : > { %503 = vmatpush.bf16.msra.mxu0 %v489_v16  ;;  %516 = vmatpush.bf16.msra.mxu1 %v492_v17 }
  0xe7   : > { %v748_v19 = vld [vmem:[#allocation2 + $0x8] sm:$0xf0]  ;;  %v734_v21 = vld [vmem:[#allocation2 + $0xc] sm:$0xf0] }
  0xe8   : > { %v733_v22 = vor.u32 %v748_v19, %v732_v18  ;;  %v737_v23 = vor.u32 %v747_v20, %v734_v21 }
  0xea   : > { %504 = vmatpush.bf16.msra.mxu0 %v733_v22  ;;  %517 = vmatpush.bf16.msra.mxu1 %v737_v23 }
  0xed   : > { %742 = vmatmul.msk.bf16.vlgmr.msra.gmra.mxu0 %vm483_vm14, %v458_v8  ;;  %743 = vmatmul.msk.bf16.vlgmr.msra.gmra.mxu1 %vm483_vm14, %v458_v8 }
 0x163   : > { %v532_v27 = vpop.f32.mrf.mxu2 }
 0x164   : > { %v569_v28 = vpack.c.bf16 %v532_v27, %v532_v27  ;;  %v546_v29 = vmul.f32 %v540_v26, %v532_v27 }
 0x166   : > { %572 = vst.msk [vmem:[%s270_s27 + $0x8] sm:$0xf] %vm571_vm0, %v569_v28  ;;  %v560_v32 = vmul.f32 %v546_v29, %v546_v29  ;;  %v550_v39 = vsel %vm549_vm1, %v546_v29, 0.0 }
 0x168   : > { %v562_v43 = vsel %vm549_vm1, %v560_v32, 0.0 }
 0x16a   : > { %v506_v33 = vpop.f32.mrf.mxu0  ;;  %v519_v34 = vpop.f32.mrf.mxu1 }
 0x16b   : > { %v544_v35 = vmul.f32 %v538_v30, %v506_v33  ;;  %v545_v36 = vmul.f32 %v539_v31, %v519_v34  ;;  %v568_v37 = vpack.c.bf16 %v519_v34, %v506_v33  ;;  %v534_v38 = vpop.f32.mrf.mxu2 }
 0x16d   : > { %v558_v40 = vmul.f32 %v544_v35, %v544_v35  ;;  %v559_v41 = vmul.f32 %v545_v36, %v545_v36  ;;  %570 = vst [vmem:[%s270_s27] sm:$0xff] %v568_v37  ;;  %v548_v42 = vadd.f32 %v545_v36, %v544_v35 }
 0x16f   : > { %v551_v44 = vadd.f32 %v550_v39, %v548_v42  ;;  %v561_v45 = vadd.f32 %v559_v41, %v558_v40 }
 0x171   : > { %552 = vadd.xlane.f32.xlu1 %v551_v44  ;;  %v563_v46 = vadd.f32 %v562_v43, %v561_v45 }
 0x172   : > { %v508_v47 = vpop.f32.mrf.mxu0  ;;  %v521_v48 = vpop.f32.mrf.mxu1 }
 0x173   : > { %564 = vadd.xlane.f32.xlu2 %v563_v46 }
 0x1e4   : > { %v553_v50 = vpop.xlane.xlu1 %552 }
 0x1e5   : > { %v554_v52 = vadd.f32 %v553_v50, %v547_v49 }
 0x1e6   : > { %v565_v53 = vpop.xlane.xlu2 %564 }
 0x1e7   : > { %556 = vst.msk [vmem:[%s902_s14] sm:$0xff] %vm285_vm15, %v554_v52  ;;  %v566_v54 = vadd.f32 %v565_v53, %v557_v51 }
 0x1e9   : > { %567 = vst.msk [vmem:[%s909_s17] sm:$0xff] %vm285_vm15, %v566_v54 }
 0x1ea PF: > { %s16_s20 = sadd.s32 1, %s807_s20   ;;  %s941_s18 = smov %s803_s19 }
 0x1eb   : > { %p13_p5 = scmp.ge.s32.totalorder %s16_s20, 4   ;;  %s942_s19 = smov %s944_s21 }
 0x1ed   :  { %15 = sbr.rel (!%p13_p5) target bundleno = 2 (0x2), region = 96 }

// kernel: varnet2_forward.58
= control target key start
LH: loop header
LB: loop body
LE: loop exit
PB: predicated region body
PF: predicated region fallthrough
CT: control target
= control target key end

     0   :  { %s906_s18 = smov 0   ;;  %s908_s19 = smov 0   ;;  %s1005_s0 = inlined_call_operand.vmem [shape: bf16[2,1,8,342], index: 0, kind: input, shape index: {}]   ;;  %s1006_s1 = inlined_call_operand.vmem [shape: bf16[8,72], index: 1, kind: input, shape index: {}]   ;;  %s1007_s2 = inlined_call_operand.vmem [shape: f32[1,288], index: 2, kind: input, shape index: {}]   ;;  %s1008_s3 = inlined_call_operand.vmem [shape: bf16[2,8,288], index: 3, kind: output, shape index: {0}]   ;;  %s1009_s4 = inlined_call_operand.vmem [shape: f32[2,8,1], index: 4, kind: output, shape index: {1}]   ;;  %s1010_s5 = inlined_call_operand.vmem [shape: f32[2,8,1], index: 5, kind: output, shape index: {2}]  }
   0x1   :  { %s910_s20 = smov 0  }
   0x2 LB: > { %s28_s21 = sadd.s32 1, %s861_s19  ;;  %p739_p0 = scmp.ge.s32.totalorder %s865_s20, 1  ;;  %s865_s20 = sphi %s910_s20, %s16_s20   ;;  %s861_s19 = sphi %s908_s19, %s1012_s19   ;;  %s857_s18 = sphi %s906_s18, %s1011_s18  }
   0x3   : > { %p30_p1 = scmp.ge.s32.totalorder %s28_s21, 2  ;;  %p212_p2 = scmp.lt.s32.totalorder %s865_s20, 3 }
   0x5   : > { %s1014_s21 = smov (%p30_p1, %s28_s21), 0  ;;  %p213_p3 = pnand %p739_p0, %p212_p2 }
   0x6   : > { %p256_p4 = scmp.lt.s32.totalorder (!%p213_p3), %s857_s18, 1  ;;  %s867_s26 = smov (!%p213_p3), 92  }
   0x7   : > { %216 = sbr.rel (%p213_p3) target bundleno = 442 (0x1ba), region = 32  ;;  %s868_s27 = smov (!%p213_p3), 90  }
   0x8   : > { %s869_s28 = smov (!%p213_p3), 91   ;;  %s870_s29 = smov (!%p213_p3), 108  }
   0x9   : > { %s871_s30 = smov (!%p213_p3), 109   ;;  %s872_s6 = smov (!%p213_p3), 126  }
   0xa   : > { %s873_s7 = smov (!%p213_p3), 110   ;;  %s874_s8 = smov (!%p213_p3), 127  }
   0xc   : > { %s1016_s18 = smov (!%p256_p4, %s857_s18), 1  ;;  %vm294_vm0 = vcmask 257024   ;;  %vm304_vm1 = vcmask 1043456   ;;  %vm371_vm2 = vcmask 752640   ;;  %vm384_vm3 = vcmask 744448  }
   0xd   : > { %s809_s22 = smul.u32 12, %s1016_s18  ;;  %vm397_vm4 = vcmask 736256   ;;  %vm345_vm5 = vcmask 891904   ;;  %vm358_vm6 = vcmask 883712   ;;  %vm332_vm7 = vcmask 900096   ;;  %s742_s11 = sshll.u32 %s1016_s18, 3 }
   0xe   : > { %vm319_vm8 = vcmask 1031168   ;;  %vm494_vm9 = vcmask 588800   ;;  %vm306_vm10 = vcmask 1039360   ;;  %s970_s14 = scalar_lea.vmem %s1009_s4, %s742_s11  ;;  %vm288_vm11 = vcmask 7168   ;;  %s980_s24 = scalar_lea.vmem %s1010_s5, %s742_s11 }
   0xf   : > { %s264_s25 = scalar_lea.vmem %s1005_s0, %s809_s22  ;;  %vm560_vm12 = vcmask 261120  }
  0x10   : > { %v292_v0 = vld [vmem:[%s264_s25 + $0x8] sm:$0xf]  ;;  %v291_v1 = vld [vmem:[%s264_s25] sm:$0xff] }
  0x11   : > { %366 = vrot.lane.b32.xlu1 %v292_v0, %s867_s26  ;;  %392 = vrot.lane.b32.xlu0 %v292_v0, %s868_s27  ;;  %293 = vst [vmem:[#allocation2] sm:$0xff] %v291_v1 }
  0x12   : > { %364 = vrot.lane.b32.xlu2 %v291_v1, %s867_s26  ;;  %295 = vst.msk [vmem:[#allocation2 + $0x8] sm:$0xf] %vm294_vm0, %v292_v0 }
  0x19   : > { %379 = vrot.lane.b32.xlu1 %v292_v0, %s869_s28  ;;  %390 = vrot.lane.b32.xlu0 %v291_v1, %s868_s27  ;;  %v754_v62 = vld [vmem:[#allocation2 + $0x8] sm:$0xf]  ;;  %s273_s27 = scalar_lea.vmem %s1008_s3, %s809_s22 }
  0x1a   : > { %377 = vrot.lane.b32.xlu2 %v291_v1, %s869_s28 }
  0x21   : > { %353 = vrot.lane.b32.xlu1 %v292_v0, %s870_s29  ;;  %340 = vrot.lane.b32.xlu0 %v292_v0, %s871_s30 }
  0x22   : > { %338 = vrot.lane.b32.xlu2 %v291_v1, %s871_s30 }
  0x29   : > { %314 = vrot.lane.b32.xlu1 %v292_v0, %s872_s6  ;;  %351 = vrot.lane.b32.xlu0 %v291_v1, %s870_s29 }
  0x2a   : > { %327 = vrot.lane.b32.xlu2 %v292_v0, %s873_s7 }
  0x31   : > { %325 = vrot.lane.b32.xlu1 %v291_v1, %s873_s7  ;;  %312 = vrot.lane.b32.xlu0 %v291_v1, %s872_s6 }
  0x32   : > { %300 = vrot.lane.b32.xlu2 %v292_v0, %s874_s8 }
  0x39   : > { %298 = vrot.lane.b32.xlu0 %v291_v1, %s874_s8 }
  0x6c   : > { %v365_v2 = vpop.permute.xlu2 %364 }
  0x6d   : > { %v368_v5 = vrot.slane %v365_v2, 4 }
  0x74   : > { %v378_v3 = vpop.permute.xlu2 %377 }
  0x75   : > { %v381_v12 = vrot.slane %v378_v3, 4 }
  0x7c   : > { %v339_v4 = vpop.permute.xlu2 %338 }
  0x7d   : > { %v342_v29 = vrot.slane %v339_v4, 4 }
  0x83   : > { %v367_v6 = vpop.permute.xlu1 %366  ;;  %v393_v7 = vpop.permute.xlu0 %392 }
  0x84   : > { %v369_v8 = vrot.slane %v367_v6, 4  ;;  %376 = vst.msk [vmem:[#allocation2 + $0x50] sm:$0xf] %vm294_vm0, %v367_v6  ;;  %v934_v9 = vpop.permute.xlu2 %327  ;;  %v395_v13 = vrot.slane %v393_v7, 4 }
  0x85   : > { %402 = vst.msk [vmem:[#allocation2 + $0x68] sm:$0xf] %vm294_vm0, %v393_v7  ;;  %v330_v58 = vrot.slane %v934_v9, 4 }
  0x86   : > { %v370_v10 = vsel %vm304_vm1, %v368_v5, %v369_v8  ;;  %337 = vst.msk [vmem:[#allocation2 + $0x2c] sm:$0xf] %vm294_vm0, %v934_v9 }
  0x87   : > { %v372_v11 = vsel %vm371_vm2, %v365_v2, %v370_v10 }
  0x88   : > { %375 = vst [vmem:[#allocation2 + $0x48] sm:$0xff] %v372_v11 }
  0x8b   : > { %v380_v14 = vpop.permute.xlu1 %379  ;;  %v391_v15 = vpop.permute.xlu0 %390  ;;  %v790_v34 = vld [vmem:[#allocation2 + $0x50] sm:$0xf] }
  0x8c   : > { %v382_v16 = vrot.slane %v380_v14, 4  ;;  %389 = vst.msk [vmem:[#allocation2 + $0x5c] sm:$0xf] %vm294_vm0, %v380_v14  ;;  %v394_v17 = vrot.slane %v391_v15, 4  ;;  %v420_v18 = vld [vmem:[#allocation2 + $0x68] sm:$0xf]  ;;  %v941_v19 = vpop.permute.xlu2 %300 }
  0x8d   : > { %v466_v20 = vunpack.c.l.b16 %v420_v18  ;;  %311 = vst.msk [vmem:[#allocation2 + $0x14] sm:$0xf] %vm294_vm0, %v941_v19  ;;  %v802_v57 = vld [vmem:[#allocation2 + $0x28] sm:$0xf0] }
  0x8e   : > { %v383_v21 = vsel %vm304_vm1, %v381_v12, %v382_v16  ;;  %v396_v22 = vsel %vm304_vm1, %v394_v17, %v395_v13  ;;  %v421_v17 = vld [vmem:[%s1006_s1] sm:$0xf] }
  0x8f   : > { %v385_v23 = vsel %vm384_vm3, %v378_v3, %v383_v21  ;;  %v398_v24 = vsel %vm397_vm4, %v391_v15, %v396_v22  ;;  %v481_v25 = vpack.c.b16 %v466_v20, %v466_v20  ;;  %v782_v41 = vld [vmem:[#allocation2 + $0x48] sm:$0xf]  ;;  %v806_v44 = vld [vmem:[#allocation2 + $0x4c] sm:$0xf]  ;;  %v303_v15 = vrot.slane %v941_v19, 4 }
  0x90   : > { %388 = vst [vmem:[#allocation2 + $0x54] sm:$0xff] %v385_v23  ;;  %v464_v26 = vunpack.c.l.b16 %v398_v24  ;;  %v465_v27 = vunpack.c.h.b16 %v398_v24 }
  0x91   : > { %v506_v28 = vsel %vm304_vm1, %v481_v25, 0 }
  0x92   : > { %537 = vmatpush.bf16.msra.mxu2 %v506_v28  ;;  %v479_v30 = vpack.c.b16 %v464_v26, %v464_v26  ;;  %v480_v31 = vpack.c.b16 %v465_v27, %v465_v27  ;;  %v746_v27 = vld [vmem:[#allocation2] sm:$0xf]  ;;  %v797_v28 = vld [vmem:[#allocation2 + $0x4] sm:$0xf] }
  0x93   : > { %v354_v32 = vpop.permute.xlu1 %353  ;;  %v341_v33 = vpop.permute.xlu0 %340  ;;  %v808_v35 = vld [vmem:[#allocation2 + $0x58] sm:$0xf0] }
  0x94   : > { %363 = vst.msk [vmem:[#allocation2 + $0x44] sm:$0xf] %vm294_vm0, %v354_v32  ;;  %v343_v36 = vrot.slane %v341_v33, 4  ;;  %v791_v37 = vor.u32 %v808_v35, %v790_v34  ;;  %v500_v38 = vsel %vm304_vm1, %v479_v30, 0  ;;  %v503_v39 = vsel %vm304_vm1, %v480_v31, 0 }
  0x95   : > { %350 = vst.msk [vmem:[#allocation2 + $0x38] sm:$0xf] %vm294_vm0, %v341_v33  ;;  %511 = vmatpush.bf16.msra.mxu0 %v500_v38  ;;  %524 = vmatpush.bf16.msra.mxu1 %v503_v39  ;;  %v356_v51 = vrot.slane %v354_v32, 4  ;;  %v799_v3 = vld [vmem:[#allocation2 + $0x10] sm:$0xf0]  ;;  %v875_v33 = vmov 0.0  }
  0x96   : > { %v344_v40 = vsel %vm304_vm1, %v342_v29, %v343_v36  ;;  %538 = vmatpush.bf16.msra.mxu2 %v791_v37  ;;  %v755_v12 = vor.u32 %v799_v3, %v754_v62  ;;  %289 = vst.msk [vmem:[%s970_s14] sm:$0xff] %vm288_vm11, %v875_v33  ;;  %v547_v34 = vld [vmem:[%s1007_s2] sm:$0x7] }
  0x97   : > { %v346_v42 = vsel %vm345_vm5, %v339_v4, %v344_v40  ;;  %v807_v43 = vld [vmem:[#allocation2 + $0x50] sm:$0xf0]  ;;  %v784_v45 = vld [vmem:[#allocation2 + $0x54] sm:$0xf0]  ;;  %290 = vst.msk [vmem:[%s980_s24] sm:$0xff] %vm288_vm11, %v875_v33  ;;  %v551_v36 = vperm.slane %v547_v34, 2 }
  0x98   : > { %349 = vst [vmem:[#allocation2 + $0x30] sm:$0xff] %v346_v42  ;;  %v783_v46 = vor.u32 %v807_v43, %v782_v41  ;;  %v787_v47 = vor.u32 %v806_v44, %v784_v45  ;;  %v549_v39 = vperm.slane %v547_v34, 0  ;;  %v550_v40 = vperm.slane %v547_v34, 1 }
  0x9a   : > { %512 = vmatpush.bf16.msra.mxu0 %v783_v46  ;;  %525 = vmatpush.bf16.msra.mxu1 %v787_v47 }
  0x9b   : > { %v315_v48 = vpop.permute.xlu1 %314  ;;  %v352_v49 = vpop.permute.xlu0 %351  ;;  %v805_v50 = vld [vmem:[#allocation2 + $0x40] sm:$0xf0] }
  0x9c   : > { %324 = vst.msk [vmem:[#allocation2 + $0x20] sm:$0xf] %vm294_vm0, %v315_v48  ;;  %v355_v52 = vrot.slane %v352_v49, 4  ;;  %v778_v53 = vld [vmem:[#allocation2 + $0x38] sm:$0xf]  ;;  %v317_v63 = vrot.slane %v315_v48, 4 }
  0x9d   : > { %v779_v54 = vor.u32 %v805_v50, %v778_v53 }
  0x9e   : > { %v357_v55 = vsel %vm304_vm1, %v355_v52, %v356_v51 }
  0x9f   : > { %v359_v56 = vsel %vm358_vm6, %v352_v49, %v357_v55  ;;  %539 = vmatpush.bf16.msra.mxu2 %v779_v54  ;;  %v770_v6 = vld [vmem:[#allocation2 + $0x30] sm:$0xf]  ;;  %v803_v10 = vld [vmem:[#allocation2 + $0x34] sm:$0xf] }
  0xa0   : > { %362 = vst [vmem:[#allocation2 + $0x3c] sm:$0xff] %v359_v56 }
  0xa3   : > { %v326_v59 = vpop.permute.xlu1 %325  ;;  %v313_v60 = vpop.permute.xlu0 %312  ;;  %v766_v61 = vld [vmem:[#allocation2 + $0x20] sm:$0xf] }
  0xa4   : > { %v329_v0 = vrot.slane %v326_v59, 4  ;;  %v316_v1 = vrot.slane %v313_v60, 4  ;;  %v767_v2 = vor.u32 %v802_v57, %v766_v61 }
  0xa6   : > { %v331_v4 = vsel %vm304_vm1, %v329_v0, %v330_v58  ;;  %v318_v5 = vsel %vm304_vm1, %v316_v1, %v317_v63  ;;  %540 = vmatpush.bf16.msra.mxu2 %v767_v2  ;;  %v558_v58 = vld [vmem:[%s970_s14] sm:$0xff] }
  0xa7   : > { %v333_v7 = vsel %vm332_vm7, %v326_v59, %v331_v4  ;;  %v320_v8 = vsel %vm319_vm8, %v313_v60, %v318_v5  ;;  %v804_v9 = vld [vmem:[#allocation2 + $0x38] sm:$0xf0]  ;;  %v772_v11 = vld [vmem:[#allocation2 + $0x3c] sm:$0xf0] }
  0xa8   : > { %336 = vst [vmem:[#allocation2 + $0x24] sm:$0xff] %v333_v7  ;;  %v771_v13 = vor.u32 %v804_v9, %v770_v6  ;;  %v775_v14 = vor.u32 %v803_v10, %v772_v11  ;;  %v568_v60 = vld [vmem:[%s980_s24] sm:$0xff] }
  0xa9   : > { %323 = vst [vmem:[#allocation2 + $0x18] sm:$0xff] %v320_v8 }
  0xaa   : > { %513 = vmatpush.bf16.msra.mxu0 %v771_v13  ;;  %526 = vmatpush.bf16.msra.mxu1 %v775_v14 }
  0xab   : > { %v299_v16 = vpop.permute.xlu0 %298  ;;  %541 = vmatpush.bf16.msra.mxu2 %v755_v12 }
  0xac   : > { %v302_v18 = vrot.slane %v299_v16, 4 }
  0xae   : > { %v305_v20 = vsel %vm304_vm1, %v302_v18, %v303_v15  ;;  %794 = vmatmul.msk.bf16.vlgmr.msra.gmra.mxu2 %vm494_vm9, %v421_v17 }
  0xaf   : > { %v307_v21 = vsel %vm306_vm10, %v299_v16, %v305_v20  ;;  %v801_v22 = vld [vmem:[#allocation2 + $0x20] sm:$0xf0]  ;;  %v760_v23 = vld [vmem:[#allocation2 + $0x24] sm:$0xf0] }
  0xb0   : > { %310 = vst [vmem:[#allocation2 + $0xc] sm:$0xff] %v307_v21  ;;  %v758_v19 = vld [vmem:[#allocation2 + $0x18] sm:$0xf]  ;;  %v800_v24 = vld [vmem:[#allocation2 + $0x1c] sm:$0xf] }
  0xb1   : > { %v759_v25 = vor.u32 %v801_v22, %v758_v19  ;;  %v763_v26 = vor.u32 %v800_v24, %v760_v23 }
  0xb3   : > { %514 = vmatpush.bf16.msra.mxu0 %v759_v25  ;;  %527 = vmatpush.bf16.msra.mxu1 %v763_v26 }
  0xb7   : > { %v798_v29 = vld [vmem:[#allocation2 + $0x8] sm:$0xf0]  ;;  %v748_v30 = vld [vmem:[#allocation2 + $0xc] sm:$0xf0] }
  0xb8   : > { %v747_v31 = vor.u32 %v798_v29, %v746_v27  ;;  %v751_v32 = vor.u32 %v797_v28, %v748_v30 }
  0xba   : > { %515 = vmatpush.bf16.msra.mxu0 %v747_v31  ;;  %528 = vmatpush.bf16.msra.mxu1 %v751_v32 }
  0xbd   : > { %792 = vmatmul.msk.bf16.vlgmr.msra.gmra.mxu0 %vm494_vm9, %v421_v17  ;;  %793 = vmatmul.msk.bf16.vlgmr.msra.gmra.mxu1 %vm494_vm9, %v421_v17 }
 0x131   : > { %v543_v35 = vpop.f32.mrf.mxu2 }
 0x132   : > { %v580_v37 = vpack.c.bf16 %v543_v35, %v543_v35  ;;  %v557_v38 = vmul.f32 %v551_v36, %v543_v35 }
 0x134   : > { %582 = vst.msk [vmem:[%s273_s27 + $0x8] sm:$0xf] %vm294_vm0, %v580_v37  ;;  %v571_v42 = vmul.f32 %v557_v38, %v557_v38  ;;  %v561_v48 = vsel %vm560_vm12, %v557_v38, 0.0 }
 0x136   : > { %v573_v52 = vsel %vm560_vm12, %v571_v42, 0.0 }
 0x139   : > { %v545_v41 = vpop.f32.mrf.mxu2 }
 0x13a   : > { %v517_v43 = vpop.f32.mrf.mxu0  ;;  %v530_v44 = vpop.f32.mrf.mxu1 }
 0x13b   : > { %v555_v45 = vmul.f32 %v549_v39, %v517_v43  ;;  %v556_v46 = vmul.f32 %v550_v40, %v530_v44  ;;  %v579_v47 = vpack.c.bf16 %v530_v44, %v517_v43 }
 0x13d   : > { %v569_v49 = vmul.f32 %v555_v45, %v555_v45  ;;  %v570_v50 = vmul.f32 %v556_v46, %v556_v46  ;;  %581 = vst [vmem:[%s273_s27] sm:$0xff] %v579_v47  ;;  %v559_v51 = vadd.f32 %v556_v46, %v555_v45 }
 0x13f   : > { %v562_v53 = vadd.f32 %v561_v48, %v559_v51  ;;  %v572_v54 = vadd.f32 %v570_v50, %v569_v49 }
 0x141   : > { %563 = vadd.xlane.f32.xlu1 %v562_v53  ;;  %v574_v55 = vadd.f32 %v573_v52, %v572_v54 }
 0x142   : > { %v519_v56 = vpop.f32.mrf.mxu0  ;;  %v532_v57 = vpop.f32.mrf.mxu1 }
 0x143   : > { %575 = vadd.xlane.f32.xlu2 %v574_v55 }
 0x1b4   : > { %v564_v59 = vpop.xlane.xlu1 %563 }
 0x1b5   : > { %v565_v61 = vadd.f32 %v564_v59, %v558_v58 }
 0x1b6   : > { %v576_v62 = vpop.xlane.xlu2 %575 }
 0x1b7   : > { %567 = vst.msk [vmem:[%s970_s14] sm:$0xff] %vm288_vm11, %v565_v61  ;;  %v577_v63 = vadd.f32 %v576_v62, %v568_v60 }
 0x1b9   : > { %578 = vst.msk [vmem:[%s980_s24] sm:$0xff] %vm288_vm11, %v577_v63 }
 0x1ba PF: > { %s16_s20 = sadd.s32 1, %s865_s20   ;;  %s1011_s18 = smov %s861_s19 }
 0x1bb   : > { %p13_p5 = scmp.ge.s32.totalorder %s16_s20, 4   ;;  %s1012_s19 = smov %s1014_s21 }
 0x1bd   :  { %15 = sbr.rel (!%p13_p5) target bundleno = 2 (0x2), region = 90 }

// kernel: varnet2_forward.61
= control target key start
LH: loop header
LB: loop body
LE: loop exit
PB: predicated region body
PF: predicated region fallthrough
CT: control target
= control target key end

     0   :  { %s487_s12 = smov 0   ;;  %s489_s13 = smov 0   ;;  %s526_s0 = inlined_call_operand.vmem [shape: bf16[2,16,80], index: 0, kind: input, shape index: {}]   ;;  %s527_s1 = inlined_call_operand.vmem [shape: f32[2,16,1], index: 1, kind: input, shape index: {}]   ;;  %s528_s2 = inlined_call_operand.vmem [shape: f32[2,16,1], index: 2, kind: input, shape index: {}]   ;;  %s529_s3 = inlined_call_operand.vmem [shape: bf16[2,16,80], index: 3, kind: output, shape index: {}]  }
   0x1   :  { %s491_s14 = smov 0  }
   0x2 LB: > { %s25_s15 = sadd.s32 1, %s460_s13  ;;  %p396_p0 = scmp.ge.s32.totalorder %s464_s14, 1  ;;  %s464_s14 = sphi %s491_s14, %s13_s14   ;;  %s460_s13 = sphi %s489_s13, %s531_s13   ;;  %s456_s12 = sphi %s487_s12, %s530_s12  }
   0x3   : > { %p27_p1 = scmp.ge.s32.totalorder %s25_s15, 2  ;;  %p176_p2 = scmp.lt.s32.totalorder %s464_s14, 3 }
   0x5   : > { %s533_s15 = smov (%p27_p1, %s25_s15), 0  ;;  %p177_p3 = pnand %p396_p0, %p176_p2 }
   0x6   : > { %p216_p4 = scmp.lt.s32.totalorder (!%p177_p3), %s456_s12, 1 }
   0x7   : > { %180 = sbr.rel (%p177_p3) target bundleno = 150 (0x96), region = 32 }
   0xc   : > { %v466_v0 = vmov 0   ;;  %s535_s12 = smov (!%p216_p4, %s456_s12), 1  ;;  %vm282_vm1 = vcmask 650240  }
   0xd   : > { %441 = vset.pattern.permute.xlu1 %v466_v0  ;;  %440 = vset.pattern.permute.xlu0 %v466_v0  ;;  %s408_s16 = sshll.u32 %s535_s12, 4  ;;  %s407_s23 = sshll.u32 %s535_s12, 3 }
   0xe   : > { %s233_s19 = scalar_lea.vmem %s528_s2, %s408_s16  ;;  %s228_s22 = scalar_lea.vmem %s527_s1, %s408_s16 }
   0xf   : > { %v260_v1 = vld [vmem:[%s233_s19] sm:$0xff]  ;;  %v261_v3 = vld [vmem:[%s233_s19 + $0x8] sm:$0xff]  ;;  %s223_s26 = scalar_lea.vmem %s526_s0, %s407_s23  ;;  %s241_s29 = scalar_lea.vmem %s529_s3, %s407_s23 }
  0x10   : > { %v246_v2 = vld [vmem:[%s228_s22] sm:$0xff]  ;;  %264 = vperm.xlu1 %441, %v260_v1   ;;  %v247_v4 = vld [vmem:[%s228_s22 + $0x8] sm:$0xff] }
  0x11   : > { %250 = vperm.xlu0 %440, %v246_v2   ;;  %v412_v5 = vld [vmem:[%s223_s26] sm:$0xff]  }
  0x12   : > { %v413_v6 = vunpack.c.l.bf16 %v412_v5  ;;  %v414_v12 = vunpack.c.h.bf16 %v412_v5 }
  0x18   : > { %269 = vperm.xlu1 %441, %v261_v3  }
  0x19   : > { %255 = vperm.xlu0 %440, %v247_v4  }
  0x82   : > { %v265_v7 = vpop.permute.xlu1 %264 }
  0x83   : > { %v251_v8 = vpop.permute.xlu0 %250 }
  0x84   : > { %v258_v9 = vsub.f32 %v413_v6, %v251_v8 }
  0x86   : > { %v272_v10 = vmul.f32 %v265_v7, %v258_v9 }
  0x88   : > { %vm274_vm0 = vcmp.ge.f32.partialorder %v272_v10, 0.0  ;;  %v276_v11 = vmul.f32 0.2, %v272_v10 }
  0x8a   : > { %v278_v13 = vsel %vm274_vm0, %v272_v10, %v276_v11  ;;  %v270_v17 = vpop.permute.xlu1 %269 }
  0x8b   : > { %v280_v14 = vpack.c.bf16 %v278_v13, %v278_v13  ;;  %v256_v15 = vpop.permute.xlu0 %255 }
  0x8c   : > { %v259_v16 = vsub.f32 %v414_v12, %v256_v15 }
  0x8d   : > { %283 = vst.msk [vmem:[%s241_s29] sm:$0xf] %vm282_vm1, %v280_v14 }
  0x8e   : > { %v273_v18 = vmul.f32 %v270_v17, %v259_v16 }
  0x90   : > { %vm275_vm2 = vcmp.ge.f32.partialorder %v273_v18, 0.0  ;;  %v277_v19 = vmul.f32 0.2, %v273_v18 }
  0x92   : > { %v279_v20 = vsel %vm275_vm2, %v273_v18, %v277_v19 }
  0x93   : > { %v281_v21 = vpack.c.bf16 %v279_v20, %v279_v20 }
  0x95   : > { %284 = vst.msk [vmem:[%s241_s29 + $0x4] sm:$0xf] %vm282_vm1, %v281_v21 }
  0x96 PF: > { %s13_s14 = sadd.s32 1, %s464_s14   ;;  %s530_s12 = smov %s460_s13 }
  0x97   : > { %p10_p5 = scmp.ge.s32.totalorder %s13_s14, 4   ;;  %s531_s13 = smov %s533_s15 }
  0x99   :  { %12 = sbr.rel (!%p10_p5) target bundleno = 2 (0x2), region = 68 }

// kernel: varnet2_forward.60
= control target key start
LH: loop header
LB: loop body
LE: loop exit
PB: predicated region body
PF: predicated region fallthrough
CT: control target
= control target key end

     0   :  { %s713_s18 = smov 0   ;;  %s715_s19 = smov 0   ;;  %s802_s0 = inlined_call_operand.vmem [shape: bf16[2,1,8,110], index: 0, kind: input, shape index: {}]   ;;  %s803_s1 = inlined_call_operand.vmem [shape: bf16[16,72], index: 1, kind: input, shape index: {}]   ;;  %s804_s2 = inlined_call_operand.vmem [shape: f32[1,80], index: 2, kind: input, shape index: {}]   ;;  %s805_s3 = inlined_call_operand.vmem [shape: bf16[2,16,80], index: 3, kind: output, shape index: {0}]   ;;  %s806_s4 = inlined_call_operand.vmem [shape: f32[2,16,1], index: 4, kind: output, shape index: {1}]   ;;  %s807_s5 = inlined_call_operand.vmem [shape: f32[2,16,1], index: 5, kind: output, shape index: {2}]  }
   0x1   :  { %s717_s20 = smov 0  }
   0x2 LB: > { %s28_s21 = sadd.s32 1, %s668_s19  ;;  %p577_p0 = scmp.ge.s32.totalorder %s672_s20, 1  ;;  %s672_s20 = sphi %s717_s20, %s16_s20   ;;  %s668_s19 = sphi %s715_s19, %s809_s19   ;;  %s664_s18 = sphi %s713_s18, %s808_s18  }
   0x3   : > { %p30_p1 = scmp.ge.s32.totalorder %s28_s21, 2  ;;  %p210_p2 = scmp.lt.s32.totalorder %s672_s20, 3 }
   0x5   : > { %s811_s21 = smov (%p30_p1, %s28_s21), 0  ;;  %p211_p3 = pnand %p577_p0, %p210_p2 }
   0x6   : > { %p253_p4 = scmp.lt.s32.totalorder (!%p211_p3), %s664_s18, 1  ;;  %s674_s26 = smov (!%p211_p3), 107  }
   0x7   : > { %214 = sbr.rel (%p211_p3) target bundleno = 422 (0x1a6), region = 32  ;;  %s675_s27 = smov (!%p211_p3), 106  }
   0x8   : > { %s676_s28 = smov (!%p211_p3), 116   ;;  %s677_s29 = smov (!%p211_p3), 117  }
   0x9   : > { %s678_s30 = smov (!%p211_p3), 108   ;;  %s679_s6 = smov (!%p211_p3), 126  }
   0xa   : > { %s680_s7 = smov (!%p211_p3), 118   ;;  %s681_s8 = smov (!%p211_p3), 127  }
   0xc   : > { %s813_s18 = smov (!%p253_p4, %s664_s18), 1  ;;  %vm289_vm0 = vcmask 650240   ;;  %vm371_vm1 = vcmask 1043456   ;;  %v615_v17 = vld [vmem:[%s803_s1] sm:$0xff]  ;;  %vm367_vm2 = vcmask 588800   ;;  %vm283_vm3 = vcmask 7168  }
   0xd   : > { %s578_s22 = sshll.u32 %s813_s18, 2  ;;  %s609_s11 = sshll.u32 %s813_s18, 4  ;;  %v682_v18 = vmov 0.0   ;;  %v649_v19 = vld [vmem:[%s804_s2] ss:$0 sm:$0xff]  ;;  %vm397_vm4 = vcmask 654336  }
   0xe   : > { %s259_s25 = scalar_lea.vmem %s802_s0, %s578_s22  ;;  %s753_s14 = scalar_lea.vmem %s806_s4, %s609_s11 }
   0xf   : > { %v288_v0 = vld [vmem:[%s259_s25] sm:$0xf]  ;;  %284 = vst.msk [vmem:[%s753_s14] sm:$0xff] %vm283_vm3, %v682_v18  ;;  %s762_s17 = scalar_lea.vmem %s807_s5, %s609_s11  ;;  %s608_s22 = sshll.u32 %s813_s18, 3 }
  0x10   : > { %316 = vrot.lane.b32.xlu1 %v288_v0, %s674_s26  ;;  %320 = vrot.lane.b32.xlu0 %v288_v0, %s675_s27  ;;  %290 = vst.msk [vmem:[#allocation2] sm:$0xf] %vm289_vm0, %v288_v0  ;;  %s267_s27 = scalar_lea.vmem %s805_s3, %s608_s22 }
  0x11   : > { %308 = vrot.lane.b32.xlu2 %v288_v0, %s676_s28  ;;  %285 = vst.msk [vmem:[%s753_s14 + $0x8] sm:$0xff] %vm283_vm3, %v682_v18 }
  0x12   : > { %286 = vst.msk [vmem:[%s762_s17] sm:$0xff] %vm283_vm3, %v682_v18 }
  0x13   : > { %287 = vst.msk [vmem:[%s762_s17 + $0x8] sm:$0xff] %vm283_vm3, %v682_v18 }
  0x16   : > { %v395_v32 = vld [vmem:[%s753_s14] sm:$0xff] }
  0x18   : > { %304 = vrot.lane.b32.xlu1 %v288_v0, %s677_s29  ;;  %312 = vrot.lane.b32.xlu0 %v288_v0, %s678_s30  ;;  %v396_v38 = vld [vmem:[%s753_s14 + $0x8] sm:$0xff] }
  0x19   : > { %296 = vrot.lane.b32.xlu2 %v288_v0, %s679_s6  ;;  %v409_v34 = vld [vmem:[%s762_s17] sm:$0xff] }
  0x1a   : > { %v410_v40 = vld [vmem:[%s762_s17 + $0x8] sm:$0xff] }
  0x20   : > { %300 = vrot.lane.b32.xlu0 %v288_v0, %s680_s7  ;;  %292 = vrot.lane.b32.xlu1 %v288_v0, %s681_s8 }
  0x6b   : > { %v309_v1 = vpop.permute.xlu2 %308 }
  0x6c   : > { %311 = vst.msk [vmem:[#allocation2 + $0x14] sm:$0xf] %vm289_vm0, %v309_v1 }
  0x73   : > { %v297_v2 = vpop.permute.xlu2 %296 }
  0x74   : > { %299 = vst.msk [vmem:[#allocation2 + $0x8] sm:$0xf] %vm289_vm0, %v297_v2 }
  0x82   : > { %v317_v3 = vpop.permute.xlu1 %316  ;;  %v321_v4 = vpop.permute.xlu0 %320 }
  0x83   : > { %319 = vst.msk [vmem:[#allocation2 + $0x1c] sm:$0xf] %vm289_vm0, %v317_v3 }
  0x84   : > { %323 = vst.msk [vmem:[#allocation2 + $0x20] sm:$0xf] %vm289_vm0, %v321_v4 }
  0x8a   : > { %v305_v5 = vpop.permute.xlu1 %304  ;;  %v313_v6 = vpop.permute.xlu0 %312 }
  0x8b   : > { %307 = vst.msk [vmem:[#allocation2 + $0x10] sm:$0xf] %vm289_vm0, %v305_v5  ;;  %v332_v7 = vld [vmem:[#allocation2 + $0x20] sm:$0xf] }
  0x8c   : > { %315 = vst.msk [vmem:[#allocation2 + $0x18] sm:$0xf] %vm289_vm0, %v313_v6  ;;  %v357_v8 = vunpack.c.l.b16 %v332_v7 }
  0x8e   : > { %v362_v9 = vpack.c.b16 %v357_v8, %v357_v8 }
  0x90   : > { %v373_v10 = vsel %vm371_vm1, %v362_v9, 0 }
  0x91   : > { %378 = vmatpush.bf16.msra.mxu0 %v373_v10 }
  0x92   : > { %v301_v11 = vpop.permute.xlu0 %300  ;;  %v293_v12 = vpop.permute.xlu1 %292  ;;  %v613_v14 = vld [vmem:[#allocation2 + $0x10] sm:$0xff] }
  0x93   : > { %303 = vst.msk [vmem:[#allocation2 + $0xc] sm:$0xf] %vm289_vm0, %v301_v11  ;;  %v614_v13 = vld [vmem:[#allocation2 + $0x18] sm:$0xff] }
  0x94   : > { %295 = vst.msk [vmem:[#allocation2 + $0x4] sm:$0xf] %vm289_vm0, %v293_v12 }
  0x95   : > { %379 = vmatpush.bf16.msra.mxu0 %v614_v13 }
  0x99   : > { %380 = vmatpush.bf16.msra.mxu0 %v613_v14 }
  0x9a   : > { %v612_v15 = vld [vmem:[#allocation2 + $0x8] sm:$0xff] }
  0x9b   : > { %v611_v16 = vld [vmem:[#allocation2] sm:$0xff] }
  0x9d   : > { %381 = vmatpush.bf16.msra.mxu0 %v612_v15 }
  0xa1   : > { %382 = vmatpush.bf16.msra.mxu0 %v611_v16 }
  0xa4   : > { %605 = vmatmul.msk.bf16.vlgmr.msra.gmra.mxu0 %vm367_vm2, %v615_v17 }
 0x121   : > { %v384_v20 = vpop.f32.mrf.mxu0 }
 0x122   : > { %v393_v21 = vmul.f32 %v649_v19, %v384_v20  ;;  %v423_v22 = vpack.c.bf16 %v384_v20, %v384_v20 }
 0x124   : > { %425 = vst.msk [vmem:[%s267_s27] sm:$0xf] %vm289_vm0, %v423_v22  ;;  %v398_v23 = vsel %vm397_vm4, %v393_v21, 0.0  ;;  %v411_v24 = vmul.f32 %v393_v21, %v393_v21 }
 0x125   : > { %399 = vadd.xlane.f32.xlu2 %v398_v23 }
 0x126   : > { %v413_v25 = vsel %vm397_vm4, %v411_v24, 0.0 }
 0x127   : > { %414 = vadd.xlane.f32.xlu1 %v413_v25 }
 0x129   : > { %v386_v26 = vpop.f32.mrf.mxu0 }
 0x12a   : > { %v394_v27 = vmul.f32 %v649_v19, %v386_v26  ;;  %v424_v28 = vpack.c.bf16 %v386_v26, %v386_v26 }
 0x12c   : > { %426 = vst.msk [vmem:[%s267_s27 + $0x4] sm:$0xf] %vm289_vm0, %v424_v28  ;;  %v401_v29 = vsel %vm397_vm4, %v394_v27, 0.0  ;;  %v412_v30 = vmul.f32 %v394_v27, %v394_v27 }
 0x12d   : > { %402 = vadd.xlane.f32.xlu0 %v401_v29 }
 0x12e   : > { %v416_v31 = vsel %vm397_vm4, %v412_v30, 0.0 }
 0x12f   : > { %417 = vadd.xlane.f32.xlu2 %v416_v31 }
 0x198   : > { %v400_v33 = vpop.xlane.xlu2 %399 }
 0x199   : > { %v404_v35 = vadd.f32 %v400_v33, %v395_v32 }
 0x19a   : > { %v415_v36 = vpop.xlane.xlu1 %414 }
 0x19b   : > { %407 = vst.msk [vmem:[%s753_s14] sm:$0xff] %vm283_vm3, %v404_v35  ;;  %v419_v37 = vadd.f32 %v415_v36, %v409_v34 }
 0x19d   : > { %421 = vst.msk [vmem:[%s762_s17] sm:$0xff] %vm283_vm3, %v419_v37 }
 0x1a0   : > { %v403_v39 = vpop.xlane.xlu0 %402 }
 0x1a1   : > { %v405_v41 = vadd.f32 %v403_v39, %v396_v38 }
 0x1a2   : > { %v418_v42 = vpop.xlane.xlu2 %417 }
 0x1a3   : > { %408 = vst.msk [vmem:[%s753_s14 + $0x8] sm:$0xff] %vm283_vm3, %v405_v41  ;;  %v420_v43 = vadd.f32 %v418_v42, %v410_v40 }
 0x1a5   : > { %422 = vst.msk [vmem:[%s762_s17 + $0x8] sm:$0xff] %vm283_vm3, %v420_v43 }
 0x1a6 PF: > { %s16_s20 = sadd.s32 1, %s672_s20   ;;  %s808_s18 = smov %s668_s19 }
 0x1a7   : > { %p13_p5 = scmp.ge.s32.totalorder %s16_s20, 4   ;;  %s809_s19 = smov %s811_s21 }
 0x1a9   :  { %15 = sbr.rel (!%p13_p5) target bundleno = 2 (0x2), region = 90 }

// kernel: varnet2_forward.62
= control target key start
LH: loop header
LB: loop body
LE: loop exit
PB: predicated region body
PF: predicated region fallthrough
CT: control target
= control target key end

     0   :  { %s842_s18 = smov 0   ;;  %s844_s19 = smov 0   ;;  %s952_s0 = inlined_call_operand.vmem [shape: bf16[2,1,16,110], index: 0, kind: input, shape index: {}]   ;;  %s953_s1 = inlined_call_operand.vmem [shape: bf16[16,144], index: 1, kind: input, shape index: {}]   ;;  %s954_s2 = inlined_call_operand.vmem [shape: f32[1,80], index: 2, kind: input, shape index: {}]   ;;  %s955_s3 = inlined_call_operand.vmem [shape: bf16[2,16,80], index: 3, kind: output, shape index: {0}]   ;;  %s956_s4 = inlined_call_operand.vmem [shape: f32[2,16,1], index: 4, kind: output, shape index: {1}]   ;;  %s957_s5 = inlined_call_operand.vmem [shape: f32[2,16,1], index: 5, kind: output, shape index: {2}]  }
   0x1   :  { %s846_s20 = smov 0  }
   0x2 LB: > { %s28_s21 = sadd.s32 1, %s797_s19  ;;  %p674_p0 = scmp.ge.s32.totalorder %s801_s20, 1  ;;  %s801_s20 = sphi %s846_s20, %s16_s20   ;;  %s797_s19 = sphi %s844_s19, %s959_s19   ;;  %s793_s18 = sphi %s842_s18, %s958_s18  }
   0x3   : > { %p30_p1 = scmp.ge.s32.totalorder %s28_s21, 2  ;;  %p212_p2 = scmp.lt.s32.totalorder %s801_s20, 3 }
   0x5   : > { %s961_s21 = smov (%p30_p1, %s28_s21), 0  ;;  %p213_p3 = pnand %p674_p0, %p212_p2 }
   0x6   : > { %p257_p4 = scmp.lt.s32.totalorder (!%p213_p3), %s793_s18, 1  ;;  %s803_s26 = smov (!%p213_p3), 108  }
   0x7   : > { %216 = sbr.rel (%p213_p3) target bundleno = 448 (0x1c0), region = 32  ;;  %s804_s27 = smov (!%p213_p3), 107  }
   0x8   : > { %s805_s28 = smov (!%p213_p3), 116   ;;  %s806_s29 = smov (!%p213_p3), 117  }
   0x9   : > { %s807_s30 = smov (!%p213_p3), 118   ;;  %s808_s6 = smov (!%p213_p3), 126  }
   0xa   : > { %s809_s7 = smov (!%p213_p3), 127   ;;  %s810_s8 = smov (!%p213_p3), 106  }
   0xc   : > { %s963_s18 = smov (!%p257_p4, %s793_s18), 1  ;;  %vm296_vm0 = vcmask 650240   ;;  %v685_v26 = vld [vmem:[%s953_s1] sm:$0xf]  ;;  %v744_v27 = vld [vmem:[%s953_s1 + $0x4] sm:$0xf0] }
   0xd   : > { %s730_s22 = sshll.u32 %s963_s18, 3  ;;  %v686_v28 = vor.u32 %v744_v27, %v685_v26  ;;  %v743_v29 = vld [vmem:[%s953_s1 + $0x4] sm:$0xf]  ;;  %v687_v30 = vld [vmem:[%s953_s1 + $0x8] sm:$0xf0]  ;;  %vm448_vm1 = vcmask 130048  }
   0xe   : > { %s265_s25 = scalar_lea.vmem %s952_s0, %s730_s22  ;;  %v690_v32 = vor.u32 %v743_v29, %v687_v30  ;;  %s732_s17 = sshll.u32 %s963_s18, 4  ;;  %vm289_vm2 = vcmask 7168   ;;  %v811_v33 = vmov 0.0   ;;  %v778_v35 = vld [vmem:[%s954_s2] ss:$0 sm:$0xff]  ;;  %vm488_vm3 = vcmask 654336  }
   0xf   : > { %v294_v0 = vld [vmem:[%s265_s25] sm:$0xf]  ;;  %v295_v1 = vld [vmem:[%s265_s25 + $0x4] sm:$0xf]  ;;  %s902_s25 = scalar_lea.vmem %s956_s4, %s732_s17 }
  0x10   : > { %341 = vrot.lane.b32.xlu1 %v294_v0, %s803_s26  ;;  %349 = vrot.lane.b32.xlu0 %v294_v0, %s804_s27  ;;  %297 = vst.msk [vmem:[#allocation2] sm:$0xf] %vm296_vm0, %v294_v0 }
  0x11   : > { %333 = vrot.lane.b32.xlu2 %v294_v0, %s805_s28  ;;  %298 = vst.msk [vmem:[#allocation2 + $0x4] sm:$0xf] %vm296_vm0, %v295_v1 }
  0x12   : > { %290 = vst.msk [vmem:[%s902_s25] sm:$0xff] %vm289_vm2, %v811_v33 }
  0x13   : > { %291 = vst.msk [vmem:[%s902_s25 + $0x8] sm:$0xff] %vm289_vm2, %v811_v33 }
  0x18   : > { %343 = vrot.lane.b32.xlu1 %v295_v1, %s803_s26  ;;  %351 = vrot.lane.b32.xlu0 %v295_v1, %s804_s27  ;;  %v734_v25 = vld [vmem:[#allocation2] sm:$0xff] }
  0x19   : > { %335 = vrot.lane.b32.xlu2 %v295_v1, %s805_s28  ;;  %s907_s28 = scalar_lea.vmem %s957_s5, %s732_s17  ;;  %v486_v51 = vld [vmem:[%s902_s25] sm:$0xff] }
  0x1a   : > { %292 = vst.msk [vmem:[%s907_s28] sm:$0xff] %vm289_vm2, %v811_v33  ;;  %v487_v57 = vld [vmem:[%s902_s25 + $0x8] sm:$0xff] }
  0x1b   : > { %293 = vst.msk [vmem:[%s907_s28 + $0x8] sm:$0xff] %vm289_vm2, %v811_v33 }
  0x20   : > { %327 = vrot.lane.b32.xlu1 %v295_v1, %s806_s29  ;;  %325 = vrot.lane.b32.xlu0 %v294_v0, %s806_s29 }
  0x21   : > { %317 = vrot.lane.b32.xlu2 %v294_v0, %s807_s30  ;;  %v500_v53 = vld [vmem:[%s907_s28] sm:$0xff] }
  0x22   : > { %v501_v60 = vld [vmem:[%s907_s28 + $0x8] sm:$0xff] }
  0x28   : > { %309 = vrot.lane.b32.xlu1 %v294_v0, %s808_s6  ;;  %319 = vrot.lane.b32.xlu0 %v295_v1, %s807_s30 }
  0x29   : > { %311 = vrot.lane.b32.xlu2 %v295_v1, %s808_s6 }
  0x30   : > { %303 = vrot.lane.b32.xlu1 %v295_v1, %s809_s7  ;;  %301 = vrot.lane.b32.xlu0 %v294_v0, %s809_s7 }
  0x31   : > { %357 = vrot.lane.b32.xlu2 %v294_v0, %s810_s8 }
  0x38   : > { %359 = vrot.lane.b32.xlu0 %v295_v1, %s810_s8  ;;  %s273_s8 = scalar_lea.vmem %s955_s3, %s730_s22 }
  0x6b   : > { %v334_v2 = vpop.permute.xlu2 %333 }
  0x6c   : > { %339 = vst.msk [vmem:[#allocation2 + $0x28] sm:$0xf] %vm296_vm0, %v334_v2 }
  0x73   : > { %v336_v3 = vpop.permute.xlu2 %335 }
  0x74   : > { %340 = vst.msk [vmem:[#allocation2 + $0x2c] sm:$0xf] %vm296_vm0, %v336_v3 }
  0x7b   : > { %v318_v4 = vpop.permute.xlu2 %317  ;;  %v739_v17 = vld [vmem:[#allocation2 + $0x28] sm:$0xff] }
  0x7c   : > { %323 = vst.msk [vmem:[#allocation2 + $0x18] sm:$0xf] %vm296_vm0, %v318_v4 }
  0x82   : > { %v342_v5 = vpop.permute.xlu1 %341  ;;  %v350_v6 = vpop.permute.xlu0 %349 }
  0x83   : > { %347 = vst.msk [vmem:[#allocation2 + $0x30] sm:$0xf] %vm296_vm0, %v342_v5  ;;  %v312_v7 = vpop.permute.xlu2 %311 }
  0x84   : > { %355 = vst.msk [vmem:[#allocation2 + $0x38] sm:$0xf] %vm296_vm0, %v350_v6 }
  0x85   : > { %316 = vst.msk [vmem:[#allocation2 + $0x14] sm:$0xf] %vm296_vm0, %v312_v7 }
  0x8a   : > { %v344_v8 = vpop.permute.xlu1 %343  ;;  %v352_v9 = vpop.permute.xlu0 %351 }
  0x8b   : > { %348 = vst.msk [vmem:[#allocation2 + $0x34] sm:$0xf] %vm296_vm0, %v344_v8  ;;  %v358_v10 = vpop.permute.xlu2 %357 }
  0x8c   : > { %356 = vst.msk [vmem:[#allocation2 + $0x3c] sm:$0xf] %vm296_vm0, %v352_v9 }
  0x8d   : > { %363 = vst.msk [vmem:[#allocation2 + $0x40] sm:$0xf] %vm296_vm0, %v358_v10 }
  0x92   : > { %v328_v11 = vpop.permute.xlu1 %327  ;;  %v326_v12 = vpop.permute.xlu0 %325  ;;  %v740_v14 = vld [vmem:[#allocation2 + $0x30] sm:$0xff] }
  0x93   : > { %332 = vst.msk [vmem:[#allocation2 + $0x24] sm:$0xf] %vm296_vm0, %v328_v11  ;;  %v741_v13 = vld [vmem:[#allocation2 + $0x38] sm:$0xff] }
  0x94   : > { %331 = vst.msk [vmem:[#allocation2 + $0x20] sm:$0xf] %vm296_vm0, %v326_v12  ;;  %452 = vmatpush.bf16.msra.mxu0 %v741_v13 }
  0x98   : > { %453 = vmatpush.bf16.msra.mxu0 %v740_v14 }
  0x9a   : > { %v310_v15 = vpop.permute.xlu1 %309  ;;  %v320_v16 = vpop.permute.xlu0 %319 }
  0x9b   : > { %315 = vst.msk [vmem:[#allocation2 + $0x10] sm:$0xf] %vm296_vm0, %v310_v15  ;;  %v738_v18 = vld [vmem:[#allocation2 + $0x20] sm:$0xff] }
  0x9c   : > { %324 = vst.msk [vmem:[#allocation2 + $0x1c] sm:$0xf] %vm296_vm0, %v320_v16  ;;  %454 = vmatpush.bf16.msra.mxu0 %v739_v17 }
  0xa0   : > { %455 = vmatpush.bf16.msra.mxu0 %v738_v18 }
  0xa2   : > { %v304_v19 = vpop.permute.xlu1 %303  ;;  %v302_v20 = vpop.permute.xlu0 %301  ;;  %v736_v22 = vld [vmem:[#allocation2 + $0x10] sm:$0xff] }
  0xa3   : > { %308 = vst.msk [vmem:[#allocation2 + $0xc] sm:$0xf] %vm296_vm0, %v304_v19  ;;  %v737_v21 = vld [vmem:[#allocation2 + $0x18] sm:$0xff] }
  0xa4   : > { %307 = vst.msk [vmem:[#allocation2 + $0x8] sm:$0xf] %vm296_vm0, %v302_v20  ;;  %456 = vmatpush.bf16.msra.mxu0 %v737_v21 }
  0xa8   : > { %457 = vmatpush.bf16.msra.mxu0 %v736_v22 }
  0xaa   : > { %v360_v23 = vpop.permute.xlu0 %359 }
  0xab   : > { %364 = vst.msk [vmem:[#allocation2 + $0x44] sm:$0xf] %vm296_vm0, %v360_v23  ;;  %v735_v24 = vld [vmem:[#allocation2 + $0x8] sm:$0xff] }
  0xac   : > { %458 = vmatpush.bf16.msra.mxu0 %v735_v24 }
  0xb0   : > { %459 = vmatpush.bf16.msra.mxu0 %v734_v25 }
  0xb2   : > { %v742_v31 = vld [vmem:[#allocation2 + $0x40] sm:$0xff] }
  0xb3   : > { %460 = vmatmul.bf16.vlgmr.msra.gmra.mxu0 %v686_v28  ;;  %473 = vmatpush.bf16.msra.mxu1 %v742_v31 }
  0xb6   : > { %727 = vmatmul.msk.bf16.vlgmr.msra.gmra.mxu1 %vm448_vm1, %v690_v32 }
 0x130   : > { %v461_v34 = vpop.f32.mrf.mxu0 }
 0x133   : > { %v475_v36 = vpop.f32.mrf.mxu1 }
 0x134   : > { %v476_v37 = vadd.f32 %v475_v36, %v461_v34 }
 0x136   : > { %v514_v38 = vpack.c.bf16 %v476_v37, %v476_v37  ;;  %v484_v39 = vmul.f32 %v778_v35, %v476_v37 }
 0x138   : > { %516 = vst.msk [vmem:[%s273_s8] sm:$0xf] %vm296_vm0, %v514_v38  ;;  %v489_v40 = vsel %vm488_vm3, %v484_v39, 0.0  ;;  %v502_v41 = vmul.f32 %v484_v39, %v484_v39  ;;  %v463_v43 = vpop.f32.mrf.mxu0 }
 0x139   : > { %490 = vadd.xlane.f32.xlu1 %v489_v40 }
 0x13a   : > { %v504_v42 = vsel %vm488_vm3, %v502_v41, 0.0 }
 0x13b   : > { %v477_v44 = vpop.f32.mrf.mxu1  ;;  %505 = vadd.xlane.f32.xlu0 %v504_v42 }
 0x13c   : > { %v478_v45 = vadd.f32 %v477_v44, %v463_v43 }
 0x13e   : > { %v515_v46 = vpack.c.bf16 %v478_v45, %v478_v45  ;;  %v485_v47 = vmul.f32 %v778_v35, %v478_v45 }
 0x140   : > { %517 = vst.msk [vmem:[%s273_s8 + $0x4] sm:$0xf] %vm296_vm0, %v515_v46  ;;  %v492_v48 = vsel %vm488_vm3, %v485_v47, 0.0  ;;  %v503_v49 = vmul.f32 %v485_v47, %v485_v47 }
 0x141   : > { %493 = vadd.xlane.f32.xlu2 %v492_v48 }
 0x142   : > { %v507_v50 = vsel %vm488_vm3, %v503_v49, 0.0 }
 0x149   : > { %508 = vadd.xlane.f32.xlu2 %v507_v50 }
 0x1ac   : > { %v491_v52 = vpop.xlane.xlu1 %490 }
 0x1ad   : > { %v495_v54 = vadd.f32 %v491_v52, %v486_v51 }
 0x1ae   : > { %v506_v55 = vpop.xlane.xlu0 %505 }
 0x1af   : > { %498 = vst.msk [vmem:[%s902_s25] sm:$0xff] %vm289_vm2, %v495_v54  ;;  %v510_v56 = vadd.f32 %v506_v55, %v500_v53 }
 0x1b1   : > { %512 = vst.msk [vmem:[%s907_s28] sm:$0xff] %vm289_vm2, %v510_v56 }
 0x1b4   : > { %v494_v58 = vpop.xlane.xlu2 %493 }
 0x1b5   : > { %v496_v59 = vadd.f32 %v494_v58, %v487_v57 }
 0x1b7   : > { %499 = vst.msk [vmem:[%s902_s25 + $0x8] sm:$0xff] %vm289_vm2, %v496_v59 }
 0x1bc   : > { %v509_v61 = vpop.xlane.xlu2 %508 }
 0x1bd   : > { %v511_v62 = vadd.f32 %v509_v61, %v501_v60 }
 0x1bf   : > { %513 = vst.msk [vmem:[%s907_s28 + $0x8] sm:$0xff] %vm289_vm2, %v511_v62 }
 0x1c0 PF: > { %s16_s20 = sadd.s32 1, %s801_s20   ;;  %s958_s18 = smov %s797_s19 }
 0x1c1   : > { %p13_p5 = scmp.ge.s32.totalorder %s16_s20, 4   ;;  %s959_s19 = smov %s961_s21 }
 0x1c3   :  { %15 = sbr.rel (!%p13_p5) target bundleno = 2 (0x2), region = 90 }

// kernel: varnet2_forward.65
= control target key start
LH: loop header
LB: loop body
LE: loop exit
PB: predicated region body
PF: predicated region fallthrough
CT: control target
= control target key end

     0   :  { %s535_s12 = smov 0   ;;  %s537_s13 = smov 0   ;;  %s588_s0 = inlined_call_operand.vmem [shape: bf16[2,32,24], index: 0, kind: input, shape index: {}]   ;;  %s589_s1 = inlined_call_operand.vmem [shape: f32[2,32,1], index: 1, kind: input, shape index: {}]   ;;  %s590_s2 = inlined_call_operand.vmem [shape: f32[2,32,1], index: 2, kind: input, shape index: {}]   ;;  %s591_s3 = inlined_call_operand.vmem [shape: bf16[2,32,24], index: 3, kind: output, shape index: {}]  }
   0x1   :  { %s539_s14 = smov 0  }
   0x2 LB: > { %s25_s15 = sadd.s32 1, %s508_s13  ;;  %p438_p0 = scmp.ge.s32.totalorder %s512_s14, 1  ;;  %s512_s14 = sphi %s539_s14, %s13_s14   ;;  %s508_s13 = sphi %s537_s13, %s593_s13   ;;  %s504_s12 = sphi %s535_s12, %s592_s12  }
   0x3   : > { %p27_p1 = scmp.ge.s32.totalorder %s25_s15, 2  ;;  %p176_p2 = scmp.lt.s32.totalorder %s512_s14, 3 }
   0x5   : > { %s595_s15 = smov (%p27_p1, %s25_s15), 0  ;;  %p177_p3 = pnand %p438_p0, %p176_p2 }
   0x6   : > { %p216_p4 = scmp.lt.s32.totalorder (!%p177_p3), %s504_s12, 1 }
   0x7   : > { %180 = sbr.rel (%p177_p3) target bundleno = 156 (0x9c), region = 32 }
   0xc   : > { %v514_v0 = vmov 0   ;;  %s597_s12 = smov (!%p216_p4, %s504_s12), 1  ;;  %vm322_vm1 = vcmask 191488  }
   0xd   : > { %488 = vset.pattern.permute.xlu1 %v514_v0  ;;  %487 = vset.pattern.permute.xlu0 %v514_v0  ;;  %s450_s16 = sshll.u32 %s597_s12, 5  ;;  %s449_s23 = sshll.u32 %s597_s12, 4 }
   0xe   : > { %489 = vset.pattern.permute.xlu2 %v514_v0  ;;  %s228_s19 = scalar_lea.vmem %s589_s1, %s450_s16  ;;  %s233_s22 = scalar_lea.vmem %s590_s2, %s450_s16 }
   0xf   : > { %v252_v1 = vld [vmem:[%s228_s19 + $0x10] sm:$0xff]  ;;  %v250_v2 = vld [vmem:[%s228_s19] sm:$0xff]  ;;  %v253_v4 = vld [vmem:[%s228_s19 + $0x18] sm:$0xff]  ;;  %s223_s26 = scalar_lea.vmem %s588_s0, %s449_s23  ;;  %s569_s29 = scalar_lea.vmem %s591_s3, %s449_s23 }
  0x10   : > { %266 = vperm.xlu1 %488, %v252_v1   ;;  %256 = vperm.xlu0 %487, %v250_v2   ;;  %v278_v3 = vld [vmem:[%s233_s22] sm:$0xff]  ;;  %v251_v5 = vld [vmem:[%s228_s19 + $0x8] sm:$0xff]  ;;  %v281_v7 = vld [vmem:[%s233_s22 + $0x18] sm:$0xff] }
  0x11   : > { %284 = vperm.xlu2 %489, %v278_v3   ;;  %v279_v6 = vld [vmem:[%s233_s22 + $0x8] sm:$0xff]  ;;  %v280_v8 = vld [vmem:[%s233_s22 + $0x10] sm:$0xff]  ;;  %v454_v9 = vld [vmem:[%s223_s26] sm:$0xff]  }
  0x12   : > { %v455_v10 = vunpack.c.l.bf16 %v454_v9  ;;  %v456_v17 = vunpack.c.h.bf16 %v454_v9  ;;  %v461_v19 = vld [vmem:[%s223_s26 + $0x8] sm:$0xff]  }
  0x13   : > { %v459_v25 = vunpack.c.l.bf16 %v461_v19  ;;  %v460_v26 = vunpack.c.h.bf16 %v461_v19 }
  0x18   : > { %271 = vperm.xlu1 %488, %v253_v4   ;;  %261 = vperm.xlu0 %487, %v251_v5  }
  0x19   : > { %289 = vperm.xlu2 %489, %v279_v6  }
  0x20   : > { %299 = vperm.xlu1 %488, %v281_v7   ;;  %294 = vperm.xlu0 %487, %v280_v8  }
  0x6b   : > { %v285_v11 = vpop.permute.xlu2 %284 }
  0x73   : > { %v290_v24 = vpop.permute.xlu2 %289 }
  0x82   : > { %v267_v12 = vpop.permute.xlu1 %266  ;;  %v257_v13 = vpop.permute.xlu0 %256 }
  0x83   : > { %v274_v14 = vsub.f32 %v455_v10, %v257_v13  ;;  %v276_v29 = vsub.f32 %v459_v25, %v267_v12 }
  0x85   : > { %v302_v15 = vmul.f32 %v285_v11, %v274_v14 }
  0x87   : > { %vm306_vm0 = vcmp.ge.f32.partialorder %v302_v15, 0.0  ;;  %v310_v16 = vmul.f32 0.2, %v302_v15 }
  0x89   : > { %v314_v18 = vsel %vm306_vm0, %v302_v15, %v310_v16 }
  0x8a   : > { %v318_v20 = vpack.c.bf16 %v314_v18, %v314_v18  ;;  %v272_v21 = vpop.permute.xlu1 %271  ;;  %v262_v22 = vpop.permute.xlu0 %261 }
  0x8b   : > { %v275_v23 = vsub.f32 %v456_v17, %v262_v22  ;;  %v277_v30 = vsub.f32 %v460_v26, %v272_v21 }
  0x8c   : > { %323 = vst.msk [vmem:[%s569_s29] sm:$0xf] %vm322_vm1, %v318_v20 }
  0x8d   : > { %v303_v27 = vmul.f32 %v290_v24, %v275_v23 }
  0x8f   : > { %vm307_vm2 = vcmp.ge.f32.partialorder %v303_v27, 0.0  ;;  %v311_v28 = vmul.f32 0.2, %v303_v27 }
  0x91   : > { %v315_v31 = vsel %vm307_vm2, %v303_v27, %v311_v28 }
  0x92   : > { %v319_v32 = vpack.c.bf16 %v315_v31, %v315_v31  ;;  %v300_v33 = vpop.permute.xlu1 %299  ;;  %v295_v34 = vpop.permute.xlu0 %294 }
  0x93   : > { %v305_v35 = vmul.f32 %v300_v33, %v277_v30  ;;  %v304_v36 = vmul.f32 %v295_v34, %v276_v29 }
  0x94   : > { %324 = vst.msk [vmem:[%s569_s29 + $0x4] sm:$0xf] %vm322_vm1, %v319_v32 }
  0x95   : > { %vm309_vm3 = vcmp.ge.f32.partialorder %v305_v35, 0.0  ;;  %v313_v37 = vmul.f32 0.2, %v305_v35  ;;  %vm308_vm4 = vcmp.ge.f32.partialorder %v304_v36, 0.0  ;;  %v312_v38 = vmul.f32 0.2, %v304_v36 }
  0x97   : > { %v317_v39 = vsel %vm309_vm3, %v305_v35, %v313_v37  ;;  %v316_v40 = vsel %vm308_vm4, %v304_v36, %v312_v38 }
  0x98   : > { %v321_v41 = vpack.c.bf16 %v317_v39, %v317_v39  ;;  %v320_v42 = vpack.c.bf16 %v316_v40, %v316_v40 }
  0x9a   : > { %326 = vst.msk [vmem:[%s569_s29 + $0xc] sm:$0xf] %vm322_vm1, %v321_v41 }
  0x9b   : > { %325 = vst.msk [vmem:[%s569_s29 + $0x8] sm:$0xf] %vm322_vm1, %v320_v42 }
  0x9c PF: > { %s13_s14 = sadd.s32 1, %s512_s14   ;;  %s592_s12 = smov %s508_s13 }
  0x9d   : > { %p10_p5 = scmp.ge.s32.totalorder %s13_s14, 4   ;;  %s593_s13 = smov %s595_s15 }
  0x9f   :  { %12 = sbr.rel (!%p10_p5) target bundleno = 2 (0x2), region = 68 }

// kernel: varnet2_forward.64
= control target key start
LH: loop header
LB: loop body
LE: loop exit
PB: predicated region body
PF: predicated region fallthrough
CT: control target
= control target key end

     0   :  { %s921_s18 = smov 0   ;;  %s923_s19 = smov 0   ;;  %s1074_s0 = inlined_call_operand.vmem [shape: bf16[2,1,16,42], index: 0, kind: input, shape index: {}]   ;;  %s1075_s1 = inlined_call_operand.vmem [shape: bf16[32,144], index: 1, kind: input, shape index: {}]   ;;  %s1076_s2 = inlined_call_operand.vmem [shape: f32[1,24], index: 2, kind: input, shape index: {}]   ;;  %s1077_s3 = inlined_call_operand.vmem [shape: bf16[2,32,24], index: 3, kind: output, shape index: {0}]   ;;  %s1078_s4 = inlined_call_operand.vmem [shape: f32[2,32,1], index: 4, kind: output, shape index: {1}]   ;;  %s1079_s5 = inlined_call_operand.vmem [shape: f32[2,32,1], index: 5, kind: output, shape index: {2}]  }
   0x1   :  { %s925_s20 = smov 0  }
   0x2 LB: > { %s28_s21 = sadd.s32 1, %s876_s19  ;;  %p734_p0 = scmp.ge.s32.totalorder %s880_s20, 1  ;;  %s880_s20 = sphi %s925_s20, %s16_s20   ;;  %s876_s19 = sphi %s923_s19, %s1081_s19   ;;  %s872_s18 = sphi %s921_s18, %s1080_s18  }
   0x3   : > { %p30_p1 = scmp.ge.s32.totalorder %s28_s21, 2  ;;  %p212_p2 = scmp.lt.s32.totalorder %s880_s20, 3 }
   0x5   : > { %s1083_s21 = smov (%p30_p1, %s28_s21), 0  ;;  %p213_p3 = pnand %p734_p0, %p212_p2 }
   0x6   : > { %p257_p4 = scmp.lt.s32.totalorder (!%p213_p3), %s872_s18, 1  ;;  %s882_s26 = smov (!%p213_p3), 116  }
   0x7   : > { %216 = sbr.rel (%p213_p3) target bundleno = 460 (0x1cc), region = 32  ;;  %s883_s27 = smov (!%p213_p3), 115  }
   0x8   : > { %s884_s28 = smov (!%p213_p3), 120   ;;  %s885_s29 = smov (!%p213_p3), 121  }
   0x9   : > { %s886_s30 = smov (!%p213_p3), 122   ;;  %s887_s6 = smov (!%p213_p3), 114  }
   0xa   : > { %s888_s7 = smov (!%p213_p3), 126   ;;  %s889_s8 = smov (!%p213_p3), 127  }
   0xc   : > { %s1085_s18 = smov (!%p257_p4, %s872_s18), 1  ;;  %vm300_vm0 = vcmask 191488   ;;  %v812_v19 = vld [vmem:[%s1075_s1 + $0x4] sm:$0xf]  ;;  %v747_v20 = vld [vmem:[%s1075_s1 + $0x8] sm:$0xf0] }
   0xd   : > { %s799_s22 = sshll.u32 %s1085_s18, 3  ;;  %v750_v25 = vor.u32 %v812_v19, %v747_v20  ;;  %vm463_vm1 = vcmask 130048   ;;  %v814_v28 = vld [vmem:[%s1075_s1 + $0x14] sm:$0xf]  ;;  %v755_v29 = vld [vmem:[%s1075_s1 + $0x18] sm:$0xf0] }
   0xe   : > { %s265_s25 = scalar_lea.vmem %s1074_s0, %s799_s22  ;;  %v745_v32 = vld [vmem:[%s1075_s1] sm:$0xf]  ;;  %v758_v33 = vor.u32 %v814_v28, %v755_v29  ;;  %v813_v34 = vld [vmem:[%s1075_s1 + $0x4] sm:$0xf0]  ;;  %v753_v35 = vld [vmem:[%s1075_s1 + $0x10] sm:$0xf] }
   0xf   : > { %v298_v0 = vld [vmem:[%s265_s25] sm:$0xf]  ;;  %v299_v1 = vld [vmem:[%s265_s25 + $0x4] sm:$0xf]  ;;  %v815_v36 = vld [vmem:[%s1075_s1 + $0x14] sm:$0xf0]  ;;  %v746_v37 = vor.u32 %v813_v34, %v745_v32 }
  0x10   : > { %345 = vrot.lane.b32.xlu1 %v298_v0, %s882_s26  ;;  %353 = vrot.lane.b32.xlu0 %v298_v0, %s883_s27  ;;  %301 = vst.msk [vmem:[#allocation2] sm:$0xf] %vm300_vm0, %v298_v0  ;;  %v754_v38 = vor.u32 %v815_v36, %v753_v35  ;;  %vm289_vm2 = vcmask 7168   ;;  %v857_v41 = vld [vmem:[%s1076_s2] ss:$0 sm:$0xff]  ;;  %v890_v42 = vmov 0.0  }
  0x11   : > { %337 = vrot.lane.b32.xlu2 %v298_v0, %s884_s28  ;;  %302 = vst.msk [vmem:[#allocation2 + $0x4] sm:$0xf] %vm300_vm0, %v299_v1  ;;  %vm520_vm3 = vcmask 195584  }
  0x18   : > { %347 = vrot.lane.b32.xlu1 %v299_v1, %s882_s26  ;;  %355 = vrot.lane.b32.xlu0 %v299_v1, %s883_s27  ;;  %v803_v31 = vld [vmem:[#allocation2] sm:$0xff] }
  0x19   : > { %339 = vrot.lane.b32.xlu2 %v299_v1, %s884_s28 }
  0x20   : > { %331 = vrot.lane.b32.xlu1 %v299_v1, %s885_s29  ;;  %329 = vrot.lane.b32.xlu0 %v298_v0, %s885_s29  ;;  %s801_s29 = sshll.u32 %s1085_s18, 5 }
  0x21   : > { %321 = vrot.lane.b32.xlu2 %v298_v0, %s886_s30  ;;  %s1004_s13 = scalar_lea.vmem %s1079_s5, %s801_s29 }
  0x22   : > { %294 = vst.msk [vmem:[%s1004_s13] sm:$0xff] %vm289_vm2, %v890_v42 }
  0x23   : > { %295 = vst.msk [vmem:[%s1004_s13 + $0x8] sm:$0xff] %vm289_vm2, %v890_v42 }
  0x24   : > { %296 = vst.msk [vmem:[%s1004_s13 + $0x10] sm:$0xff] %vm289_vm2, %v890_v42 }
  0x25   : > { %297 = vst.msk [vmem:[%s1004_s13 + $0x18] sm:$0xff] %vm289_vm2, %v890_v42 }
  0x28   : > { %361 = vrot.lane.b32.xlu1 %v298_v0, %s887_s6  ;;  %323 = vrot.lane.b32.xlu0 %v299_v1, %s886_s30 }
  0x29   : > { %363 = vrot.lane.b32.xlu2 %v299_v1, %s887_s6 }
  0x30   : > { %315 = vrot.lane.b32.xlu1 %v299_v1, %s888_s7  ;;  %313 = vrot.lane.b32.xlu0 %v298_v0, %s888_s7  ;;  %s993_s7 = scalar_lea.vmem %s1078_s4, %s801_s29 }
  0x31   : > { %305 = vrot.lane.b32.xlu2 %v298_v0, %s889_s8  ;;  %290 = vst.msk [vmem:[%s993_s7] sm:$0xff] %vm289_vm2, %v890_v42 }
  0x32   : > { %291 = vst.msk [vmem:[%s993_s7 + $0x8] sm:$0xff] %vm289_vm2, %v890_v42 }
  0x33   : > { %292 = vst.msk [vmem:[%s993_s7 + $0x10] sm:$0xff] %vm289_vm2, %v890_v42 }
  0x34   : > { %293 = vst.msk [vmem:[%s993_s7 + $0x18] sm:$0xff] %vm289_vm2, %v890_v42 }
  0x38   : > { %307 = vrot.lane.b32.xlu0 %v299_v1, %s889_s8  ;;  %s800_s8 = sshll.u32 %s1085_s18, 4 }
  0x39   : > { %s1013_s15 = scalar_lea.vmem %s1077_s3, %s800_s8 }
  0x6b   : > { %v338_v2 = vpop.permute.xlu2 %337 }
  0x6c   : > { %343 = vst.msk [vmem:[#allocation2 + $0x28] sm:$0xf] %vm300_vm0, %v338_v2 }
  0x73   : > { %v340_v3 = vpop.permute.xlu2 %339 }
  0x74   : > { %344 = vst.msk [vmem:[#allocation2 + $0x2c] sm:$0xf] %vm300_vm0, %v340_v3 }
  0x7b   : > { %v322_v4 = vpop.permute.xlu2 %321  ;;  %v808_v17 = vld [vmem:[#allocation2 + $0x28] sm:$0xff] }
  0x7c   : > { %327 = vst.msk [vmem:[#allocation2 + $0x18] sm:$0xf] %vm300_vm0, %v322_v4 }
  0x82   : > { %v346_v5 = vpop.permute.xlu1 %345  ;;  %v354_v6 = vpop.permute.xlu0 %353 }
  0x83   : > { %351 = vst.msk [vmem:[#allocation2 + $0x30] sm:$0xf] %vm300_vm0, %v346_v5  ;;  %v364_v7 = vpop.permute.xlu2 %363 }
  0x84   : > { %359 = vst.msk [vmem:[#allocation2 + $0x38] sm:$0xf] %vm300_vm0, %v354_v6 }
  0x85   : > { %368 = vst.msk [vmem:[#allocation2 + $0x44] sm:$0xf] %vm300_vm0, %v364_v7 }
  0x8a   : > { %v348_v8 = vpop.permute.xlu1 %347  ;;  %v356_v9 = vpop.permute.xlu0 %355 }
  0x8b   : > { %352 = vst.msk [vmem:[#allocation2 + $0x34] sm:$0xf] %vm300_vm0, %v348_v8  ;;  %v306_v10 = vpop.permute.xlu2 %305 }
  0x8c   : > { %360 = vst.msk [vmem:[#allocation2 + $0x3c] sm:$0xf] %vm300_vm0, %v356_v9  ;;  %v516_v9 = vld [vmem:[%s993_s7] sm:$0xff] }
  0x8d   : > { %311 = vst.msk [vmem:[#allocation2 + $0x8] sm:$0xf] %vm300_vm0, %v306_v10 }
  0x92   : > { %v332_v11 = vpop.permute.xlu1 %331  ;;  %v330_v12 = vpop.permute.xlu0 %329  ;;  %v809_v14 = vld [vmem:[#allocation2 + $0x30] sm:$0xff] }
  0x93   : > { %336 = vst.msk [vmem:[#allocation2 + $0x24] sm:$0xf] %vm300_vm0, %v332_v11  ;;  %v810_v13 = vld [vmem:[#allocation2 + $0x38] sm:$0xff] }
  0x94   : > { %335 = vst.msk [vmem:[#allocation2 + $0x20] sm:$0xf] %vm300_vm0, %v330_v12  ;;  %470 = vmatpush.bf16.msra.mxu0 %v810_v13  ;;  %816 = vmatpush.bf16.msra.mxu2 %v810_v13  ;;  %v518_v12 = vld [vmem:[%s993_s7 + $0x10] sm:$0xff] }
  0x98   : > { %471 = vmatpush.bf16.msra.mxu0 %v809_v14  ;;  %817 = vmatpush.bf16.msra.mxu2 %v809_v14  ;;  %v542_v14 = vld [vmem:[%s1004_s13] sm:$0xff] }
  0x9a   : > { %v362_v15 = vpop.permute.xlu1 %361  ;;  %v324_v16 = vpop.permute.xlu0 %323 }
  0x9b   : > { %367 = vst.msk [vmem:[#allocation2 + $0x40] sm:$0xf] %vm300_vm0, %v362_v15  ;;  %v807_v18 = vld [vmem:[#allocation2 + $0x20] sm:$0xff]  ;;  %v517_v15 = vld [vmem:[%s993_s7 + $0x8] sm:$0xff] }
  0x9c   : > { %328 = vst.msk [vmem:[#allocation2 + $0x1c] sm:$0xf] %vm300_vm0, %v324_v16  ;;  %472 = vmatpush.bf16.msra.mxu0 %v808_v17  ;;  %818 = vmatpush.bf16.msra.mxu2 %v808_v17 }
  0xa0   : > { %473 = vmatpush.bf16.msra.mxu0 %v807_v18  ;;  %819 = vmatpush.bf16.msra.mxu2 %v807_v18 }
  0xa2   : > { %v316_v21 = vpop.permute.xlu1 %315  ;;  %v314_v22 = vpop.permute.xlu0 %313  ;;  %v811_v23 = vld [vmem:[#allocation2 + $0x40] sm:$0xff] }
  0xa3   : > { %320 = vst.msk [vmem:[#allocation2 + $0x14] sm:$0xf] %vm300_vm0, %v316_v21  ;;  %v806_v24 = vld [vmem:[#allocation2 + $0x18] sm:$0xff]  ;;  %496 = vmatpush.bf16.msra.mxu1 %v811_v23  ;;  %v544_v21 = vld [vmem:[%s1004_s13 + $0x10] sm:$0xff] }
  0xa4   : > { %319 = vst.msk [vmem:[#allocation2 + $0x10] sm:$0xf] %vm300_vm0, %v314_v22  ;;  %474 = vmatpush.bf16.msra.mxu0 %v806_v24  ;;  %820 = vmatpush.bf16.msra.mxu2 %v806_v24  ;;  %v545_v23 = vld [vmem:[%s1004_s13 + $0x18] sm:$0xff] }
  0xa5   : > { %v519_v24 = vld [vmem:[%s993_s7 + $0x18] sm:$0xff] }
  0xa6   : > { %795 = vmatmul.msk.bf16.vlgmr.msra.gmra.mxu1 %vm463_vm1, %v750_v25 }
  0xaa   : > { %v308_v26 = vpop.permute.xlu0 %307 }
  0xab   : > { %312 = vst.msk [vmem:[#allocation2 + $0xc] sm:$0xf] %vm300_vm0, %v308_v26  ;;  %v805_v27 = vld [vmem:[#allocation2 + $0x10] sm:$0xff] }
  0xac   : > { %475 = vmatpush.bf16.msra.mxu0 %v805_v27  ;;  %821 = vmatpush.bf16.msra.mxu2 %v805_v27 }
  0xb2   : > { %v804_v30 = vld [vmem:[#allocation2 + $0x8] sm:$0xff] }
  0xb3   : > { %476 = vmatpush.bf16.msra.mxu0 %v804_v30  ;;  %822 = vmatpush.bf16.msra.mxu2 %v804_v30  ;;  %v543_v30 = vld [vmem:[%s1004_s13 + $0x8] sm:$0xff] }
  0xb6   : > { %796 = vmatmul.msk.bf16.gmra.mxu1 %vm463_vm1, %v758_v33 }
  0xb7   : > { %477 = vmatpush.bf16.msra.mxu0 %v803_v31  ;;  %823 = vmatpush.bf16.msra.mxu2 %v803_v31 }
  0xba   : > { %478 = vmatmul.bf16.vlgmr.msra.gmra.mxu0 %v746_v37  ;;  %483 = vmatmul.bf16.vlgmr.msra.gmra.mxu2 %v754_v38 }
 0x123   : > { %v498_v39 = vpop.f32.mrf.mxu1 }
 0x12b   : > { %v500_v40 = vpop.f32.mrf.mxu1 }
 0x133   : > { %v503_v47 = vpop.f32.mrf.mxu1 }
 0x137   : > { %v479_v43 = vpop.f32.mrf.mxu0 }
 0x138   : > { %v499_v44 = vadd.f32 %v498_v39, %v479_v43 }
 0x13a   : > { %v570_v45 = vpack.c.bf16 %v499_v44, %v499_v44  ;;  %v512_v46 = vmul.f32 %v857_v41, %v499_v44 }
 0x13b   : > { %v505_v61 = vpop.f32.mrf.mxu1 }
 0x13c   : > { %574 = vst.msk [vmem:[%s1013_s15] sm:$0xf] %vm300_vm0, %v570_v45  ;;  %v521_v48 = vsel %vm520_vm3, %v512_v46, 0.0  ;;  %v546_v55 = vmul.f32 %v512_v46, %v512_v46 }
 0x13d   : > { %v484_v49 = vpop.f32.mrf.mxu2  ;;  %522 = vadd.xlane.f32.xlu1 %v521_v48 }
 0x13e   : > { %v504_v50 = vadd.f32 %v503_v47, %v484_v49  ;;  %v550_v59 = vsel %vm520_vm3, %v546_v55, 0.0 }
 0x13f   : > { %v481_v51 = vpop.f32.mrf.mxu0 }
 0x140   : > { %v572_v52 = vpack.c.bf16 %v504_v50, %v504_v50  ;;  %v501_v53 = vadd.f32 %v500_v40, %v481_v51  ;;  %v514_v54 = vmul.f32 %v857_v41, %v504_v50 }
 0x142   : > { %576 = vst.msk [vmem:[%s1013_s15 + $0x8] sm:$0xf] %vm300_vm0, %v572_v52  ;;  %v571_v56 = vpack.c.bf16 %v501_v53, %v501_v53  ;;  %v527_v57 = vsel %vm520_vm3, %v514_v54, 0.0  ;;  %v513_v58 = vmul.f32 %v857_v41, %v501_v53  ;;  %v548_v0 = vmul.f32 %v514_v54, %v514_v54 }
 0x143   : > { %528 = vadd.xlane.f32.xlu0 %v527_v57 }
 0x144   : > { %575 = vst.msk [vmem:[%s1013_s15 + $0x4] sm:$0xf] %vm300_vm0, %v571_v56  ;;  %v524_v60 = vsel %vm520_vm3, %v513_v58, 0.0  ;;  %v556_v3 = vsel %vm520_vm3, %v548_v0, 0.0  ;;  %v547_v7 = vmul.f32 %v513_v58, %v513_v58 }
 0x145   : > { %v486_v62 = vpop.f32.mrf.mxu2  ;;  %551 = vadd.xlane.f32.xlu1 %v550_v59  ;;  %525 = vadd.xlane.f32.xlu2 %v524_v60 }
 0x146   : > { %v506_v63 = vadd.f32 %v505_v61, %v486_v62  ;;  %v553_v8 = vsel %vm520_vm3, %v547_v7, 0.0 }
 0x148   : > { %v515_v1 = vmul.f32 %v857_v41, %v506_v63  ;;  %v573_v2 = vpack.c.bf16 %v506_v63, %v506_v63 }
 0x14a   : > { %577 = vst.msk [vmem:[%s1013_s15 + $0xc] sm:$0xf] %vm300_vm0, %v573_v2  ;;  %v549_v4 = vmul.f32 %v515_v1, %v515_v1  ;;  %v530_v6 = vsel %vm520_vm3, %v515_v1, 0.0 }
 0x14b   : > { %557 = vadd.xlane.f32.xlu0 %v556_v3 }
 0x14c   : > { %v559_v5 = vsel %vm520_vm3, %v549_v4, 0.0 }
 0x14d   : > { %560 = vadd.xlane.f32.xlu1 %v559_v5  ;;  %531 = vadd.xlane.f32.xlu2 %v530_v6 }
 0x155   : > { %554 = vadd.xlane.f32.xlu2 %v553_v8 }
 0x1b0   : > { %v523_v10 = vpop.xlane.xlu1 %522 }
 0x1b1   : > { %v533_v11 = vadd.f32 %v523_v10, %v516_v9 }
 0x1b3   : > { %538 = vst.msk [vmem:[%s993_s7] sm:$0xff] %vm289_vm2, %v533_v11 }
 0x1b6   : > { %v529_v13 = vpop.xlane.xlu0 %528 }
 0x1b7   : > { %v535_v16 = vadd.f32 %v529_v13, %v518_v12 }
 0x1b8   : > { %v552_v17 = vpop.xlane.xlu1 %551  ;;  %v526_v18 = vpop.xlane.xlu2 %525 }
 0x1b9   : > { %540 = vst.msk [vmem:[%s993_s7 + $0x10] sm:$0xff] %vm289_vm2, %v535_v16  ;;  %v562_v19 = vadd.f32 %v552_v17, %v542_v14  ;;  %v534_v20 = vadd.f32 %v526_v18, %v517_v15 }
 0x1bb   : > { %566 = vst.msk [vmem:[%s1004_s13] sm:$0xff] %vm289_vm2, %v562_v19 }
 0x1bc   : > { %539 = vst.msk [vmem:[%s993_s7 + $0x8] sm:$0xff] %vm289_vm2, %v534_v20 }
 0x1be   : > { %v558_v22 = vpop.xlane.xlu0 %557 }
 0x1bf   : > { %v564_v25 = vadd.f32 %v558_v22, %v544_v21 }
 0x1c0   : > { %v561_v26 = vpop.xlane.xlu1 %560  ;;  %v532_v27 = vpop.xlane.xlu2 %531 }
 0x1c1   : > { %568 = vst.msk [vmem:[%s1004_s13 + $0x10] sm:$0xff] %vm289_vm2, %v564_v25  ;;  %v565_v28 = vadd.f32 %v561_v26, %v545_v23  ;;  %v536_v29 = vadd.f32 %v532_v27, %v519_v24 }
 0x1c3   : > { %569 = vst.msk [vmem:[%s1004_s13 + $0x18] sm:$0xff] %vm289_vm2, %v565_v28 }
 0x1c4   : > { %541 = vst.msk [vmem:[%s993_s7 + $0x18] sm:$0xff] %vm289_vm2, %v536_v29 }
 0x1c8   : > { %v555_v31 = vpop.xlane.xlu2 %554 }
 0x1c9   : > { %v563_v32 = vadd.f32 %v555_v31, %v543_v30 }
 0x1cb   : > { %567 = vst.msk [vmem:[%s1004_s13 + $0x8] sm:$0xff] %vm289_vm2, %v563_v32 }
 0x1cc PF: > { %s16_s20 = sadd.s32 1, %s880_s20   ;;  %s1080_s18 = smov %s876_s19 }
 0x1cd   : > { %p13_p5 = scmp.ge.s32.totalorder %s16_s20, 4   ;;  %s1081_s19 = smov %s1083_s21 }
 0x1cf   :  { %15 = sbr.rel (!%p13_p5) target bundleno = 2 (0x2), region = 90 }

// kernel: varnet2_forward.69
= control target key start
LH: loop header
LB: loop body
LE: loop exit
PB: predicated region body
PF: predicated region fallthrough
CT: control target
= control target key end

     0   :  { %s629_s12 = smov 0   ;;  %s631_s13 = smov 0   ;;  %s696_s0 = inlined_call_operand.vmem [shape: bf16[2,64,16], index: 0, kind: input, shape index: {}]   ;;  %s697_s1 = inlined_call_operand.vmem [shape: f32[2,64,1], index: 1, kind: input, shape index: {}]   ;;  %s698_s2 = inlined_call_operand.vmem [shape: f32[2,64,1], index: 2, kind: input, shape index: {}]   ;;  %s699_s3 = inlined_call_operand.vmem [shape: bf16[2,64,16], index: 3, kind: output, shape index: {}]  }
   0x1   :  { %s633_s14 = smov 0  }
   0x2 LB: > { %s25_s15 = sadd.s32 1, %s602_s13  ;;  %p522_p0 = scmp.ge.s32.totalorder %s606_s14, 1  ;;  %s606_s14 = sphi %s633_s14, %s13_s14   ;;  %s602_s13 = sphi %s631_s13, %s701_s13   ;;  %s598_s12 = sphi %s629_s12, %s700_s12  }
   0x3   : > { %p27_p1 = scmp.ge.s32.totalorder %s25_s15, 2  ;;  %p176_p2 = scmp.lt.s32.totalorder %s606_s14, 3 }
   0x5   : > { %s703_s15 = smov (%p27_p1, %s25_s15), 0  ;;  %p177_p3 = pnand %p522_p0, %p176_p2 }
   0x6   : > { %p216_p4 = scmp.lt.s32.totalorder (!%p177_p3), %s598_s12, 1 }
   0x7   : > { %180 = sbr.rel (%p177_p3) target bundleno = 180 (0xb4), region = 32 }
   0xc   : > { %v608_v0 = vmov 0   ;;  %s705_s12 = smov (!%p216_p4, %s598_s12), 1  ;;  %vm402_vm1 = vcmask 125952  }
   0xd   : > { %583 = vset.pattern.permute.xlu2 %v608_v0  ;;  %582 = vset.pattern.permute.xlu1 %v608_v0  ;;  %s534_s16 = sshll.u32 %s705_s12, 6  ;;  %s533_s23 = sshll.u32 %s705_s12, 5 }
   0xe   : > { %581 = vset.pattern.permute.xlu0 %v608_v0  ;;  %s228_s19 = scalar_lea.vmem %s697_s1, %s534_s16  ;;  %s233_s22 = scalar_lea.vmem %s698_s2, %s534_s16 }
   0xf   : > { %v262_v1 = vld [vmem:[%s228_s19 + $0x20] sm:$0xff]  ;;  %v260_v2 = vld [vmem:[%s228_s19 + $0x10] sm:$0xff]  ;;  %v263_v4 = vld [vmem:[%s228_s19 + $0x28] sm:$0xff]  ;;  %s660_s26 = scalar_lea.vmem %s696_s0, %s533_s23  ;;  %s667_s29 = scalar_lea.vmem %s699_s3, %s533_s23 }
  0x10   : > { %v258_v3 = vld [vmem:[%s228_s19] sm:$0xff]  ;;  %288 = vperm.xlu2 %583, %v262_v1   ;;  %278 = vperm.xlu1 %582, %v260_v2   ;;  %v261_v5 = vld [vmem:[%s228_s19 + $0x18] sm:$0xff]  ;;  %v259_v6 = vld [vmem:[%s228_s19 + $0x8] sm:$0xff] }
  0x11   : > { %268 = vperm.xlu0 %581, %v258_v3   ;;  %v314_v7 = vld [vmem:[%s233_s22] sm:$0xff]  ;;  %v265_v8 = vld [vmem:[%s228_s19 + $0x38] sm:$0xff]  ;;  %v264_v9 = vld [vmem:[%s228_s19 + $0x30] sm:$0xff] }
  0x12   : > { %v317_v10 = vld [vmem:[%s233_s22 + $0x18] sm:$0xff]  ;;  %v316_v11 = vld [vmem:[%s233_s22 + $0x10] sm:$0xff]  ;;  %v315_v12 = vld [vmem:[%s233_s22 + $0x8] sm:$0xff] }
  0x13   : > { %v320_v13 = vld [vmem:[%s233_s22 + $0x30] sm:$0xff]  ;;  %v319_v14 = vld [vmem:[%s233_s22 + $0x28] sm:$0xff]  ;;  %v318_v15 = vld [vmem:[%s233_s22 + $0x20] sm:$0xff] }
  0x14   : > { %v321_v16 = vld [vmem:[%s233_s22 + $0x38] sm:$0xff]  ;;  %v538_v19 = vld [vmem:[%s660_s26] sm:$0xff]   ;;  %v553_v24 = vld [vmem:[%s660_s26 + $0x8] sm:$0xff]  }
  0x15   : > { %v539_v20 = vunpack.c.l.bf16 %v538_v19  ;;  %v544_v27 = vunpack.c.h.bf16 %v553_v24  ;;  %v555_v36 = vld [vmem:[%s660_s26 + $0x18] sm:$0xff]   ;;  %v543_v44 = vunpack.c.l.bf16 %v553_v24  ;;  %v540_v46 = vunpack.c.h.bf16 %v538_v19  ;;  %v554_v50 = vld [vmem:[%s660_s26 + $0x10] sm:$0xff]  }
  0x16   : > { %v551_v38 = vunpack.c.l.bf16 %v555_v36  ;;  %v548_v58 = vunpack.c.h.bf16 %v554_v50  ;;  %v547_v60 = vunpack.c.l.bf16 %v554_v50 }
  0x18   : > { %293 = vperm.xlu2 %583, %v263_v4   ;;  %283 = vperm.xlu1 %582, %v261_v5  }
  0x19   : > { %273 = vperm.xlu0 %581, %v259_v6  }
  0x20   : > { %324 = vperm.xlu2 %583, %v314_v7   ;;  %303 = vperm.xlu1 %582, %v265_v8  }
  0x21   : > { %298 = vperm.xlu0 %581, %v264_v9   ;;  %v552_v9 = vunpack.c.h.bf16 %v555_v36 }
  0x28   : > { %339 = vperm.xlu2 %583, %v317_v10   ;;  %334 = vperm.xlu1 %582, %v316_v11  }
  0x29   : > { %329 = vperm.xlu0 %581, %v315_v12  }
  0x30   : > { %354 = vperm.xlu2 %583, %v320_v13   ;;  %349 = vperm.xlu1 %582, %v319_v14  }
  0x31   : > { %344 = vperm.xlu0 %581, %v318_v15  }
  0x39   : > { %359 = vperm.xlu0 %581, %v321_v16  }
  0x6a   : > { %v289_v17 = vpop.permute.xlu2 %288 }
  0x6b   : > { %v310_v3 = vsub.f32 %v547_v60, %v289_v17 }
  0x72   : > { %v294_v18 = vpop.permute.xlu2 %293 }
  0x73   : > { %v311_v1 = vsub.f32 %v548_v58, %v294_v18 }
  0x7a   : > { %v325_v21 = vpop.permute.xlu2 %324 }
  0x82   : > { %v279_v22 = vpop.permute.xlu1 %278  ;;  %v340_v31 = vpop.permute.xlu2 %339 }
  0x83   : > { %v269_v23 = vpop.permute.xlu0 %268  ;;  %v308_v49 = vsub.f32 %v543_v44, %v279_v22 }
  0x84   : > { %v306_v25 = vsub.f32 %v539_v20, %v269_v23 }
  0x86   : > { %v362_v26 = vmul.f32 %v325_v21, %v306_v25 }
  0x88   : > { %vm370_vm0 = vcmp.ge.f32.partialorder %v362_v26, 0.0  ;;  %v378_v28 = vmul.f32 0.2, %v362_v26 }
  0x8a   : > { %v386_v29 = vsel %vm370_vm0, %v362_v26, %v378_v28  ;;  %v284_v30 = vpop.permute.xlu1 %283  ;;  %v355_v45 = vpop.permute.xlu2 %354 }
  0x8b   : > { %v394_v32 = vpack.c.bf16 %v386_v29, %v386_v29  ;;  %v309_v33 = vsub.f32 %v544_v27, %v284_v30  ;;  %v274_v34 = vpop.permute.xlu0 %273 }
  0x8c   : > { %v307_v51 = vsub.f32 %v540_v46, %v274_v34 }
  0x8d   : > { %403 = vst.msk [vmem:[%s667_s29] sm:$0xf] %vm402_vm1, %v394_v32  ;;  %v365_v35 = vmul.f32 %v340_v31, %v309_v33 }
  0x8f   : > { %vm373_vm2 = vcmp.ge.f32.partialorder %v365_v35, 0.0  ;;  %v381_v37 = vmul.f32 0.2, %v365_v35 }
  0x91   : > { %v389_v39 = vsel %vm373_vm2, %v365_v35, %v381_v37 }
  0x92   : > { %v397_v40 = vpack.c.bf16 %v389_v39, %v389_v39  ;;  %v304_v41 = vpop.permute.xlu1 %303 }
  0x93   : > { %v299_v42 = vpop.permute.xlu0 %298  ;;  %v313_v15 = vsub.f32 %v552_v9, %v304_v41 }
  0x94   : > { %406 = vst.msk [vmem:[%s667_s29 + $0xc] sm:$0xf] %vm402_vm1, %v397_v40  ;;  %v312_v43 = vsub.f32 %v551_v38, %v299_v42 }
  0x96   : > { %v368_v47 = vmul.f32 %v355_v45, %v312_v43 }
  0x98   : > { %vm376_vm3 = vcmp.ge.f32.partialorder %v368_v47, 0.0  ;;  %v384_v48 = vmul.f32 0.2, %v368_v47 }
  0x9a   : > { %v392_v52 = vsel %vm376_vm3, %v368_v47, %v384_v48  ;;  %v335_v53 = vpop.permute.xlu1 %334 }
  0x9b   : > { %v400_v54 = vpack.c.bf16 %v392_v52, %v392_v52  ;;  %v364_v55 = vmul.f32 %v335_v53, %v308_v49  ;;  %v330_v56 = vpop.permute.xlu0 %329 }
  0x9c   : > { %v363_v57 = vmul.f32 %v330_v56, %v307_v51 }
  0x9d   : > { %409 = vst.msk [vmem:[%s667_s29 + $0x18] sm:$0xf] %vm402_vm1, %v400_v54  ;;  %vm372_vm4 = vcmp.ge.f32.partialorder %v364_v55, 0.0  ;;  %v380_v59 = vmul.f32 0.2, %v364_v55 }
  0x9e   : > { %vm371_vm5 = vcmp.ge.f32.partialorder %v363_v57, 0.0  ;;  %v379_v61 = vmul.f32 0.2, %v363_v57 }
  0x9f   : > { %v388_v62 = vsel %vm372_vm4, %v364_v55, %v380_v59 }
  0xa0   : > { %v396_v63 = vpack.c.bf16 %v388_v62, %v388_v62  ;;  %v387_v0 = vsel %vm371_vm5, %v363_v57, %v379_v61 }
  0xa1   : > { %v395_v2 = vpack.c.bf16 %v387_v0, %v387_v0 }
  0xa2   : > { %405 = vst.msk [vmem:[%s667_s29 + $0x8] sm:$0xf] %vm402_vm1, %v396_v63  ;;  %v350_v4 = vpop.permute.xlu1 %349 }
  0xa3   : > { %404 = vst.msk [vmem:[%s667_s29 + $0x4] sm:$0xf] %vm402_vm1, %v395_v2  ;;  %v367_v5 = vmul.f32 %v350_v4, %v311_v1  ;;  %v345_v6 = vpop.permute.xlu0 %344 }
  0xa4   : > { %v366_v7 = vmul.f32 %v345_v6, %v310_v3 }
  0xa5   : > { %vm375_vm6 = vcmp.ge.f32.partialorder %v367_v5, 0.0  ;;  %v383_v8 = vmul.f32 0.2, %v367_v5 }
  0xa6   : > { %vm374_vm7 = vcmp.ge.f32.partialorder %v366_v7, 0.0  ;;  %v382_v10 = vmul.f32 0.2, %v366_v7 }
  0xa7   : > { %v391_v11 = vsel %vm375_vm6, %v367_v5, %v383_v8 }
  0xa8   : > { %v399_v12 = vpack.c.bf16 %v391_v11, %v391_v11  ;;  %v390_v13 = vsel %vm374_vm7, %v366_v7, %v382_v10 }
  0xa9   : > { %v398_v14 = vpack.c.bf16 %v390_v13, %v390_v13 }
  0xaa   : > { %408 = vst.msk [vmem:[%s667_s29 + $0x14] sm:$0xf] %vm402_vm1, %v399_v12 }
  0xab   : > { %407 = vst.msk [vmem:[%s667_s29 + $0x10] sm:$0xf] %vm402_vm1, %v398_v14  ;;  %v360_v16 = vpop.permute.xlu0 %359 }
  0xac   : > { %v369_v17 = vmul.f32 %v360_v16, %v313_v15 }
  0xae   : > { %vm377_vm8 = vcmp.ge.f32.partialorder %v369_v17, 0.0  ;;  %v385_v18 = vmul.f32 0.2, %v369_v17 }
  0xb0   : > { %v393_v19 = vsel %vm377_vm8, %v369_v17, %v385_v18 }
  0xb1   : > { %v401_v20 = vpack.c.bf16 %v393_v19, %v393_v19 }
  0xb3   : > { %410 = vst.msk [vmem:[%s667_s29 + $0x1c] sm:$0xf] %vm402_vm1, %v401_v20 }
  0xb4 PF: > { %s13_s14 = sadd.s32 1, %s606_s14   ;;  %s700_s12 = smov %s602_s13 }
  0xb5   : > { %p10_p5 = scmp.ge.s32.totalorder %s13_s14, 4   ;;  %s701_s13 = smov %s703_s15 }
  0xb7   :  { %12 = sbr.rel (!%p10_p5) target bundleno = 2 (0x2), region = 68 }

// kernel: varnet2_forward.66
= control target key start
LH: loop header
LB: loop body
LE: loop exit
PB: predicated region body
PF: predicated region fallthrough
CT: control target
= control target key end

     0   :  { %s1153_s18 = smov 0   ;;  %s1155_s19 = smov 0   ;;  %s1339_s0 = inlined_call_operand.vmem [shape: bf16[2,1,32,42], index: 0, kind: input, shape index: {}]   ;;  %s1340_s1 = inlined_call_operand.vmem [shape: bf16[32,288], index: 1, kind: input, shape index: {}]   ;;  %s1341_s2 = inlined_call_operand.vmem [shape: f32[1,24], index: 2, kind: input, shape index: {}]   ;;  %s1342_s3 = inlined_call_operand.vmem [shape: bf16[2,32,24], index: 3, kind: output, shape index: {0}]   ;;  %s1343_s4 = inlined_call_operand.vmem [shape: f32[2,32,1], index: 4, kind: output, shape index: {1}]   ;;  %s1344_s5 = inlined_call_operand.vmem [shape: f32[2,32,1], index: 5, kind: output, shape index: {2}]  }
   0x1   :  { %s1157_s20 = smov 0  }
   0x2 LB: > { %s28_s21 = sadd.s32 1, %s1108_s19  ;;  %p911_p0 = scmp.ge.s32.totalorder %s1112_s20, 1  ;;  %s1112_s20 = sphi %s1157_s20, %s16_s20   ;;  %s1108_s19 = sphi %s1155_s19, %s1346_s19   ;;  %s1104_s18 = sphi %s1153_s18, %s1345_s18  }
   0x3   : > { %p30_p1 = scmp.ge.s32.totalorder %s28_s21, 2  ;;  %p212_p2 = scmp.lt.s32.totalorder %s1112_s20, 3 }
   0x5   : > { %s1348_s21 = smov (%p30_p1, %s28_s21), 0  ;;  %p213_p3 = pnand %p911_p0, %p212_p2 }
   0x6   : > { %p257_p4 = scmp.lt.s32.totalorder (!%p213_p3), %s1104_s18, 1  ;;  %s1114_s26 = smov (!%p213_p3), 115  }
   0x7   : > { %216 = sbr.rel (%p213_p3) target bundleno = 507 (0x1fb), region = 32  ;;  %s1115_s27 = smov (!%p213_p3), 116  }
   0x8   : > { %s1116_s28 = smov (!%p213_p3), 122   ;;  %s1117_s29 = smov (!%p213_p3), 120  }
   0x9   : > { %s1118_s30 = smov (!%p213_p3), 126   ;;  %s1119_s6 = smov (!%p213_p3), 114  }
   0xa   : > { %s1120_s7 = smov (!%p213_p3), 121   ;;  %s1121_s8 = smov (!%p213_p3), 127  }
   0xc   : > { %s1350_s18 = smov (!%p257_p4, %s1104_s18), 1  ;;  %vm302_vm0 = vcmask 191488   ;;  %v930_v44 = vld [vmem:[%s1340_s1 + $0x8] sm:$0xf]  ;;  %v1044_v45 = vld [vmem:[%s1340_s1 + $0x10] sm:$0xf0] }
   0xd   : > { %s1020_s22 = sshll.u32 %s1350_s18, 4  ;;  %v931_v49 = vor.u32 %v1044_v45, %v930_v44  ;;  %vm621_vm1 = vcmask 261120   ;;  %v1042_v50 = vld [vmem:[%s1340_s1 + $0x4] sm:$0xf]  ;;  %v924_v51 = vld [vmem:[%s1340_s1 + $0xc] sm:$0xf0] }
   0xe   : > { %s265_s25 = scalar_lea.vmem %s1339_s0, %s1020_s22  ;;  %v927_v56 = vor.u32 %v1042_v50, %v924_v51  ;;  %v942_v57 = vld [vmem:[%s1340_s1 + $0x20] sm:$0xf]  ;;  %v1047_v58 = vld [vmem:[%s1340_s1 + $0x28] sm:$0xf0]  ;;  %s1022_s13 = sshll.u32 %s1350_s18, 5  ;;  %vm289_vm2 = vcmask 7168  }
   0xf   : > { %v300_v0 = vld [vmem:[%s265_s25 + $0x8] sm:$0xf]  ;;  %v298_v1 = vld [vmem:[%s265_s25] sm:$0xf]  ;;  %v301_v2 = vld [vmem:[%s265_s25 + $0xc] sm:$0xf]  ;;  %v943_v60 = vor.u32 %v1047_v58, %v942_v57  ;;  %s1257_s16 = scalar_lea.vmem %s1343_s4, %s1022_s13 }
  0x10   : > { %411 = vrot.lane.b32.xlu0 %v300_v0, %s1114_s26  ;;  %407 = vrot.lane.b32.xlu1 %v298_v1, %s1114_s26  ;;  %v299_v3 = vld [vmem:[%s265_s25 + $0x4] sm:$0xf]  ;;  %303 = vst.msk [vmem:[#allocation2] sm:$0xf] %vm302_vm0, %v298_v1  ;;  %v922_v63 = vld [vmem:[%s1340_s1] sm:$0xf] }
  0x11   : > { %395 = vrot.lane.b32.xlu2 %v300_v0, %s1115_s27  ;;  %304 = vst.msk [vmem:[#allocation2 + $0x4] sm:$0xf] %vm302_vm0, %v299_v3  ;;  %vm697_vm3 = vcmask 195584  }
  0x12   : > { %305 = vst.msk [vmem:[#allocation2 + $0x8] sm:$0xf] %vm302_vm0, %v300_v0 }
  0x13   : > { %306 = vst.msk [vmem:[#allocation2 + $0xc] sm:$0xf] %vm302_vm0, %v301_v2 }
  0x18   : > { %413 = vrot.lane.b32.xlu0 %v301_v2, %s1114_s26  ;;  %409 = vrot.lane.b32.xlu1 %v299_v3, %s1114_s26  ;;  %v1024_v62 = vld [vmem:[#allocation2] sm:$0xff]  ;;  %s1267_s26 = scalar_lea.vmem %s1344_s5, %s1022_s13 }
  0x19   : > { %397 = vrot.lane.b32.xlu2 %v301_v2, %s1115_s27 }
  0x1a   : > { %v1025_v61 = vld [vmem:[#allocation2 + $0x8] sm:$0xff] }
  0x20   : > { %347 = vrot.lane.b32.xlu0 %v300_v0, %s1116_s28  ;;  %349 = vrot.lane.b32.xlu1 %v301_v2, %s1116_s28 }
  0x21   : > { %391 = vrot.lane.b32.xlu2 %v298_v1, %s1115_s27 }
  0x28   : > { %393 = vrot.lane.b32.xlu0 %v299_v3, %s1115_s27  ;;  %343 = vrot.lane.b32.xlu1 %v298_v1, %s1116_s28 }
  0x29   : > { %345 = vrot.lane.b32.xlu2 %v299_v3, %s1116_s28 }
  0x30   : > { %379 = vrot.lane.b32.xlu0 %v300_v0, %s1117_s29  ;;  %381 = vrot.lane.b32.xlu1 %v301_v2, %s1117_s29 }
  0x31   : > { %331 = vrot.lane.b32.xlu2 %v300_v0, %s1118_s30 }
  0x38   : > { %333 = vrot.lane.b32.xlu0 %v301_v2, %s1118_s30  ;;  %375 = vrot.lane.b32.xlu1 %v298_v1, %s1117_s29 }
  0x39   : > { %377 = vrot.lane.b32.xlu2 %v299_v3, %s1117_s29  ;;  %s1278_s29 = scalar_lea.vmem %s1342_s3, %s1020_s22 }
  0x40   : > { %427 = vrot.lane.b32.xlu0 %v300_v0, %s1119_s6  ;;  %429 = vrot.lane.b32.xlu1 %v301_v2, %s1119_s6 }
  0x41   : > { %327 = vrot.lane.b32.xlu2 %v298_v1, %s1118_s30 }
  0x48   : > { %329 = vrot.lane.b32.xlu0 %v299_v3, %s1118_s30  ;;  %363 = vrot.lane.b32.xlu1 %v300_v0, %s1120_s7 }
  0x49   : > { %365 = vrot.lane.b32.xlu2 %v301_v2, %s1120_s7 }
  0x50   : > { %423 = vrot.lane.b32.xlu0 %v298_v1, %s1119_s6  ;;  %425 = vrot.lane.b32.xlu1 %v299_v3, %s1119_s6 }
  0x51   : > { %315 = vrot.lane.b32.xlu2 %v300_v0, %s1121_s8  ;;  %v1043_v0 = vld [vmem:[%s1340_s1 + $0x8] sm:$0xf0] }
  0x58   : > { %317 = vrot.lane.b32.xlu0 %v301_v2, %s1121_s8  ;;  %359 = vrot.lane.b32.xlu1 %v298_v1, %s1120_s7  ;;  %v1046_v2 = vld [vmem:[%s1340_s1 + $0x20] sm:$0xf0] }
  0x59   : > { %361 = vrot.lane.b32.xlu2 %v299_v3, %s1120_s7 }
  0x60   : > { %311 = vrot.lane.b32.xlu0 %v298_v1, %s1121_s8  ;;  %313 = vrot.lane.b32.xlu1 %v299_v3, %s1121_s8  ;;  %v934_v1 = vld [vmem:[%s1340_s1 + $0x18] sm:$0xf]  ;;  %v1045_v3 = vld [vmem:[%s1340_s1 + $0x1c] sm:$0xf] }
  0x6b   : > { %v396_v4 = vpop.permute.xlu2 %395 }
  0x6c   : > { %405 = vst.msk [vmem:[#allocation2 + $0x68] sm:$0xf] %vm302_vm0, %v396_v4  ;;  %v936_v4 = vld [vmem:[%s1340_s1 + $0x24] sm:$0xf0] }
  0x73   : > { %v398_v5 = vpop.permute.xlu2 %397 }
  0x74   : > { %406 = vst.msk [vmem:[#allocation2 + $0x6c] sm:$0xf] %vm302_vm0, %v398_v5  ;;  %v923_v5 = vor.u32 %v1043_v0, %v922_v63 }
  0x7b   : > { %v392_v6 = vpop.permute.xlu2 %391  ;;  %v1037_v20 = vld [vmem:[#allocation2 + $0x68] sm:$0xff] }
  0x7c   : > { %403 = vst.msk [vmem:[#allocation2 + $0x60] sm:$0xf] %vm302_vm0, %v392_v6  ;;  %v935_v6 = vor.u32 %v1046_v2, %v934_v1 }
  0x82   : > { %v412_v7 = vpop.permute.xlu0 %411  ;;  %v408_v8 = vpop.permute.xlu1 %407 }
  0x83   : > { %421 = vst.msk [vmem:[#allocation2 + $0x78] sm:$0xf] %vm302_vm0, %v412_v7  ;;  %v346_v9 = vpop.permute.xlu2 %345  ;;  %v939_v7 = vor.u32 %v1045_v3, %v936_v4 }
  0x84   : > { %419 = vst.msk [vmem:[#allocation2 + $0x70] sm:$0xf] %vm302_vm0, %v408_v8 }
  0x85   : > { %356 = vst.msk [vmem:[#allocation2 + $0x34] sm:$0xf] %vm302_vm0, %v346_v9 }
  0x8a   : > { %v414_v10 = vpop.permute.xlu0 %413  ;;  %v410_v11 = vpop.permute.xlu1 %409 }
  0x8b   : > { %422 = vst.msk [vmem:[#allocation2 + $0x7c] sm:$0xf] %vm302_vm0, %v414_v10  ;;  %v332_v12 = vpop.permute.xlu2 %331 }
  0x8c   : > { %420 = vst.msk [vmem:[#allocation2 + $0x74] sm:$0xf] %vm302_vm0, %v410_v11 }
  0x8d   : > { %341 = vst.msk [vmem:[#allocation2 + $0x28] sm:$0xf] %vm302_vm0, %v332_v12 }
  0x92   : > { %v348_v13 = vpop.permute.xlu0 %347  ;;  %v350_v14 = vpop.permute.xlu1 %349  ;;  %v1039_v15 = vld [vmem:[#allocation2 + $0x78] sm:$0xff] }
  0x93   : > { %357 = vst.msk [vmem:[#allocation2 + $0x38] sm:$0xf] %vm302_vm0, %v348_v13  ;;  %v378_v16 = vpop.permute.xlu2 %377  ;;  %647 = vmatpush.bf16.msra.mxu1 %v1039_v15  ;;  %v1038_v17 = vld [vmem:[#allocation2 + $0x70] sm:$0xff]  ;;  %v1122_v15 = vmov 0.0  }
  0x94   : > { %358 = vst.msk [vmem:[#allocation2 + $0x3c] sm:$0xf] %vm302_vm0, %v350_v14  ;;  %v1089_v14 = vld [vmem:[%s1341_s2] ss:$0 sm:$0xff] }
  0x95   : > { %388 = vst.msk [vmem:[#allocation2 + $0x54] sm:$0xf] %vm302_vm0, %v378_v16 }
  0x96   : > { %290 = vst.msk [vmem:[%s1257_s16] sm:$0xff] %vm289_vm2, %v1122_v15 }
  0x97   : > { %648 = vmatpush.bf16.msra.mxu1 %v1038_v17  ;;  %291 = vst.msk [vmem:[%s1257_s16 + $0x8] sm:$0xff] %vm289_vm2, %v1122_v15 }
  0x98   : > { %292 = vst.msk [vmem:[%s1257_s16 + $0x10] sm:$0xff] %vm289_vm2, %v1122_v15 }
  0x99   : > { %293 = vst.msk [vmem:[%s1257_s16 + $0x18] sm:$0xff] %vm289_vm2, %v1122_v15 }
  0x9a   : > { %v394_v18 = vpop.permute.xlu0 %393  ;;  %v344_v19 = vpop.permute.xlu1 %343  ;;  %294 = vst.msk [vmem:[%s1267_s26] sm:$0xff] %vm289_vm2, %v1122_v15 }
  0x9b   : > { %404 = vst.msk [vmem:[#allocation2 + $0x64] sm:$0xf] %vm302_vm0, %v394_v18  ;;  %v1031_v21 = vld [vmem:[#allocation2 + $0x38] sm:$0xff]  ;;  %v328_v22 = vpop.permute.xlu2 %327  ;;  %649 = vmatpush.bf16.msra.mxu1 %v1037_v20 }
  0x9c   : > { %355 = vst.msk [vmem:[#allocation2 + $0x30] sm:$0xf] %vm302_vm0, %v344_v19  ;;  %628 = vmatpush.bf16.msra.mxu0 %v1031_v21  ;;  %1048 = vmatpush.bf16.msra.mxu3 %v1031_v21 }
  0x9d   : > { %339 = vst.msk [vmem:[#allocation2 + $0x20] sm:$0xf] %vm302_vm0, %v328_v22  ;;  %v693_v50 = vld [vmem:[%s1257_s16] sm:$0xff] }
  0x9e   : > { %295 = vst.msk [vmem:[%s1267_s26 + $0x8] sm:$0xff] %vm289_vm2, %v1122_v15 }
  0x9f   : > { %296 = vst.msk [vmem:[%s1267_s26 + $0x10] sm:$0xff] %vm289_vm2, %v1122_v15 }
  0xa0   : > { %297 = vst.msk [vmem:[%s1267_s26 + $0x18] sm:$0xff] %vm289_vm2, %v1122_v15  ;;  %v696_v0 = vld [vmem:[%s1257_s16 + $0x18] sm:$0xff] }
  0xa2   : > { %v380_v23 = vpop.permute.xlu0 %379  ;;  %v382_v24 = vpop.permute.xlu1 %381  ;;  %v1036_v25 = vld [vmem:[#allocation2 + $0x60] sm:$0xff] }
  0xa3   : > { %389 = vst.msk [vmem:[#allocation2 + $0x58] sm:$0xf] %vm302_vm0, %v380_v23  ;;  %v1030_v26 = vld [vmem:[#allocation2 + $0x30] sm:$0xff]  ;;  %v366_v27 = vpop.permute.xlu2 %365  ;;  %650 = vmatpush.bf16.msra.mxu1 %v1036_v25 }
  0xa4   : > { %390 = vst.msk [vmem:[#allocation2 + $0x5c] sm:$0xf] %vm302_vm0, %v382_v24  ;;  %629 = vmatpush.bf16.msra.mxu0 %v1030_v26  ;;  %1049 = vmatpush.bf16.msra.mxu3 %v1030_v26 }
  0xa5   : > { %374 = vst.msk [vmem:[#allocation2 + $0x4c] sm:$0xf] %vm302_vm0, %v366_v27  ;;  %v720_v1 = vld [vmem:[%s1267_s26 + $0x8] sm:$0xff] }
  0xaa   : > { %v334_v28 = vpop.permute.xlu0 %333  ;;  %v376_v29 = vpop.permute.xlu1 %375 }
  0xab   : > { %342 = vst.msk [vmem:[#allocation2 + $0x2c] sm:$0xf] %vm302_vm0, %v334_v28  ;;  %v1035_v30 = vld [vmem:[#allocation2 + $0x58] sm:$0xff]  ;;  %v316_v31 = vpop.permute.xlu2 %315 }
  0xac   : > { %387 = vst.msk [vmem:[#allocation2 + $0x50] sm:$0xf] %vm302_vm0, %v376_v29  ;;  %651 = vmatpush.bf16.msra.mxu1 %v1035_v30 }
  0xad   : > { %325 = vst.msk [vmem:[#allocation2 + $0x18] sm:$0xf] %vm302_vm0, %v316_v31 }
  0xb2   : > { %v428_v32 = vpop.permute.xlu0 %427  ;;  %v430_v33 = vpop.permute.xlu1 %429  ;;  %v1029_v34 = vld [vmem:[#allocation2 + $0x28] sm:$0xff] }
  0xb3   : > { %437 = vst.msk [vmem:[#allocation2 + $0x88] sm:$0xf] %vm302_vm0, %v428_v32  ;;  %v1034_v35 = vld [vmem:[#allocation2 + $0x50] sm:$0xff]  ;;  %v362_v36 = vpop.permute.xlu2 %361  ;;  %630 = vmatpush.bf16.msra.mxu0 %v1029_v34  ;;  %1050 = vmatpush.bf16.msra.mxu3 %v1029_v34 }
  0xb4   : > { %438 = vst.msk [vmem:[#allocation2 + $0x8c] sm:$0xf] %vm302_vm0, %v430_v33  ;;  %652 = vmatpush.bf16.msra.mxu1 %v1034_v35 }
  0xb5   : > { %372 = vst.msk [vmem:[#allocation2 + $0x44] sm:$0xf] %vm302_vm0, %v362_v36 }
  0xba   : > { %v330_v37 = vpop.permute.xlu0 %329  ;;  %v364_v38 = vpop.permute.xlu1 %363 }
  0xbb   : > { %340 = vst.msk [vmem:[#allocation2 + $0x24] sm:$0xf] %vm302_vm0, %v330_v37  ;;  %v1041_v39 = vld [vmem:[#allocation2 + $0x88] sm:$0xff] }
  0xbc   : > { %373 = vst.msk [vmem:[#allocation2 + $0x48] sm:$0xf] %vm302_vm0, %v364_v38  ;;  %672 = vmatpush.bf16.msra.mxu2 %v1041_v39 }
  0xc2   : > { %v424_v40 = vpop.permute.xlu0 %423  ;;  %v426_v41 = vpop.permute.xlu1 %425  ;;  %v1028_v42 = vld [vmem:[#allocation2 + $0x20] sm:$0xff] }
  0xc3   : > { %435 = vst.msk [vmem:[#allocation2 + $0x80] sm:$0xf] %vm302_vm0, %v424_v40  ;;  %v1033_v43 = vld [vmem:[#allocation2 + $0x48] sm:$0xff]  ;;  %631 = vmatpush.bf16.msra.mxu0 %v1028_v42  ;;  %1051 = vmatpush.bf16.msra.mxu3 %v1028_v42 }
  0xc4   : > { %436 = vst.msk [vmem:[#allocation2 + $0x84] sm:$0xf] %vm302_vm0, %v426_v41  ;;  %653 = vmatpush.bf16.msra.mxu1 %v1033_v43 }
  0xca   : > { %v318_v46 = vpop.permute.xlu0 %317  ;;  %v360_v47 = vpop.permute.xlu1 %359 }
  0xcb   : > { %326 = vst.msk [vmem:[#allocation2 + $0x1c] sm:$0xf] %vm302_vm0, %v318_v46  ;;  %v1040_v48 = vld [vmem:[#allocation2 + $0x80] sm:$0xff] }
  0xcc   : > { %371 = vst.msk [vmem:[#allocation2 + $0x40] sm:$0xf] %vm302_vm0, %v360_v47  ;;  %673 = vmatpush.bf16.msra.mxu2 %v1040_v48 }
  0xcf   : > { %1016 = vmatmul.msk.bf16.vlgmr.msra.gmra.mxu2 %vm621_vm1, %v931_v49 }
  0xd2   : > { %v312_v52 = vpop.permute.xlu0 %311  ;;  %v314_v53 = vpop.permute.xlu1 %313  ;;  %v1027_v54 = vld [vmem:[#allocation2 + $0x18] sm:$0xff] }
  0xd3   : > { %323 = vst.msk [vmem:[#allocation2 + $0x10] sm:$0xf] %vm302_vm0, %v312_v52  ;;  %v1032_v55 = vld [vmem:[#allocation2 + $0x40] sm:$0xff]  ;;  %632 = vmatpush.bf16.msra.mxu0 %v1027_v54  ;;  %1052 = vmatpush.bf16.msra.mxu3 %v1027_v54 }
  0xd4   : > { %324 = vst.msk [vmem:[#allocation2 + $0x14] sm:$0xf] %vm302_vm0, %v314_v53  ;;  %654 = vmatpush.bf16.msra.mxu1 %v1032_v55  ;;  %v695_v53 = vld [vmem:[%s1257_s16 + $0x10] sm:$0xff]  ;;  %v719_v55 = vld [vmem:[%s1267_s26] sm:$0xff] }
  0xd7   : > { %655 = vmatmul.bf16.vlgmr.msra.gmra.mxu1 %v927_v56  ;;  %v694_v56 = vld [vmem:[%s1257_s16 + $0x8] sm:$0xff] }
  0xdb   : > { %v1026_v59 = vld [vmem:[#allocation2 + $0x10] sm:$0xff] }
  0xdc   : > { %633 = vmatpush.bf16.msra.mxu0 %v1026_v59  ;;  %1053 = vmatpush.bf16.msra.mxu3 %v1026_v59 }
  0xdf   : > { %1017 = vmatmul.msk.bf16.gmra.mxu2 %vm621_vm1, %v943_v60 }
  0xe0   : > { %634 = vmatpush.bf16.msra.mxu0 %v1025_v61  ;;  %1054 = vmatpush.bf16.msra.mxu3 %v1025_v61 }
  0xe4   : > { %635 = vmatpush.bf16.msra.mxu0 %v1024_v62  ;;  %1055 = vmatpush.bf16.msra.mxu3 %v1024_v62  ;;  %v721_v62 = vld [vmem:[%s1267_s26 + $0x10] sm:$0xff] }
  0xe7   : > { %636 = vmatmul.bf16.vlgmr.msra.gmra.mxu0 %v923_v5  ;;  %641 = vmatmul.bf16.vlgmr.msra.gmra.mxu3 %v935_v6 }
  0xe8   : > { %660 = vmatmul.bf16.gmra.mxu1 %v939_v7  ;;  %v722_v7 = vld [vmem:[%s1267_s26 + $0x18] sm:$0xff] }
 0x152   : > { %v675_v9 = vpop.f32.mrf.mxu2 }
 0x154   : > { %v656_v8 = vpop.f32.mrf.mxu1 }
 0x15a   : > { %v677_v11 = vpop.f32.mrf.mxu2 }
 0x15c   : > { %v658_v10 = vpop.f32.mrf.mxu1 }
 0x162   : > { %v680_v20 = vpop.f32.mrf.mxu2 }
 0x164   : > { %v637_v12 = vpop.f32.mrf.mxu0 }
 0x165   : > { %v657_v13 = vadd.f32 %v656_v8, %v637_v12  ;;  %v661_v17 = vpop.f32.mrf.mxu1 }
 0x167   : > { %v676_v16 = vadd.f32 %v675_v9, %v657_v13 }
 0x169   : > { %v747_v18 = vpack.c.bf16 %v676_v16, %v676_v16  ;;  %v689_v19 = vmul.f32 %v1089_v14, %v676_v16 }
 0x16a   : > { %v642_v21 = vpop.f32.mrf.mxu3  ;;  %v682_v39 = vpop.f32.mrf.mxu2 }
 0x16b   : > { %751 = vst.msk [vmem:[%s1278_s29] sm:$0xf] %vm302_vm0, %v747_v18  ;;  %v662_v22 = vadd.f32 %v661_v17, %v642_v21  ;;  %v698_v23 = vsel %vm697_vm3, %v689_v19, 0.0  ;;  %v723_v30 = vmul.f32 %v689_v19, %v689_v19 }
 0x16c   : > { %699 = vadd.xlane.f32.xlu2 %v698_v23  ;;  %v639_v24 = vpop.f32.mrf.mxu0 }
 0x16d   : > { %v681_v25 = vadd.f32 %v680_v20, %v662_v22  ;;  %v659_v26 = vadd.f32 %v658_v10, %v639_v24  ;;  %v663_v34 = vpop.f32.mrf.mxu1  ;;  %v727_v37 = vsel %vm697_vm3, %v723_v30, 0.0 }
 0x16f   : > { %v749_v27 = vpack.c.bf16 %v681_v25, %v681_v25  ;;  %v678_v28 = vadd.f32 %v677_v11, %v659_v26  ;;  %v691_v29 = vmul.f32 %v1089_v14, %v681_v25 }
 0x171   : > { %753 = vst.msk [vmem:[%s1278_s29 + $0x8] sm:$0xf] %vm302_vm0, %v749_v27  ;;  %v748_v31 = vpack.c.bf16 %v678_v28, %v678_v28  ;;  %v704_v32 = vsel %vm697_vm3, %v691_v29, 0.0  ;;  %v690_v33 = vmul.f32 %v1089_v14, %v678_v28  ;;  %v725_v41 = vmul.f32 %v691_v29, %v691_v29 }
 0x172   : > { %705 = vadd.xlane.f32.xlu1 %v704_v32  ;;  %v644_v35 = vpop.f32.mrf.mxu3 }
 0x173   : > { %752 = vst.msk [vmem:[%s1278_s29 + $0x4] sm:$0xf] %vm302_vm0, %v748_v31  ;;  %v664_v36 = vadd.f32 %v663_v34, %v644_v35  ;;  %v701_v38 = vsel %vm697_vm3, %v690_v33, 0.0  ;;  %v724_v44 = vmul.f32 %v690_v33, %v690_v33  ;;  %v733_v45 = vsel %vm697_vm3, %v725_v41, 0.0 }
 0x174   : > { %728 = vadd.xlane.f32.xlu2 %v727_v37  ;;  %702 = vadd.xlane.f32.xlu0 %v701_v38 }
 0x175   : > { %v683_v40 = vadd.f32 %v682_v39, %v664_v36  ;;  %v730_v47 = vsel %vm697_vm3, %v724_v44, 0.0 }
 0x177   : > { %v750_v42 = vpack.c.bf16 %v683_v40, %v683_v40  ;;  %v692_v43 = vmul.f32 %v1089_v14, %v683_v40 }
 0x179   : > { %754 = vst.msk [vmem:[%s1278_s29 + $0xc] sm:$0xf] %vm302_vm0, %v750_v42  ;;  %v707_v46 = vsel %vm697_vm3, %v692_v43, 0.0  ;;  %v726_v48 = vmul.f32 %v692_v43, %v692_v43 }
 0x17a   : > { %734 = vadd.xlane.f32.xlu1 %v733_v45 }
 0x17b   : > { %v736_v49 = vsel %vm697_vm3, %v726_v48, 0.0 }
 0x17c   : > { %708 = vadd.xlane.f32.xlu2 %v707_v46  ;;  %731 = vadd.xlane.f32.xlu0 %v730_v47 }
 0x184   : > { %737 = vadd.xlane.f32.xlu2 %v736_v49 }
 0x1df   : > { %v700_v51 = vpop.xlane.xlu2 %699 }
 0x1e0   : > { %v710_v52 = vadd.f32 %v700_v51, %v693_v50 }
 0x1e2   : > { %715 = vst.msk [vmem:[%s1257_s16] sm:$0xff] %vm289_vm2, %v710_v52 }
 0x1e5   : > { %v706_v54 = vpop.xlane.xlu1 %705 }
 0x1e6   : > { %v712_v57 = vadd.f32 %v706_v54, %v695_v53 }
 0x1e7   : > { %v729_v58 = vpop.xlane.xlu2 %728  ;;  %v703_v59 = vpop.xlane.xlu0 %702 }
 0x1e8   : > { %717 = vst.msk [vmem:[%s1257_s16 + $0x10] sm:$0xff] %vm289_vm2, %v712_v57  ;;  %v739_v60 = vadd.f32 %v729_v58, %v719_v55  ;;  %v711_v61 = vadd.f32 %v703_v59, %v694_v56 }
 0x1ea   : > { %743 = vst.msk [vmem:[%s1267_s26] sm:$0xff] %vm289_vm2, %v739_v60 }
 0x1eb   : > { %716 = vst.msk [vmem:[%s1257_s16 + $0x8] sm:$0xff] %vm289_vm2, %v711_v61 }
 0x1ed   : > { %v735_v63 = vpop.xlane.xlu1 %734 }
 0x1ee   : > { %v741_v2 = vadd.f32 %v735_v63, %v721_v62 }
 0x1ef   : > { %v709_v3 = vpop.xlane.xlu2 %708  ;;  %v732_v4 = vpop.xlane.xlu0 %731 }
 0x1f0   : > { %745 = vst.msk [vmem:[%s1267_s26 + $0x10] sm:$0xff] %vm289_vm2, %v741_v2  ;;  %v713_v5 = vadd.f32 %v709_v3, %v696_v0  ;;  %v740_v6 = vadd.f32 %v732_v4, %v720_v1 }
 0x1f2   : > { %718 = vst.msk [vmem:[%s1257_s16 + $0x18] sm:$0xff] %vm289_vm2, %v713_v5 }
 0x1f3   : > { %744 = vst.msk [vmem:[%s1267_s26 + $0x8] sm:$0xff] %vm289_vm2, %v740_v6 }
 0x1f7   : > { %v738_v8 = vpop.xlane.xlu2 %737 }
 0x1f8   : > { %v742_v9 = vadd.f32 %v738_v8, %v722_v7 }
 0x1fa   : > { %746 = vst.msk [vmem:[%s1267_s26 + $0x18] sm:$0xff] %vm289_vm2, %v742_v9 }
 0x1fb PF: > { %s16_s20 = sadd.s32 1, %s1112_s20   ;;  %s1345_s18 = smov %s1108_s19 }
 0x1fc   : > { %p13_p5 = scmp.ge.s32.totalorder %s16_s20, 4   ;;  %s1346_s19 = smov %s1348_s21 }
 0x1fe   :  { %15 = sbr.rel (!%p13_p5) target bundleno = 2 (0x2), region = 90 }

// kernel: varnet2_forward.68
= control target key start
LH: loop header
LB: loop body
LE: loop exit
PB: predicated region body
PF: predicated region fallthrough
CT: control target
= control target key end

     0   :  { %s768_s15 = smov 0   ;;  %s770_s16 = smov 0   ;;  %s946_s0 = inlined_call_operand.vmem [shape: bf16[2,32,16], index: 0, kind: input, shape index: {}]   ;;  %s947_s1 = inlined_call_operand.vmem [shape: bf16[64,32], index: 1, kind: input, shape index: {}]   ;;  %s948_s2 = inlined_call_operand.vmem [shape: bf16[2,64,16], index: 2, kind: output, shape index: {0}]   ;;  %s949_s3 = inlined_call_operand.vmem [shape: f32[2,64,1], index: 3, kind: output, shape index: {1}]   ;;  %s950_s4 = inlined_call_operand.vmem [shape: f32[2,64,1], index: 4, kind: output, shape index: {2}]  }
   0x1   :  { %s772_s17 = smov 0  }
   0x2 LB: > { %s27_s18 = sadd.s32 1, %s736_s16  ;;  %p638_p0 = scmp.ge.s32.totalorder %s740_s17, 1  ;;  %s740_s17 = sphi %s772_s17, %s15_s17   ;;  %s736_s16 = sphi %s770_s16, %s952_s16   ;;  %s732_s15 = sphi %s768_s15, %s951_s15  }
   0x3   : > { %p29_p1 = scmp.ge.s32.totalorder %s27_s18, 2  ;;  %p186_p2 = scmp.lt.s32.totalorder %s740_s17, 3 }
   0x5   : > { %s954_s18 = smov (%p29_p1, %s27_s18), 0  ;;  %p187_p3 = pnand %p638_p0, %p186_p2 }
   0x6   : > { %p228_p4 = scmp.lt.s32.totalorder (!%p187_p3), %s732_s15, 1 }
   0x7   : > { %190 = sbr.rel (%p187_p3) target bundleno = 309 (0x135), region = 28 }
   0xc   : > { %s956_s15 = smov (!%p228_p4, %s732_s15), 1  ;;  %v683_v2 = vld [vmem:[%s947_s1] sm:$0xff]  ;;  %v684_v3 = vld [vmem:[%s947_s1 + $0x8] sm:$0xff]  ;;  %vm320_vm0 = vcmask 261120   ;;  %v686_v4 = vld [vmem:[%s947_s1 + $0x18] sm:$0xff]  ;;  %vm370_vm1 = vcmask 130048  }
   0xd   : > { %s677_s19 = sshll.u32 %s956_s15, 4  ;;  %v685_v5 = vld [vmem:[%s947_s1 + $0x10] sm:$0xff]  ;;  %s678_s5 = sshll.u32 %s956_s15, 5  ;;  %vm476_vm2 = vcmask 125952   ;;  %vm259_vm3 = vcmask 7168   ;;  %v742_v26 = vmov 0.0  }
   0xe   : > { %s235_s22 = scalar_lea.vmem %s946_s0, %s677_s19  ;;  %s808_s8 = scalar_lea.vmem %s948_s2, %s678_s5 }
   0xf   : > { %v682_v0 = vld [vmem:[%s235_s22 + $0x8] sm:$0xff]  ;;  %v681_v1 = vld [vmem:[%s235_s22] sm:$0xff]  ;;  %s679_s9 = sshll.u32 %s956_s15, 6 }
  0x10   : > { %339 = vmatpush.bf16.msra.mxu0 %v682_v0  ;;  %687 = vmatpush.bf16.msra.mxu1 %v682_v0  ;;  %s830_s12 = scalar_lea.vmem %s949_s3, %s679_s9  ;;  %s858_s19 = scalar_lea.vmem %s950_s4, %s679_s9 }
  0x11   : > { %689 = vmatpush.bf16.msra.mxu3 %v682_v0  ;;  %688 = vmatpush.bf16.msra.mxu2 %v682_v0  ;;  %262 = vst.msk [vmem:[%s830_s12 + $0x10] sm:$0xff] %vm259_vm3, %v742_v26 }
  0x12   : > { %260 = vst.msk [vmem:[%s830_s12] sm:$0xff] %vm259_vm3, %v742_v26 }
  0x13   : > { %261 = vst.msk [vmem:[%s830_s12 + $0x8] sm:$0xff] %vm259_vm3, %v742_v26 }
  0x14   : > { %340 = vmatpush.bf16.msra.mxu0 %v681_v1  ;;  %690 = vmatpush.bf16.msra.mxu1 %v681_v1  ;;  %263 = vst.msk [vmem:[%s830_s12 + $0x18] sm:$0xff] %vm259_vm3, %v742_v26 }
  0x15   : > { %692 = vmatpush.bf16.msra.mxu3 %v681_v1  ;;  %691 = vmatpush.bf16.msra.mxu2 %v681_v1  ;;  %264 = vst.msk [vmem:[%s830_s12 + $0x20] sm:$0xff] %vm259_vm3, %v742_v26 }
  0x16   : > { %265 = vst.msk [vmem:[%s830_s12 + $0x28] sm:$0xff] %vm259_vm3, %v742_v26 }
  0x17   : > { %671 = vmatmul.msk.bf16.vlgmr.msra.gmra.mxu0 %vm320_vm0, %v683_v2  ;;  %672 = vmatmul.msk.bf16.vlgmr.msra.gmra.mxu1 %vm320_vm0, %v684_v3  ;;  %266 = vst.msk [vmem:[%s830_s12 + $0x30] sm:$0xff] %vm259_vm3, %v742_v26 }
  0x18   : > { %674 = vmatmul.msk.bf16.vlgmr.msra.gmra.mxu3 %vm320_vm0, %v686_v4  ;;  %673 = vmatmul.msk.bf16.vlgmr.msra.gmra.mxu2 %vm320_vm0, %v685_v5  ;;  %267 = vst.msk [vmem:[%s830_s12 + $0x38] sm:$0xff] %vm259_vm3, %v742_v26  ;;  %v364_v47 = vld [vmem:[%s830_s12 + $0x10] sm:$0xff] }
  0x19   : > { %268 = vst.msk [vmem:[%s858_s19] sm:$0xff] %vm259_vm3, %v742_v26  ;;  %v362_v48 = vld [vmem:[%s830_s12] sm:$0xff] }
  0x1a   : > { %269 = vst.msk [vmem:[%s858_s19 + $0x8] sm:$0xff] %vm259_vm3, %v742_v26  ;;  %v363_v2 = vld [vmem:[%s830_s12 + $0x8] sm:$0xff] }
  0x1b   : > { %270 = vst.msk [vmem:[%s858_s19 + $0x10] sm:$0xff] %vm259_vm3, %v742_v26  ;;  %v365_v1 = vld [vmem:[%s830_s12 + $0x18] sm:$0xff] }
  0x1c   : > { %271 = vst.msk [vmem:[%s858_s19 + $0x18] sm:$0xff] %vm259_vm3, %v742_v26  ;;  %v366_v62 = vld [vmem:[%s830_s12 + $0x20] sm:$0xff] }
  0x1d   : > { %272 = vst.msk [vmem:[%s858_s19 + $0x20] sm:$0xff] %vm259_vm3, %v742_v26 }
  0x1e   : > { %273 = vst.msk [vmem:[%s858_s19 + $0x28] sm:$0xff] %vm259_vm3, %v742_v26  ;;  %v368_v57 = vld [vmem:[%s830_s12 + $0x30] sm:$0xff] }
  0x1f   : > { %274 = vst.msk [vmem:[%s858_s19 + $0x30] sm:$0xff] %vm259_vm3, %v742_v26 }
  0x20   : > { %275 = vst.msk [vmem:[%s858_s19 + $0x38] sm:$0xff] %vm259_vm3, %v742_v26  ;;  %v412_v53 = vld [vmem:[%s858_s19] sm:$0xff] }
  0x22   : > { %v414_v56 = vld [vmem:[%s858_s19 + $0x10] sm:$0xff] }
  0x94   : > { %v342_v6 = vpop.f32.mrf.mxu0  ;;  %v347_v7 = vpop.f32.mrf.mxu1 }
  0x95   : > { %v468_v8 = vpack.c.bf16 %v342_v6, %v342_v6  ;;  %v470_v9 = vpack.c.bf16 %v347_v7, %v347_v7  ;;  %v377_v10 = vsel %vm370_vm1, %v347_v7, 0.0  ;;  %v371_v11 = vsel %vm370_vm1, %v342_v6, 0.0 }
  0x96   : > { %378 = vadd.xlane.f32.xlu1 %v377_v10  ;;  %372 = vadd.xlane.f32.xlu0 %v371_v11  ;;  %v420_v12 = vmul.f32 %v342_v6, %v342_v6  ;;  %v422_v13 = vmul.f32 %v347_v7, %v347_v7  ;;  %v415_v7 = vld [vmem:[%s858_s19 + $0x18] sm:$0xff]  ;;  %v416_v11 = vld [vmem:[%s858_s19 + $0x20] sm:$0xff] }
  0x97   : > { %477 = vst.msk [vmem:[%s808_s8] sm:$0xf] %vm476_vm2, %v468_v8  ;;  %v369_v10 = vld [vmem:[%s830_s12 + $0x38] sm:$0xff] }
  0x98   : > { %479 = vst.msk [vmem:[%s808_s8 + $0x8] sm:$0xf] %vm476_vm2, %v470_v9  ;;  %v428_v14 = vsel %vm370_vm1, %v420_v12, 0.0  ;;  %v434_v17 = vsel %vm370_vm1, %v422_v13, 0.0 }
  0x99   : > { %429 = vadd.xlane.f32.xlu2 %v428_v14 }
  0x9b   : > { %v357_v15 = vpop.f32.mrf.mxu3  ;;  %v352_v16 = vpop.f32.mrf.mxu2 }
  0x9c   : > { %v474_v18 = vpack.c.bf16 %v357_v15, %v357_v15  ;;  %v344_v19 = vpop.f32.mrf.mxu0  ;;  %v349_v20 = vpop.f32.mrf.mxu1  ;;  %v389_v21 = vsel %vm370_vm1, %v357_v15, 0.0  ;;  %v472_v24 = vpack.c.bf16 %v352_v16, %v352_v16  ;;  %v383_v25 = vsel %vm370_vm1, %v352_v16, 0.0 }
  0x9d   : > { %v469_v22 = vpack.c.bf16 %v344_v19, %v344_v19  ;;  %v471_v23 = vpack.c.bf16 %v349_v20, %v349_v20  ;;  %v423_v29 = vmul.f32 %v349_v20, %v349_v20  ;;  %v380_v32 = vsel %vm370_vm1, %v349_v20, 0.0  ;;  %v413_v20 = vld [vmem:[%s858_s19 + $0x8] sm:$0xff] }
  0x9e   : > { %483 = vst.msk [vmem:[%s808_s8 + $0x18] sm:$0xf] %vm476_vm2, %v474_v18  ;;  %435 = vadd.xlane.f32.xlu1 %v434_v17  ;;  %390 = vadd.xlane.f32.xlu0 %v389_v21  ;;  %v374_v33 = vsel %vm370_vm1, %v344_v19, 0.0  ;;  %v424_v35 = vmul.f32 %v352_v16, %v352_v16  ;;  %v421_v39 = vmul.f32 %v344_v19, %v344_v19  ;;  %v367_v16 = vld [vmem:[%s830_s12 + $0x28] sm:$0xff] }
  0x9f   : > { %478 = vst.msk [vmem:[%s808_s8 + $0x4] sm:$0xf] %vm476_vm2, %v469_v22  ;;  %v437_v34 = vsel %vm370_vm1, %v423_v29, 0.0  ;;  %v426_v41 = vmul.f32 %v357_v15, %v357_v15  ;;  %v417_v19 = vld [vmem:[%s858_s19 + $0x28] sm:$0xff] }
  0xa0   : > { %480 = vst.msk [vmem:[%s808_s8 + $0xc] sm:$0xf] %vm476_vm2, %v471_v23  ;;  %v440_v37 = vsel %vm370_vm1, %v424_v35, 0.0  ;;  %v431_v43 = vsel %vm370_vm1, %v421_v39, 0.0 }
  0xa1   : > { %481 = vst.msk [vmem:[%s808_s8 + $0x10] sm:$0xf] %vm476_vm2, %v472_v24  ;;  %384 = vadd.xlane.f32.xlu2 %v383_v25  ;;  %v446_v44 = vsel %vm370_vm1, %v426_v41, 0.0  ;;  %v418_v25 = vld [vmem:[%s858_s19 + $0x30] sm:$0xff] }
  0xa3   : > { %v359_v27 = vpop.f32.mrf.mxu3  ;;  %v354_v28 = vpop.f32.mrf.mxu2 }
  0xa4   : > { %v475_v30 = vpack.c.bf16 %v359_v27, %v359_v27  ;;  %v473_v31 = vpack.c.bf16 %v354_v28, %v354_v28  ;;  %v392_v36 = vsel %vm370_vm1, %v359_v27, 0.0  ;;  %v386_v38 = vsel %vm370_vm1, %v354_v28, 0.0 }
  0xa5   : > { %v425_v40 = vmul.f32 %v354_v28, %v354_v28  ;;  %v427_v45 = vmul.f32 %v359_v27, %v359_v27  ;;  %v419_v28 = vld [vmem:[%s858_s19 + $0x38] sm:$0xff] }
  0xa6   : > { %484 = vst.msk [vmem:[%s808_s8 + $0x1c] sm:$0xf] %vm476_vm2, %v475_v30  ;;  %381 = vadd.xlane.f32.xlu1 %v380_v32  ;;  %375 = vadd.xlane.f32.xlu0 %v374_v33 }
  0xa7   : > { %482 = vst.msk [vmem:[%s808_s8 + $0x14] sm:$0xf] %vm476_vm2, %v473_v31  ;;  %v443_v42 = vsel %vm370_vm1, %v425_v40, 0.0  ;;  %v449_v46 = vsel %vm370_vm1, %v427_v45, 0.0 }
  0xa9   : > { %438 = vadd.xlane.f32.xlu2 %v437_v34 }
  0xae   : > { %393 = vadd.xlane.f32.xlu1 %v392_v36  ;;  %441 = vadd.xlane.f32.xlu0 %v440_v37 }
  0xb1   : > { %387 = vadd.xlane.f32.xlu2 %v386_v38 }
  0xb6   : > { %444 = vadd.xlane.f32.xlu1 %v443_v42  ;;  %432 = vadd.xlane.f32.xlu0 %v431_v43 }
  0xb9   : > { %447 = vadd.xlane.f32.xlu2 %v446_v44 }
  0xbe   : > { %450 = vadd.xlane.f32.xlu0 %v449_v46 }
 0x109   : > { %v379_v49 = vpop.xlane.xlu1 %378  ;;  %v373_v50 = vpop.xlane.xlu0 %372 }
 0x10a   : > { %v397_v51 = vadd.f32 %v379_v49, %v364_v47  ;;  %v395_v52 = vadd.f32 %v373_v50, %v362_v48 }
 0x10c   : > { %406 = vst.msk [vmem:[%s830_s12 + $0x10] sm:$0xff] %vm259_vm3, %v397_v51  ;;  %v430_v54 = vpop.xlane.xlu2 %429 }
 0x10d   : > { %404 = vst.msk [vmem:[%s830_s12] sm:$0xff] %vm259_vm3, %v395_v52  ;;  %v452_v55 = vadd.f32 %v430_v54, %v412_v53 }
 0x10f   : > { %460 = vst.msk [vmem:[%s858_s19] sm:$0xff] %vm259_vm3, %v452_v55 }
 0x111   : > { %v436_v58 = vpop.xlane.xlu1 %435  ;;  %v391_v59 = vpop.xlane.xlu0 %390 }
 0x112   : > { %v454_v60 = vadd.f32 %v436_v58, %v414_v56  ;;  %v401_v61 = vadd.f32 %v391_v59, %v368_v57 }
 0x114   : > { %462 = vst.msk [vmem:[%s858_s19 + $0x10] sm:$0xff] %vm259_vm3, %v454_v60  ;;  %v385_v63 = vpop.xlane.xlu2 %384 }
 0x115   : > { %410 = vst.msk [vmem:[%s830_s12 + $0x30] sm:$0xff] %vm259_vm3, %v401_v61  ;;  %v399_v0 = vadd.f32 %v385_v63, %v366_v62 }
 0x117   : > { %408 = vst.msk [vmem:[%s830_s12 + $0x20] sm:$0xff] %vm259_vm3, %v399_v0 }
 0x119   : > { %v382_v3 = vpop.xlane.xlu1 %381  ;;  %v376_v4 = vpop.xlane.xlu0 %375 }
 0x11a   : > { %v398_v5 = vadd.f32 %v382_v3, %v365_v1  ;;  %v396_v6 = vadd.f32 %v376_v4, %v363_v2 }
 0x11c   : > { %407 = vst.msk [vmem:[%s830_s12 + $0x18] sm:$0xff] %vm259_vm3, %v398_v5  ;;  %v439_v8 = vpop.xlane.xlu2 %438 }
 0x11d   : > { %405 = vst.msk [vmem:[%s830_s12 + $0x8] sm:$0xff] %vm259_vm3, %v396_v6  ;;  %v455_v9 = vadd.f32 %v439_v8, %v415_v7 }
 0x11f   : > { %463 = vst.msk [vmem:[%s858_s19 + $0x18] sm:$0xff] %vm259_vm3, %v455_v9 }
 0x121   : > { %v394_v12 = vpop.xlane.xlu1 %393  ;;  %v442_v13 = vpop.xlane.xlu0 %441 }
 0x122   : > { %v402_v14 = vadd.f32 %v394_v12, %v369_v10  ;;  %v456_v15 = vadd.f32 %v442_v13, %v416_v11 }
 0x124   : > { %411 = vst.msk [vmem:[%s830_s12 + $0x38] sm:$0xff] %vm259_vm3, %v402_v14  ;;  %v388_v17 = vpop.xlane.xlu2 %387 }
 0x125   : > { %464 = vst.msk [vmem:[%s858_s19 + $0x20] sm:$0xff] %vm259_vm3, %v456_v15  ;;  %v400_v18 = vadd.f32 %v388_v17, %v367_v16 }
 0x127   : > { %409 = vst.msk [vmem:[%s830_s12 + $0x28] sm:$0xff] %vm259_vm3, %v400_v18 }
 0x129   : > { %v445_v21 = vpop.xlane.xlu1 %444  ;;  %v433_v22 = vpop.xlane.xlu0 %432 }
 0x12a   : > { %v457_v23 = vadd.f32 %v445_v21, %v417_v19  ;;  %v453_v24 = vadd.f32 %v433_v22, %v413_v20 }
 0x12c   : > { %465 = vst.msk [vmem:[%s858_s19 + $0x28] sm:$0xff] %vm259_vm3, %v457_v23  ;;  %v448_v26 = vpop.xlane.xlu2 %447 }
 0x12d   : > { %461 = vst.msk [vmem:[%s858_s19 + $0x8] sm:$0xff] %vm259_vm3, %v453_v24  ;;  %v458_v27 = vadd.f32 %v448_v26, %v418_v25 }
 0x12f   : > { %466 = vst.msk [vmem:[%s858_s19 + $0x30] sm:$0xff] %vm259_vm3, %v458_v27 }
 0x131   : > { %v451_v29 = vpop.xlane.xlu0 %450 }
 0x132   : > { %v459_v30 = vadd.f32 %v451_v29, %v419_v28 }
 0x134   : > { %467 = vst.msk [vmem:[%s858_s19 + $0x38] sm:$0xff] %vm259_vm3, %v459_v30 }
 0x135 PF: > { %s15_s17 = sadd.s32 1, %s740_s17   ;;  %s951_s15 = smov %s736_s16 }
 0x136   : > { %p12_p5 = scmp.ge.s32.totalorder %s15_s17, 4   ;;  %s952_s16 = smov %s954_s18 }
 0x138   :  { %14 = sbr.rel (!%p12_p5) target bundleno = 2 (0x2), region = 86 }

// kernel: varnet2_forward.74
= control target key start
LH: loop header
LB: loop body
LE: loop exit
PB: predicated region body
PF: predicated region fallthrough
CT: control target
= control target key end

     0   :  { %s640_s15 = smov 0   ;;  %s642_s16 = smov 0   ;;  %s741_s0 = inlined_call_operand.vmem [shape: bf16[2,16,64], index: 0, kind: input, shape index: {}]   ;;  %s742_s1 = inlined_call_operand.vmem [shape: bf16[32,16], index: 1, kind: input, shape index: {}]   ;;  %s743_s2 = inlined_call_operand.vmem [shape: bf16[2,32,64], index: 2, kind: output, shape index: {0}]   ;;  %s744_s3 = inlined_call_operand.vmem [shape: f32[2,32,1], index: 3, kind: output, shape index: {1}]   ;;  %s745_s4 = inlined_call_operand.vmem [shape: f32[2,32,1], index: 4, kind: output, shape index: {2}]  }
   0x1   :  { %s644_s17 = smov 0  }
   0x2 LB: > { %s27_s18 = sadd.s32 1, %s608_s16  ;;  %p532_p0 = scmp.ge.s32.totalorder %s612_s17, 1  ;;  %s612_s17 = sphi %s644_s17, %s15_s17   ;;  %s608_s16 = sphi %s642_s16, %s747_s16   ;;  %s604_s15 = sphi %s640_s15, %s746_s15  }
   0x3   : > { %p29_p1 = scmp.ge.s32.totalorder %s27_s18, 2  ;;  %p186_p2 = scmp.lt.s32.totalorder %s612_s17, 3 }
   0x5   : > { %s749_s18 = smov (%p29_p1, %s27_s18), 0  ;;  %p187_p3 = pnand %p532_p0, %p186_p2 }
   0x6   : > { %p228_p4 = scmp.lt.s32.totalorder (!%p187_p3), %s604_s15, 1 }
   0x7   : > { %190 = sbr.rel (%p187_p3) target bundleno = 282 (0x11a), region = 28 }
   0xc   : > { %s751_s15 = smov (!%p228_p4, %s604_s15), 1  ;;  %v562_v1 = vld [vmem:[%s742_s1] sm:$0xff]  ;;  %v563_v2 = vld [vmem:[%s742_s1 + $0x8] sm:$0xff]  ;;  %vm290_vm0 = vcmask 130048   ;;  %vm259_vm1 = vcmask 7168   ;;  %v614_v3 = vmov 0.0  }
   0xd   : > { %s557_s19 = sshll.u32 %s751_s15, 3  ;;  %s559_s27 = sshll.u32 %s751_s15, 5  ;;  %vm320_vm2 = vcmask 523264   ;;  %vm374_vm3 = vcmask 519168  }
   0xe   : > { %s235_s22 = scalar_lea.vmem %s741_s0, %s557_s19  ;;  %s670_s30 = scalar_lea.vmem %s744_s3, %s559_s27 }
   0xf   : > { %v561_v0 = vld [vmem:[%s235_s22] sm:$0xff]  ;;  %262 = vst.msk [vmem:[%s670_s30 + $0x10] sm:$0xff] %vm259_vm1, %v614_v3  ;;  %s677_s7 = scalar_lea.vmem %s745_s4, %s559_s27  ;;  %s558_s8 = sshll.u32 %s751_s15, 4 }
  0x10   : > { %304 = vmatpush.bf16.msra.mxu0 %v561_v0  ;;  %564 = vmatpush.bf16.msra.mxu1 %v561_v0  ;;  %260 = vst.msk [vmem:[%s670_s30] sm:$0xff] %vm259_vm1, %v614_v3  ;;  %s243_s11 = scalar_lea.vmem %s743_s2, %s558_s8 }
  0x11   : > { %261 = vst.msk [vmem:[%s670_s30 + $0x8] sm:$0xff] %vm259_vm1, %v614_v3 }
  0x12   : > { %263 = vst.msk [vmem:[%s670_s30 + $0x18] sm:$0xff] %vm259_vm1, %v614_v3 }
  0x13   : > { %553 = vmatmul.msk.bf16.vlgmr.msra.gmra.mxu0 %vm290_vm0, %v562_v1  ;;  %554 = vmatmul.msk.bf16.vlgmr.msra.gmra.mxu1 %vm290_vm0, %v563_v2  ;;  %264 = vst.msk [vmem:[%s677_s7] sm:$0xff] %vm259_vm1, %v614_v3 }
  0x14   : > { %265 = vst.msk [vmem:[%s677_s7 + $0x8] sm:$0xff] %vm259_vm1, %v614_v3 }
  0x15   : > { %266 = vst.msk [vmem:[%s677_s7 + $0x10] sm:$0xff] %vm259_vm1, %v614_v3 }
  0x16   : > { %267 = vst.msk [vmem:[%s677_s7 + $0x18] sm:$0xff] %vm259_vm1, %v614_v3  ;;  %v318_v24 = vld [vmem:[%s670_s30 + $0x10] sm:$0xff] }
  0x17   : > { %v316_v25 = vld [vmem:[%s670_s30] sm:$0xff] }
  0x18   : > { %v317_v34 = vld [vmem:[%s670_s30 + $0x8] sm:$0xff] }
  0x19   : > { %v319_v33 = vld [vmem:[%s670_s30 + $0x18] sm:$0xff] }
  0x1a   : > { %v342_v30 = vld [vmem:[%s677_s7] sm:$0xff] }
  0x1b   : > { %v343_v37 = vld [vmem:[%s677_s7 + $0x8] sm:$0xff] }
  0x1c   : > { %v344_v43 = vld [vmem:[%s677_s7 + $0x10] sm:$0xff] }
  0x1d   : > { %v345_v42 = vld [vmem:[%s677_s7 + $0x18] sm:$0xff] }
  0x90   : > { %v306_v4 = vpop.f32.mrf.mxu0  ;;  %v311_v5 = vpop.f32.mrf.mxu1 }
  0x91   : > { %v370_v6 = vpack.c.bf16 %v306_v4, %v306_v4  ;;  %v372_v7 = vpack.c.bf16 %v311_v5, %v311_v5  ;;  %v327_v8 = vsel %vm320_vm2, %v311_v5, 0.0  ;;  %v321_v9 = vsel %vm320_vm2, %v306_v4, 0.0 }
  0x92   : > { %328 = vadd.xlane.f32.xlu1 %v327_v8  ;;  %322 = vadd.xlane.f32.xlu0 %v321_v9  ;;  %v346_v10 = vmul.f32 %v306_v4, %v306_v4  ;;  %v348_v21 = vmul.f32 %v311_v5, %v311_v5 }
  0x93   : > { %375 = vst.msk [vmem:[%s243_s11] sm:$0xf] %vm374_vm3, %v370_v6 }
  0x94   : > { %377 = vst.msk [vmem:[%s243_s11 + $0x8] sm:$0xf] %vm374_vm3, %v372_v7  ;;  %v350_v11 = vsel %vm320_vm2, %v346_v10, 0.0  ;;  %v356_v23 = vsel %vm320_vm2, %v348_v21, 0.0 }
  0x95   : > { %351 = vadd.xlane.f32.xlu2 %v350_v11 }
  0x98   : > { %v308_v12 = vpop.f32.mrf.mxu0  ;;  %v313_v13 = vpop.f32.mrf.mxu1 }
  0x99   : > { %v347_v14 = vmul.f32 %v308_v12, %v308_v12  ;;  %v371_v15 = vpack.c.bf16 %v308_v12, %v308_v12  ;;  %v373_v16 = vpack.c.bf16 %v313_v13, %v313_v13  ;;  %v330_v17 = vsel %vm320_vm2, %v313_v13, 0.0 }
  0x9a   : > { %v324_v18 = vsel %vm320_vm2, %v308_v12, 0.0  ;;  %331 = vadd.xlane.f32.xlu1 %v330_v17  ;;  %v349_v20 = vmul.f32 %v313_v13, %v313_v13 }
  0x9b   : > { %376 = vst.msk [vmem:[%s243_s11 + $0x4] sm:$0xf] %vm374_vm3, %v371_v15  ;;  %325 = vadd.xlane.f32.xlu0 %v324_v18  ;;  %v353_v19 = vsel %vm320_vm2, %v347_v14, 0.0 }
  0x9c   : > { %378 = vst.msk [vmem:[%s243_s11 + $0xc] sm:$0xf] %vm374_vm3, %v373_v16  ;;  %v359_v22 = vsel %vm320_vm2, %v349_v20, 0.0 }
  0x9d   : > { %354 = vadd.xlane.f32.xlu2 %v353_v19 }
  0xa2   : > { %360 = vadd.xlane.f32.xlu1 %v359_v22 }
  0xa3   : > { %357 = vadd.xlane.f32.xlu0 %v356_v23 }
 0x105   : > { %v329_v26 = vpop.xlane.xlu1 %328  ;;  %v323_v27 = vpop.xlane.xlu0 %322 }
 0x106   : > { %v335_v28 = vadd.f32 %v329_v26, %v318_v24  ;;  %v333_v29 = vadd.f32 %v323_v27, %v316_v25 }
 0x108   : > { %340 = vst.msk [vmem:[%s670_s30 + $0x10] sm:$0xff] %vm259_vm1, %v335_v28  ;;  %v352_v31 = vpop.xlane.xlu2 %351 }
 0x109   : > { %338 = vst.msk [vmem:[%s670_s30] sm:$0xff] %vm259_vm1, %v333_v29  ;;  %v362_v32 = vadd.f32 %v352_v31, %v342_v30 }
 0x10b   : > { %366 = vst.msk [vmem:[%s677_s7] sm:$0xff] %vm259_vm1, %v362_v32 }
 0x10d   : > { %v332_v35 = vpop.xlane.xlu1 %331 }
 0x10e   : > { %v326_v36 = vpop.xlane.xlu0 %325  ;;  %v336_v38 = vadd.f32 %v332_v35, %v319_v33 }
 0x10f   : > { %v334_v39 = vadd.f32 %v326_v36, %v317_v34 }
 0x110   : > { %v355_v40 = vpop.xlane.xlu2 %354  ;;  %341 = vst.msk [vmem:[%s670_s30 + $0x18] sm:$0xff] %vm259_vm1, %v336_v38 }
 0x111   : > { %v363_v41 = vadd.f32 %v355_v40, %v343_v37  ;;  %339 = vst.msk [vmem:[%s670_s30 + $0x8] sm:$0xff] %vm259_vm1, %v334_v39 }
 0x113   : > { %367 = vst.msk [vmem:[%s677_s7 + $0x8] sm:$0xff] %vm259_vm1, %v363_v41 }
 0x115   : > { %v361_v44 = vpop.xlane.xlu1 %360 }
 0x116   : > { %v358_v45 = vpop.xlane.xlu0 %357  ;;  %v365_v46 = vadd.f32 %v361_v44, %v345_v42 }
 0x117   : > { %v364_v47 = vadd.f32 %v358_v45, %v344_v43 }
 0x118   : > { %369 = vst.msk [vmem:[%s677_s7 + $0x18] sm:$0xff] %vm259_vm1, %v365_v46 }
 0x119   : > { %368 = vst.msk [vmem:[%s677_s7 + $0x10] sm:$0xff] %vm259_vm1, %v364_v47 }
 0x11a PF: > { %s15_s17 = sadd.s32 1, %s612_s17   ;;  %s746_s15 = smov %s608_s16 }
 0x11b   : > { %p12_p5 = scmp.ge.s32.totalorder %s15_s17, 4   ;;  %s747_s16 = smov %s749_s18 }
 0x11d   :  { %14 = sbr.rel (!%p12_p5) target bundleno = 2 (0x2), region = 86 }

// kernel: varnet2_forward.70
= control target key start
LH: loop header
LB: loop body
LE: loop exit
PB: predicated region body
PF: predicated region fallthrough
CT: control target
= control target key end

     0   :  { %s1056_s18 = smov 0   ;;  %s1058_s19 = smov 0   ;;  %s1191_s0 = inlined_call_operand.vmem [shape: bf16[2,1,32,110], index: 0, kind: input, shape index: {}]   ;;  %s1192_s1 = inlined_call_operand.vmem [shape: bf16[16,288], index: 1, kind: input, shape index: {}]   ;;  %s1193_s2 = inlined_call_operand.vmem [shape: f32[1,80], index: 2, kind: input, shape index: {}]   ;;  %s1194_s3 = inlined_call_operand.vmem [shape: bf16[2,16,80], index: 3, kind: output, shape index: {0}]   ;;  %s1195_s4 = inlined_call_operand.vmem [shape: f32[2,16,1], index: 4, kind: output, shape index: {1}]   ;;  %s1196_s5 = inlined_call_operand.vmem [shape: f32[2,16,1], index: 5, kind: output, shape index: {2}]  }
   0x1   :  { %s1060_s20 = smov 0  }
   0x2 LB: > { %s28_s21 = sadd.s32 1, %s1011_s19  ;;  %p838_p0 = scmp.ge.s32.totalorder %s1015_s20, 1  ;;  %s1015_s20 = sphi %s1060_s20, %s16_s20   ;;  %s1011_s19 = sphi %s1058_s19, %s1198_s19   ;;  %s1007_s18 = sphi %s1056_s18, %s1197_s18  }
   0x3   : > { %p30_p1 = scmp.ge.s32.totalorder %s28_s21, 2  ;;  %p212_p2 = scmp.lt.s32.totalorder %s1015_s20, 3 }
   0x5   : > { %s1200_s21 = smov (%p30_p1, %s28_s21), 0  ;;  %p213_p3 = pnand %p838_p0, %p212_p2 }
   0x6   : > { %p257_p4 = scmp.lt.s32.totalorder (!%p213_p3), %s1007_s18, 1  ;;  %s1017_s26 = smov (!%p213_p3), 107  }
   0x7   : > { %216 = sbr.rel (%p213_p3) target bundleno = 485 (0x1e5), region = 32  ;;  %s1018_s27 = smov (!%p213_p3), 118  }
   0x8   : > { %s1019_s28 = smov (!%p213_p3), 126   ;;  %s1020_s29 = smov (!%p213_p3), 108  }
   0x9   : > { %s1021_s30 = smov (!%p213_p3), 127   ;;  %s1022_s6 = smov (!%p213_p3), 116  }
   0xa   : > { %s1023_s7 = smov (!%p213_p3), 106   ;;  %s1024_s8 = smov (!%p213_p3), 117  }
   0xc   : > { %s1202_s18 = smov (!%p257_p4, %s1007_s18), 1  ;;  %vm298_vm0 = vcmask 650240   ;;  %v849_v46 = vld [vmem:[%s1192_s1] sm:$0xf]  ;;  %v957_v47 = vld [vmem:[%s1192_s1 + $0x8] sm:$0xf0] }
   0xd   : > { %s1077_s22 = sshll.u32 %s1202_s18, 4  ;;  %v850_v51 = vor.u32 %v957_v47, %v849_v46  ;;  %v857_v52 = vld [vmem:[%s1192_s1 + $0x8] sm:$0xf]  ;;  %v958_v53 = vld [vmem:[%s1192_s1 + $0x10] sm:$0xf0]  ;;  %vm598_vm1 = vcmask 261120  }
   0xe   : > { %s265_s25 = scalar_lea.vmem %s1191_s0, %s1077_s22  ;;  %v858_v58 = vor.u32 %v958_v53, %v857_v52  ;;  %v956_v59 = vld [vmem:[%s1192_s1 + $0x4] sm:$0xf]  ;;  %v851_v60 = vld [vmem:[%s1192_s1 + $0xc] sm:$0xf0]  ;;  %vm289_vm2 = vcmask 7168   ;;  %v1025_v63 = vmov 0.0  }
   0xf   : > { %v296_v0 = vld [vmem:[%s265_s25 + $0x8] sm:$0xf]  ;;  %v294_v1 = vld [vmem:[%s265_s25] sm:$0xf]  ;;  %v297_v2 = vld [vmem:[%s265_s25 + $0xc] sm:$0xf]  ;;  %v854_v62 = vor.u32 %v956_v59, %v851_v60 }
  0x10   : > { %407 = vrot.lane.b32.xlu1 %v296_v0, %s1017_s26  ;;  %343 = vrot.lane.b32.xlu0 %v296_v0, %s1018_s27  ;;  %v295_v3 = vld [vmem:[%s265_s25 + $0x4] sm:$0xf]  ;;  %299 = vst.msk [vmem:[#allocation2] sm:$0xf] %vm298_vm0, %v294_v1  ;;  %vm652_vm3 = vcmask 654336  }
  0x11   : > { %339 = vrot.lane.b32.xlu2 %v294_v1, %s1018_s27  ;;  %300 = vst.msk [vmem:[#allocation2 + $0x4] sm:$0xf] %vm298_vm0, %v295_v3 }
  0x12   : > { %301 = vst.msk [vmem:[#allocation2 + $0x8] sm:$0xf] %vm298_vm0, %v296_v0 }
  0x13   : > { %302 = vst.msk [vmem:[#allocation2 + $0xc] sm:$0xf] %vm298_vm0, %v297_v2 }
  0x18   : > { %409 = vrot.lane.b32.xlu1 %v297_v2, %s1017_s26  ;;  %345 = vrot.lane.b32.xlu0 %v297_v2, %s1018_s27  ;;  %v938_v45 = vld [vmem:[#allocation2] sm:$0xff] }
  0x19   : > { %341 = vrot.lane.b32.xlu2 %v295_v3, %s1018_s27 }
  0x1a   : > { %v939_v44 = vld [vmem:[#allocation2 + $0x8] sm:$0xff] }
  0x20   : > { %405 = vrot.lane.b32.xlu1 %v295_v3, %s1017_s26  ;;  %403 = vrot.lane.b32.xlu0 %v294_v1, %s1017_s26 }
  0x21   : > { %327 = vrot.lane.b32.xlu2 %v296_v0, %s1019_s28 }
  0x28   : > { %391 = vrot.lane.b32.xlu1 %v296_v0, %s1020_s29  ;;  %329 = vrot.lane.b32.xlu0 %v297_v2, %s1019_s28 }
  0x29   : > { %393 = vrot.lane.b32.xlu2 %v297_v2, %s1020_s29 }
  0x30   : > { %325 = vrot.lane.b32.xlu1 %v295_v3, %s1019_s28  ;;  %323 = vrot.lane.b32.xlu0 %v294_v1, %s1019_s28  ;;  %s1141_s28 = scalar_lea.vmem %s1195_s4, %s1077_s22 }
  0x31   : > { %387 = vrot.lane.b32.xlu2 %v294_v1, %s1020_s29  ;;  %290 = vst.msk [vmem:[%s1141_s28] sm:$0xff] %vm289_vm2, %v1025_v63 }
  0x32   : > { %291 = vst.msk [vmem:[%s1141_s28 + $0x8] sm:$0xff] %vm289_vm2, %v1025_v63 }
  0x38   : > { %311 = vrot.lane.b32.xlu1 %v296_v0, %s1021_s30  ;;  %389 = vrot.lane.b32.xlu0 %v295_v3, %s1020_s29 }
  0x39   : > { %313 = vrot.lane.b32.xlu2 %v297_v2, %s1021_s30 }
  0x40   : > { %377 = vrot.lane.b32.xlu1 %v297_v2, %s1022_s6  ;;  %375 = vrot.lane.b32.xlu0 %v296_v0, %s1022_s6 }
  0x41   : > { %307 = vrot.lane.b32.xlu2 %v294_v1, %s1021_s30 }
  0x48   : > { %371 = vrot.lane.b32.xlu1 %v294_v1, %s1022_s6  ;;  %309 = vrot.lane.b32.xlu0 %v295_v3, %s1021_s30 }
  0x49   : > { %373 = vrot.lane.b32.xlu2 %v295_v3, %s1022_s6  ;;  %s1151_s6 = scalar_lea.vmem %s1196_s5, %s1077_s22 }
  0x4a   : > { %292 = vst.msk [vmem:[%s1151_s6] sm:$0xff] %vm289_vm2, %v1025_v63 }
  0x4b   : > { %293 = vst.msk [vmem:[%s1151_s6 + $0x8] sm:$0xff] %vm289_vm2, %v1025_v63 }
  0x50   : > { %425 = vrot.lane.b32.xlu1 %v297_v2, %s1023_s7  ;;  %423 = vrot.lane.b32.xlu0 %v296_v0, %s1023_s7 }
  0x51   : > { %359 = vrot.lane.b32.xlu2 %v296_v0, %s1024_s8 }
  0x58   : > { %419 = vrot.lane.b32.xlu1 %v294_v1, %s1023_s7  ;;  %361 = vrot.lane.b32.xlu0 %v297_v2, %s1024_s8 }
  0x59   : > { %421 = vrot.lane.b32.xlu2 %v295_v3, %s1023_s7  ;;  %s935_s7 = sshll.u32 %s1202_s18, 3 }
  0x5a   : > { %s273_s22 = scalar_lea.vmem %s1194_s3, %s935_s7 }
  0x60   : > { %357 = vrot.lane.b32.xlu1 %v295_v3, %s1024_s8  ;;  %355 = vrot.lane.b32.xlu0 %v294_v1, %s1024_s8 }
  0x6b   : > { %v340_v4 = vpop.permute.xlu2 %339 }
  0x6c   : > { %351 = vst.msk [vmem:[#allocation2 + $0x30] sm:$0xf] %vm298_vm0, %v340_v4  ;;  %v992_v4 = vld [vmem:[%s1193_s2] ss:$0 sm:$0xff] }
  0x73   : > { %v342_v5 = vpop.permute.xlu2 %341 }
  0x74   : > { %352 = vst.msk [vmem:[#allocation2 + $0x34] sm:$0xf] %vm298_vm0, %v342_v5 }
  0x7b   : > { %v328_v6 = vpop.permute.xlu2 %327  ;;  %v944_v18 = vld [vmem:[#allocation2 + $0x30] sm:$0xff] }
  0x7c   : > { %337 = vst.msk [vmem:[#allocation2 + $0x28] sm:$0xf] %vm298_vm0, %v328_v6 }
  0x82   : > { %v408_v7 = vpop.permute.xlu1 %407  ;;  %v344_v8 = vpop.permute.xlu0 %343 }
  0x83   : > { %417 = vst.msk [vmem:[#allocation2 + $0x78] sm:$0xf] %vm298_vm0, %v408_v7  ;;  %v394_v9 = vpop.permute.xlu2 %393 }
  0x84   : > { %353 = vst.msk [vmem:[#allocation2 + $0x38] sm:$0xf] %vm298_vm0, %v344_v8 }
  0x85   : > { %402 = vst.msk [vmem:[#allocation2 + $0x6c] sm:$0xf] %vm298_vm0, %v394_v9 }
  0x8a   : > { %v410_v10 = vpop.permute.xlu1 %409  ;;  %v346_v11 = vpop.permute.xlu0 %345 }
  0x8b   : > { %418 = vst.msk [vmem:[#allocation2 + $0x7c] sm:$0xf] %vm298_vm0, %v410_v10  ;;  %v388_v12 = vpop.permute.xlu2 %387 }
  0x8c   : > { %354 = vst.msk [vmem:[#allocation2 + $0x3c] sm:$0xf] %vm298_vm0, %v346_v11 }
  0x8d   : > { %399 = vst.msk [vmem:[#allocation2 + $0x60] sm:$0xf] %vm298_vm0, %v388_v12 }
  0x92   : > { %v406_v13 = vpop.permute.xlu1 %405  ;;  %v404_v14 = vpop.permute.xlu0 %403  ;;  %v953_v15 = vld [vmem:[#allocation2 + $0x78] sm:$0xff] }
  0x93   : > { %416 = vst.msk [vmem:[#allocation2 + $0x74] sm:$0xf] %vm298_vm0, %v406_v13  ;;  %v945_v16 = vld [vmem:[#allocation2 + $0x38] sm:$0xff]  ;;  %v314_v17 = vpop.permute.xlu2 %313  ;;  %616 = vmatpush.bf16.msra.mxu1 %v953_v15 }
  0x94   : > { %415 = vst.msk [vmem:[#allocation2 + $0x70] sm:$0xf] %vm298_vm0, %v404_v14  ;;  %602 = vmatpush.bf16.msra.mxu0 %v945_v16 }
  0x95   : > { %322 = vst.msk [vmem:[#allocation2 + $0x1c] sm:$0xf] %vm298_vm0, %v314_v17 }
  0x98   : > { %603 = vmatpush.bf16.msra.mxu0 %v944_v18 }
  0x9a   : > { %v392_v19 = vpop.permute.xlu1 %391  ;;  %v330_v20 = vpop.permute.xlu0 %329 }
  0x9b   : > { %401 = vst.msk [vmem:[#allocation2 + $0x68] sm:$0xf] %vm298_vm0, %v392_v19  ;;  %v952_v21 = vld [vmem:[#allocation2 + $0x70] sm:$0xff]  ;;  %v308_v22 = vpop.permute.xlu2 %307 }
  0x9c   : > { %338 = vst.msk [vmem:[#allocation2 + $0x2c] sm:$0xf] %vm298_vm0, %v330_v20  ;;  %617 = vmatpush.bf16.msra.mxu1 %v952_v21  ;;  %v650_v21 = vld [vmem:[%s1141_s28] sm:$0xff] }
  0x9d   : > { %319 = vst.msk [vmem:[#allocation2 + $0x10] sm:$0xf] %vm298_vm0, %v308_v22 }
  0xa2   : > { %v326_v23 = vpop.permute.xlu1 %325  ;;  %v324_v24 = vpop.permute.xlu0 %323  ;;  %v951_v25 = vld [vmem:[#allocation2 + $0x68] sm:$0xff] }
  0xa3   : > { %336 = vst.msk [vmem:[#allocation2 + $0x24] sm:$0xf] %vm298_vm0, %v326_v23  ;;  %v943_v26 = vld [vmem:[#allocation2 + $0x28] sm:$0xff]  ;;  %v374_v27 = vpop.permute.xlu2 %373  ;;  %618 = vmatpush.bf16.msra.mxu1 %v951_v25  ;;  %v664_v23 = vld [vmem:[%s1151_s6] sm:$0xff] }
  0xa4   : > { %335 = vst.msk [vmem:[#allocation2 + $0x20] sm:$0xf] %vm298_vm0, %v324_v24  ;;  %604 = vmatpush.bf16.msra.mxu0 %v943_v26 }
  0xa5   : > { %384 = vst.msk [vmem:[#allocation2 + $0x54] sm:$0xf] %vm298_vm0, %v374_v27  ;;  %v651_v27 = vld [vmem:[%s1141_s28 + $0x8] sm:$0xff] }
  0xaa   : > { %v312_v28 = vpop.permute.xlu1 %311  ;;  %v390_v29 = vpop.permute.xlu0 %389 }
  0xab   : > { %321 = vst.msk [vmem:[#allocation2 + $0x18] sm:$0xf] %vm298_vm0, %v312_v28  ;;  %v942_v30 = vld [vmem:[#allocation2 + $0x20] sm:$0xff]  ;;  %v360_v31 = vpop.permute.xlu2 %359 }
  0xac   : > { %400 = vst.msk [vmem:[#allocation2 + $0x64] sm:$0xf] %vm298_vm0, %v390_v29  ;;  %605 = vmatpush.bf16.msra.mxu0 %v942_v30  ;;  %v665_v29 = vld [vmem:[%s1151_s6 + $0x8] sm:$0xff] }
  0xad   : > { %369 = vst.msk [vmem:[#allocation2 + $0x48] sm:$0xf] %vm298_vm0, %v360_v31 }
  0xb2   : > { %v378_v32 = vpop.permute.xlu1 %377  ;;  %v376_v33 = vpop.permute.xlu0 %375  ;;  %v941_v34 = vld [vmem:[#allocation2 + $0x18] sm:$0xff] }
  0xb3   : > { %386 = vst.msk [vmem:[#allocation2 + $0x5c] sm:$0xf] %vm298_vm0, %v378_v32  ;;  %v950_v35 = vld [vmem:[#allocation2 + $0x60] sm:$0xff]  ;;  %v422_v36 = vpop.permute.xlu2 %421  ;;  %606 = vmatpush.bf16.msra.mxu0 %v941_v34 }
  0xb4   : > { %385 = vst.msk [vmem:[#allocation2 + $0x58] sm:$0xf] %vm298_vm0, %v376_v33  ;;  %619 = vmatpush.bf16.msra.mxu1 %v950_v35 }
  0xb5   : > { %432 = vst.msk [vmem:[#allocation2 + $0x84] sm:$0xf] %vm298_vm0, %v422_v36 }
  0xba   : > { %v372_v37 = vpop.permute.xlu1 %371  ;;  %v310_v38 = vpop.permute.xlu0 %309 }
  0xbb   : > { %383 = vst.msk [vmem:[#allocation2 + $0x50] sm:$0xf] %vm298_vm0, %v372_v37  ;;  %v949_v39 = vld [vmem:[#allocation2 + $0x58] sm:$0xff] }
  0xbc   : > { %320 = vst.msk [vmem:[#allocation2 + $0x14] sm:$0xf] %vm298_vm0, %v310_v38  ;;  %620 = vmatpush.bf16.msra.mxu1 %v949_v39 }
  0xc2   : > { %v426_v40 = vpop.permute.xlu1 %425  ;;  %v424_v41 = vpop.permute.xlu0 %423  ;;  %v948_v42 = vld [vmem:[#allocation2 + $0x50] sm:$0xff] }
  0xc3   : > { %434 = vst.msk [vmem:[#allocation2 + $0x8c] sm:$0xf] %vm298_vm0, %v426_v40  ;;  %v940_v43 = vld [vmem:[#allocation2 + $0x10] sm:$0xff]  ;;  %621 = vmatpush.bf16.msra.mxu1 %v948_v42 }
  0xc4   : > { %433 = vst.msk [vmem:[#allocation2 + $0x88] sm:$0xf] %vm298_vm0, %v424_v41  ;;  %607 = vmatpush.bf16.msra.mxu0 %v940_v43 }
  0xc8   : > { %608 = vmatpush.bf16.msra.mxu0 %v939_v44 }
  0xca   : > { %v420_v48 = vpop.permute.xlu1 %419  ;;  %v362_v49 = vpop.permute.xlu0 %361 }
  0xcb   : > { %431 = vst.msk [vmem:[#allocation2 + $0x80] sm:$0xf] %vm298_vm0, %v420_v48  ;;  %v955_v50 = vld [vmem:[#allocation2 + $0x88] sm:$0xff] }
  0xcc   : > { %370 = vst.msk [vmem:[#allocation2 + $0x4c] sm:$0xf] %vm298_vm0, %v362_v49  ;;  %636 = vmatpush.bf16.msra.mxu2 %v955_v50  ;;  %609 = vmatpush.bf16.msra.mxu0 %v938_v45 }
  0xcf   : > { %610 = vmatmul.bf16.vlgmr.msra.gmra.mxu0 %v850_v51 }
  0xd2   : > { %v358_v54 = vpop.permute.xlu1 %357  ;;  %v356_v55 = vpop.permute.xlu0 %355  ;;  %v954_v56 = vld [vmem:[#allocation2 + $0x80] sm:$0xff] }
  0xd3   : > { %368 = vst.msk [vmem:[#allocation2 + $0x44] sm:$0xf] %vm298_vm0, %v358_v54  ;;  %v947_v57 = vld [vmem:[#allocation2 + $0x48] sm:$0xff]  ;;  %637 = vmatpush.bf16.msra.mxu2 %v954_v56 }
  0xd4   : > { %367 = vst.msk [vmem:[#allocation2 + $0x40] sm:$0xf] %vm298_vm0, %v356_v55  ;;  %622 = vmatpush.bf16.msra.mxu1 %v947_v57 }
  0xd6   : > { %931 = vmatmul.msk.bf16.vlgmr.msra.gmra.mxu2 %vm598_vm1, %v858_v58 }
  0xdb   : > { %v946_v61 = vld [vmem:[#allocation2 + $0x40] sm:$0xff] }
  0xdc   : > { %623 = vmatpush.bf16.msra.mxu1 %v946_v61 }
  0xdf   : > { %624 = vmatmul.bf16.vlgmr.msra.gmra.mxu1 %v854_v62 }
 0x14c   : > { %v611_v0 = vpop.f32.mrf.mxu0 }
 0x154   : > { %v613_v10 = vpop.f32.mrf.mxu0 }
 0x159   : > { %v639_v1 = vpop.f32.mrf.mxu2 }
 0x15c   : > { %v625_v2 = vpop.f32.mrf.mxu1 }
 0x15d   : > { %v626_v3 = vadd.f32 %v625_v2, %v611_v0 }
 0x15f   : > { %v640_v5 = vadd.f32 %v639_v1, %v626_v3 }
 0x161   : > { %v678_v6 = vpack.c.bf16 %v640_v5, %v640_v5  ;;  %v648_v7 = vmul.f32 %v992_v4, %v640_v5  ;;  %v641_v14 = vpop.f32.mrf.mxu2 }
 0x163   : > { %680 = vst.msk [vmem:[%s273_s22] sm:$0xf] %vm298_vm0, %v678_v6  ;;  %v653_v8 = vsel %vm652_vm3, %v648_v7, 0.0  ;;  %v666_v9 = vmul.f32 %v648_v7, %v648_v7 }
 0x164   : > { %v627_v11 = vpop.f32.mrf.mxu1  ;;  %654 = vadd.xlane.f32.xlu2 %v653_v8 }
 0x165   : > { %v628_v12 = vadd.f32 %v627_v11, %v613_v10  ;;  %v668_v13 = vsel %vm652_vm3, %v666_v9, 0.0 }
 0x166   : > { %669 = vadd.xlane.f32.xlu1 %v668_v13 }
 0x167   : > { %v642_v15 = vadd.f32 %v641_v14, %v628_v12 }
 0x169   : > { %v679_v16 = vpack.c.bf16 %v642_v15, %v642_v15  ;;  %v649_v17 = vmul.f32 %v992_v4, %v642_v15 }
 0x16b   : > { %681 = vst.msk [vmem:[%s273_s22 + $0x4] sm:$0xf] %vm298_vm0, %v679_v16  ;;  %v656_v18 = vsel %vm652_vm3, %v649_v17, 0.0  ;;  %v667_v19 = vmul.f32 %v649_v17, %v649_v17 }
 0x16c   : > { %657 = vadd.xlane.f32.xlu0 %v656_v18 }
 0x16d   : > { %v671_v20 = vsel %vm652_vm3, %v667_v19, 0.0 }
 0x16e   : > { %672 = vadd.xlane.f32.xlu2 %v671_v20 }
 0x1d7   : > { %v655_v22 = vpop.xlane.xlu2 %654 }
 0x1d8   : > { %v659_v24 = vadd.f32 %v655_v22, %v650_v21 }
 0x1d9   : > { %v670_v25 = vpop.xlane.xlu1 %669 }
 0x1da   : > { %662 = vst.msk [vmem:[%s1141_s28] sm:$0xff] %vm289_vm2, %v659_v24  ;;  %v674_v26 = vadd.f32 %v670_v25, %v664_v23 }
 0x1dc   : > { %676 = vst.msk [vmem:[%s1151_s6] sm:$0xff] %vm289_vm2, %v674_v26 }
 0x1df   : > { %v658_v28 = vpop.xlane.xlu0 %657 }
 0x1e0   : > { %v660_v30 = vadd.f32 %v658_v28, %v651_v27 }
 0x1e1   : > { %v673_v31 = vpop.xlane.xlu2 %672 }
 0x1e2   : > { %663 = vst.msk [vmem:[%s1141_s28 + $0x8] sm:$0xff] %vm289_vm2, %v660_v30  ;;  %v675_v32 = vadd.f32 %v673_v31, %v665_v29 }
 0x1e4   : > { %677 = vst.msk [vmem:[%s1151_s6 + $0x8] sm:$0xff] %vm289_vm2, %v675_v32 }
 0x1e5 PF: > { %s16_s20 = sadd.s32 1, %s1015_s20   ;;  %s1197_s18 = smov %s1011_s19 }
 0x1e6   : > { %p13_p5 = scmp.ge.s32.totalorder %s16_s20, 4   ;;  %s1198_s19 = smov %s1200_s21 }
 0x1e8   :  { %15 = sbr.rel (!%p13_p5) target bundleno = 2 (0x2), region = 90 }

// kernel: varnet2_forward.75
= control target key start
LH: loop header
LB: loop body
LE: loop exit
PB: predicated region body
PF: predicated region fallthrough
CT: control target
= control target key end

     0   :  { %s535_s12 = smov 0   ;;  %s537_s13 = smov 0   ;;  %s588_s0 = inlined_call_operand.vmem [shape: bf16[2,32,64], index: 0, kind: input, shape index: {}]   ;;  %s589_s1 = inlined_call_operand.vmem [shape: f32[2,32,1], index: 1, kind: input, shape index: {}]   ;;  %s590_s2 = inlined_call_operand.vmem [shape: f32[2,32,1], index: 2, kind: input, shape index: {}]   ;;  %s591_s3 = inlined_call_operand.vmem [shape: bf16[2,32,64], index: 3, kind: output, shape index: {}]  }
   0x1   :  { %s539_s14 = smov 0  }
   0x2 LB: > { %s25_s15 = sadd.s32 1, %s508_s13  ;;  %p438_p0 = scmp.ge.s32.totalorder %s512_s14, 1  ;;  %s512_s14 = sphi %s539_s14, %s13_s14   ;;  %s508_s13 = sphi %s537_s13, %s593_s13   ;;  %s504_s12 = sphi %s535_s12, %s592_s12  }
   0x3   : > { %p27_p1 = scmp.ge.s32.totalorder %s25_s15, 2  ;;  %p176_p2 = scmp.lt.s32.totalorder %s512_s14, 3 }
   0x5   : > { %s595_s15 = smov (%p27_p1, %s25_s15), 0  ;;  %p177_p3 = pnand %p438_p0, %p176_p2 }
   0x6   : > { %p216_p4 = scmp.lt.s32.totalorder (!%p177_p3), %s504_s12, 1 }
   0x7   : > { %180 = sbr.rel (%p177_p3) target bundleno = 156 (0x9c), region = 32 }
   0xc   : > { %v514_v0 = vmov 0   ;;  %s597_s12 = smov (!%p216_p4, %s504_s12), 1  ;;  %vm322_vm1 = vcmask 519168  }
   0xd   : > { %488 = vset.pattern.permute.xlu1 %v514_v0  ;;  %487 = vset.pattern.permute.xlu0 %v514_v0  ;;  %s450_s16 = sshll.u32 %s597_s12, 5  ;;  %s449_s23 = sshll.u32 %s597_s12, 4 }
   0xe   : > { %489 = vset.pattern.permute.xlu2 %v514_v0  ;;  %s228_s19 = scalar_lea.vmem %s589_s1, %s450_s16  ;;  %s233_s22 = scalar_lea.vmem %s590_s2, %s450_s16 }
   0xf   : > { %v252_v1 = vld [vmem:[%s228_s19 + $0x10] sm:$0xff]  ;;  %v250_v2 = vld [vmem:[%s228_s19] sm:$0xff]  ;;  %v253_v4 = vld [vmem:[%s228_s19 + $0x18] sm:$0xff]  ;;  %s223_s26 = scalar_lea.vmem %s588_s0, %s449_s23  ;;  %s569_s29 = scalar_lea.vmem %s591_s3, %s449_s23 }
  0x10   : > { %266 = vperm.xlu1 %488, %v252_v1   ;;  %256 = vperm.xlu0 %487, %v250_v2   ;;  %v278_v3 = vld [vmem:[%s233_s22] sm:$0xff]  ;;  %v251_v5 = vld [vmem:[%s228_s19 + $0x8] sm:$0xff]  ;;  %v281_v7 = vld [vmem:[%s233_s22 + $0x18] sm:$0xff] }
  0x11   : > { %284 = vperm.xlu2 %489, %v278_v3   ;;  %v279_v6 = vld [vmem:[%s233_s22 + $0x8] sm:$0xff]  ;;  %v280_v8 = vld [vmem:[%s233_s22 + $0x10] sm:$0xff]  ;;  %v454_v9 = vld [vmem:[%s223_s26] sm:$0xff]  }
  0x12   : > { %v455_v10 = vunpack.c.l.bf16 %v454_v9  ;;  %v456_v17 = vunpack.c.h.bf16 %v454_v9  ;;  %v461_v19 = vld [vmem:[%s223_s26 + $0x8] sm:$0xff]  }
  0x13   : > { %v459_v25 = vunpack.c.l.bf16 %v461_v19  ;;  %v460_v26 = vunpack.c.h.bf16 %v461_v19 }
  0x18   : > { %271 = vperm.xlu1 %488, %v253_v4   ;;  %261 = vperm.xlu0 %487, %v251_v5  }
  0x19   : > { %289 = vperm.xlu2 %489, %v279_v6  }
  0x20   : > { %299 = vperm.xlu1 %488, %v281_v7   ;;  %294 = vperm.xlu0 %487, %v280_v8  }
  0x6b   : > { %v285_v11 = vpop.permute.xlu2 %284 }
  0x73   : > { %v290_v24 = vpop.permute.xlu2 %289 }
  0x82   : > { %v267_v12 = vpop.permute.xlu1 %266  ;;  %v257_v13 = vpop.permute.xlu0 %256 }
  0x83   : > { %v274_v14 = vsub.f32 %v455_v10, %v257_v13  ;;  %v276_v29 = vsub.f32 %v459_v25, %v267_v12 }
  0x85   : > { %v302_v15 = vmul.f32 %v285_v11, %v274_v14 }
  0x87   : > { %vm306_vm0 = vcmp.ge.f32.partialorder %v302_v15, 0.0  ;;  %v310_v16 = vmul.f32 0.2, %v302_v15 }
  0x89   : > { %v314_v18 = vsel %vm306_vm0, %v302_v15, %v310_v16 }
  0x8a   : > { %v318_v20 = vpack.c.bf16 %v314_v18, %v314_v18  ;;  %v272_v21 = vpop.permute.xlu1 %271  ;;  %v262_v22 = vpop.permute.xlu0 %261 }
  0x8b   : > { %v275_v23 = vsub.f32 %v456_v17, %v262_v22  ;;  %v277_v30 = vsub.f32 %v460_v26, %v272_v21 }
  0x8c   : > { %323 = vst.msk [vmem:[%s569_s29] sm:$0xf] %vm322_vm1, %v318_v20 }
  0x8d   : > { %v303_v27 = vmul.f32 %v290_v24, %v275_v23 }
  0x8f   : > { %vm307_vm2 = vcmp.ge.f32.partialorder %v303_v27, 0.0  ;;  %v311_v28 = vmul.f32 0.2, %v303_v27 }
  0x91   : > { %v315_v31 = vsel %vm307_vm2, %v303_v27, %v311_v28 }
  0x92   : > { %v319_v32 = vpack.c.bf16 %v315_v31, %v315_v31  ;;  %v300_v33 = vpop.permute.xlu1 %299  ;;  %v295_v34 = vpop.permute.xlu0 %294 }
  0x93   : > { %v305_v35 = vmul.f32 %v300_v33, %v277_v30  ;;  %v304_v36 = vmul.f32 %v295_v34, %v276_v29 }
  0x94   : > { %324 = vst.msk [vmem:[%s569_s29 + $0x4] sm:$0xf] %vm322_vm1, %v319_v32 }
  0x95   : > { %vm309_vm3 = vcmp.ge.f32.partialorder %v305_v35, 0.0  ;;  %v313_v37 = vmul.f32 0.2, %v305_v35  ;;  %vm308_vm4 = vcmp.ge.f32.partialorder %v304_v36, 0.0  ;;  %v312_v38 = vmul.f32 0.2, %v304_v36 }
  0x97   : > { %v317_v39 = vsel %vm309_vm3, %v305_v35, %v313_v37  ;;  %v316_v40 = vsel %vm308_vm4, %v304_v36, %v312_v38 }
  0x98   : > { %v321_v41 = vpack.c.bf16 %v317_v39, %v317_v39  ;;  %v320_v42 = vpack.c.bf16 %v316_v40, %v316_v40 }
  0x9a   : > { %326 = vst.msk [vmem:[%s569_s29 + $0xc] sm:$0xf] %vm322_vm1, %v321_v41 }
  0x9b   : > { %325 = vst.msk [vmem:[%s569_s29 + $0x8] sm:$0xf] %vm322_vm1, %v320_v42 }
  0x9c PF: > { %s13_s14 = sadd.s32 1, %s512_s14   ;;  %s592_s12 = smov %s508_s13 }
  0x9d   : > { %p10_p5 = scmp.ge.s32.totalorder %s13_s14, 4   ;;  %s593_s13 = smov %s595_s15 }
  0x9f   :  { %12 = sbr.rel (!%p10_p5) target bundleno = 2 (0x2), region = 68 }

// kernel: varnet2_forward.80
= control target key start
LH: loop header
LB: loop body
LE: loop exit
PB: predicated region body
PF: predicated region fallthrough
CT: control target
= control target key end

     0   :  { %s441_s12 = smov 0   ;;  %s443_s13 = smov 0   ;;  %s480_s0 = inlined_call_operand.vmem [shape: bf16[2,8,256], index: 0, kind: input, shape index: {}]   ;;  %s481_s1 = inlined_call_operand.vmem [shape: bf16[2,8], index: 1, kind: input, shape index: {}]   ;;  %s482_s2 = inlined_call_operand.vmem [shape: f32[2,1], index: 2, kind: input, shape index: {}]   ;;  %s483_s3 = inlined_call_operand.vmem [shape: f32[2,2,256], index: 3, kind: output, shape index: {}]  }
   0x1   :  { %s445_s14 = smov 0  }
   0x2 LB: > { %s25_s15 = sadd.s32 1, %s414_s13  ;;  %p359_p0 = scmp.ge.s32.totalorder %s418_s14, 1  ;;  %s418_s14 = sphi %s445_s14, %s13_s14   ;;  %s414_s13 = sphi %s443_s13, %s485_s13   ;;  %s410_s12 = sphi %s441_s12, %s484_s12  }
   0x3   : > { %p27_p1 = scmp.ge.s32.totalorder %s25_s15, 2  ;;  %p158_p2 = scmp.lt.s32.totalorder %s418_s14, 3 }
   0x5   : > { %s487_s15 = smov (%p27_p1, %s25_s15), 0  ;;  %p159_p3 = pnand %p359_p0, %p158_p2 }
   0x6   : > { %p191_p4 = scmp.lt.s32.totalorder (!%p159_p3), %s410_s12, 1 }
   0x7   : > { %162 = sbr.rel (%p159_p3) target bundleno = 158 (0x9e), region = 32 }
   0xc   : > { %v420_v0 = vmov 0   ;;  %v213_v1 = vld [vmem:[%s482_s2] sm:$0x3]  ;;  %s489_s12 = smov (!%p191_p4, %s410_s12), 1  ;;  %vm228_vm0 = vcmask 1043456   ;;  %vm224_vm1 = vcmask 64512  }
   0xd   : > { %395 = vset.pattern.permute.xlu0 %v420_v0  ;;  %s368_s18 = sshll.u32 %s489_s12, 3  ;;  %v211_v9 = vld [vmem:[%s481_s1] sm:$0x1]  ;;  %s369_s24 = sshll.u32 %s489_s12, 2  ;;  %vm264_vm2 = vcmask 1041408  }
   0xe   : > { %216 = vperm.xlu0 %395, %v213_v1   ;;  %s198_s21 = scalar_lea.vmem %s480_s0, %s368_s18  ;;  %s208_s27 = scalar_lea.vmem %s483_s3, %s369_s24 }
   0xf   : > { %v212_v2 = vld [vmem:[%s198_s21] sm:$0xff] }
  0x10   : > { %v220_v3 = vunpack.c.l.b16 %v212_v2  ;;  %v221_v4 = vunpack.c.h.b16 %v212_v2 }
  0x12   : > { %v222_v5 = vpack.c.b16 %v220_v3, %v220_v3  ;;  %v223_v6 = vpack.c.b16 %v221_v4, %v221_v4 }
  0x14   : > { %v230_v7 = vsel %vm228_vm0, %v222_v5, 0  ;;  %v233_v8 = vsel %vm228_vm0, %v223_v6, 0 }
  0x15   : > { %242 = vmatpush.bf16.msra.mxu0 %v230_v7  ;;  %255 = vmatpush.bf16.msra.mxu1 %v233_v8 }
  0x18   : > { %364 = vmatmul.msk.bf16.vlgmr.msra.gmra.mxu0 %vm224_vm1, %v211_v9  ;;  %365 = vmatmul.msk.bf16.vlgmr.msra.gmra.mxu1 %vm224_vm1, %v211_v9 }
  0x80   : > { %v217_v10 = vpop.permute.xlu0 %216 }
  0x95   : > { %v244_v11 = vpop.f32.mrf.mxu0  ;;  %v257_v12 = vpop.f32.mrf.mxu1 }
  0x96   : > { %v258_v13 = vadd.f32 %v257_v12, %v217_v10  ;;  %v245_v14 = vadd.f32 %v244_v11, %v217_v10 }
  0x98   : > { %v263_v15 = vrot.slane %v258_v13, 6 }
  0x9a   : > { %v265_v16 = vsel %vm264_vm2, %v245_v14, %v263_v15 }
  0x9b   : > { %267 = vst [vmem:[%s208_s27] sm:$0xf] %v265_v16 }
  0x9d   : > { %v246_v17 = vpop.f32.mrf.mxu0  ;;  %v259_v18 = vpop.f32.mrf.mxu1 }
  0x9e PF: > { %s13_s14 = sadd.s32 1, %s418_s14   ;;  %s484_s12 = smov %s414_s13 }
  0x9f   : > { %p10_p5 = scmp.ge.s32.totalorder %s13_s14, 4   ;;  %s485_s13 = smov %s487_s15 }
  0xa1   :  { %12 = sbr.rel (!%p10_p5) target bundleno = 2 (0x2), region = 62 }

// kernel: varnet2_forward.76
= control target key start
LH: loop header
LB: loop body
LE: loop exit
PB: predicated region body
PF: predicated region fallthrough
CT: control target
= control target key end

     0   :  { %s1209_s18 = smov 0   ;;  %s1211_s19 = smov 0   ;;  %s1350_s0 = inlined_call_operand.vmem [shape: bf16[2,1,16,342], index: 0, kind: input, shape index: {}]   ;;  %s1351_s1 = inlined_call_operand.vmem [shape: bf16[8,144], index: 1, kind: input, shape index: {}]   ;;  %s1352_s2 = inlined_call_operand.vmem [shape: f32[1,288], index: 2, kind: input, shape index: {}]   ;;  %s1353_s3 = inlined_call_operand.vmem [shape: bf16[2,8,288], index: 3, kind: output, shape index: {0}]   ;;  %s1354_s4 = inlined_call_operand.vmem [shape: f32[2,8,1], index: 4, kind: output, shape index: {1}]   ;;  %s1355_s5 = inlined_call_operand.vmem [shape: f32[2,8,1], index: 5, kind: output, shape index: {2}]  }
   0x1   :  { %s1213_s20 = smov 0  }
   0x2 LB: > { %s28_s21 = sadd.s32 1, %s1164_s19  ;;  %p966_p0 = scmp.ge.s32.totalorder %s1168_s20, 1  ;;  %s1168_s20 = sphi %s1213_s20, %s16_s20   ;;  %s1164_s19 = sphi %s1211_s19, %s1357_s19   ;;  %s1160_s18 = sphi %s1209_s18, %s1356_s18  }
   0x3   : > { %p30_p1 = scmp.ge.s32.totalorder %s28_s21, 2  ;;  %p212_p2 = scmp.lt.s32.totalorder %s1168_s20, 3 }
   0x5   : > { %s1359_s21 = smov (%p30_p1, %s28_s21), 0  ;;  %p213_p3 = pnand %p966_p0, %p212_p2 }
   0x6   : > { %p256_p4 = scmp.lt.s32.totalorder (!%p213_p3), %s1160_s18, 1  ;;  %s1170_s26 = smov (!%p213_p3), 91  }
   0x7   : > { %216 = sbr.rel (%p213_p3) target bundleno = 494 (0x1ee), region = 32  ;;  %s1171_s27 = smov (!%p213_p3), 92  }
   0x8   : > { %s1172_s28 = smov (!%p213_p3), 108   ;;  %s1173_s29 = smov (!%p213_p3), 109  }
   0x9   : > { %s1174_s30 = smov (!%p213_p3), 90   ;;  %s1175_s6 = smov (!%p213_p3), 110  }
   0xa   : > { %s1176_s7 = smov (!%p213_p3), 126   ;;  %s1177_s8 = smov (!%p213_p3), 127  }
   0xc   : > { %s1361_s18 = smov (!%p256_p4, %s1160_s18), 1  ;;  %vm296_vm0 = vcmask 257024   ;;  %vm316_vm1 = vcmask 1043456   ;;  %vm443_vm2 = vcmask 752640   ;;  %vm468_vm3 = vcmask 744448  }
   0xd   : > { %s1111_s22 = smul.u32 24, %s1361_s18  ;;  %vm418_vm4 = vcmask 883712   ;;  %vm393_vm5 = vcmask 891904   ;;  %vm493_vm6 = vcmask 736256   ;;  %vm368_vm7 = vcmask 900096   ;;  %s969_s11 = sshll.u32 %s1361_s18, 3 }
   0xe   : > { %vm692_vm8 = vcmask 130048   ;;  %vm343_vm9 = vcmask 1031168   ;;  %vm318_vm10 = vcmask 1039360   ;;  %s1316_s14 = scalar_lea.vmem %s1354_s4, %s969_s11  ;;  %vm288_vm11 = vcmask 7168   ;;  %s1112_s15 = smul.u32 12, %s1361_s18 }
   0xf   : > { %s264_s25 = scalar_lea.vmem %s1350_s0, %s1111_s22  ;;  %s1324_s22 = scalar_lea.vmem %s1355_s5, %s969_s11  ;;  %vm787_vm12 = vcmask 261120  }
  0x10   : > { %v293_v0 = vld [vmem:[%s264_s25 + $0xc] sm:$0xff]  ;;  %v291_v1 = vld [vmem:[%s264_s25] sm:$0xff]  ;;  %v294_v2 = vld [vmem:[%s264_s25 + $0x14] sm:$0xf]  ;;  %s273_s18 = scalar_lea.vmem %s1353_s3, %s1112_s15 }
  0x11   : > { %459 = vrot.lane.b32.xlu1 %v293_v0, %s1170_s26  ;;  %298 = vst [vmem:[#allocation2 + $0xc] sm:$0xff] %v293_v0  ;;  %455 = vrot.lane.b32.xlu0 %v291_v1, %s1170_s26  ;;  %v292_v3 = vld [vmem:[%s264_s25 + $0x8] sm:$0xf] }
  0x12   : > { %295 = vst [vmem:[#allocation2] sm:$0xff] %v291_v1  ;;  %430 = vrot.lane.b32.xlu2 %v291_v1, %s1171_s27 }
  0x13   : > { %297 = vst.msk [vmem:[#allocation2 + $0x8] sm:$0xf] %vm296_vm0, %v292_v3 }
  0x14   : > { %299 = vst.msk [vmem:[#allocation2 + $0x14] sm:$0xf] %vm296_vm0, %v294_v2 }
  0x19   : > { %461 = vrot.lane.b32.xlu1 %v294_v2, %s1170_s26  ;;  %457 = vrot.lane.b32.xlu0 %v292_v3, %s1170_s26 }
  0x1a   : > { %432 = vrot.lane.b32.xlu2 %v292_v3, %s1171_s27 }
  0x21   : > { %436 = vrot.lane.b32.xlu1 %v294_v2, %s1171_s27  ;;  %434 = vrot.lane.b32.xlu0 %v293_v0, %s1171_s27 }
  0x22   : > { %405 = vrot.lane.b32.xlu2 %v291_v1, %s1172_s28 }
  0x29   : > { %409 = vrot.lane.b32.xlu1 %v293_v0, %s1172_s28  ;;  %407 = vrot.lane.b32.xlu0 %v292_v3, %s1172_s28 }
  0x2a   : > { %411 = vrot.lane.b32.xlu2 %v294_v2, %s1172_s28 }
  0x31   : > { %382 = vrot.lane.b32.xlu1 %v292_v3, %s1173_s29  ;;  %380 = vrot.lane.b32.xlu0 %v291_v1, %s1173_s29 }
  0x32   : > { %384 = vrot.lane.b32.xlu2 %v293_v0, %s1173_s29 }
  0x39   : > { %480 = vrot.lane.b32.xlu1 %v291_v1, %s1174_s30  ;;  %386 = vrot.lane.b32.xlu0 %v294_v2, %s1173_s29 }
  0x3a   : > { %482 = vrot.lane.b32.xlu2 %v292_v3, %s1174_s30 }
  0x41   : > { %486 = vrot.lane.b32.xlu1 %v294_v2, %s1174_s30  ;;  %484 = vrot.lane.b32.xlu0 %v293_v0, %s1174_s30 }
  0x42   : > { %355 = vrot.lane.b32.xlu2 %v291_v1, %s1175_s6 }
  0x49   : > { %359 = vrot.lane.b32.xlu1 %v293_v0, %s1175_s6  ;;  %357 = vrot.lane.b32.xlu0 %v292_v3, %s1175_s6 }
  0x4a   : > { %361 = vrot.lane.b32.xlu2 %v294_v2, %s1175_s6 }
  0x51   : > { %332 = vrot.lane.b32.xlu1 %v292_v3, %s1176_s7  ;;  %330 = vrot.lane.b32.xlu0 %v291_v1, %s1176_s7 }
  0x52   : > { %334 = vrot.lane.b32.xlu2 %v293_v0, %s1176_s7 }
  0x59   : > { %304 = vrot.lane.b32.xlu1 %v291_v1, %s1177_s8  ;;  %336 = vrot.lane.b32.xlu0 %v294_v2, %s1176_s7 }
  0x5a   : > { %306 = vrot.lane.b32.xlu2 %v292_v3, %s1177_s8 }
  0x61   : > { %310 = vrot.lane.b32.xlu1 %v294_v2, %s1177_s8  ;;  %308 = vrot.lane.b32.xlu0 %v293_v0, %s1177_s8 }
  0x6c   : > { %v431_v4 = vpop.permute.xlu2 %430 }
  0x6d   : > { %v438_v5 = vrot.slane %v431_v4, 4 }
  0x74   : > { %v433_v6 = vpop.permute.xlu2 %432 }
  0x75   : > { %v439_v7 = vrot.slane %v433_v6, 4  ;;  %452 = vst.msk [vmem:[#allocation2 + $0x98] sm:$0xf] %vm296_vm0, %v433_v6 }
  0x77   : > { %v442_v8 = vsel %vm316_vm1, %v438_v5, %v439_v7 }
  0x78   : > { %v444_v9 = vsel %vm443_vm2, %v431_v4, %v442_v8 }
  0x79   : > { %451 = vst [vmem:[#allocation2 + $0x90] sm:$0xff] %v444_v9 }
  0x7c   : > { %v406_v10 = vpop.permute.xlu2 %405 }
  0x7d   : > { %v413_v38 = vrot.slane %v406_v10, 4 }
  0x80   : > { %v1045_v47 = vld [vmem:[#allocation2 + $0x90] sm:$0xf]  ;;  %v1102_v51 = vld [vmem:[#allocation2 + $0x94] sm:$0xf] }
  0x83   : > { %v460_v11 = vpop.permute.xlu1 %459  ;;  %v456_v12 = vpop.permute.xlu0 %455 }
  0x84   : > { %v412_v13 = vpop.permute.xlu2 %411  ;;  %v465_v16 = vrot.slane %v460_v11, 4  ;;  %v463_v17 = vrot.slane %v456_v12, 4 }
  0x85   : > { %429 = vst.msk [vmem:[#allocation2 + $0x8c] sm:$0xf] %vm296_vm0, %v412_v13  ;;  %v416_v39 = vrot.slane %v412_v13, 4 }
  0x8b   : > { %v462_v14 = vpop.permute.xlu1 %461  ;;  %v458_v15 = vpop.permute.xlu0 %457 }
  0x8c   : > { %v466_v18 = vrot.slane %v462_v14, 4  ;;  %479 = vst.msk [vmem:[#allocation2 + $0xbc] sm:$0xf] %vm296_vm0, %v462_v14  ;;  %v464_v19 = vrot.slane %v458_v15, 4  ;;  %v1240_v20 = vpop.permute.xlu2 %384 }
  0x8d   : > { %477 = vst.msk [vmem:[#allocation2 + $0xb0] sm:$0xf] %vm296_vm0, %v458_v15  ;;  %v390_v4 = vrot.slane %v1240_v20, 4 }
  0x8e   : > { %v470_v21 = vsel %vm316_vm1, %v465_v16, %v466_v18  ;;  %v467_v22 = vsel %vm316_vm1, %v463_v17, %v464_v19 }
  0x8f   : > { %v471_v23 = vsel %vm468_vm3, %v460_v11, %v470_v21  ;;  %v469_v24 = vsel %vm468_vm3, %v456_v12, %v467_v22 }
  0x90   : > { %478 = vst [vmem:[#allocation2 + $0xb4] sm:$0xff] %v471_v23 }
  0x91   : > { %476 = vst [vmem:[#allocation2 + $0xa8] sm:$0xff] %v469_v24 }
  0x93   : > { %v437_v25 = vpop.permute.xlu1 %436  ;;  %v435_v26 = vpop.permute.xlu0 %434 }
  0x94   : > { %v441_v27 = vrot.slane %v437_v25, 4  ;;  %454 = vst.msk [vmem:[#allocation2 + $0xa4] sm:$0xf] %vm296_vm0, %v437_v25  ;;  %v440_v28 = vrot.slane %v435_v26, 4  ;;  %v1246_v29 = vpop.permute.xlu2 %482 }
  0x95   : > { %502 = vst.msk [vmem:[#allocation2 + $0xc8] sm:$0xf] %vm296_vm0, %v1246_v29  ;;  %v489_v5 = vrot.slane %v1246_v29, 4 }
  0x96   : > { %v445_v30 = vsel %vm316_vm1, %v440_v28, %v441_v27 }
  0x97   : > { %v446_v31 = vsel %vm443_vm2, %v435_v26, %v445_v30  ;;  %v1106_v32 = vld [vmem:[#allocation2 + $0xb0] sm:$0xf0]  ;;  %v1059_v33 = vld [vmem:[#allocation2 + $0xb4] sm:$0xf0]  ;;  %v1282_v30 = vld [vmem:[%s1351_s1] sm:$0xff] }
  0x98   : > { %453 = vst [vmem:[#allocation2 + $0x9c] sm:$0xff] %v446_v31  ;;  %v1057_v34 = vld [vmem:[#allocation2 + $0xa8] sm:$0xf]  ;;  %v1105_v35 = vld [vmem:[#allocation2 + $0xac] sm:$0xf] }
  0x99   : > { %v1058_v36 = vor.u32 %v1106_v32, %v1057_v34  ;;  %v1062_v37 = vor.u32 %v1105_v35, %v1059_v33  ;;  %v1065_v35 = vld [vmem:[#allocation2 + $0xb0] sm:$0xf] }
  0x9b   : > { %696 = vmatpush.bf16.msra.mxu0 %v1058_v36  ;;  %722 = vmatpush.bf16.msra.mxu2 %v1062_v37  ;;  %v410_v40 = vpop.permute.xlu1 %409  ;;  %v408_v41 = vpop.permute.xlu0 %407  ;;  %v1107_v36 = vld [vmem:[#allocation2 + $0xb8] sm:$0xf0]  ;;  %v544_v37 = vunpack.c.h.b16 %v1282_v30 }
  0x9c   : > { %v415_v42 = vrot.slane %v410_v40, 4  ;;  %v414_v43 = vrot.slane %v408_v41, 4  ;;  %427 = vst.msk [vmem:[#allocation2 + $0x80] sm:$0xf] %vm296_vm0, %v408_v41  ;;  %v1253_v44 = vpop.permute.xlu2 %355  ;;  %v1077_v41 = vld [vmem:[#allocation2 + $0xc8] sm:$0xf] }
  0x9d   : > { %v363_v28 = vrot.slane %v1253_v44, 4 }
  0x9e   : > { %v420_v45 = vsel %vm316_vm1, %v415_v42, %v416_v39  ;;  %v417_v46 = vsel %vm316_vm1, %v413_v38, %v414_v43 }
  0x9f   : > { %v421_v48 = vsel %vm418_vm4, %v410_v40, %v420_v45  ;;  %v419_v49 = vsel %vm418_vm4, %v406_v10, %v417_v46  ;;  %v1103_v50 = vld [vmem:[#allocation2 + $0x98] sm:$0xf0]  ;;  %v1047_v52 = vld [vmem:[#allocation2 + $0x9c] sm:$0xf0] }
  0xa0   : > { %428 = vst [vmem:[#allocation2 + $0x84] sm:$0xff] %v421_v48  ;;  %v1046_v53 = vor.u32 %v1103_v50, %v1045_v47  ;;  %v1050_v54 = vor.u32 %v1102_v51, %v1047_v52  ;;  %v1066_v51 = vor.u32 %v1107_v36, %v1065_v35 }
  0xa1   : > { %426 = vst [vmem:[#allocation2 + $0x78] sm:$0xff] %v419_v49 }
  0xa2   : > { %697 = vmatpush.bf16.msra.mxu0 %v1046_v53  ;;  %723 = vmatpush.bf16.msra.mxu2 %v1050_v54  ;;  %v1289_v53 = vpack.c.b16 %v544_v37, %v544_v37  ;;  %v1053_v54 = vld [vmem:[#allocation2 + $0x98] sm:$0xf] }
  0xa3   : > { %v383_v55 = vpop.permute.xlu1 %382  ;;  %v381_v56 = vpop.permute.xlu0 %380 }
  0xa4   : > { %v389_v57 = vrot.slane %v383_v55, 4  ;;  %402 = vst.msk [vmem:[#allocation2 + $0x68] sm:$0xf] %vm296_vm0, %v383_v55  ;;  %v388_v58 = vrot.slane %v381_v56, 4  ;;  %v362_v59 = vpop.permute.xlu2 %361  ;;  %v1104_v55 = vld [vmem:[#allocation2 + $0xa0] sm:$0xf0] }
  0xa5   : > { %379 = vst.msk [vmem:[#allocation2 + $0x5c] sm:$0xf] %vm296_vm0, %v362_v59  ;;  %v366_v29 = vrot.slane %v362_v59, 4  ;;  %v1054_v59 = vor.u32 %v1104_v55, %v1053_v54  ;;  %v543_v54 = vunpack.c.l.b16 %v1282_v30 }
  0xa6   : > { %v392_v60 = vsel %vm316_vm1, %v388_v58, %v389_v57 }
  0xa7   : > { %v394_v61 = vsel %vm393_vm5, %v381_v56, %v392_v60  ;;  %v1100_v62 = vld [vmem:[#allocation2 + $0x80] sm:$0xf0]  ;;  %v1035_v63 = vld [vmem:[#allocation2 + $0x84] sm:$0xf0] }
  0xa8   : > { %401 = vst [vmem:[#allocation2 + $0x60] sm:$0xff] %v394_v61  ;;  %v1033_v0 = vld [vmem:[#allocation2 + $0x78] sm:$0xf]  ;;  %v1099_v1 = vld [vmem:[#allocation2 + $0x7c] sm:$0xf] }
  0xa9   : > { %v1034_v2 = vor.u32 %v1100_v62, %v1033_v0  ;;  %v1038_v3 = vor.u32 %v1099_v1, %v1035_v63  ;;  %v1101_v61 = vld [vmem:[#allocation2 + $0x88] sm:$0xf0]  ;;  %v1041_v1 = vld [vmem:[#allocation2 + $0x80] sm:$0xf] }
  0xab   : > { %698 = vmatpush.bf16.msra.mxu0 %v1034_v2  ;;  %724 = vmatpush.bf16.msra.mxu2 %v1038_v3  ;;  %v481_v6 = vpop.permute.xlu1 %480  ;;  %v387_v7 = vpop.permute.xlu0 %386 }
  0xac   : > { %v488_v8 = vrot.slane %v481_v6, 4  ;;  %v391_v9 = vrot.slane %v387_v7, 4  ;;  %404 = vst.msk [vmem:[#allocation2 + $0x74] sm:$0xf] %vm296_vm0, %v387_v7  ;;  %v1264_v10 = vpop.permute.xlu2 %334 }
  0xae   : > { %v492_v11 = vsel %vm316_vm1, %v488_v8, %v489_v5  ;;  %v395_v12 = vsel %vm316_vm1, %v390_v4, %v391_v9  ;;  %v1042_v8 = vor.u32 %v1101_v61, %v1041_v1 }
  0xaf   : > { %v396_v13 = vsel %vm393_vm5, %v1240_v20, %v395_v12  ;;  %v494_v14 = vsel %vm493_vm6, %v481_v6, %v492_v11  ;;  %v1021_v22 = vld [vmem:[#allocation2 + $0x60] sm:$0xf]  ;;  %v1096_v24 = vld [vmem:[#allocation2 + $0x64] sm:$0xf]  ;;  %v340_v6 = vrot.slane %v1264_v10, 4 }
  0xb0   : > { %403 = vst [vmem:[#allocation2 + $0x6c] sm:$0xff] %v396_v13 }
  0xb1   : > { %501 = vst [vmem:[#allocation2 + $0xc0] sm:$0xff] %v494_v14 }
  0xb3   : > { %v487_v15 = vpop.permute.xlu1 %486  ;;  %v485_v16 = vpop.permute.xlu0 %484  ;;  %v1098_v12 = vld [vmem:[#allocation2 + $0x70] sm:$0xf0] }
  0xb4   : > { %v491_v17 = vrot.slane %v487_v15, 4  ;;  %504 = vst.msk [vmem:[#allocation2 + $0xd4] sm:$0xf] %vm296_vm0, %v487_v15  ;;  %v490_v18 = vrot.slane %v485_v16, 4  ;;  %v1272_v19 = vpop.permute.xlu2 %306  ;;  %v1029_v15 = vld [vmem:[#allocation2 + $0x68] sm:$0xf] }
  0xb5   : > { %327 = vst.msk [vmem:[#allocation2 + $0x20] sm:$0xf] %vm296_vm0, %v1272_v19  ;;  %v313_v7 = vrot.slane %v1272_v19, 4 }
  0xb6   : > { %v495_v21 = vsel %vm316_vm1, %v490_v18, %v491_v17  ;;  %v1030_v18 = vor.u32 %v1098_v12, %v1029_v15 }
  0xb7   : > { %v496_v20 = vsel %vm493_vm6, %v485_v16, %v495_v21  ;;  %v1097_v23 = vld [vmem:[#allocation2 + $0x68] sm:$0xf0]  ;;  %v1023_v25 = vld [vmem:[#allocation2 + $0x6c] sm:$0xf0] }
  0xb8   : > { %503 = vst [vmem:[#allocation2 + $0xcc] sm:$0xff] %v496_v20  ;;  %v1022_v26 = vor.u32 %v1097_v23, %v1021_v22  ;;  %v1026_v27 = vor.u32 %v1096_v24, %v1023_v25  ;;  %v1069_v40 = vld [vmem:[#allocation2 + $0xc0] sm:$0xf]  ;;  %v1108_v47 = vld [vmem:[#allocation2 + $0xc4] sm:$0xf] }
  0xb9   : > { %v1095_v22 = vld [vmem:[#allocation2 + $0x58] sm:$0xf0] }
  0xba   : > { %699 = vmatpush.bf16.msra.mxu0 %v1022_v26  ;;  %725 = vmatpush.bf16.msra.mxu2 %v1026_v27 }
  0xbb   : > { %v360_v31 = vpop.permute.xlu1 %359  ;;  %v358_v32 = vpop.permute.xlu0 %357  ;;  %v1110_v42 = vld [vmem:[#allocation2 + $0xd0] sm:$0xf0] }
  0xbc   : > { %v365_v33 = vrot.slane %v360_v31, 4  ;;  %v364_v34 = vrot.slane %v358_v32, 4  ;;  %377 = vst.msk [vmem:[#allocation2 + $0x50] sm:$0xf] %vm296_vm0, %v358_v32  ;;  %v1078_v52 = vor.u32 %v1110_v42, %v1077_v41  ;;  %v981_v42 = vld [vmem:[#allocation2 + $0x8] sm:$0xf] }
  0xbe   : > { %v370_v38 = vsel %vm316_vm1, %v365_v33, %v366_v29  ;;  %v367_v39 = vsel %vm316_vm1, %v363_v28, %v364_v34 }
  0xbf   : > { %v371_v43 = vsel %vm368_vm7, %v360_v31, %v370_v38  ;;  %v369_v45 = vsel %vm368_vm7, %v1253_v44, %v367_v39  ;;  %v1109_v46 = vld [vmem:[#allocation2 + $0xc8] sm:$0xf0]  ;;  %v1071_v48 = vld [vmem:[#allocation2 + $0xcc] sm:$0xf0]  ;;  %v993_v39 = vld [vmem:[#allocation2 + $0x20] sm:$0xf] }
  0xc0   : > { %378 = vst [vmem:[#allocation2 + $0x54] sm:$0xff] %v371_v43  ;;  %v1070_v49 = vor.u32 %v1109_v46, %v1069_v40  ;;  %v1074_v50 = vor.u32 %v1108_v47, %v1071_v48  ;;  %v1086_v43 = vld [vmem:[#allocation2 + $0x10] sm:$0xf0]  ;;  %v1085_v46 = vld [vmem:[#allocation2 + $0x8] sm:$0xf0] }
  0xc1   : > { %376 = vst [vmem:[#allocation2 + $0x48] sm:$0xff] %v369_v45  ;;  %v973_v45 = vld [vmem:[#allocation2] sm:$0xf]  ;;  %v1084_v48 = vld [vmem:[#allocation2 + $0x4] sm:$0xf] }
  0xc2   : > { %716 = vmatpush.bf16.msra.mxu1 %v1070_v49  ;;  %742 = vmatpush.bf16.msra.mxu3 %v1074_v50  ;;  %v975_v49 = vld [vmem:[#allocation2 + $0xc] sm:$0xf0] }
  0xc3   : > { %v333_v56 = vpop.permute.xlu1 %332  ;;  %v331_v44 = vpop.permute.xlu0 %330  ;;  %v1017_v21 = vld [vmem:[#allocation2 + $0x50] sm:$0xf] }
  0xc4   : > { %v339_v57 = vrot.slane %v333_v56, 4  ;;  %352 = vst.msk [vmem:[#allocation2 + $0x38] sm:$0xf] %vm296_vm0, %v333_v56  ;;  %v338_v58 = vrot.slane %v331_v44, 4  ;;  %v1018_v23 = vor.u32 %v1095_v22, %v1017_v21 }
  0xc5   : > { %1080 = vmatmul.msk.bf16.vlgmr.msra.gmra.mxu3 %vm692_vm8, %v1289_v53  ;;  %1079 = vmatmul.msk.bf16.vlgmr.msra.gmra.mxu1 %vm692_vm8, %v1289_v53 }
  0xc6   : > { %748 = vmatpush.bf16.msrb.mxu1 %v1066_v51  ;;  %768 = vmatpush.bf16.msrb.mxu3 %v1078_v52  ;;  %v342_v60 = vsel %vm316_vm1, %v338_v58, %v339_v57  ;;  %v978_v57 = vor.u32 %v1084_v48, %v975_v49  ;;  %v545_v58 = vpack.c.b16 %v543_v54, %v543_v54 }
  0xc7   : > { %v344_v62 = vsel %vm343_vm9, %v331_v44, %v342_v60  ;;  %v1094_v63 = vld [vmem:[#allocation2 + $0x50] sm:$0xf0]  ;;  %v1011_v0 = vld [vmem:[#allocation2 + $0x54] sm:$0xf0]  ;;  %v974_v44 = vor.u32 %v1085_v46, %v973_v45 }
  0xc8   : > { %351 = vst [vmem:[#allocation2 + $0x30] sm:$0xff] %v344_v62  ;;  %v1009_v2 = vld [vmem:[#allocation2 + $0x48] sm:$0xf]  ;;  %v1093_v3 = vld [vmem:[#allocation2 + $0x4c] sm:$0xf] }
  0xc9   : > { %v1010_v4 = vor.u32 %v1094_v63, %v1009_v2  ;;  %v1014_v5 = vor.u32 %v1093_v3, %v1011_v0  ;;  %v1178_v63 = vmov 0.0   ;;  %v774_v3 = vld [vmem:[%s1352_s2] sm:$0x7] }
  0xca   : > { %749 = vmatpush.bf16.msrb.mxu1 %v1054_v59  ;;  %289 = vst.msk [vmem:[%s1316_s14] sm:$0xff] %vm288_vm11, %v1178_v63 }
  0xcb   : > { %700 = vmatpush.bf16.msra.mxu0 %v1010_v4  ;;  %726 = vmatpush.bf16.msra.mxu2 %v1014_v5  ;;  %v305_v9 = vpop.permute.xlu1 %304  ;;  %v337_v11 = vpop.permute.xlu0 %336  ;;  %v1005_v26 = vld [vmem:[#allocation2 + $0x38] sm:$0xf]  ;;  %290 = vst.msk [vmem:[%s1324_s22] sm:$0xff] %vm288_vm11, %v1178_v63  ;;  %v778_v4 = vperm.slane %v774_v3, 2 }
  0xcc   : > { %v312_v13 = vrot.slane %v305_v9, 4  ;;  %v341_v14 = vrot.slane %v337_v11, 4  ;;  %354 = vst.msk [vmem:[#allocation2 + $0x44] sm:$0xf] %vm296_vm0, %v337_v11  ;;  %v777_v11 = vperm.slane %v774_v3, 1 }
  0xce   : > { %750 = vmatpush.bf16.msrb.mxu1 %v1042_v8  ;;  %v317_v16 = vsel %vm316_vm1, %v312_v13, %v313_v7  ;;  %v345_v17 = vsel %vm316_vm1, %v340_v6, %v341_v14  ;;  %v776_v8 = vperm.slane %v774_v3, 0 }
  0xcf   : > { %v346_v19 = vsel %vm343_vm9, %v1264_v10, %v345_v17  ;;  %v319_v20 = vsel %vm318_vm10, %v305_v9, %v317_v16  ;;  %v997_v32 = vld [vmem:[#allocation2 + $0x30] sm:$0xf]  ;;  %v1090_v35 = vld [vmem:[#allocation2 + $0x34] sm:$0xf] }
  0xd0   : > { %353 = vst [vmem:[#allocation2 + $0x3c] sm:$0xff] %v346_v19 }
  0xd1   : > { %326 = vst [vmem:[#allocation2 + $0x18] sm:$0xff] %v319_v20 }
  0xd2   : > { %751 = vmatpush.bf16.msrb.mxu1 %v1030_v18 }
  0xd3   : > { %v311_v24 = vpop.permute.xlu1 %310  ;;  %v309_v25 = vpop.permute.xlu0 %308  ;;  %v1092_v27 = vld [vmem:[#allocation2 + $0x40] sm:$0xf0] }
  0xd4   : > { %v315_v28 = vrot.slane %v311_v24, 4  ;;  %329 = vst.msk [vmem:[#allocation2 + $0x2c] sm:$0xf] %vm296_vm0, %v311_v24  ;;  %v314_v29 = vrot.slane %v309_v25, 4  ;;  %v1006_v31 = vor.u32 %v1092_v27, %v1005_v26 }
  0xd5   : > { %1081 = vmatmul.msk.bf16.vlgmr.msrb.gmra.mxu3 %vm692_vm8, %v1289_v53  ;;  %v982_v53 = vor.u32 %v1086_v43, %v981_v42 }
  0xd6   : > { %752 = vmatpush.bf16.msrb.mxu1 %v1018_v23  ;;  %v320_v10 = vsel %vm316_vm1, %v314_v29, %v315_v28  ;;  %v785_v29 = vld [vmem:[%s1316_s14] sm:$0xff] }
  0xd7   : > { %v321_v33 = vsel %vm318_vm10, %v309_v25, %v320_v10  ;;  %v1091_v34 = vld [vmem:[#allocation2 + $0x38] sm:$0xf0]  ;;  %v999_v36 = vld [vmem:[#allocation2 + $0x3c] sm:$0xf0] }
  0xd8   : > { %328 = vst [vmem:[#allocation2 + $0x24] sm:$0xff] %v321_v33  ;;  %v998_v37 = vor.u32 %v1091_v34, %v997_v32  ;;  %v1002_v38 = vor.u32 %v1090_v35, %v999_v36  ;;  %v985_v47 = vld [vmem:[#allocation2 + $0x18] sm:$0xf]  ;;  %v1087_v51 = vld [vmem:[#allocation2 + $0x1c] sm:$0xf]  ;;  %v795_v10 = vld [vmem:[%s1324_s22] sm:$0xff] }
  0xda   : > { %753 = vmatpush.bf16.msrb.mxu1 %v1006_v31  ;;  %701 = vmatpush.bf16.msra.mxu0 %v998_v37 }
  0xdb   : > { %727 = vmatpush.bf16.msra.mxu2 %v1002_v38  ;;  %v1089_v40 = vld [vmem:[#allocation2 + $0x28] sm:$0xf0] }
  0xdc   : > { %v994_v41 = vor.u32 %v1089_v40, %v993_v39 }
  0xde   : > { %754 = vmatpush.bf16.msrb.mxu1 %v994_v41 }
  0xdf   : > { %v1088_v50 = vld [vmem:[#allocation2 + $0x20] sm:$0xf0]  ;;  %v987_v52 = vld [vmem:[#allocation2 + $0x24] sm:$0xf0] }
  0xe0   : > { %v986_v55 = vor.u32 %v1088_v50, %v985_v47  ;;  %v990_v56 = vor.u32 %v1087_v51, %v987_v52 }
  0xe2   : > { %702 = vmatpush.bf16.msra.mxu0 %v986_v55  ;;  %728 = vmatpush.bf16.msra.mxu2 %v990_v56 }
  0xe3   : > { %755 = vmatpush.bf16.msrb.mxu1 %v982_v53 }
  0xe6   : > { %703 = vmatpush.bf16.msra.mxu0 %v974_v44  ;;  %729 = vmatpush.bf16.msra.mxu2 %v978_v57 }
  0xe7   : > { %756 = vmatmul.bf16.vlgmr.msrb.gmra.mxu1 %v545_v58 }
  0xe9   : > { %704 = vmatmul.bf16.vlgmr.msra.gmra.mxu0 %v545_v58  ;;  %730 = vmatmul.bf16.vlgmr.msra.gmra.mxu2 %v545_v58 }
 0x142   : > { %v718_v59 = vpop.f32.mrf.mxu1 }
 0x148   : > { %v744_v60 = vpop.f32.mrf.mxu3 }
 0x14a   : > { %v720_v61 = vpop.f32.mrf.mxu1 }
 0x150   : > { %v746_v62 = vpop.f32.mrf.mxu3 }
 0x158   : > { %v770_v30 = vpop.f32.mrf.mxu3 }
 0x160   : > { %v772_v0 = vpop.f32.mrf.mxu3 }
 0x164   : > { %v757_v1 = vpop.f32.mrf.mxu1 }
 0x165   : > { %v771_v2 = vadd.f32 %v770_v30, %v757_v1 }
 0x166   : > { %v705_v5 = vpop.f32.mrf.mxu0 }
 0x167   : > { %v807_v6 = vpack.c.bf16 %v771_v2, %v771_v2  ;;  %v719_v7 = vadd.f32 %v718_v59, %v705_v5  ;;  %v784_v9 = vmul.f32 %v778_v4, %v771_v2 }
 0x169   : > { %809 = vst.msk [vmem:[%s273_s18 + $0x8] sm:$0xf] %vm296_vm0, %v807_v6  ;;  %v782_v14 = vmul.f32 %v776_v8, %v719_v7  ;;  %v798_v17 = vmul.f32 %v784_v9, %v784_v9  ;;  %v788_v21 = vsel %vm787_vm12, %v784_v9, 0.0 }
 0x16b   : > { %v796_v22 = vmul.f32 %v782_v14, %v782_v14  ;;  %v800_v24 = vsel %vm787_vm12, %v798_v17, 0.0 }
 0x16c   : > { %v731_v12 = vpop.f32.mrf.mxu2  ;;  %v759_v13 = vpop.f32.mrf.mxu1 }
 0x16d   : > { %v745_v15 = vadd.f32 %v744_v60, %v731_v12 }
 0x16e   : > { %v707_v16 = vpop.f32.mrf.mxu0 }
 0x16f   : > { %v783_v18 = vmul.f32 %v777_v11, %v745_v15  ;;  %v806_v19 = vpack.c.bf16 %v745_v15, %v719_v7 }
 0x171   : > { %v797_v20 = vmul.f32 %v783_v18, %v783_v18  ;;  %808 = vst [vmem:[%s273_s18] sm:$0xff] %v806_v19  ;;  %v786_v23 = vadd.f32 %v783_v18, %v782_v14 }
 0x173   : > { %v789_v25 = vadd.f32 %v788_v21, %v786_v23  ;;  %v799_v26 = vadd.f32 %v797_v20, %v796_v22 }
 0x174   : > { %v733_v27 = vpop.f32.mrf.mxu2 }
 0x175   : > { %790 = vadd.xlane.f32.xlu2 %v789_v25  ;;  %v801_v28 = vadd.f32 %v800_v24, %v799_v26 }
 0x177   : > { %802 = vadd.xlane.f32.xlu0 %v801_v28 }
 0x1e8   : > { %v791_v31 = vpop.xlane.xlu2 %790 }
 0x1e9   : > { %v792_v32 = vadd.f32 %v791_v31, %v785_v29 }
 0x1ea   : > { %v803_v33 = vpop.xlane.xlu0 %802 }
 0x1eb   : > { %794 = vst.msk [vmem:[%s1316_s14] sm:$0xff] %vm288_vm11, %v792_v32  ;;  %v804_v34 = vadd.f32 %v803_v33, %v795_v10 }
 0x1ed   : > { %805 = vst.msk [vmem:[%s1324_s22] sm:$0xff] %vm288_vm11, %v804_v34 }
 0x1ee PF: > { %s16_s20 = sadd.s32 1, %s1168_s20   ;;  %s1356_s18 = smov %s1164_s19 }
 0x1ef   : > { %p13_p5 = scmp.ge.s32.totalorder %s16_s20, 4   ;;  %s1357_s19 = smov %s1359_s21 }
 0x1f1   :  { %15 = sbr.rel (!%p13_p5) target bundleno = 2 (0x2), region = 90 }

// kernel: varnet2_forward.81
= control target key start
LH: loop header
LB: loop body
LE: loop exit
PB: predicated region body
PF: predicated region fallthrough
CT: control target
= control target key end

     0   :  { %s1609_s26 = smov 0   ;;  %s1611_s27 = smov 0   ;;  %s1766_s0 = inlined_call_operand.vmem [shape: f32[2,16,16], index: 0, kind: input, shape index: {}]   ;;  %s1767_s1 = inlined_call_operand.vmem [shape: f32[2,16,16], index: 1, kind: input, shape index: {}]   ;;  %s1768_s2 = inlined_call_operand.vmem [shape: f32[2,4,16,16], index: 2, kind: input, shape index: {}]   ;;  %s1769_s3 = inlined_call_operand.vmem [shape: f32[2,4,16,16], index: 3, kind: input, shape index: {}]   ;;  %s1770_s4 = inlined_call_operand.vmem [shape: f32[2,4,16,16], index: 4, kind: input, shape index: {}, may-alias: {4,6}]   ;;  %s1771_s5 = inlined_call_operand.vmem [shape: f32[2,4,16,16], index: 5, kind: input, shape index: {}, may-alias: {5,7}]   ;;  %s1772_s6 = inlined_call_operand.vmem [shape: f32[2,4,16,16], index: 6, kind: input, shape index: {}, may-alias: {4,6}]   ;;  %s1773_s7 = inlined_call_operand.vmem [shape: f32[2,4,16,16], index: 7, kind: input, shape index: {}, may-alias: {5,7}]   ;;  %s1774_s8 = inlined_call_operand.vmem [shape: f32[2,1,1,16], index: 8, kind: input, shape index: {}]   ;;  %s1775_s9 = inlined_call_operand.vmem [shape: f32[16,16], index: 9, kind: input, shape index: {}, may-alias: {9,12}]   ;;  %s1776_s10 = inlined_call_operand.vmem [shape: f32[16,16], index: 10, kind: input, shape index: {}, may-alias: {10,13}]   ;;  %s1777_s11 = inlined_call_operand.vmem [shape: f32[16,16], index: 11, kind: input, shape index: {}, may-alias: {11,14}]   ;;  %s1778_s12 = inlined_call_operand.vmem [shape: f32[16,16], index: 12, kind: input, shape index: {}, may-alias: {9,12}]   ;;  %s1779_s13 = inlined_call_operand.vmem [shape: f32[16,16], index: 13, kind: input, shape index: {}, may-alias: {10,13}]   ;;  %s1780_s14 = inlined_call_operand.vmem [shape: f32[16,16], index: 14, kind: input, shape index: {}, may-alias: {11,14}]   ;;  %s1781_s15 = inlined_call_operand.<no memory space> [shape: f32[1], index: 15, kind: input, shape index: {}]   ;;  %s1782_s16 = inlined_call_operand.vmem [shape: f32[2,4,16,16], index: 16, kind: output, shape index: {0}]   ;;  %s1783_s17 = inlined_call_operand.vmem [shape: f32[2,4,16,16], index: 17, kind: output, shape index: {1}]  }
   0x1   :  { %1787 = sst [smem:[#allocation8_spill]] %s1766_s0  ;;  %s1613_s28 = smov 0  }
   0x2   :  { %1788 = sst [smem:[#allocation9_spill]] %s1767_s1  ;;  %s1615_s29 = smov 0  }
   0x3   :  { %1789 = sst [smem:[#allocation10_spill]] %s1771_s5  ;;  %s1617_s0 = smov 0  }
   0x4   :  { %1790 = sst [smem:[#allocation11_spill]] %s1773_s7 }
   0x5   :  { %1791 = sst [smem:[#allocation12_spill]] %s1782_s16 }
   0x6   :  { %1792 = sst [smem:[#allocation13_spill]] %s1783_s17 }
   0x7   :  { %23 = sst [smem:[#allocation2]] %s1781_s15 }
   0x8 LB: > { %1793 = sst [smem:[#allocation3_spill]] %s1505_s28  ;;  %s38_s15 = sadd.s32 1, %s1505_s28  ;;  %s1513_s0 = sphi %s1617_s0, %s29_s0   ;;  %s1509_s29 = sphi %s1615_s29, %s1810_s29   ;;  %s1505_s28 = sphi %s1613_s28, %s1809_s28   ;;  %s1501_s27 = sphi %s1611_s27, %s1808_s27   ;;  %s1497_s26 = sphi %s1609_s26, %s1807_s26  }
   0x9   : > { %1794 = sst [smem:[#allocation4_spill]] %s1509_s29  ;;  %s41_s30 = sadd.s32 1, %s1509_s29 }
   0xa   : > { %1795 = sst [smem:[#allocation5_spill]] %s1513_s0  ;;  %p39_p0 = scmp.ge.s32.totalorder %s38_s15, 4 }
   0xb   : > { %p1385_p1 = scmp.ge.s32.totalorder %s1513_s0, 1  ;;  %p621_p2 = scmp.lt.s32.totalorder %s1513_s0, 9 }
   0xc   : > { %s1812_s15 = smov (%p39_p0, %s38_s15), 0  ;;  %s1814_s30 = smov (!%p39_p0, %s41_s30), %s1509_s29 }
   0xd   : > { %1796 = sst [smem:[#allocation6_spill]] %s1812_s15  ;;  %p622_p3 = pnand %p1385_p1, %p621_p2 }
   0xe   : > { %p43_p4 = scmp.ge.s32.totalorder %s1814_s30, 2  ;;  %p748_p5 = scmp.lt.s32.totalorder (!%p622_p3), %s1501_s27, 1 }
   0xf   : > { %625 = sbr.rel (%p622_p3) target bundleno = 323 (0x143), region = 84  ;;  %p760_p6 = scmp.lt.s32.totalorder (!%p622_p3), %s1497_s26, 3 }
  0x10   : > { %s1816_s30 = smov (%p43_p4, %s1814_s30), 0  ;;  %s1798_s21 = sld [smem:[#allocation8_spill]] (!%p622_p3) }
  0x11   : > { %1797 = sst [smem:[#allocation7_spill]] %s1816_s30 }
  0x12   : > { %s1799_s25 = sld [smem:[#allocation9_spill]] (!%p622_p3) }
  0x13   : > { %s1060_s24 = sld [smem:[#allocation2]] (!%p622_p3) }
  0x14   : > { %s1818_s27 = smov (!%p748_p5, %s1501_s27), 1  ;;  %s1820_s26 = smov (!%p760_p6, %s1497_s26), 3  ;;  %v853_v20 = vld [vmem:[%s1775_s9] sm:$0xff]  ;;  %vm859_vm0 = vcmask 130048   ;;  %v854_v21 = vld [vmem:[%s1775_s9 + $0x8] sm:$0xff]  ;;  %v1515_v49 = vmov 0  }
  0x15   : > { %s1428_s18 = sshll.u32 %s1818_s27, 4  ;;  %s1391_s19 = sshll.u32 %s1818_s27, 3  ;;  %v855_v22 = vld [vmem:[%s1776_s10] sm:$0xff]  ;;  %v856_v23 = vld [vmem:[%s1776_s10 + $0x8] sm:$0xff] }
  0x16   : > { %s752_s22 = scalar_lea.vmem %s1798_s21, %s1428_s18  ;;  %s1390_s29 = sshll.u32 %s1820_s26, 1  ;;  %v857_v26 = vld [vmem:[%s1777_s11] sm:$0xff]  ;;  %v858_v27 = vld [vmem:[%s1777_s11 + $0x8] sm:$0xff] }
  0x17   : > { %s764_s30 = sadd.s32 %s1391_s19, %s1390_s29  ;;  %v838_v0 = vld [vmem:[%s752_s22 + $0x8] sm:$0xff]  ;;  %v837_v2 = vld [vmem:[%s752_s22] sm:$0xff]  ;;  %s1800_s5 = sld [smem:[#allocation10_spill]] }
  0x18   : > { %s757_s15 = scalar_lea.vmem %s1799_s25, %s1428_s18  ;;  %s1649_s28 = sshll.u32 %s764_s30, 3  ;;  %v956_v28 = vld [vmem:[%s1778_s12 + $0x8] sm:$0xff]  ;;  %v955_v29 = vld [vmem:[%s1778_s12] sm:$0xff] }
  0x19   : > { %v840_v1 = vld [vmem:[%s757_s15 + $0x8] sm:$0xff]  ;;  %s766_s16 = scalar_lea.vmem %s1768_s2, %s1649_s28  ;;  %s775_s1 = scalar_lea.vmem %s1769_s3, %s1649_s28  ;;  %v839_v3 = vld [vmem:[%s757_s15] sm:$0xff]  ;;  %v1072_v59 = vstv %s1060_s24 }
  0x1a   : > { %v834_v4 = vld [vmem:[%s766_s16 + $0x8] sm:$0xff]  ;;  %v833_v6 = vld [vmem:[%s766_s16] sm:$0xff]  ;;  %s814_s30 = scalar_lea.vmem %s1774_s8, %s1818_s27  ;;  %s784_s20 = scalar_lea.vmem %s1770_s4, %s1649_s28 }
  0x1b   : > { %v836_v5 = vld [vmem:[%s775_s1 + $0x8] sm:$0xff]  ;;  %v842_v7 = vmul.f32 %v838_v0, %v834_v4  ;;  %v850_v10 = vmul.f32 %v840_v1, %v834_v4  ;;  %v835_v11 = vld [vmem:[%s775_s1] sm:$0xff]  ;;  %v841_v12 = vmul.f32 %v837_v2, %v833_v6  ;;  %v849_v15 = vmul.f32 %v839_v3, %v833_v6  ;;  %s802_s23 = scalar_lea.vmem %s1772_s6, %s1649_s28  ;;  %s1801_s17 = sld [smem:[#allocation11_spill]] }
  0x1c   : > { %v844_v8 = vmul.f32 %v840_v1, %v836_v5  ;;  %v848_v9 = vmul.f32 %v838_v0, %v836_v5  ;;  %v843_v13 = vmul.f32 %v839_v3, %v835_v11  ;;  %v847_v14 = vmul.f32 %v837_v2, %v835_v11  ;;  %v960_v30 = vld [vmem:[%s1780_s14 + $0x8] sm:$0xff]  ;;  %v957_v32 = vld [vmem:[%s1779_s13] sm:$0xff]  ;;  %s1804_s15 = sld [smem:[#allocation12_spill]] }
  0x1d   : > { %v958_v31 = vld [vmem:[%s1779_s13 + $0x8] sm:$0xff]  ;;  %v959_v33 = vld [vmem:[%s1780_s14] sm:$0xff]  ;;  %s793_s27 = scalar_lea.vmem %s1800_s5, %s1649_s28 }
  0x1e   : > { %v846_v16 = vsub.f32 %v842_v7, %v844_v8  ;;  %v852_v17 = vadd.f32 %v850_v10, %v848_v9  ;;  %v845_v18 = vsub.f32 %v841_v12, %v843_v13  ;;  %v851_v19 = vadd.f32 %v849_v15, %v847_v14  ;;  %v1061_v48 = vld [vmem:[%s814_s30] sm:$0x1]  ;;  %v1057_v61 = vld [vmem:[%s784_s20 + $0x8] sm:$0xff] }
  0x1f   : > { %vm1062_vm1 = vcmp.gt.f32.partialorder %v1061_v48, 0.5  ;;  %v1056_v51 = vld [vmem:[%s784_s20] sm:$0xff]  ;;  %v1067_v62 = vld [vmem:[%s802_s23 + $0x8] sm:$0xff]  ;;  %s1805_s20 = sld [smem:[#allocation13_spill]] }
  0x20   : > { %880 = vmatpush.msra.mxu0 %v846_v16  ;;  %1430 = vmatpush.msra.mxu2 %v846_v16  ;;  %v919_v24 = vadd.f32 %v852_v17, %v846_v16  ;;  %v918_v25 = vadd.f32 %v851_v19, %v845_v18  ;;  %v1063_v50 = vsel %vm1062_vm1, 1, %v1515_v49  ;;  %v1066_v53 = vld [vmem:[%s802_s23] sm:$0xff]  ;;  %v1069_v1 = vsub.f32 %v1057_v61, %v1067_v62  ;;  %v1059_v2 = vld [vmem:[%s793_s27 + $0x8] sm:$0xff] }
  0x21   : > { %909 = vmatpush.msra.mxu1 %v852_v17  ;;  %1432 = vmatpush.msra.mxu3 %v852_v17  ;;  %v1064_v52 = vperm.slane %v1063_v50, 0  ;;  %s811_s26 = scalar_lea.vmem %s1801_s17, %s1649_s28  ;;  %v1068_v54 = vsub.f32 %v1056_v51, %v1066_v53  ;;  %v1058_v56 = vld [vmem:[%s793_s27] sm:$0xff] }
  0x22   : > { %881 = vmatpush.msra.mxu0 %v845_v18  ;;  %1431 = vmatpush.msra.mxu2 %v845_v18  ;;  %v1075_v57 = vld [vmem:[%s811_s26] sm:$0xff]  ;;  %v1076_v3 = vld [vmem:[%s811_s26 + $0x8] sm:$0xff]  ;;  %s823_s30 = scalar_lea.vmem %s1804_s15, %s1649_s28 }
  0x23   : > { %910 = vmatpush.msra.mxu1 %v851_v19  ;;  %1433 = vmatpush.msra.mxu3 %v851_v19  ;;  %vm1727_vm2 = vcmp.eq.s32.totalorder %v1064_v52, 1  ;;  %v1077_v60 = vsub.f32 %v1058_v56, %v1075_v57  ;;  %v1078_v9 = vsub.f32 %v1059_v2, %v1076_v3 }
  0x24   : > { %1414 = vmatmul.msk.f32.vlgmr.msra.gmra.mxu0 %vm859_vm0, %v853_v20  ;;  %1415 = vmatmul.msk.f32.vlgmr.msra.gmra.mxu2 %vm859_vm0, %v854_v21  ;;  %v1070_v58 = vsel %vm1727_vm2, %v1068_v54, 0.0  ;;  %v1071_v8 = vsel %vm1727_vm2, %v1069_v1, 0.0 }
  0x25   : > { %1416 = vmatmul.msk.f32.vlgmr.msra.gmra.mxu1 %vm859_vm0, %v855_v22  ;;  %1417 = vmatmul.msk.f32.vlgmr.msra.gmra.mxu3 %vm859_vm0, %v856_v23  ;;  %v1073_v63 = vmul.f32 %v1072_v59, %v1070_v58  ;;  %v1079_v0 = vsel %vm1727_vm2, %v1077_v60, 0.0  ;;  %v1074_v15 = vmul.f32 %v1072_v59, %v1071_v8  ;;  %v1080_v16 = vsel %vm1727_vm2, %v1078_v9, 0.0  ;;  %s832_s21 = scalar_lea.vmem %s1805_s20, %s1649_s28 }
  0x26   : > { %940 = vmatpush.msrb.mxu2 %v919_v24  ;;  %981 = vmatpush.msrb.mxu3 %v956_v28  ;;  %v1081_v6 = vmul.f32 %v1079_v0, %v1072_v59  ;;  %v1082_v20 = vmul.f32 %v1080_v16, %v1072_v59 }
  0x27   : > { %1041 = vmatpush.msrb.mxu1 %v960_v30  ;;  %1010 = vmatpush.msrb.mxu0 %v958_v31  ;;  %v1083_v5 = vsub.f32 %v1056_v51, %v1073_v63  ;;  %v1084_v19 = vsub.f32 %v1057_v61, %v1074_v15 }
  0x28   : > { %941 = vmatpush.msrb.mxu2 %v918_v25  ;;  %982 = vmatpush.msrb.mxu3 %v955_v29  ;;  %v1089_v14 = vsub.f32 %v1058_v56, %v1081_v6 }
  0x29   : > { %1011 = vmatpush.msrb.mxu0 %v957_v32  ;;  %1042 = vmatpush.msrb.mxu1 %v959_v33 }
  0x2c   : > { %1418 = vmatmul.msk.f32.vlgmr.msrb.gmra.mxu2 %vm859_vm0, %v857_v26 }
  0x34   : > { %1419 = vmatmul.msk.f32.gmra.mxu2 %vm859_vm0, %v858_v27  ;;  %v1090_v27 = vsub.f32 %v1059_v2, %v1082_v20 }
  0xa1   : > { %v883_v34 = vpop.f32.mrf.mxu0 }
  0xa2   : > { %v912_v35 = vpop.f32.mrf.mxu1 }
  0xa3   : > { %v949_v36 = vsub.f32 %v883_v34, %v912_v35 }
  0xa5   : > { %1420 = vmatmul.msk.f32.vlgmr.msrb.gmra.mxu3 %vm859_vm0, %v949_v36 }
  0xa7   : > { %v886_v37 = vpop.f32.mrf.mxu2 }
  0xa8   : > { %v915_v38 = vpop.f32.mrf.mxu3 }
  0xa9   : > { %v950_v39 = vsub.f32 %v886_v37, %v915_v38 }
  0xad   : > { %1421 = vmatmul.msk.f32.gmra.mxu3 %vm859_vm0, %v950_v39 }
  0xaf   : > { %v943_v40 = vpop.f32.mrf.mxu2 }
  0xb0   : > { %v951_v41 = vsub.f32 %v943_v40, %v883_v34 }
  0xb2   : > { %v953_v42 = vsub.f32 %v951_v41, %v912_v35 }
  0xb4   : > { %v1019_v43 = vadd.f32 %v953_v42, %v949_v36  ;;  %1422 = vmatmul.msk.f32.vlgmr.msrb.gmra.mxu0 %vm859_vm0, %v953_v42 }
  0xb6   : > { %1424 = vmatmul.msk.f32.vlgmr.msrb.gmra.mxu1 %vm859_vm0, %v1019_v43 }
  0xb7   : > { %v946_v44 = vpop.f32.mrf.mxu2 }
  0xb8   : > { %v952_v45 = vsub.f32 %v946_v44, %v886_v37 }
  0xba   : > { %v954_v46 = vsub.f32 %v952_v45, %v915_v38 }
  0xbc   : > { %1423 = vmatmul.msk.f32.gmra.mxu0 %vm859_vm0, %v954_v46  ;;  %v1020_v47 = vadd.f32 %v954_v46, %v950_v39 }
  0xbe   : > { %1425 = vmatmul.msk.f32.gmra.mxu1 %vm859_vm0, %v1020_v47 }
 0x128   : > { %v984_v4 = vpop.f32.mrf.mxu3 }
 0x130   : > { %v987_v21 = vpop.f32.mrf.mxu3 }
 0x131   : > { %v1013_v7 = vpop.f32.mrf.mxu0 }
 0x132   : > { %v1050_v10 = vsub.f32 %v984_v4, %v1013_v7 }
 0x133   : > { %v1044_v11 = vpop.f32.mrf.mxu1 }
 0x134   : > { %v1085_v12 = vsub.f32 %v1083_v5, %v1050_v10  ;;  %v1052_v13 = vsub.f32 %v1044_v11, %v984_v4 }
 0x136   : > { %1087 = vst.msk [vmem:[%s823_s30] sm:$0xff] %vm859_vm0, %v1085_v12  ;;  %v1054_v17 = vsub.f32 %v1052_v13, %v1013_v7 }
 0x138   : > { %v1091_v18 = vsub.f32 %v1089_v14, %v1054_v17 }
 0x139   : > { %v1016_v22 = vpop.f32.mrf.mxu0 }
 0x13a   : > { %1093 = vst.msk [vmem:[%s832_s21] sm:$0xff] %vm859_vm0, %v1091_v18  ;;  %v1051_v23 = vsub.f32 %v987_v21, %v1016_v22 }
 0x13b   : > { %v1047_v24 = vpop.f32.mrf.mxu1 }
 0x13c   : > { %v1086_v25 = vsub.f32 %v1084_v19, %v1051_v23  ;;  %v1053_v26 = vsub.f32 %v1047_v24, %v987_v21 }
 0x13e   : > { %1088 = vst.msk [vmem:[%s823_s30 + $0x8] sm:$0xff] %vm859_vm0, %v1086_v25  ;;  %v1055_v28 = vsub.f32 %v1053_v26, %v1016_v22 }
 0x140   : > { %v1092_v29 = vsub.f32 %v1090_v27, %v1055_v28 }
 0x142   : > { %1094 = vst.msk [vmem:[%s832_s21 + $0x8] sm:$0xff] %vm859_vm0, %v1092_v29 }
 0x143 PF: > { %s1806_s28 = sld [smem:[#allocation5_spill]] }
 0x144   : > { %s1807_s26 = sld [smem:[#allocation3_spill]] }
 0x145   : > { %s1808_s27 = sld [smem:[#allocation4_spill]] }
 0x146   : > { %s1810_s29 = sld [smem:[#allocation7_spill]] }
 0x149   : > { %s29_s0 = sadd.s32 1, %s1806_s28   ;;  %s1809_s28 = sld [smem:[#allocation6_spill]] }
 0x14a   : > { %p26_p7 = scmp.ge.s32.totalorder %s29_s0, 10  }
 0x14c   :  { %28 = sbr.rel (!%p26_p7) target bundleno = 8 (0x8), region = 150 }

</bundles_post_ra>
